<compile_context>
chip_gen: v5e
topology: v5e:2x2
jax: 0.10.0
libtpu: 0.0.40
codegen_flags: <defaults>
</compile_context>

<pallas_src>
import functools

import jax
import jax.numpy as jnp
import numpy as np
from jax.experimental import pallas as pl
from jax.experimental.pallas import tpu as pltpu


def _round_up(n, m):
    return ((n + m - 1) // m) * m


def _pad_lane(n):
    return max(128, _round_up(n, 128))


# ----------------------------- Pallas kernel --------------------------------

def _dense(h, w_ref, b_ref, relu):
    """y = act(h @ W + b): bf16 MXU matmul, f32 accumulation, f32 elementwise."""
    y = jnp.dot(h.astype(w_ref.dtype), w_ref[...],
                preferred_element_type=jnp.float32)
    y = y + b_ref[...]                       # (1, N) f32 bias broadcast over rows
    if relu:
        y = jnp.maximum(y, 0.0)
    return y


def _fused_vae_kernel(x_ref, eps_ref, *refs, z_pad):
    (we0, be0, we1, be1, we2, be2, we3, be3,          # encoder
     wh, bh,                                          # fused mean/logvar head
     wd0, bd0, wd1, bd1, wd2, bd2, wd3, bd3, wd4, bd4,  # decoder
     xrec_ref, mean_ref, std_ref) = refs              # outputs

    h = x_ref[...].astype(jnp.float32)

    # encoder: Linear + ReLU x4
    h = _dense(h, we0, be0, True)
    h = _dense(h, we1, be1, True)
    h = _dense(h, we2, be2, True)
    h = _dense(h, we3, be3, True)

    # fused head (no activation): mean in lanes [0, z_pad), logvar in [z_pad, 2*z_pad)
    mv = _dense(h, wh, bh, False)
    mean_ = mv[:, :z_pad]          # 128-lane-aligned split: no cross-lane shuffle
    logvar = mv[:, z_pad:]

    # reparameterization: std = exp(0.5*logvar) (EUP), z = mean + std * eps
    std = jnp.exp(0.5 * logvar)
    z = mean_ + std * eps_ref[...]

    # decoder: Linear + ReLU x5 (sigmoid=False path -> final ReLU)
    h = _dense(z, wd0, bd0, True)
    h = _dense(h, wd1, bd1, True)
    h = _dense(h, wd2, bd2, True)
    h = _dense(h, wd3, bd3, True)
    h = _dense(h, wd4, bd4, True)

    xrec_ref[...] = h
    mean_ref[...] = mean_
    std_ref[...] = std             # module returns exp(0.5*logvar), i.e. std


# ----------------------------- parameter setup ------------------------------

def _uniform_linear(key, fan_in, fan_out):
    """nn.Linear-style U(-1/sqrt(in), 1/sqrt(in)) init, f32."""
    kw, kb = jax.random.split(key)
    bound = 1.0 / float(np.sqrt(fan_in))
    w = jax.random.uniform(kw, (fan_in, fan_out), jnp.float32, -bound, bound)
    b = jax.random.uniform(kb, (fan_out,), jnp.float32, -bound, bound)
    return w, b


def _pad_wb(w, b, in_pad, out_pad):
    """Zero-pad (exact) to lane-aligned shapes; weights bf16, bias f32 (1, N)."""
    fi, fo = w.shape
    w_p = jnp.zeros((in_pad, out_pad), jnp.float32).at[:fi, :fo].set(w)
    b_p = jnp.zeros((1, out_pad), jnp.float32).at[0, :fo].set(b)
    return w_p.astype(jnp.bfloat16), b_p


def init_linear_vae_params(key, input_neurons, latent_dim):
    """Returns (flat_padded_params_for_kernel, raw_f32_params_for_reference)."""
    L, L2 = latent_dim, 2 * latent_dim
    enc_dims = [input_neurons, 1000, 250, 75, L2]
    dec_dims = [L, L2, 75, 250, 1000, input_neurons]
    enc_p = [_pad_lane(d) for d in enc_dims]
    dec_p = [_pad_lane(d) for d in dec_dims]
    z_pad = _pad_lane(L)

    keys = jax.random.split(key, (len(enc_dims) - 1) + 2 + (len(dec_dims) - 1))
    ki = iter(keys)

    flat = []                                           # [w, b, w, b, ...] padded
    raw = {"encoder": [], "head": None, "decoder": []}  # unpadded f32 (reference)

    for i in range(len(enc_dims) - 1):
        w, b = _uniform_linear(next(ki), enc_dims[i], enc_dims[i + 1])
        raw["encoder"].append((w, b))
        flat += list(_pad_wb(w, b, enc_p[i], enc_p[i + 1]))

    # Fused mean/logvar head: mean weights -> lanes [0, L), logvar -> [z_pad, z_pad+L)
    mw, mb = _uniform_linear(next(ki), L2, L)
    vw, vb = _uniform_linear(next(ki), L2, L)
    raw["head"] = (mw, mb, vw, vb)
    wh = jnp.zeros((enc_p[-1], 2 * z_pad), jnp.float32)
    wh = wh.at[:L2, :L].set(mw).at[:L2, z_pad:z_pad + L].set(vw)
    bh = jnp.zeros((1, 2 * z_pad), jnp.float32)
    bh = bh.at[0, :L].set(mb).at[0, z_pad:z_pad + L].set(vb)
    flat += [wh.astype(jnp.bfloat16), bh]

    for i in range(len(dec_dims) - 1):
        w, b = _uniform_linear(next(ki), dec_dims[i], dec_dims[i + 1])
        raw["decoder"].append((w, b))
        flat += list(_pad_wb(w, b, dec_p[i], dec_p[i + 1]))

    return flat, raw


# --------------------------------- forward ----------------------------------

def linear_vae_forward(flat, x, eps, *, row_tile=256):
    """Mirrors linearVAE.forward (sigmoid=False). Returns (x_recon, mean_, var_)
    where var_ = exp(0.5 * logvar) as in the PyTorch module."""
    M, D = x.shape
    L = eps.shape[1]
    d_in_p = flat[0].shape[0]        # padded input width
    d_out_p = flat[-2].shape[1]      # padded output width
    z_pad = _pad_lane(L)
    assert flat[8].shape[1] == 2 * z_pad   # fused head width

    # Row tiling: MXU-sized tile, shrink for tiny batches; pad rows to a tile multiple.
    tm = min(row_tile, _round_up(M, 8))
    m_pad = _round_up(M, tm)
    grid = (m_pad // tm,)

    x_p = jnp.zeros((m_pad, d_in_p), jnp.float32).at[:M, :D].set(x)
    eps_p = jnp.zeros((m_pad, z_pad), jnp.float32).at[:M, :L].set(eps)

    x_spec = pl.BlockSpec((tm, d_in_p), lambda i: (i, 0))
    eps_spec = pl.BlockSpec((tm, z_pad), lambda i: (i, 0))
    # Weights/biases: whole-array blocks pinned at (0, 0) -> DMA'd once, then
    # VMEM-resident for every batch-row grid step.
    pin_specs = [pl.BlockSpec(t.shape, lambda i: (0, 0)) for t in flat]

    out_shape = (
        jax.ShapeDtypeStruct((m_pad, d_out_p), jnp.float32),
        jax.ShapeDtypeStruct((m_pad, z_pad), jnp.float32),
        jax.ShapeDtypeStruct((m_pad, z_pad), jnp.float32),
    )
    out_specs = (
        pl.BlockSpec((tm, d_out_p), lambda i: (i, 0)),
        pl.BlockSpec((tm, z_pad), lambda i: (i, 0)),
        pl.BlockSpec((tm, z_pad), lambda i: (i, 0)),
    )

    # Advisory cost estimate so XLA schedules surrounding ops around this call.
    mats = flat[0::2]
    flops = 2 * m_pad * sum(int(w.shape[0]) * int(w.shape[1]) for w in mats)
    bytes_accessed = (sum(int(t.size) * t.dtype.itemsize for t in flat)
                      + int(x_p.size) * 4 + int(eps_p.size) * 4
                      + m_pad * (d_out_p + 2 * z_pad) * 4)
    cost = pl.CostEstimate(flops=int(flops),
                           transcendentals=int(m_pad * z_pad),
                           bytes_accessed=int(bytes_accessed))

    kernel = functools.partial(_fused_vae_kernel, z_pad=z_pad)

    x_rec_p, mean_p, std_p = pl.pallas_call(
        kernel,
        out_shape=out_shape,
        grid=grid,
        in_specs=[x_spec, eps_spec] + pin_specs,
        out_specs=out_specs,
        compiler_params=pltpu.CompilerParams(
            dimension_semantics=("parallel",),        # shardable batch-row axis
            vmem_limit_bytes=48 * 1024 * 1024),       # headroom; safe on v7x's 64 MiB
        cost_estimate=cost,
    )(x_p, eps_p, *flat)

    return x_rec_p[:M, :D], mean_p[:M, :L], std_p[:M, :L]


# ------------------------- pure-JAX reference (check) ------------------------

def linear_vae_reference(raw, x, eps):
    """Same numerics as the kernel (bf16 matmul inputs, f32 accum/elementwise)."""
    def dense(h, w, b, relu):
        y = jnp.dot(h.astype(jnp.bfloat16), w.astype(jnp.bfloat16),
                    preferred_element_type=jnp.float32) + b
        return jnp.maximum(y, 0.0) if relu else y

    h = x.astype(jnp.float32)
    for w, b in raw["encoder"]:
        h = dense(h, w, b, True)
    mw, mb, vw, vb = raw["head"]
    mean_ = dense(h, mw, mb, False)
    logvar = dense(h, vw, vb, False)
    std = jnp.exp(0.5 * logvar)
    z = mean_ + std * eps
    h = z
    for w, b in raw["decoder"]:
        h = dense(h, w, b, True)
    return h, mean_, std


# ----------------------------------- main ------------------------------------

if __name__ == "__main__":
    # Small shapes consistent with the module: flattened 3x16x16 image, latent 30.
    input_neurons = 3 * 16 * 16   # 768 (module default 3*64*64 works but is larger)
    latent_dim = 30

    key = jax.random.PRNGKey(0)
    k_params, k_x, k_eps, k_xb, k_epsb = jax.random.split(key, 5)

    flat, raw = init_linear_vae_params(k_params, input_neurons, latent_dim)
    fwd = jax.jit(linear_vae_forward, static_argnames=("row_tile",))

    def run_and_check(kx, keps, batch):
        x = jax.random.normal(kx, (batch, input_neurons), jnp.float32)
        # epsilon of reparameterization_trick (torch.randn_like), drawn in glue code.
        eps = jax.random.normal(keps, (batch, latent_dim), jnp.float32)
        x_rec, mean_, var_ = fwd(flat, x, eps)
        jax.block_until_ready((x_rec, mean_, var_))

        assert x_rec.shape == (batch, input_neurons)
        assert mean_.shape == (batch, latent_dim)
        assert var_.shape == (batch, latent_dim)
        assert bool(jnp.all(jnp.isfinite(x_rec)))
        assert bool(jnp.all(var_ > 0.0))   # var_ is std = exp(0.5*logvar)

        xr_ref, m_ref, v_ref = linear_vae_reference(raw, x, eps)
        assert np.allclose(np.asarray(x_rec), np.asarray(xr_ref), rtol=2e-2, atol=2e-2)
        assert np.allclose(np.asarray(mean_), np.asarray(m_ref), rtol=2e-2, atol=2e-2)
        assert np.allclose(np.asarray(var_), np.asarray(v_ref), rtol=2e-2, atol=2e-2)

    # (1) module-scale tiny batch (pads to one 8-row tile, single grid step).
    run_and_check(k_x, k_eps, batch=2)
    # (2) batched case exercising the real row grid: 512 rows -> 2 grid steps of
    #     256 rows with the weight set VMEM-resident across steps.
    run_and_check(k_xb, k_epsb, batch=512)

    print("KERNEL_OK")
</pallas_src>

<mosaic_0001>
module attributes {stable_mosaic.version = 11 : i64} {
  func.func @_fused_vae_kernel(%arg0: i32, %arg1: memref<8x768xf32, #tpu.memory_space<vmem>>, %arg2: memref<8x128xf32, #tpu.memory_space<vmem>>, %arg3: memref<768x1024xbf16, #tpu.memory_space<vmem>>, %arg4: memref<1x1024xf32, #tpu.memory_space<vmem>>, %arg5: memref<1024x256xbf16, #tpu.memory_space<vmem>>, %arg6: memref<1x256xf32, #tpu.memory_space<vmem>>, %arg7: memref<256x128xbf16, #tpu.memory_space<vmem>>, %arg8: memref<1x128xf32, #tpu.memory_space<vmem>>, %arg9: memref<128x128xbf16, #tpu.memory_space<vmem>>, %arg10: memref<1x128xf32, #tpu.memory_space<vmem>>, %arg11: memref<128x256xbf16, #tpu.memory_space<vmem>>, %arg12: memref<1x256xf32, #tpu.memory_space<vmem>>, %arg13: memref<128x128xbf16, #tpu.memory_space<vmem>>, %arg14: memref<1x128xf32, #tpu.memory_space<vmem>>, %arg15: memref<128x128xbf16, #tpu.memory_space<vmem>>, %arg16: memref<1x128xf32, #tpu.memory_space<vmem>>, %arg17: memref<128x256xbf16, #tpu.memory_space<vmem>>, %arg18: memref<1x256xf32, #tpu.memory_space<vmem>>, %arg19: memref<256x1024xbf16, #tpu.memory_space<vmem>>, %arg20: memref<1x1024xf32, #tpu.memory_space<vmem>>, %arg21: memref<1024x768xbf16, #tpu.memory_space<vmem>>, %arg22: memref<1x768xf32, #tpu.memory_space<vmem>>, %arg23: memref<8x768xf32, #tpu.memory_space<vmem>>, %arg24: memref<8x128xf32, #tpu.memory_space<vmem>>, %arg25: memref<8x128xf32, #tpu.memory_space<vmem>>) attributes {dimension_semantics = [#tpu.dimension_semantics<parallel>], iteration_bounds = array<i64: 1>, scalar_prefetch = 0 : i64, scratch_operands = 0 : i64, tpu.core_type = #tpu.core_type<tc>, window_params = [{transform_indices = @transform_0, window_bounds = array<i64: 8, 768>}, {transform_indices = @transform_1, window_bounds = array<i64: 8, 128>}, {pipeline_mode = #tpu.pipeline_mode<synchronous>, transform_indices = @transform_2, window_bounds = array<i64: 768, 1024>}, {pipeline_mode = #tpu.pipeline_mode<synchronous>, transform_indices = @transform_3, window_bounds = array<i64: 1, 1024>}, {pipeline_mode = #tpu.pipeline_mode<synchronous>, transform_indices = @transform_4, window_bounds = array<i64: 1024, 256>}, {pipeline_mode = #tpu.pipeline_mode<synchronous>, transform_indices = @transform_5, window_bounds = array<i64: 1, 256>}, {pipeline_mode = #tpu.pipeline_mode<synchronous>, transform_indices = @transform_6, window_bounds = array<i64: 256, 128>}, {pipeline_mode = #tpu.pipeline_mode<synchronous>, transform_indices = @transform_7, window_bounds = array<i64: 1, 128>}, {pipeline_mode = #tpu.pipeline_mode<synchronous>, transform_indices = @transform_8, window_bounds = array<i64: 128, 128>}, {pipeline_mode = #tpu.pipeline_mode<synchronous>, transform_indices = @transform_9, window_bounds = array<i64: 1, 128>}, {pipeline_mode = #tpu.pipeline_mode<synchronous>, transform_indices = @transform_10, window_bounds = array<i64: 128, 256>}, {pipeline_mode = #tpu.pipeline_mode<synchronous>, transform_indices = @transform_11, window_bounds = array<i64: 1, 256>}, {pipeline_mode = #tpu.pipeline_mode<synchronous>, transform_indices = @transform_12, window_bounds = array<i64: 128, 128>}, {pipeline_mode = #tpu.pipeline_mode<synchronous>, transform_indices = @transform_13, window_bounds = array<i64: 1, 128>}, {pipeline_mode = #tpu.pipeline_mode<synchronous>, transform_indices = @transform_14, window_bounds = array<i64: 128, 128>}, {pipeline_mode = #tpu.pipeline_mode<synchronous>, transform_indices = @transform_15, window_bounds = array<i64: 1, 128>}, {pipeline_mode = #tpu.pipeline_mode<synchronous>, transform_indices = @transform_16, window_bounds = array<i64: 128, 256>}, {pipeline_mode = #tpu.pipeline_mode<synchronous>, transform_indices = @transform_17, window_bounds = array<i64: 1, 256>}, {pipeline_mode = #tpu.pipeline_mode<synchronous>, transform_indices = @transform_18, window_bounds = array<i64: 256, 1024>}, {pipeline_mode = #tpu.pipeline_mode<synchronous>, transform_indices = @transform_19, window_bounds = array<i64: 1, 1024>}, {pipeline_mode = #tpu.pipeline_mode<synchronous>, transform_indices = @transform_20, window_bounds = array<i64: 1024, 768>}, {pipeline_mode = #tpu.pipeline_mode<synchronous>, transform_indices = @transform_21, window_bounds = array<i64: 1, 768>}, {transform_indices = @transform_22, window_bounds = array<i64: 8, 768>}, {transform_indices = @transform_23, window_bounds = array<i64: 8, 128>}, {transform_indices = @transform_24, window_bounds = array<i64: 8, 128>}]} {
    %c0 = arith.constant 0 : index
    %c0_0 = arith.constant 0 : index
    %0 = vector.load %arg1[%c0, %c0_0] : memref<8x768xf32, #tpu.memory_space<vmem>>, vector<8x768xf32>
    %1 = arith.truncf %0 : vector<8x768xf32> to vector<8x768xbf16>
    %c0_1 = arith.constant 0 : index
    %c0_2 = arith.constant 0 : index
    %2 = vector.load %arg3[%c0_1, %c0_2] : memref<768x1024xbf16, #tpu.memory_space<vmem>>, vector<768x1024xbf16>
    %cst = arith.constant dense<0.000000e+00> : vector<8x1024xf32>
    %3 = tpu.matmul %1, %2, %cst {dimension_numbers = #tpu.dot_dimension_numbers<[1], [0], [0], [1], [0, 0, 1, 1], [], []>} : vector<8x768xbf16>, vector<768x1024xbf16>, vector<8x1024xf32> -> vector<8x1024xf32>
    %c0_3 = arith.constant 0 : index
    %c0_4 = arith.constant 0 : index
    %4 = vector.load %arg4[%c0_3, %c0_4] : memref<1x1024xf32, #tpu.memory_space<vmem>>, vector<1x1024xf32>
    %5 = vector.broadcast %4 : vector<1x1024xf32> to vector<8x1024xf32>
    %6 = arith.addf %3, %5 : vector<8x1024xf32>
    %cst_5 = arith.constant 0.000000e+00 : f32
    %7 = vector.broadcast %cst_5 : f32 to vector<8x1024xf32>
    %8 = arith.maximumf %6, %7 : vector<8x1024xf32>
    %9 = arith.truncf %8 : vector<8x1024xf32> to vector<8x1024xbf16>
    %c0_6 = arith.constant 0 : index
    %c0_7 = arith.constant 0 : index
    %10 = vector.load %arg5[%c0_6, %c0_7] : memref<1024x256xbf16, #tpu.memory_space<vmem>>, vector<1024x256xbf16>
    %cst_8 = arith.constant dense<0.000000e+00> : vector<8x256xf32>
    %11 = tpu.matmul %9, %10, %cst_8 {dimension_numbers = #tpu.dot_dimension_numbers<[1], [0], [0], [1], [0, 0, 1, 1], [], []>} : vector<8x1024xbf16>, vector<1024x256xbf16>, vector<8x256xf32> -> vector<8x256xf32>
    %c0_9 = arith.constant 0 : index
    %c0_10 = arith.constant 0 : index
    %12 = vector.load %arg6[%c0_9, %c0_10] : memref<1x256xf32, #tpu.memory_space<vmem>>, vector<1x256xf32>
    %13 = vector.broadcast %12 : vector<1x256xf32> to vector<8x256xf32>
    %14 = arith.addf %11, %13 : vector<8x256xf32>
    %cst_11 = arith.constant 0.000000e+00 : f32
    %15 = vector.broadcast %cst_11 : f32 to vector<8x256xf32>
    %16 = arith.maximumf %14, %15 : vector<8x256xf32>
    %17 = arith.truncf %16 : vector<8x256xf32> to vector<8x256xbf16>
    %c0_12 = arith.constant 0 : index
    %c0_13 = arith.constant 0 : index
    %18 = vector.load %arg7[%c0_12, %c0_13] : memref<256x128xbf16, #tpu.memory_space<vmem>>, vector<256x128xbf16>
    %cst_14 = arith.constant dense<0.000000e+00> : vector<8x128xf32>
    %19 = tpu.matmul %17, %18, %cst_14 {dimension_numbers = #tpu.dot_dimension_numbers<[1], [0], [0], [1], [0, 0, 1, 1], [], []>} : vector<8x256xbf16>, vector<256x128xbf16>, vector<8x128xf32> -> vector<8x128xf32>
    %c0_15 = arith.constant 0 : index
    %c0_16 = arith.constant 0 : index
    %20 = vector.load %arg8[%c0_15, %c0_16] : memref<1x128xf32, #tpu.memory_space<vmem>>, vector<1x128xf32>
    %21 = vector.broadcast %20 : vector<1x128xf32> to vector<8x128xf32>
    %22 = arith.addf %19, %21 : vector<8x128xf32>
    %cst_17 = arith.constant 0.000000e+00 : f32
    %23 = vector.broadcast %cst_17 : f32 to vector<8x128xf32>
    %24 = arith.maximumf %22, %23 : vector<8x128xf32>
    %25 = arith.truncf %24 : vector<8x128xf32> to vector<8x128xbf16>
    %c0_18 = arith.constant 0 : index
    %c0_19 = arith.constant 0 : index
    %26 = vector.load %arg9[%c0_18, %c0_19] : memref<128x128xbf16, #tpu.memory_space<vmem>>, vector<128x128xbf16>
    %cst_20 = arith.constant dense<0.000000e+00> : vector<8x128xf32>
    %27 = tpu.matmul %25, %26, %cst_20 {dimension_numbers = #tpu.dot_dimension_numbers<[1], [0], [0], [1], [0, 0, 1, 1], [], []>} : vector<8x128xbf16>, vector<128x128xbf16>, vector<8x128xf32> -> vector<8x128xf32>
    %c0_21 = arith.constant 0 : index
    %c0_22 = arith.constant 0 : index
    %28 = vector.load %arg10[%c0_21, %c0_22] : memref<1x128xf32, #tpu.memory_space<vmem>>, vector<1x128xf32>
    %29 = vector.broadcast %28 : vector<1x128xf32> to vector<8x128xf32>
    %30 = arith.addf %27, %29 : vector<8x128xf32>
    %cst_23 = arith.constant 0.000000e+00 : f32
    %31 = vector.broadcast %cst_23 : f32 to vector<8x128xf32>
    %32 = arith.maximumf %30, %31 : vector<8x128xf32>
    %33 = arith.truncf %32 : vector<8x128xf32> to vector<8x128xbf16>
    %c0_24 = arith.constant 0 : index
    %c0_25 = arith.constant 0 : index
    %34 = vector.load %arg11[%c0_24, %c0_25] : memref<128x256xbf16, #tpu.memory_space<vmem>>, vector<128x256xbf16>
    %cst_26 = arith.constant dense<0.000000e+00> : vector<8x256xf32>
    %35 = tpu.matmul %33, %34, %cst_26 {dimension_numbers = #tpu.dot_dimension_numbers<[1], [0], [0], [1], [0, 0, 1, 1], [], []>} : vector<8x128xbf16>, vector<128x256xbf16>, vector<8x256xf32> -> vector<8x256xf32>
    %c0_27 = arith.constant 0 : index
    %c0_28 = arith.constant 0 : index
    %36 = vector.load %arg12[%c0_27, %c0_28] : memref<1x256xf32, #tpu.memory_space<vmem>>, vector<1x256xf32>
    %37 = vector.broadcast %36 : vector<1x256xf32> to vector<8x256xf32>
    %38 = arith.addf %35, %37 : vector<8x256xf32>
    %39 = vector.extract_strided_slice %38 {offsets = [0, 0], sizes = [8, 128], strides = [1, 1]} : vector<8x256xf32> to vector<8x128xf32>
    %40 = vector.extract_strided_slice %38 {offsets = [0, 128], sizes = [8, 128], strides = [1, 1]} : vector<8x256xf32> to vector<8x128xf32>
    %cst_29 = arith.constant 5.000000e-01 : f32
    %41 = vector.broadcast %cst_29 : f32 to vector<8x128xf32>
    %42 = arith.mulf %41, %40 : vector<8x128xf32>
    %43 = math.exp %42 : vector<8x128xf32>
    %c0_30 = arith.constant 0 : index
    %c0_31 = arith.constant 0 : index
    %44 = vector.load %arg2[%c0_30, %c0_31] : memref<8x128xf32, #tpu.memory_space<vmem>>, vector<8x128xf32>
    %45 = arith.mulf %43, %44 : vector<8x128xf32>
    %46 = arith.addf %39, %45 : vector<8x128xf32>
    %47 = arith.truncf %46 : vector<8x128xf32> to vector<8x128xbf16>
    %c0_32 = arith.constant 0 : index
    %c0_33 = arith.constant 0 : index
    %48 = vector.load %arg13[%c0_32, %c0_33] : memref<128x128xbf16, #tpu.memory_space<vmem>>, vector<128x128xbf16>
    %cst_34 = arith.constant dense<0.000000e+00> : vector<8x128xf32>
    %49 = tpu.matmul %47, %48, %cst_34 {dimension_numbers = #tpu.dot_dimension_numbers<[1], [0], [0], [1], [0, 0, 1, 1], [], []>} : vector<8x128xbf16>, vector<128x128xbf16>, vector<8x128xf32> -> vector<8x128xf32>
    %c0_35 = arith.constant 0 : index
    %c0_36 = arith.constant 0 : index
    %50 = vector.load %arg14[%c0_35, %c0_36] : memref<1x128xf32, #tpu.memory_space<vmem>>, vector<1x128xf32>
    %51 = vector.broadcast %50 : vector<1x128xf32> to vector<8x128xf32>
    %52 = arith.addf %49, %51 : vector<8x128xf32>
    %cst_37 = arith.constant 0.000000e+00 : f32
    %53 = vector.broadcast %cst_37 : f32 to vector<8x128xf32>
    %54 = arith.maximumf %52, %53 : vector<8x128xf32>
    %55 = arith.truncf %54 : vector<8x128xf32> to vector<8x128xbf16>
    %c0_38 = arith.constant 0 : index
    %c0_39 = arith.constant 0 : index
    %56 = vector.load %arg15[%c0_38, %c0_39] : memref<128x128xbf16, #tpu.memory_space<vmem>>, vector<128x128xbf16>
    %cst_40 = arith.constant dense<0.000000e+00> : vector<8x128xf32>
    %57 = tpu.matmul %55, %56, %cst_40 {dimension_numbers = #tpu.dot_dimension_numbers<[1], [0], [0], [1], [0, 0, 1, 1], [], []>} : vector<8x128xbf16>, vector<128x128xbf16>, vector<8x128xf32> -> vector<8x128xf32>
    %c0_41 = arith.constant 0 : index
    %c0_42 = arith.constant 0 : index
    %58 = vector.load %arg16[%c0_41, %c0_42] : memref<1x128xf32, #tpu.memory_space<vmem>>, vector<1x128xf32>
    %59 = vector.broadcast %58 : vector<1x128xf32> to vector<8x128xf32>
    %60 = arith.addf %57, %59 : vector<8x128xf32>
    %cst_43 = arith.constant 0.000000e+00 : f32
    %61 = vector.broadcast %cst_43 : f32 to vector<8x128xf32>
    %62 = arith.maximumf %60, %61 : vector<8x128xf32>
    %63 = arith.truncf %62 : vector<8x128xf32> to vector<8x128xbf16>
    %c0_44 = arith.constant 0 : index
    %c0_45 = arith.constant 0 : index
    %64 = vector.load %arg17[%c0_44, %c0_45] : memref<128x256xbf16, #tpu.memory_space<vmem>>, vector<128x256xbf16>
    %cst_46 = arith.constant dense<0.000000e+00> : vector<8x256xf32>
    %65 = tpu.matmul %63, %64, %cst_46 {dimension_numbers = #tpu.dot_dimension_numbers<[1], [0], [0], [1], [0, 0, 1, 1], [], []>} : vector<8x128xbf16>, vector<128x256xbf16>, vector<8x256xf32> -> vector<8x256xf32>
    %c0_47 = arith.constant 0 : index
    %c0_48 = arith.constant 0 : index
    %66 = vector.load %arg18[%c0_47, %c0_48] : memref<1x256xf32, #tpu.memory_space<vmem>>, vector<1x256xf32>
    %67 = vector.broadcast %66 : vector<1x256xf32> to vector<8x256xf32>
    %68 = arith.addf %65, %67 : vector<8x256xf32>
    %cst_49 = arith.constant 0.000000e+00 : f32
    %69 = vector.broadcast %cst_49 : f32 to vector<8x256xf32>
    %70 = arith.maximumf %68, %69 : vector<8x256xf32>
    %71 = arith.truncf %70 : vector<8x256xf32> to vector<8x256xbf16>
    %c0_50 = arith.constant 0 : index
    %c0_51 = arith.constant 0 : index
    %72 = vector.load %arg19[%c0_50, %c0_51] : memref<256x1024xbf16, #tpu.memory_space<vmem>>, vector<256x1024xbf16>
    %cst_52 = arith.constant dense<0.000000e+00> : vector<8x1024xf32>
    %73 = tpu.matmul %71, %72, %cst_52 {dimension_numbers = #tpu.dot_dimension_numbers<[1], [0], [0], [1], [0, 0, 1, 1], [], []>} : vector<8x256xbf16>, vector<256x1024xbf16>, vector<8x1024xf32> -> vector<8x1024xf32>
    %c0_53 = arith.constant 0 : index
    %c0_54 = arith.constant 0 : index
    %74 = vector.load %arg20[%c0_53, %c0_54] : memref<1x1024xf32, #tpu.memory_space<vmem>>, vector<1x1024xf32>
    %75 = vector.broadcast %74 : vector<1x1024xf32> to vector<8x1024xf32>
    %76 = arith.addf %73, %75 : vector<8x1024xf32>
    %cst_55 = arith.constant 0.000000e+00 : f32
    %77 = vector.broadcast %cst_55 : f32 to vector<8x1024xf32>
    %78 = arith.maximumf %76, %77 : vector<8x1024xf32>
    %79 = arith.truncf %78 : vector<8x1024xf32> to vector<8x1024xbf16>
    %c0_56 = arith.constant 0 : index
    %c0_57 = arith.constant 0 : index
    %80 = vector.load %arg21[%c0_56, %c0_57] : memref<1024x768xbf16, #tpu.memory_space<vmem>>, vector<1024x768xbf16>
    %cst_58 = arith.constant dense<0.000000e+00> : vector<8x768xf32>
    %81 = tpu.matmul %79, %80, %cst_58 {dimension_numbers = #tpu.dot_dimension_numbers<[1], [0], [0], [1], [0, 0, 1, 1], [], []>} : vector<8x1024xbf16>, vector<1024x768xbf16>, vector<8x768xf32> -> vector<8x768xf32>
    %c0_59 = arith.constant 0 : index
    %c0_60 = arith.constant 0 : index
    %82 = vector.load %arg22[%c0_59, %c0_60] : memref<1x768xf32, #tpu.memory_space<vmem>>, vector<1x768xf32>
    %83 = vector.broadcast %82 : vector<1x768xf32> to vector<8x768xf32>
    %84 = arith.addf %81, %83 : vector<8x768xf32>
    %cst_61 = arith.constant 0.000000e+00 : f32
    %85 = vector.broadcast %cst_61 : f32 to vector<8x768xf32>
    %86 = arith.maximumf %84, %85 : vector<8x768xf32>
    %c0_62 = arith.constant 0 : index
    %c0_63 = arith.constant 0 : index
    %87 = vector.load %arg23[%c0_62, %c0_63] : memref<8x768xf32, #tpu.memory_space<vmem>>, vector<8x768xf32>
    tpu.vector_store %arg23[%c0_62, %c0_63], %86 {strides = array<i32>} : memref<8x768xf32, #tpu.memory_space<vmem>>, vector<8x768xf32>,
    %c0_64 = arith.constant 0 : index
    %c0_65 = arith.constant 0 : index
    %88 = vector.load %arg24[%c0_64, %c0_65] : memref<8x128xf32, #tpu.memory_space<vmem>>, vector<8x128xf32>
    tpu.vector_store %arg24[%c0_64, %c0_65], %39 {strides = array<i32>} : memref<8x128xf32, #tpu.memory_space<vmem>>, vector<8x128xf32>,
    %c0_66 = arith.constant 0 : index
    %c0_67 = arith.constant 0 : index
    %89 = vector.load %arg25[%c0_66, %c0_67] : memref<8x128xf32, #tpu.memory_space<vmem>>, vector<8x128xf32>
    tpu.vector_store %arg25[%c0_66, %c0_67], %43 {strides = array<i32>} : memref<8x128xf32, #tpu.memory_space<vmem>>, vector<8x128xf32>,
    return
  }
  func.func @transform_0(%arg0: i32) -> (i32, i32) {
    %c0_i32 = arith.constant 0 : i32
    %c0_i32_0 = arith.constant 0 : i32
    return %arg0, %c0_i32 : i32, i32
  }
  func.func @transform_1(%arg0: i32) -> (i32, i32) {
    %c0_i32 = arith.constant 0 : i32
    %c0_i32_0 = arith.constant 0 : i32
    return %arg0, %c0_i32 : i32, i32
  }
  func.func @transform_2(%arg0: i32) -> (i32, i32) {
    %c0_i32 = arith.constant 0 : i32
    %c0_i32_0 = arith.constant 0 : i32
    %c0_i32_1 = arith.constant 0 : i32
    return %c0_i32, %c0_i32_0 : i32, i32
  }
  func.func @transform_3(%arg0: i32) -> (i32, i32) {
    %c0_i32 = arith.constant 0 : i32
    %c0_i32_0 = arith.constant 0 : i32
    %c0_i32_1 = arith.constant 0 : i32
    return %c0_i32, %c0_i32_0 : i32, i32
  }
  func.func @transform_4(%arg0: i32) -> (i32, i32) {
    %c0_i32 = arith.constant 0 : i32
    %c0_i32_0 = arith.constant 0 : i32
    %c0_i32_1 = arith.constant 0 : i32
    return %c0_i32, %c0_i32_0 : i32, i32
  }
  func.func @transform_5(%arg0: i32) -> (i32, i32) {
    %c0_i32 = arith.constant 0 : i32
    %c0_i32_0 = arith.constant 0 : i32
    %c0_i32_1 = arith.constant 0 : i32
    return %c0_i32, %c0_i32_0 : i32, i32
  }
  func.func @transform_6(%arg0: i32) -> (i32, i32) {
    %c0_i32 = arith.constant 0 : i32
    %c0_i32_0 = arith.constant 0 : i32
    %c0_i32_1 = arith.constant 0 : i32
    return %c0_i32, %c0_i32_0 : i32, i32
  }
  func.func @transform_7(%arg0: i32) -> (i32, i32) {
    %c0_i32 = arith.constant 0 : i32
    %c0_i32_0 = arith.constant 0 : i32
    %c0_i32_1 = arith.constant 0 : i32
    return %c0_i32, %c0_i32_0 : i32, i32
  }
  func.func @transform_8(%arg0: i32) -> (i32, i32) {
    %c0_i32 = arith.constant 0 : i32
    %c0_i32_0 = arith.constant 0 : i32
    %c0_i32_1 = arith.constant 0 : i32
    return %c0_i32, %c0_i32_0 : i32, i32
  }
  func.func @transform_9(%arg0: i32) -> (i32, i32) {
    %c0_i32 = arith.constant 0 : i32
    %c0_i32_0 = arith.constant 0 : i32
    %c0_i32_1 = arith.constant 0 : i32
    return %c0_i32, %c0_i32_0 : i32, i32
  }
  func.func @transform_10(%arg0: i32) -> (i32, i32) {
    %c0_i32 = arith.constant 0 : i32
    %c0_i32_0 = arith.constant 0 : i32
    %c0_i32_1 = arith.constant 0 : i32
    return %c0_i32, %c0_i32_0 : i32, i32
  }
  func.func @transform_11(%arg0: i32) -> (i32, i32) {
    %c0_i32 = arith.constant 0 : i32
    %c0_i32_0 = arith.constant 0 : i32
    %c0_i32_1 = arith.constant 0 : i32
    return %c0_i32, %c0_i32_0 : i32, i32
  }
  func.func @transform_12(%arg0: i32) -> (i32, i32) {
    %c0_i32 = arith.constant 0 : i32
    %c0_i32_0 = arith.constant 0 : i32
    %c0_i32_1 = arith.constant 0 : i32
    return %c0_i32, %c0_i32_0 : i32, i32
  }
  func.func @transform_13(%arg0: i32) -> (i32, i32) {
    %c0_i32 = arith.constant 0 : i32
    %c0_i32_0 = arith.constant 0 : i32
    %c0_i32_1 = arith.constant 0 : i32
    return %c0_i32, %c0_i32_0 : i32, i32
  }
  func.func @transform_14(%arg0: i32) -> (i32, i32) {
    %c0_i32 = arith.constant 0 : i32
    %c0_i32_0 = arith.constant 0 : i32
    %c0_i32_1 = arith.constant 0 : i32
    return %c0_i32, %c0_i32_0 : i32, i32
  }
  func.func @transform_15(%arg0: i32) -> (i32, i32) {
    %c0_i32 = arith.constant 0 : i32
    %c0_i32_0 = arith.constant 0 : i32
    %c0_i32_1 = arith.constant 0 : i32
    return %c0_i32, %c0_i32_0 : i32, i32
  }
  func.func @transform_16(%arg0: i32) -> (i32, i32) {
    %c0_i32 = arith.constant 0 : i32
    %c0_i32_0 = arith.constant 0 : i32
    %c0_i32_1 = arith.constant 0 : i32
    return %c0_i32, %c0_i32_0 : i32, i32
  }
  func.func @transform_17(%arg0: i32) -> (i32, i32) {
    %c0_i32 = arith.constant 0 : i32
    %c0_i32_0 = arith.constant 0 : i32
    %c0_i32_1 = arith.constant 0 : i32
    return %c0_i32, %c0_i32_0 : i32, i32
  }
  func.func @transform_18(%arg0: i32) -> (i32, i32) {
    %c0_i32 = arith.constant 0 : i32
    %c0_i32_0 = arith.constant 0 : i32
    %c0_i32_1 = arith.constant 0 : i32
    return %c0_i32, %c0_i32_0 : i32, i32
  }
  func.func @transform_19(%arg0: i32) -> (i32, i32) {
    %c0_i32 = arith.constant 0 : i32
    %c0_i32_0 = arith.constant 0 : i32
    %c0_i32_1 = arith.constant 0 : i32
    return %c0_i32, %c0_i32_0 : i32, i32
  }
  func.func @transform_20(%arg0: i32) -> (i32, i32) {
    %c0_i32 = arith.constant 0 : i32
    %c0_i32_0 = arith.constant 0 : i32
    %c0_i32_1 = arith.constant 0 : i32
    return %c0_i32, %c0_i32_0 : i32, i32
  }
  func.func @transform_21(%arg0: i32) -> (i32, i32) {
    %c0_i32 = arith.constant 0 : i32
    %c0_i32_0 = arith.constant 0 : i32
    %c0_i32_1 = arith.constant 0 : i32
    return %c0_i32, %c0_i32_0 : i32, i32
  }
  func.func @transform_22(%arg0: i32) -> (i32, i32) {
    %c0_i32 = arith.constant 0 : i32
    %c0_i32_0 = arith.constant 0 : i32
    return %arg0, %c0_i32 : i32, i32
  }
  func.func @transform_23(%arg0: i32) -> (i32, i32) {
    %c0_i32 = arith.constant 0 : i32
    %c0_i32_0 = arith.constant 0 : i32
    return %arg0, %c0_i32 : i32, i32
  }
  func.func @transform_24(%arg0: i32) -> (i32, i32) {
    %c0_i32 = arith.constant 0 : i32
    %c0_i32_0 = arith.constant 0 : i32
    return %arg0, %c0_i32 : i32, i32
  }
}

</mosaic_0001>

<bundles_post_ra>
// kernel: linear_vae_forward.1
= control target key start
LH: loop header
LB: loop body
LE: loop exit
PB: predicated region body
PF: predicated region fallthrough
CT: control target
= control target key end

     0   :  { %s15608_s0 = inlined_call_operand.vmem [shape: f32[8,768], index: 0, kind: input, shape index: {}]   ;;  %s15609_s1 = inlined_call_operand.vmem [shape: f32[8,128], index: 1, kind: input, shape index: {}]   ;;  %s15610_s2 = inlined_call_operand.hbm [shape: bf16[768,1024], index: 2, kind: input, shape index: {}]   ;;  %s15611_s3 = inlined_call_operand.hbm [shape: f32[1,1024], index: 3, kind: input, shape index: {}]   ;;  %s15612_s4 = inlined_call_operand.hbm [shape: bf16[1024,256], index: 4, kind: input, shape index: {}]   ;;  %s15613_s5 = inlined_call_operand.hbm [shape: f32[1,256], index: 5, kind: input, shape index: {}]   ;;  %s15614_s6 = inlined_call_operand.hbm [shape: bf16[256,128], index: 6, kind: input, shape index: {}]   ;;  %s15615_s7 = inlined_call_operand.hbm [shape: f32[1,128], index: 7, kind: input, shape index: {}]   ;;  %s15616_s8 = inlined_call_operand.hbm [shape: bf16[128,128], index: 8, kind: input, shape index: {}]   ;;  %s15617_s9 = inlined_call_operand.hbm [shape: f32[1,128], index: 9, kind: input, shape index: {}]   ;;  %s15618_s10 = inlined_call_operand.hbm [shape: bf16[128,256], index: 10, kind: input, shape index: {}]   ;;  %s15619_s11 = inlined_call_operand.hbm [shape: f32[1,256], index: 11, kind: input, shape index: {}]   ;;  %s15620_s12 = inlined_call_operand.hbm [shape: bf16[128,128], index: 12, kind: input, shape index: {}]   ;;  %s15621_s13 = inlined_call_operand.hbm [shape: f32[1,128], index: 13, kind: input, shape index: {}]   ;;  %s15622_s14 = inlined_call_operand.hbm [shape: bf16[128,128], index: 14, kind: input, shape index: {}]   ;;  %s15623_s15 = inlined_call_operand.hbm [shape: f32[1,128], index: 15, kind: input, shape index: {}]   ;;  %s15624_s16 = inlined_call_operand.hbm [shape: bf16[128,256], index: 16, kind: input, shape index: {}]   ;;  %s15625_s17 = inlined_call_operand.hbm [shape: f32[1,256], index: 17, kind: input, shape index: {}]   ;;  %s15626_s18 = inlined_call_operand.hbm [shape: bf16[256,1024], index: 18, kind: input, shape index: {}]   ;;  %s15627_s19 = inlined_call_operand.hbm [shape: f32[1,1024], index: 19, kind: input, shape index: {}]   ;;  %s15628_s20 = inlined_call_operand.hbm [shape: bf16[1024,768], index: 20, kind: input, shape index: {}]   ;;  %s15629_s21 = inlined_call_operand.hbm [shape: f32[1,768], index: 21, kind: input, shape index: {}]   ;;  %s15630_s22 = inlined_call_operand.vmem [shape: f32[8,768], index: 22, kind: output, shape index: {0}]   ;;  %s15631_s23 = inlined_call_operand.vmem [shape: f32[8,128], index: 23, kind: output, shape index: {1}]   ;;  %s15632_s24 = inlined_call_operand.vmem [shape: f32[8,128], index: 24, kind: output, shape index: {2}]  }
   0x1   :  { %15635 = sst [smem:[#allocation44_spill]] %s15608_s0 }
   0x2   :  { %15636 = sst [smem:[#allocation45_spill]] %s15609_s1 }
   0x3   :  { %15637 = sst [smem:[#allocation46_spill]] %s15610_s2 }
   0x4   :  { %15638 = sst [smem:[#allocation47_spill]] %s15611_s3 }
   0x5   :  { %15639 = sst [smem:[#allocation48_spill]] %s15612_s4 }
   0x6   :  { %15640 = sst [smem:[#allocation49_spill]] %s15613_s5 }
   0x7   :  { %15641 = sst [smem:[#allocation50_spill]] %s15614_s6 }
   0x8   :  { %15642 = sst [smem:[#allocation51_spill]] %s15615_s7 }
   0x9   :  { %15643 = sst [smem:[#allocation52_spill]] %s15616_s8 }
   0xa   :  { %15644 = sst [smem:[#allocation53_spill]] %s15630_s22 }
   0xb   :  { %15645 = sst [smem:[#allocation54_spill]] %s15632_s24 }
   0xc   :  { %30 = vsyncpa [#allocation3], 0 }
   0xd   :  { %31 = vsyncpa [#allocation5], 0 }
   0xe   :  { %32 = vsyncpa [#allocation8], 0 }
   0xf   :  { %33 = vsyncpa [#allocation11], 0 }
  0x10   :  { %34 = vsyncpa [#allocation14], 0 }
  0x11   :  { %35 = vsyncpa [#allocation17], 0 }
  0x12   :  { %36 = vsyncpa [#allocation20], 0 }
  0x13   :  { %37 = vsyncpa [#allocation23], 0 }
  0x14   :  { %38 = vsyncpa [#allocation26], 0 }
  0x15   :  { %39 = vsyncpa [#allocation29], 0  ;;  %s15646_s27 = sld [smem:[#allocation47_spill]] }
  0x1b   :  { %s63_s28 = sshll.u32 %s15646_s27, 4  ;;  %s64_s28 = int_to_ptr.hbm [resolvable:$true] %s63_s28 }
  0x1c   :  { %40 = vsyncpa [#allocation32], 0  ;;  %s15009_s6 = smov [#allocation4]   ;;  %s15647_s7 = sld [smem:[#allocation49_spill]] }
  0x1d   :  { %s65_s2 = sshll.u32 %s15009_s6, 4  ;;  %s15010_s3 = smov [#allocation7]   ;;  %s66_s2 = int_to_ptr.vmem [resolvable:$true] %s65_s2 }
  0x1e   :  { %68 = dma.hbm_to_vmem [thread:$0]  %s64_s28, 128, %s66_s2, [#allocation5]  }
  0x1f   :  { %s89_s25 = sshll.u32 %s15010_s3, 4  ;;  %s15648_s1 = sld [smem:[#allocation51_spill]]  ;;  %s90_s25 = int_to_ptr.vmem [resolvable:$true] %s89_s25 }
  0x20   :  { %s135_s27 = sshll.u32 %s15617_s9, 4  ;;  %s15011_s6 = smov [#allocation10]   ;;  %s136_s27 = int_to_ptr.hbm [resolvable:$true] %s135_s27 }
  0x21   :  { %s113_s24 = sshll.u32 %s15011_s6, 4  ;;  %s15012_s28 = smov [#allocation13]   ;;  %s114_s24 = int_to_ptr.vmem [resolvable:$true] %s113_s24 }
  0x22   :  { %s87_s30 = sshll.u32 %s15647_s7, 4  ;;  %s137_s2 = sshll.u32 %s15012_s28, 4  ;;  %s88_s30 = int_to_ptr.hbm [resolvable:$true] %s87_s30  ;;  %s138_s2 = int_to_ptr.vmem [resolvable:$true] %s137_s2 }
  0x23   :  { %92 = dma.hbm_to_vmem [thread:$0]  %s88_s30, 32, %s90_s25, [#allocation8]  }
  0x24   :  { %s159_s7 = sshll.u32 %s15619_s11, 4  ;;  %s183_s25 = sshll.u32 %s15621_s13, 4  ;;  %s160_s7 = int_to_ptr.hbm [resolvable:$true] %s159_s7  ;;  %s184_s25 = int_to_ptr.hbm [resolvable:$true] %s183_s25 }
  0x25   :  { %s111_s22 = sshll.u32 %s15648_s1, 4  ;;  %s15013_s8 = smov [#allocation16]   ;;  %s112_s22 = int_to_ptr.hbm [resolvable:$true] %s111_s22 }
  0x26   :  { %116 = dma.hbm_to_vmem [thread:$0]  %s112_s22, 16, %s114_s24, [#allocation11]  }
  0x27   :  { %140 = dma.hbm_to_vmem [thread:$0]  %s136_s27, 16, %s138_s2, [#allocation14]  }
  0x28   :  { %s161_s9 = sshll.u32 %s15013_s8, 4  ;;  %s15014_s4 = smov [#allocation19]   ;;  %s162_s9 = int_to_ptr.vmem [resolvable:$true] %s161_s9 }
  0x29   :  { %164 = dma.hbm_to_vmem [thread:$0]  %s160_s7, 32, %s162_s9, [#allocation17]  }
  0x2a   :  { %s185_s22 = sshll.u32 %s15014_s4, 4  ;;  %s207_s5 = sshll.u32 %s15623_s15, 4  ;;  %s186_s22 = int_to_ptr.vmem [resolvable:$true] %s185_s22  ;;  %s208_s5 = int_to_ptr.hbm [resolvable:$true] %s207_s5 }
  0x2b   :  { %188 = dma.hbm_to_vmem [thread:$0]  %s184_s25, 16, %s186_s22, [#allocation20]  }
  0x2c   :  { %s231_s27 = sshll.u32 %s15625_s17, 4  ;;  %s15015_s6 = smov [#allocation22]   ;;  %s232_s27 = int_to_ptr.hbm [resolvable:$true] %s231_s27 }
  0x2d   :  { %s209_s13 = sshll.u32 %s15015_s6, 4  ;;  %s15016_s28 = smov [#allocation25]   ;;  %s210_s13 = int_to_ptr.vmem [resolvable:$true] %s209_s13 }
  0x2e   :  { %212 = dma.hbm_to_vmem [thread:$0]  %s208_s5, 16, %s210_s13, [#allocation23]  }
  0x2f   :  { %s233_s2 = sshll.u32 %s15016_s28, 4  ;;  %s255_s7 = sshll.u32 %s15627_s19, 4  ;;  %s234_s2 = int_to_ptr.vmem [resolvable:$true] %s233_s2  ;;  %s256_s7 = int_to_ptr.hbm [resolvable:$true] %s255_s7 }
  0x30   :  { %236 = dma.hbm_to_vmem [thread:$0]  %s232_s27, 32, %s234_s2, [#allocation26]  }
  0x31   :  { %s15649_s30 = sld [smem:[#allocation46_spill]]  ;;  %s15017_s8 = smov [#allocation28]  }
  0x32   :  { %s257_s17 = sshll.u32 %s15017_s8, 4  ;;  %s15018_s9 = smov [#allocation2]   ;;  %s258_s17 = int_to_ptr.vmem [resolvable:$true] %s257_s17 }
  0x33   :  { %260 = dma.hbm_to_vmem [thread:$0]  %s256_s7, 128, %s258_s17, [#allocation29]  }
  0x34   :  { %s51_s4 = sshll.u32 %s15018_s9, 4  ;;  %s15019_s22 = smov 512   ;;  %s52_s4 = int_to_ptr.vmem [resolvable:$true] %s51_s4 }
  0x35   :  { %s15020_s24 = smov 32   ;;  %s15650_s5 = sld [smem:[#allocation48_spill]] }
  0x36   :  { %s15021_s26 = smov [#allocation6]   ;;  %s15651_s28 = sld [smem:[#allocation50_spill]] }
  0x37   :  { %s49_s25 = sshll.u32 %s15649_s30, 4  ;;  %s75_s27 = sshll.u32 %s15021_s26, 4  ;;  %s50_s25 = int_to_ptr.hbm [resolvable:$true] %s49_s25  ;;  %s76_s27 = int_to_ptr.vmem [resolvable:$true] %s75_s27 }
  0x38   :  { %57 = dma.hbm_to_vmem [thread:$0]  %s50_s25, 49152, %s52_s4, [#allocation3], %s15019_s22, %s15019_s22, %s15020_s24  }
  0x39   :  { %s15022_s29 = smov 128   ;;  %s15023_s0 = smov 8  }
  0x3a   :  { %s15024_s7 = smov [#allocation9]   ;;  %s15025_s3 = smov 64  }
  0x3b   :  { %s73_s11 = sshll.u32 %s15650_s5, 4  ;;  %s99_s15 = sshll.u32 %s15024_s7, 4  ;;  %s74_s11 = int_to_ptr.hbm [resolvable:$true] %s73_s11  ;;  %s100_s15 = int_to_ptr.vmem [resolvable:$true] %s99_s15 }
  0x3c   :  { %s97_s2 = sshll.u32 %s15651_s28, 4  ;;  %s15026_s30 = smov 4   ;;  %s98_s2 = int_to_ptr.hbm [resolvable:$true] %s97_s2 }
  0x3d   :  { %81 = dma.hbm_to_vmem [thread:$0]  %s74_s11, 16384, %s76_s27, [#allocation5], %s15022_s29, %s15022_s29, %s15023_s0  }
  0x3e   :  { %105 = dma.hbm_to_vmem [thread:$0]  %s98_s2, 2048, %s100_s15, [#allocation8], %s15025_s3, %s15025_s3, %s15026_s30  }
  0x3f   :  { %s15652_s17 = sld [smem:[#allocation52_spill]]  ;;  %s15027_s4 = smov [#allocation12]  }
  0x40   :  { %s123_s19 = sshll.u32 %s15027_s4, 4  ;;  %s145_s11 = sshll.u32 %s15618_s10, 4  ;;  %s124_s19 = int_to_ptr.vmem [resolvable:$true] %s123_s19  ;;  %s146_s11 = int_to_ptr.hbm [resolvable:$true] %s145_s11 }
  0x41   :  { %s15028_s26 = smov [#allocation15]   ;;  %s169_s28 = sshll.u32 %s15620_s12, 4  ;;  %s170_s28 = int_to_ptr.hbm [resolvable:$true] %s169_s28 }
  0x42   :  { %s147_s27 = sshll.u32 %s15028_s26, 4  ;;  %s193_s10 = sshll.u32 %s15622_s14, 4  ;;  %s148_s27 = int_to_ptr.vmem [resolvable:$true] %s147_s27  ;;  %s194_s10 = int_to_ptr.hbm [resolvable:$true] %s193_s10 }
  0x43   :  { %153 = dma.hbm_to_vmem [thread:$0]  %s146_s11, 2048, %s148_s27, [#allocation14], %s15022_s29, %s15022_s29, %s15023_s0  }
  0x44   :  { %s15029_s15 = smov [#allocation18]   ;;  %s15030_s8 = smov [#allocation21]  }
  0x45   :  { %s121_s9 = sshll.u32 %s15652_s17, 4  ;;  %s171_s25 = sshll.u32 %s15029_s15, 4  ;;  %s122_s9 = int_to_ptr.hbm [resolvable:$true] %s121_s9  ;;  %s172_s25 = int_to_ptr.vmem [resolvable:$true] %s171_s25 }
  0x46   :  { %129 = dma.hbm_to_vmem [thread:$0]  %s122_s9, 1024, %s124_s19, [#allocation11], %s15025_s3, %s15025_s3, %s15026_s30  }
  0x47   :  { %177 = dma.hbm_to_vmem [thread:$0]  %s170_s28, 1024, %s172_s25, [#allocation17], %s15025_s3, %s15025_s3, %s15026_s30  }
  0x48   :  { %s195_s12 = sshll.u32 %s15030_s8, 4  ;;  %s217_s4 = sshll.u32 %s15624_s16, 4  ;;  %s196_s12 = int_to_ptr.vmem [resolvable:$true] %s195_s12  ;;  %s218_s4 = int_to_ptr.hbm [resolvable:$true] %s217_s4 }
  0x49   :  { %201 = dma.hbm_to_vmem [thread:$0]  %s194_s10, 1024, %s196_s12, [#allocation20], %s15025_s3, %s15025_s3, %s15026_s30  }
  0x4a   :  { %s241_s1 = sshll.u32 %s15626_s18, 4  ;;  %s15031_s5 = smov [#allocation24]   ;;  %s242_s1 = int_to_ptr.hbm [resolvable:$true] %s241_s1 }
  0x4b   :  { %s219_s11 = sshll.u32 %s15031_s5, 4  ;;  %s15032_s26 = smov [#allocation27]   ;;  %s220_s11 = int_to_ptr.vmem [resolvable:$true] %s219_s11 }
  0x4c   :  { %225 = dma.hbm_to_vmem [thread:$0]  %s218_s4, 2048, %s220_s11, [#allocation23], %s15022_s29, %s15022_s29, %s15023_s0  }
  0x4d   :  { %s243_s16 = sshll.u32 %s15032_s26, 4  ;;  %s265_s13 = sshll.u32 %s15628_s20, 4  ;;  %s244_s16 = int_to_ptr.vmem [resolvable:$true] %s243_s16  ;;  %s266_s13 = int_to_ptr.hbm [resolvable:$true] %s265_s13 }
  0x4e   :  { %249 = dma.hbm_to_vmem [thread:$0]  %s242_s1, 16384, %s244_s16, [#allocation26], %s15019_s22, %s15019_s22, %s15020_s24  }
  0x4f   :  { %s15033_s18 = smov [#allocation30]   ;;  %s279_s2 = sshll.u32 %s15629_s21, 4  ;;  %s280_s2 = int_to_ptr.hbm [resolvable:$true] %s279_s2 }
  0x50   :  { %s267_s3 = sshll.u32 %s15033_s18, 4  ;;  %s15034_s29 = smov 384   ;;  %s268_s3 = int_to_ptr.vmem [resolvable:$true] %s267_s3 }
  0x51   :  { %s15035_s0 = smov 24   ;;  %s15036_s7 = smov [#allocation31]  }
  0x52   :  { %273 = dma.hbm_to_vmem [thread:$0]  %s266_s13, 49152, %s268_s3, [#allocation29], %s15034_s29, %s15034_s29, %s15035_s0  }
  0x53   :  { %s281_s10 = sshll.u32 %s15036_s7, 4  ;;  %s282_s10 = int_to_ptr.vmem [resolvable:$true] %s281_s10 }
  0x54   :  { %284 = dma.hbm_to_vmem [thread:$0]  %s280_s2, 96, %s282_s10, [#allocation32]  }
  0x55   :  { %14987 = dma.done.wait [#allocation3], 49152  }
  0x56   :  { %14988 = vsyncadd [#allocation3], 4294918144 }
  0x57   :  { %14989 = dma.done.wait [#allocation5], 16512  }
  0x58   :  { %14990 = vsyncadd [#allocation5], 4294950784 }
  0x59   :  { %14991 = dma.done.wait [#allocation8], 2080  }
  0x5a   :  { %14992 = vsyncadd [#allocation8], 4294965216 }
  0x5b   :  { %14993 = dma.done.wait [#allocation11], 1040  }
  0x5c   :  { %14994 = vsyncadd [#allocation11], 4294966256 }
  0x5d   :  { %14995 = dma.done.wait [#allocation14], 2064  }
  0x5e   :  { %14996 = vsyncadd [#allocation14], 4294965232 }
  0x5f   :  { %14997 = dma.done.wait [#allocation17], 1056  }
  0x60   :  { %14998 = vsyncadd [#allocation17], 4294966240 }
  0x61   :  { %14999 = dma.done.wait [#allocation20], 1040  }
  0x62   :  { %15000 = vsyncadd [#allocation20], 4294966256 }
  0x63   :  { %15001 = dma.done.wait [#allocation23], 2064  }
  0x64   :  { %15002 = vsyncadd [#allocation23], 4294965232 }
  0x65   :  { %15003 = dma.done.wait [#allocation26], 16416  }
  0x66   :  { %15004 = vsyncadd [#allocation26], 4294950880 }
  0x67   :  { %15005 = dma.done.wait [#allocation29], 49280  }
  0x68   :  { %15006 = vsyncadd [#allocation29], 4294918016 }
  0x69   :  { %15007 = dma.done.wait [#allocation32], 96  }
  0x6a   :  { %15008 = vsyncadd [#allocation32], 4294967200  ;;  %v9216_v0 = vld [vmem:[#allocation2 + $0x1c0] sm:$0xf]  ;;  %s15653_s22 = sld [smem:[#allocation44_spill]] }
  0x6b   :  { %v13434_v1 = vld [vmem:[#allocation2 + $0x1dc] sm:$0xf0]  ;;  %s15654_s16 = sld [smem:[#allocation45_spill]] }
  0x6c   :  { %v9472_v2 = vld [vmem:[#allocation2 + $0x3c0] sm:$0xf]  ;;  %v9217_v3 = vor.u32 %v13434_v1, %v9216_v0  ;;  %s15655_s13 = sld [smem:[#allocation54_spill]] }
  0x6d   :  { %v13498_v4 = vld [vmem:[#allocation2 + $0x3dc] sm:$0xf0]  ;;  %s15656_s3 = sld [smem:[#allocation53_spill]] }
  0x6e   :  { %v9728_v5 = vld [vmem:[#allocation2 + $0x5c0] sm:$0xf]  ;;  %v9473_v7 = vor.u32 %v13498_v4, %v9472_v2  ;;  %2699 = vmatpush.bf16.msra.mxu0 %v9217_v3 }
  0x6f   :  { %v13562_v6 = vld [vmem:[#allocation2 + $0x5dc] sm:$0xf0] }
  0x70   :  { %v9729_v8 = vor.u32 %v13562_v6, %v9728_v5  ;;  %v9984_v9 = vld [vmem:[#allocation2 + $0x7c0] sm:$0xf]  ;;  %2712 = vmatpush.bf16.msra.mxu1 %v9473_v7 }
  0x71   :  { %v13626_v10 = vld [vmem:[#allocation2 + $0x7dc] sm:$0xf0] }
  0x72   :  { %v9184_v11 = vld [vmem:[#allocation2 + $0x180] sm:$0xf]  ;;  %v9985_v12 = vor.u32 %v13626_v10, %v9984_v9  ;;  %2725 = vmatpush.bf16.msra.mxu2 %v9729_v8 }
  0x73   :  { %v13426_v13 = vld [vmem:[#allocation2 + $0x19c] sm:$0xf0] }
  0x74   :  { %v9440_v14 = vld [vmem:[#allocation2 + $0x380] sm:$0xf]  ;;  %v9185_v16 = vor.u32 %v13426_v13, %v9184_v11  ;;  %2738 = vmatpush.bf16.msra.mxu3 %v9985_v12 }
  0x75   :  { %v13490_v15 = vld [vmem:[#allocation2 + $0x39c] sm:$0xf0] }
  0x76   :  { %v9441_v17 = vor.u32 %v13490_v15, %v9440_v14  ;;  %v9696_v18 = vld [vmem:[#allocation2 + $0x580] sm:$0xf]  ;;  %2700 = vmatpush.bf16.msra.mxu0 %v9185_v16 }
  0x77   :  { %v13554_v19 = vld [vmem:[#allocation2 + $0x59c] sm:$0xf0] }
  0x78   :  { %v9952_v20 = vld [vmem:[#allocation2 + $0x780] sm:$0xf]  ;;  %v9697_v21 = vor.u32 %v13554_v19, %v9696_v18  ;;  %2713 = vmatpush.bf16.msra.mxu1 %v9441_v17 }
  0x79   :  { %v13618_v22 = vld [vmem:[#allocation2 + $0x79c] sm:$0xf0] }
  0x7a   :  { %v9152_v23 = vld [vmem:[#allocation2 + $0x140] sm:$0xf]  ;;  %v9953_v25 = vor.u32 %v13618_v22, %v9952_v20  ;;  %2726 = vmatpush.bf16.msra.mxu2 %v9697_v21 }
  0x7b   :  { %v13418_v24 = vld [vmem:[#allocation2 + $0x15c] sm:$0xf0] }
  0x7c   :  { %v9408_v26 = vld [vmem:[#allocation2 + $0x340] sm:$0xf]  ;;  %v9153_v29 = vor.u32 %v13418_v24, %v9152_v23  ;;  %2739 = vmatpush.bf16.msra.mxu3 %v9953_v25 }
  0x7d   :  { %v13482_v27 = vld [vmem:[#allocation2 + $0x35c] sm:$0xf0] }
  0x7e   :  { %v9664_v28 = vld [vmem:[#allocation2 + $0x540] sm:$0xf]  ;;  %v9409_v33 = vor.u32 %v13482_v27, %v9408_v26  ;;  %2701 = vmatpush.bf16.msra.mxu0 %v9153_v29 }
  0x7f   :  { %v13546_v30 = vld [vmem:[#allocation2 + $0x55c] sm:$0xf0] }
  0x80   :  { %v9920_v31 = vld [vmem:[#allocation2 + $0x740] sm:$0xf]  ;;  %v9665_v34 = vor.u32 %v13546_v30, %v9664_v28  ;;  %2714 = vmatpush.bf16.msra.mxu1 %v9409_v33  ;;  %v13430_v33 = vld [vmem:[#allocation2 + $0x1c4] sm:$0xf] }
  0x81   :  { %v13610_v32 = vld [vmem:[#allocation2 + $0x75c] sm:$0xf0] }
  0x82   :  { %v9120_v35 = vld [vmem:[#allocation2 + $0x100] sm:$0xf]  ;;  %v9921_v38 = vor.u32 %v13610_v32, %v9920_v31  ;;  %2727 = vmatpush.bf16.msra.mxu2 %v9665_v34  ;;  %v9218_v34 = vld [vmem:[#allocation2 + $0x1e0] sm:$0xf0] }
  0x83   :  { %v13410_v36 = vld [vmem:[#allocation2 + $0x11c] sm:$0xf0] }
  0x84   :  { %v9376_v37 = vld [vmem:[#allocation2 + $0x300] sm:$0xf]  ;;  %v9121_v44 = vor.u32 %v13410_v36, %v9120_v35  ;;  %2740 = vmatpush.bf16.msra.mxu3 %v9921_v38  ;;  %v9474_v38 = vld [vmem:[#allocation2 + $0x3e0] sm:$0xf0] }
  0x85   :  { %v13474_v39 = vld [vmem:[#allocation2 + $0x31c] sm:$0xf0] }
  0x86   :  { %v9632_v40 = vld [vmem:[#allocation2 + $0x500] sm:$0xf]  ;;  %v9377_v45 = vor.u32 %v13474_v39, %v9376_v37  ;;  %2702 = vmatpush.bf16.msra.mxu0 %v9121_v44  ;;  %v13494_v37 = vld [vmem:[#allocation2 + $0x3c4] sm:$0xf] }
  0x87   :  { %v13538_v41 = vld [vmem:[#allocation2 + $0x51c] sm:$0xf0] }
  0x88   :  { %v9888_v42 = vld [vmem:[#allocation2 + $0x700] sm:$0xf]  ;;  %v9633_v46 = vor.u32 %v13538_v41, %v9632_v40  ;;  %2715 = vmatpush.bf16.msra.mxu1 %v9377_v45 }
  0x89   :  { %v13602_v43 = vld [vmem:[#allocation2 + $0x71c] sm:$0xf0] }
  0x8a   :  { %v9088_v47 = vld [vmem:[#allocation2 + $0xc0] sm:$0xf]  ;;  %v9889_v50 = vor.u32 %v13602_v43, %v9888_v42  ;;  %2728 = vmatpush.bf16.msra.mxu2 %v9633_v46  ;;  %v9221_v42 = vor.u32 %v13430_v33, %v9218_v34  ;;  %v9477_v46 = vor.u32 %v13494_v37, %v9474_v38 }
  0x8b   :  { %v13402_v48 = vld [vmem:[#allocation2 + $0xdc] sm:$0xf0] }
  0x8c   :  { %v9344_v49 = vld [vmem:[#allocation2 + $0x2c0] sm:$0xf]  ;;  %v9089_v56 = vor.u32 %v13402_v48, %v9088_v47  ;;  %2741 = vmatpush.bf16.msra.mxu3 %v9889_v50  ;;  %v13422_v48 = vld [vmem:[#allocation2 + $0x184] sm:$0xf] }
  0x8d   :  { %v13466_v51 = vld [vmem:[#allocation2 + $0x2dc] sm:$0xf0]  ;;  %v13486_v50 = vld [vmem:[#allocation2 + $0x384] sm:$0xf] }
  0x8e   :  { %v9600_v52 = vld [vmem:[#allocation2 + $0x4c0] sm:$0xf]  ;;  %v9345_v57 = vor.u32 %v13466_v51, %v9344_v49  ;;  %2703 = vmatpush.bf16.msra.mxu0 %v9089_v56  ;;  %v9186_v49 = vld [vmem:[#allocation2 + $0x1a0] sm:$0xf0] }
  0x8f   :  { %v13530_v53 = vld [vmem:[#allocation2 + $0x4dc] sm:$0xf0]  ;;  %v9442_v51 = vld [vmem:[#allocation2 + $0x3a0] sm:$0xf0] }
  0x90   :  { %v9856_v54 = vld [vmem:[#allocation2 + $0x6c0] sm:$0xf]  ;;  %v9601_v58 = vor.u32 %v13530_v53, %v9600_v52  ;;  %2716 = vmatpush.bf16.msra.mxu1 %v9345_v57 }
  0x91   :  { %v13594_v55 = vld [vmem:[#allocation2 + $0x6dc] sm:$0xf0] }
  0x92   :  { %v9056_v59 = vld [vmem:[#allocation2 + $0x80] sm:$0xf]  ;;  %v9857_v62 = vor.u32 %v13594_v55, %v9856_v54  ;;  %2729 = vmatpush.bf16.msra.mxu2 %v9601_v58  ;;  %v9189_v55 = vor.u32 %v13422_v48, %v9186_v49 }
  0x93   :  { %v13394_v60 = vld [vmem:[#allocation2 + $0x9c] sm:$0xf0] }
  0x94   :  { %v9312_v61 = vld [vmem:[#allocation2 + $0x280] sm:$0xf]  ;;  %v9057_v4 = vor.u32 %v13394_v60, %v9056_v59  ;;  %2742 = vmatpush.bf16.msra.mxu3 %v9857_v62  ;;  %v9445_v59 = vor.u32 %v13486_v50, %v9442_v51  ;;  %v13414_v60 = vld [vmem:[#allocation2 + $0x144] sm:$0xf] }
  0x95   :  { %v13458_v63 = vld [vmem:[#allocation2 + $0x29c] sm:$0xf0]  ;;  %v13478_v62 = vld [vmem:[#allocation2 + $0x344] sm:$0xf] }
  0x96   :  { %v9568_v0 = vld [vmem:[#allocation2 + $0x480] sm:$0xf]  ;;  %v9313_v5 = vor.u32 %v13458_v63, %v9312_v61  ;;  %2704 = vmatpush.bf16.msra.mxu0 %v9057_v4  ;;  %v9154_v61 = vld [vmem:[#allocation2 + $0x160] sm:$0xf0] }
  0x97   :  { %v13522_v1 = vld [vmem:[#allocation2 + $0x49c] sm:$0xf0]  ;;  %v9410_v63 = vld [vmem:[#allocation2 + $0x360] sm:$0xf0] }
  0x98   :  { %v9824_v2 = vld [vmem:[#allocation2 + $0x680] sm:$0xf]  ;;  %v9569_v6 = vor.u32 %v13522_v1, %v9568_v0  ;;  %2717 = vmatpush.bf16.msra.mxu1 %v9313_v5  ;;  %v9157_v5 = vor.u32 %v13414_v60, %v9154_v61 }
  0x99   :  { %v13586_v3 = vld [vmem:[#allocation2 + $0x69c] sm:$0xf0] }
  0x9a   :  { %v9024_v7 = vld [vmem:[#allocation2 + $0x40] sm:$0xf]  ;;  %v9825_v10 = vor.u32 %v13586_v3, %v9824_v2  ;;  %2730 = vmatpush.bf16.msra.mxu2 %v9569_v6  ;;  %v367_v3 = vld [vmem:[%s15653_s22 + $0x10] sm:$0xff] }
  0x9b   :  { %v13386_v8 = vld [vmem:[#allocation2 + $0x5c] sm:$0xf0] }
  0x9c   :  { %v9280_v9 = vld [vmem:[#allocation2 + $0x240] sm:$0xf]  ;;  %v9025_v16 = vor.u32 %v13386_v8, %v9024_v7  ;;  %2743 = vmatpush.bf16.msra.mxu3 %v9825_v10  ;;  %v15255_v8 = vpack.c.bf16 %v367_v3, %v367_v3  ;;  %v368_v10 = vld [vmem:[%s15653_s22 + $0x18] sm:$0xff]  ;;  %v9250_v3 = vld [vmem:[#allocation2 + $0x220] sm:$0xf0] }
  0x9d   :  { %v13450_v11 = vld [vmem:[#allocation2 + $0x25c] sm:$0xf0] }
  0x9e   :  { %v9536_v12 = vld [vmem:[#allocation2 + $0x440] sm:$0xf]  ;;  %v9281_v19 = vor.u32 %v13450_v11, %v9280_v9  ;;  %2705 = vmatpush.bf16.msra.mxu0 %v9025_v16  ;;  %v9413_v11 = vor.u32 %v13478_v62, %v9410_v63  ;;  %v13470_v16 = vld [vmem:[#allocation2 + $0x304] sm:$0xf] }
  0x9f   :  { %v13514_v13 = vld [vmem:[#allocation2 + $0x45c] sm:$0xf0]  ;;  %v13374_v63 = vld [vmem:[#allocation2 + $0x4] sm:$0xf] }
  0xa0   :  { %v9792_v14 = vld [vmem:[#allocation2 + $0x640] sm:$0xf]  ;;  %v9537_v20 = vor.u32 %v13514_v13, %v9536_v12  ;;  %2718 = vmatpush.bf16.msra.mxu1 %v9281_v19  ;;  %v13406_v13 = vld [vmem:[#allocation2 + $0x104] sm:$0xf]  ;;  %v366_v19 = vld [vmem:[%s15653_s22 + $0x8] sm:$0xff] }
  0xa1   :  { %v13578_v15 = vld [vmem:[#allocation2 + $0x65c] sm:$0xf0] }
  0xa2   :  { %v8992_v17 = vld [vmem:[#allocation2] sm:$0xf]  ;;  %v9793_v24 = vor.u32 %v13578_v15, %v9792_v14  ;;  %2731 = vmatpush.bf16.msra.mxu2 %v9537_v20  ;;  %v9122_v14 = vld [vmem:[#allocation2 + $0x120] sm:$0xf0]  ;;  %v15262_v15 = vpack.c.bf16 %v368_v10, %v368_v10 }
  0xa3   :  { %v13378_v18 = vld [vmem:[#allocation2 + $0x1c] sm:$0xf0]  ;;  %v9986_v10 = vld [vmem:[#allocation2 + $0x7e0] sm:$0xf0] }
  0xa4   :  { %v9248_v21 = vld [vmem:[#allocation2 + $0x200] sm:$0xf]  ;;  %v8993_v31 = vor.u32 %v13378_v18, %v8992_v17  ;;  %2744 = vmatpush.bf16.msra.mxu3 %v9793_v24  ;;  %v9378_v17 = vld [vmem:[#allocation2 + $0x320] sm:$0xf0] }
  0xa5   :  { %v13442_v22 = vld [vmem:[#allocation2 + $0x21c] sm:$0xf0] }
  0xa6   :  { %v9504_v23 = vld [vmem:[#allocation2 + $0x400] sm:$0xf]  ;;  %v9249_v35 = vor.u32 %v13442_v22, %v9248_v21  ;;  %2706 = vmatpush.bf16.msra.mxu0 %v8993_v31  ;;  %v9125_v21 = vor.u32 %v13406_v13, %v9122_v14  ;;  %v9346_v31 = vld [vmem:[#allocation2 + $0x2e0] sm:$0xf0] }
  0xa7   :  { %v13506_v25 = vld [vmem:[#allocation2 + $0x41c] sm:$0xf0] }
  0xa8   :  { %v9760_v26 = vld [vmem:[#allocation2 + $0x600] sm:$0xf]  ;;  %v9505_v36 = vor.u32 %v13506_v25, %v9504_v23  ;;  %2719 = vmatpush.bf16.msra.mxu1 %v9249_v35  ;;  %v15270_v25 = vpack.c.bf16 %v366_v19, %v366_v19 }
  0xa9   :  { %v13570_v27 = vld [vmem:[#allocation2 + $0x61c] sm:$0xf0] }
  0xaa   :  { %v10240_v28 = vld [vmem:[#allocation2 + $0x9c0] sm:$0xf]  ;;  %v9761_v39 = vor.u32 %v13570_v27, %v9760_v26  ;;  %2732 = vmatpush.bf16.msra.mxu2 %v9505_v36  ;;  %v9381_v26 = vor.u32 %v13470_v16, %v9378_v17  ;;  %v13750_v16 = vld [vmem:[#allocation2 + $0xbc4] sm:$0xf] }
  0xab   :  { %v13690_v29 = vld [vmem:[#allocation2 + $0x9dc] sm:$0xf0]  ;;  %2720 = vmatmul.bf16.vlgmr.msra.gmra.mxu1 %v15270_v25  ;;  %v10498_v17 = vld [vmem:[#allocation2 + $0xbe0] sm:$0xf0] }
  0xac   :  { %v10496_v30 = vld [vmem:[#allocation2 + $0xbc0] sm:$0xf]  ;;  %v10241_v40 = vor.u32 %v13690_v29, %v10240_v28  ;;  %2745 = vmatpush.bf16.msra.mxu3 %v9761_v39  ;;  %v13398_v28 = vld [vmem:[#allocation2 + $0xc4] sm:$0xf] }
  0xad   :  { %v13754_v32 = vld [vmem:[#allocation2 + $0xbdc] sm:$0xf0]  ;;  %2733 = vmatmul.bf16.vlgmr.msra.gmra.mxu2 %v15255_v8  ;;  %v9090_v29 = vld [vmem:[#allocation2 + $0xe0] sm:$0xf0] }
  0xae   :  { %v10497_v41 = vor.u32 %v13754_v32, %v10496_v30  ;;  %v10208_v43 = vld [vmem:[#allocation2 + $0x980] sm:$0xf]  ;;  %2751 = vmatpush.bf16.msrb.mxu0 %v10241_v40  ;;  %2777 = vmatpush.bf16.msrb.mxu2 %v9221_v42  ;;  %v13462_v30 = vld [vmem:[#allocation2 + $0x2c4] sm:$0xf]  ;;  %v9093_v34 = vor.u32 %v13398_v28, %v9090_v29  ;;  %v10501_v28 = vor.u32 %v13750_v16, %v10498_v17 }
  0xaf   :  { %v13682_v44 = vld [vmem:[#allocation2 + $0x99c] sm:$0xf0]  ;;  %2746 = vmatmul.bf16.vlgmr.msra.gmra.mxu3 %v15262_v15  ;;  %v9349_v38 = vor.u32 %v13462_v30, %v9346_v31  ;;  %v13390_v40 = vld [vmem:[#allocation2 + $0x84] sm:$0xf] }
  0xb0   :  { %v10464_v45 = vld [vmem:[#allocation2 + $0xb80] sm:$0xf]  ;;  %v10209_v52 = vor.u32 %v13682_v44, %v10208_v43  ;;  %2764 = vmatpush.bf16.msrb.mxu1 %v10497_v41  ;;  %2790 = vmatpush.bf16.msrb.mxu3 %v9477_v46  ;;  %v9058_v41 = vld [vmem:[#allocation2 + $0xa0] sm:$0xf0] }
  0xb1   :  { %v13746_v47 = vld [vmem:[#allocation2 + $0xb9c] sm:$0xf0]  ;;  %v13454_v42 = vld [vmem:[#allocation2 + $0x284] sm:$0xf]  ;;  %v9061_v46 = vor.u32 %v13390_v40, %v9058_v41 }
  0xb2   :  { %v10176_v53 = vld [vmem:[#allocation2 + $0x940] sm:$0xf]  ;;  %v10465_v54 = vor.u32 %v13746_v47, %v10464_v45  ;;  %2752 = vmatpush.bf16.msrb.mxu0 %v10209_v52  ;;  %2778 = vmatpush.bf16.msrb.mxu2 %v9189_v55  ;;  %v9314_v43 = vld [vmem:[#allocation2 + $0x2a0] sm:$0xf0] }
  0xb3   :  { %v13674_v56 = vld [vmem:[#allocation2 + $0x95c] sm:$0xf0]  ;;  %v9317_v50 = vor.u32 %v13454_v42, %v9314_v43  ;;  %v13382_v52 = vld [vmem:[#allocation2 + $0x44] sm:$0xf] }
  0xb4   :  { %v10432_v57 = vld [vmem:[#allocation2 + $0xb40] sm:$0xf]  ;;  %v10177_v0 = vor.u32 %v13674_v56, %v10176_v53  ;;  %2765 = vmatpush.bf16.msrb.mxu1 %v10465_v54  ;;  %2791 = vmatpush.bf16.msrb.mxu3 %v9445_v59  ;;  %v9026_v53 = vld [vmem:[#allocation2 + $0x60] sm:$0xf0] }
  0xb5   :  { %v13738_v58 = vld [vmem:[#allocation2 + $0xb5c] sm:$0xf0]  ;;  %v13446_v54 = vld [vmem:[#allocation2 + $0x244] sm:$0xf]  ;;  %v9029_v60 = vor.u32 %v13382_v52, %v9026_v53 }
  0xb6   :  { %v10433_v1 = vor.u32 %v13738_v58, %v10432_v57  ;;  %v10144_v2 = vld [vmem:[#allocation2 + $0x900] sm:$0xf]  ;;  %2753 = vmatpush.bf16.msrb.mxu0 %v10177_v0  ;;  %2779 = vmatpush.bf16.msrb.mxu2 %v9157_v5  ;;  %v9282_v55 = vld [vmem:[#allocation2 + $0x260] sm:$0xf0] }
  0xb7   :  { %v365_v4 = vld [vmem:[%s15653_s22] sm:$0xff]  ;;  %v9285_v0 = vor.u32 %v13446_v54, %v9282_v55 }
  0xb8   :  { %v13666_v6 = vld [vmem:[#allocation2 + $0x91c] sm:$0xf0]  ;;  %v15257_v9 = vpack.c.bf16 %v365_v4, %v365_v4  ;;  %2766 = vmatpush.bf16.msrb.mxu1 %v10433_v1  ;;  %2792 = vmatpush.bf16.msrb.mxu3 %v9413_v11  ;;  %v8994_v1 = vld [vmem:[#allocation2 + $0x20] sm:$0xf0] }
  0xb9   :  { %v10400_v7 = vld [vmem:[#allocation2 + $0xb00] sm:$0xf]  ;;  %v10145_v18 = vor.u32 %v13666_v6, %v10144_v2  ;;  %v13438_v2 = vld [vmem:[#allocation2 + $0x204] sm:$0xf]  ;;  %v8997_v14 = vor.u32 %v13374_v63, %v8994_v1 }
  0xba   :  { %v13730_v12 = vld [vmem:[#allocation2 + $0xb1c] sm:$0xf0]  ;;  %2707 = vmatmul.bf16.vlgmr.msra.gmra.mxu0 %v15257_v9  ;;  %2780 = vmatpush.bf16.msrb.mxu2 %v9125_v21  ;;  %v13558_v4 = vld [vmem:[#allocation2 + $0x5c4] sm:$0xf]  ;;  %v9253_v19 = vor.u32 %v13438_v2, %v9250_v3  ;;  %v370_v21 = vld [vmem:[%s15653_s22 + $0x28] sm:$0xff] }
  0xbb   :  { %v10401_v20 = vor.u32 %v13730_v12, %v10400_v7  ;;  %v10112_v22 = vld [vmem:[#allocation2 + $0x8c0] sm:$0xf]  ;;  %2754 = vmatpush.bf16.msrb.mxu0 %v10145_v18  ;;  %v9730_v5 = vld [vmem:[#allocation2 + $0x5e0] sm:$0xf0] }
  0xbc   :  { %v13658_v23 = vld [vmem:[#allocation2 + $0x8dc] sm:$0xf0]  ;;  %2793 = vmatpush.bf16.msrb.mxu3 %v9381_v26  ;;  %v13622_v6 = vld [vmem:[#allocation2 + $0x7c4] sm:$0xf] }
  0xbd   :  { %v10368_v24 = vld [vmem:[#allocation2 + $0xac0] sm:$0xf]  ;;  %v10113_v32 = vor.u32 %v13658_v23, %v10112_v22  ;;  %2767 = vmatpush.bf16.msrb.mxu1 %v10401_v20  ;;  %v13686_v11 = vld [vmem:[#allocation2 + $0x9c4] sm:$0xf]  ;;  %v9733_v20 = vor.u32 %v13558_v4, %v9730_v5  ;;  %v9989_v22 = vor.u32 %v13622_v6, %v9986_v10 }
  0xbe   :  { %v13722_v27 = vld [vmem:[#allocation2 + $0xadc] sm:$0xf0]  ;;  %2781 = vmatpush.bf16.msrb.mxu2 %v9093_v34  ;;  %v10242_v12 = vld [vmem:[#allocation2 + $0x9e0] sm:$0xf0] }
  0xbf   :  { %v10369_v33 = vor.u32 %v13722_v27, %v10368_v24  ;;  %v10080_v35 = vld [vmem:[#allocation2 + $0x880] sm:$0xf]  ;;  %2755 = vmatpush.bf16.msrb.mxu0 %v10113_v32  ;;  %v10245_v23 = vor.u32 %v13686_v11, %v10242_v12  ;;  %v13550_v24 = vld [vmem:[#allocation2 + $0x584] sm:$0xf] }
  0xc0   :  { %v13650_v36 = vld [vmem:[#allocation2 + $0x89c] sm:$0xf0]  ;;  %2794 = vmatpush.bf16.msrb.mxu3 %v9349_v38  ;;  %v9698_v26 = vld [vmem:[#allocation2 + $0x5a0] sm:$0xf0] }
  0xc1   :  { %v10336_v37 = vld [vmem:[#allocation2 + $0xa80] sm:$0xf]  ;;  %v10081_v44 = vor.u32 %v13650_v36, %v10080_v35  ;;  %2768 = vmatpush.bf16.msrb.mxu1 %v10369_v33  ;;  %v13614_v27 = vld [vmem:[#allocation2 + $0x784] sm:$0xf]  ;;  %v15281_v35 = vpack.c.bf16 %v370_v21, %v370_v21  ;;  %v9701_v36 = vor.u32 %v13550_v24, %v9698_v26 }
  0xc2   :  { %v13714_v39 = vld [vmem:[#allocation2 + $0xa9c] sm:$0xf0]  ;;  %2782 = vmatpush.bf16.msrb.mxu2 %v9061_v46  ;;  %v9954_v29 = vld [vmem:[#allocation2 + $0x7a0] sm:$0xf0] }
  0xc3   :  { %v10337_v45 = vor.u32 %v13714_v39, %v10336_v37  ;;  %v10048_v47 = vld [vmem:[#allocation2 + $0x840] sm:$0xf]  ;;  %2756 = vmatpush.bf16.msrb.mxu0 %v10081_v44  ;;  %v13678_v30 = vld [vmem:[#allocation2 + $0x984] sm:$0xf]  ;;  %v9957_v37 = vor.u32 %v13614_v27, %v9954_v29 }
  0xc4   :  { %v13642_v48 = vld [vmem:[#allocation2 + $0x85c] sm:$0xf0]  ;;  %2795 = vmatpush.bf16.msrb.mxu3 %v9317_v50  ;;  %v10210_v31 = vld [vmem:[#allocation2 + $0x9a0] sm:$0xf0] }
  0xc5   :  { %v10304_v49 = vld [vmem:[#allocation2 + $0xa40] sm:$0xf]  ;;  %v10049_v56 = vor.u32 %v13642_v48, %v10048_v47  ;;  %2769 = vmatpush.bf16.msrb.mxu1 %v10337_v45  ;;  %v13742_v33 = vld [vmem:[#allocation2 + $0xb84] sm:$0xf]  ;;  %v10213_v38 = vor.u32 %v13678_v30, %v10210_v31 }
  0xc6   :  { %v13706_v51 = vld [vmem:[#allocation2 + $0xa5c] sm:$0xf0]  ;;  %2783 = vmatpush.bf16.msrb.mxu2 %v9029_v60  ;;  %v10466_v34 = vld [vmem:[#allocation2 + $0xba0] sm:$0xf0] }
  0xc7   :  { %v10016_v57 = vld [vmem:[#allocation2 + $0x800] sm:$0xf]  ;;  %v10305_v59 = vor.u32 %v13706_v51, %v10304_v49  ;;  %2757 = vmatpush.bf16.msrb.mxu0 %v10049_v56  ;;  %v13542_v39 = vld [vmem:[#allocation2 + $0x544] sm:$0xf]  ;;  %v10469_v42 = vor.u32 %v13742_v33, %v10466_v34 }
  0xc8   :  { %v13634_v58 = vld [vmem:[#allocation2 + $0x81c] sm:$0xf0]  ;;  %2796 = vmatpush.bf16.msrb.mxu3 %v9285_v0  ;;  %v9666_v40 = vld [vmem:[#allocation2 + $0x560] sm:$0xf0] }
  0xc9   :  { %v10272_v61 = vld [vmem:[#allocation2 + $0xa00] sm:$0xf]  ;;  %v10017_v7 = vor.u32 %v13634_v58, %v10016_v57  ;;  %2770 = vmatpush.bf16.msrb.mxu1 %v10305_v59  ;;  %v13606_v41 = vld [vmem:[#allocation2 + $0x744] sm:$0xf]  ;;  %v9669_v48 = vor.u32 %v13542_v39, %v9666_v40 }
  0xca   :  { %v13698_v62 = vld [vmem:[#allocation2 + $0xa1c] sm:$0xf0]  ;;  %2784 = vmatpush.bf16.msrb.mxu2 %v8997_v14  ;;  %v9922_v43 = vld [vmem:[#allocation2 + $0x760] sm:$0xf0] }
  0xcb   :  { %v10273_v13 = vor.u32 %v13698_v62, %v10272_v61  ;;  %v369_v18 = vld [vmem:[%s15653_s22 + $0x20] sm:$0xff]  ;;  %2758 = vmatpush.bf16.msrb.mxu0 %v10017_v7  ;;  %v9925_v49 = vor.u32 %v13606_v41, %v9922_v43 }
  0xcc   :  { %v15279_v32 = vpack.c.bf16 %v369_v18, %v369_v18  ;;  %2797 = vmatpush.bf16.msrb.mxu3 %v9253_v19  ;;  %v13670_v44 = vld [vmem:[#allocation2 + $0x944] sm:$0xf] }
  0xcd   :  { %2771 = vmatpush.bf16.msrb.mxu1 %v10273_v13  ;;  %v10178_v45 = vld [vmem:[#allocation2 + $0x960] sm:$0xf0]  ;;  %2785 = vmatmul.bf16.vlgmr.msrb.gmra.mxu2 %v15257_v9 }
  0xce   :  { %2829 = vmatpush.bf16.msra.mxu2 %v10245_v23  ;;  %2759 = vmatmul.bf16.vlgmr.msrb.gmra.mxu0 %v15279_v32  ;;  %v13734_v46 = vld [vmem:[#allocation2 + $0xb44] sm:$0xf]  ;;  %v10181_v50 = vor.u32 %v13670_v44, %v10178_v45 }
  0xcf   :  { %2803 = vmatpush.bf16.msra.mxu0 %v9733_v20  ;;  %v10434_v47 = vld [vmem:[#allocation2 + $0xb60] sm:$0xf0]  ;;  %2798 = vmatmul.bf16.vlgmr.msrb.gmra.mxu3 %v15270_v25 }
  0xd0   :  { %2842 = vmatpush.bf16.msra.mxu3 %v10501_v28  ;;  %2772 = vmatmul.bf16.vlgmr.msrb.gmra.mxu1 %v15281_v35  ;;  %v13534_v51 = vld [vmem:[#allocation2 + $0x504] sm:$0xf]  ;;  %v10437_v54 = vor.u32 %v13734_v46, %v10434_v47 }
  0xd1   :  { %2816 = vmatpush.bf16.msra.mxu1 %v9989_v22  ;;  %v9634_v52 = vld [vmem:[#allocation2 + $0x520] sm:$0xf0] }
  0xd2   :  { %2830 = vmatpush.bf16.msra.mxu2 %v10213_v38  ;;  %v13598_v53 = vld [vmem:[#allocation2 + $0x704] sm:$0xf]  ;;  %v9637_v60 = vor.u32 %v13534_v51, %v9634_v52  ;;  %v13435_v51 = vld [vmem:[#allocation2 + $0x1e4] sm:$0xf0] }
  0xd3   :  { %2804 = vmatpush.bf16.msra.mxu0 %v9701_v36  ;;  %v9890_v55 = vld [vmem:[#allocation2 + $0x720] sm:$0xf0]  ;;  %v9480_v52 = vld [vmem:[#allocation2 + $0x3c8] sm:$0xf] }
  0xd4   :  { %2843 = vmatpush.bf16.msra.mxu3 %v10469_v42  ;;  %v13662_v56 = vld [vmem:[#allocation2 + $0x904] sm:$0xf]  ;;  %v9893_v61 = vor.u32 %v13598_v53, %v9890_v55  ;;  %v9736_v55 = vld [vmem:[#allocation2 + $0x5c8] sm:$0xf] }
  0xd5   :  { %2817 = vmatpush.bf16.msra.mxu1 %v9957_v37  ;;  %v10146_v57 = vld [vmem:[#allocation2 + $0x920] sm:$0xf0] }
  0xd6   :  { %v13726_v58 = vld [vmem:[#allocation2 + $0xb04] sm:$0xf]  ;;  %2831 = vmatpush.bf16.msra.mxu2 %v10181_v50  ;;  %v10149_v62 = vor.u32 %v13662_v56, %v10146_v57  ;;  %v9224_v50 = vld [vmem:[#allocation2 + $0x1c8] sm:$0xf] }
  0xd7   :  { %v10402_v59 = vld [vmem:[#allocation2 + $0xb20] sm:$0xf0]  ;;  %2805 = vmatpush.bf16.msra.mxu0 %v9669_v48  ;;  %v13563_v56 = vld [vmem:[#allocation2 + $0x5e4] sm:$0xf0] }
  0xd8   :  { %v13526_v63 = vld [vmem:[#allocation2 + $0x4c4] sm:$0xf]  ;;  %2844 = vmatpush.bf16.msra.mxu3 %v10437_v54  ;;  %v10405_v2 = vor.u32 %v13726_v58, %v10402_v59  ;;  %v13499_v54 = vld [vmem:[#allocation2 + $0x3e4] sm:$0xf0] }
  0xd9   :  { %2818 = vmatpush.bf16.msra.mxu1 %v9925_v49  ;;  %v9602_v0 = vld [vmem:[#allocation2 + $0x4e0] sm:$0xf0]  ;;  %v9992_v59 = vld [vmem:[#allocation2 + $0x7c8] sm:$0xf] }
  0xda   :  { %v13590_v1 = vld [vmem:[#allocation2 + $0x6c4] sm:$0xf]  ;;  %v9605_v10 = vor.u32 %v13526_v63, %v9602_v0  ;;  %2832 = vmatpush.bf16.msra.mxu2 %v10149_v62  ;;  %v9225_v62 = vor.u32 %v13435_v51, %v9224_v50  ;;  %v9481_v63 = vor.u32 %v13499_v54, %v9480_v52  ;;  %v9737_v0 = vor.u32 %v13563_v56, %v9736_v55  ;;  %v9864_v50 = vld [vmem:[#allocation2 + $0x6c8] sm:$0xf] }
  0xdb   :  { %v9858_v3 = vld [vmem:[#allocation2 + $0x6e0] sm:$0xf0]  ;;  %2806 = vmatpush.bf16.msra.mxu0 %v9637_v60  ;;  %v13627_v60 = vld [vmem:[#allocation2 + $0x7e4] sm:$0xf0] }
  0xdc   :  { %v13654_v4 = vld [vmem:[#allocation2 + $0x8c4] sm:$0xf]  ;;  %v9861_v11 = vor.u32 %v13590_v1, %v9858_v3  ;;  %2845 = vmatpush.bf16.msra.mxu3 %v10405_v2  ;;  %v9192_v1 = vld [vmem:[#allocation2 + $0x188] sm:$0xf] }
  0xdd   :  { %v10114_v5 = vld [vmem:[#allocation2 + $0x8e0] sm:$0xf0]  ;;  %2819 = vmatpush.bf16.msra.mxu1 %v9893_v61  ;;  %v13427_v2 = vld [vmem:[#allocation2 + $0x1a4] sm:$0xf0] }
  0xde   :  { %v13718_v6 = vld [vmem:[#allocation2 + $0xac4] sm:$0xf]  ;;  %v10117_v12 = vor.u32 %v13654_v4, %v10114_v5  ;;  %v9448_v3 = vld [vmem:[#allocation2 + $0x388] sm:$0xf]  ;;  %v9993_v4 = vor.u32 %v13627_v60, %v9992_v59 }
  0xdf   :  { %v10370_v7 = vld [vmem:[#allocation2 + $0xae0] sm:$0xf0]  ;;  %2807 = vmatpush.bf16.msra.mxu0 %v9605_v10  ;;  %v13491_v5 = vld [vmem:[#allocation2 + $0x3a4] sm:$0xf0] }
  0xe0   :  { %v13518_v13 = vld [vmem:[#allocation2 + $0x484] sm:$0xf]  ;;  %v10373_v17 = vor.u32 %v13718_v6, %v10370_v7  ;;  %2833 = vmatpush.bf16.msra.mxu2 %v10117_v12  ;;  %v9704_v6 = vld [vmem:[#allocation2 + $0x588] sm:$0xf]  ;;  %v9193_v12 = vor.u32 %v13427_v2, %v9192_v1 }
  0xe1   :  { %v9570_v14 = vld [vmem:[#allocation2 + $0x4a0] sm:$0xf0]  ;;  %2820 = vmatpush.bf16.msra.mxu1 %v9861_v11  ;;  %v13555_v7 = vld [vmem:[#allocation2 + $0x5a4] sm:$0xf0] }
  0xe2   :  { %v13582_v16 = vld [vmem:[#allocation2 + $0x684] sm:$0xf]  ;;  %v9573_v23 = vor.u32 %v13518_v13, %v9570_v14  ;;  %2846 = vmatpush.bf16.msra.mxu3 %v10373_v17  ;;  %v9960_v10 = vld [vmem:[#allocation2 + $0x788] sm:$0xf]  ;;  %v9449_v13 = vor.u32 %v13491_v5, %v9448_v3  ;;  %v9705_v14 = vor.u32 %v13555_v7, %v9704_v6 }
  0xe3   :  { %v9826_v18 = vld [vmem:[#allocation2 + $0x6a0] sm:$0xf0]  ;;  %v13619_v11 = vld [vmem:[#allocation2 + $0x7a4] sm:$0xf0] }
  0xe4   :  { %v13646_v19 = vld [vmem:[#allocation2 + $0x884] sm:$0xf]  ;;  %v9829_v27 = vor.u32 %v13582_v16, %v9826_v18  ;;  %2808 = vmatpush.bf16.msra.mxu0 %v9573_v23  ;;  %v9160_v16 = vld [vmem:[#allocation2 + $0x148] sm:$0xf] }
  0xe5   :  { %v10082_v20 = vld [vmem:[#allocation2 + $0x8a0] sm:$0xf0]  ;;  %v13419_v17 = vld [vmem:[#allocation2 + $0x164] sm:$0xf0] }
  0xe6   :  { %v13710_v21 = vld [vmem:[#allocation2 + $0xa84] sm:$0xf]  ;;  %v10085_v28 = vor.u32 %v13646_v19, %v10082_v20  ;;  %2821 = vmatpush.bf16.msra.mxu1 %v9829_v27  ;;  %v9416_v18 = vld [vmem:[#allocation2 + $0x348] sm:$0xf]  ;;  %v9961_v19 = vor.u32 %v13619_v11, %v9960_v10 }
  0xe7   :  { %v10338_v22 = vld [vmem:[#allocation2 + $0xaa0] sm:$0xf0]  ;;  %v13483_v20 = vld [vmem:[#allocation2 + $0x364] sm:$0xf0] }
  0xe8   :  { %v13510_v24 = vld [vmem:[#allocation2 + $0x444] sm:$0xf]  ;;  %v10341_v33 = vor.u32 %v13710_v21, %v10338_v22  ;;  %2834 = vmatpush.bf16.msra.mxu2 %v10085_v28  ;;  %v9672_v21 = vld [vmem:[#allocation2 + $0x548] sm:$0xf]  ;;  %v9417_v27 = vor.u32 %v13483_v20, %v9416_v18 }
  0xe9   :  { %v9538_v26 = vld [vmem:[#allocation2 + $0x460] sm:$0xf0]  ;;  %v13547_v22 = vld [vmem:[#allocation2 + $0x564] sm:$0xf0] }
  0xea   :  { %v13574_v29 = vld [vmem:[#allocation2 + $0x644] sm:$0xf]  ;;  %v9541_v38 = vor.u32 %v13510_v24, %v9538_v26  ;;  %2847 = vmatpush.bf16.msra.mxu3 %v10341_v33  ;;  %v9928_v23 = vld [vmem:[#allocation2 + $0x748] sm:$0xf]  ;;  %v9161_v26 = vor.u32 %v13419_v17, %v9160_v16  ;;  %v9673_v28 = vor.u32 %v13547_v22, %v9672_v21 }
  0xeb   :  { %v9794_v30 = vld [vmem:[#allocation2 + $0x660] sm:$0xf0]  ;;  %v13611_v24 = vld [vmem:[#allocation2 + $0x764] sm:$0xf0] }
  0xec   :  { %v13638_v31 = vld [vmem:[#allocation2 + $0x844] sm:$0xf]  ;;  %v9797_v41 = vor.u32 %v13574_v29, %v9794_v30  ;;  %2809 = vmatpush.bf16.msra.mxu0 %v9541_v38  ;;  %v9128_v29 = vld [vmem:[#allocation2 + $0x108] sm:$0xf]  ;;  %v9929_v33 = vor.u32 %v13611_v24, %v9928_v23 }
  0xed   :  { %v10050_v34 = vld [vmem:[#allocation2 + $0x860] sm:$0xf0]  ;;  %v13411_v30 = vld [vmem:[#allocation2 + $0x124] sm:$0xf0] }
  0xee   :  { %v13702_v36 = vld [vmem:[#allocation2 + $0xa44] sm:$0xf]  ;;  %v10053_v42 = vor.u32 %v13638_v31, %v10050_v34  ;;  %2822 = vmatpush.bf16.msra.mxu1 %v9797_v41  ;;  %v9384_v31 = vld [vmem:[#allocation2 + $0x308] sm:$0xf] }
  0xef   :  { %v10306_v37 = vld [vmem:[#allocation2 + $0xa60] sm:$0xf0]  ;;  %v13475_v34 = vld [vmem:[#allocation2 + $0x324] sm:$0xf0] }
  0xf0   :  { %v13502_v39 = vld [vmem:[#allocation2 + $0x404] sm:$0xf]  ;;  %v10309_v46 = vor.u32 %v13702_v36, %v10306_v37  ;;  %2835 = vmatpush.bf16.msra.mxu2 %v10053_v42  ;;  %v9640_v36 = vld [vmem:[#allocation2 + $0x508] sm:$0xf]  ;;  %v9385_v41 = vor.u32 %v13475_v34, %v9384_v31  ;;  %v13431_v34 = vld [vmem:[#allocation2 + $0x1cc] sm:$0xf] }
  0xf1   :  { %v9506_v40 = vld [vmem:[#allocation2 + $0x420] sm:$0xf0]  ;;  %v13539_v37 = vld [vmem:[#allocation2 + $0x524] sm:$0xf0] }
  0xf2   :  { %v13566_v43 = vld [vmem:[#allocation2 + $0x604] sm:$0xf]  ;;  %v9509_v53 = vor.u32 %v13502_v39, %v9506_v40  ;;  %2848 = vmatpush.bf16.msra.mxu3 %v10309_v46  ;;  %v9896_v38 = vld [vmem:[#allocation2 + $0x708] sm:$0xf]  ;;  %v9129_v40 = vor.u32 %v13411_v30, %v9128_v29  ;;  %v9641_v42 = vor.u32 %v13539_v37, %v9640_v36  ;;  %v9226_v36 = vld [vmem:[#allocation2 + $0x1e8] sm:$0xf0] }
  0xf3   :  { %v9762_v44 = vld [vmem:[#allocation2 + $0x620] sm:$0xf0]  ;;  %v13603_v39 = vld [vmem:[#allocation2 + $0x724] sm:$0xf0] }
  0xf4   :  { %v13630_v45 = vld [vmem:[#allocation2 + $0x804] sm:$0xf]  ;;  %v9765_v57 = vor.u32 %v13566_v43, %v9762_v44  ;;  %2810 = vmatpush.bf16.msra.mxu0 %v9509_v53  ;;  %v9096_v43 = vld [vmem:[#allocation2 + $0xc8] sm:$0xf]  ;;  %v9897_v46 = vor.u32 %v13603_v39, %v9896_v38  ;;  %v13495_v39 = vld [vmem:[#allocation2 + $0x3cc] sm:$0xf] }
  0xf5   :  { %v10018_v47 = vld [vmem:[#allocation2 + $0x820] sm:$0xf0]  ;;  %v13403_v44 = vld [vmem:[#allocation2 + $0xe4] sm:$0xf0] }
  0xf6   :  { %v13694_v48 = vld [vmem:[#allocation2 + $0xa04] sm:$0xf]  ;;  %v10021_v58 = vor.u32 %v13630_v45, %v10018_v47  ;;  %2823 = vmatpush.bf16.msra.mxu1 %v9765_v57  ;;  %v9352_v45 = vld [vmem:[#allocation2 + $0x2c8] sm:$0xf]  ;;  %v9097_v52 = vor.u32 %v13403_v44, %v9096_v43  ;;  %v9229_v44 = vor.u32 %v13431_v34, %v9226_v36 }
  0xf7   :  { %v10274_v49 = vld [vmem:[#allocation2 + $0xa20] sm:$0xf0]  ;;  %2811 = vmatmul.bf16.vlgmr.msra.gmra.mxu0 %v15255_v8  ;;  %v13467_v47 = vld [vmem:[#allocation2 + $0x2e4] sm:$0xf0] }
  0xf8   :  { %v10277_v61 = vor.u32 %v13694_v48, %v10274_v49  ;;  %2836 = vmatpush.bf16.msra.mxu2 %v10021_v58  ;;  %2855 = vmatpush.bf16.msrb.mxu0 %v9225_v62  ;;  %v9608_v48 = vld [vmem:[#allocation2 + $0x4c8] sm:$0xf]  ;;  %v9353_v53 = vor.u32 %v13467_v47, %v9352_v45 }
  0xf9   :  { %2824 = vmatmul.bf16.vlgmr.msra.gmra.mxu1 %v15262_v15  ;;  %v13531_v49 = vld [vmem:[#allocation2 + $0x4e4] sm:$0xf0] }
  0xfa   :  { %2849 = vmatpush.bf16.msra.mxu3 %v10277_v61  ;;  %2868 = vmatpush.bf16.msrb.mxu1 %v9481_v63  ;;  %v13595_v51 = vld [vmem:[#allocation2 + $0x6e4] sm:$0xf0]  ;;  %v9609_v54 = vor.u32 %v13531_v49, %v9608_v48 }
  0xfb   :  { %2837 = vmatmul.bf16.vlgmr.msra.gmra.mxu2 %v15279_v32  ;;  %v9064_v55 = vld [vmem:[#allocation2 + $0x88] sm:$0xf]  ;;  %v9865_v58 = vor.u32 %v13595_v51, %v9864_v50  ;;  %v13423_v50 = vld [vmem:[#allocation2 + $0x18c] sm:$0xf] }
  0xfc   :  { %2881 = vmatpush.bf16.msrb.mxu2 %v9737_v0  ;;  %2856 = vmatpush.bf16.msrb.mxu0 %v9193_v12  ;;  %v13395_v56 = vld [vmem:[#allocation2 + $0xa4] sm:$0xf0]  ;;  %v9194_v51 = vld [vmem:[#allocation2 + $0x1a8] sm:$0xf0] }
  0xfd   :  { %2850 = vmatmul.bf16.vlgmr.msra.gmra.mxu3 %v15281_v35  ;;  %v9320_v57 = vld [vmem:[#allocation2 + $0x288] sm:$0xf]  ;;  %v9065_v0 = vor.u32 %v13395_v56, %v9064_v55  ;;  %v9197_v56 = vor.u32 %v13423_v50, %v9194_v51 }
  0xfe   :  { %2894 = vmatpush.bf16.msrb.mxu3 %v9993_v4  ;;  %2869 = vmatpush.bf16.msrb.mxu1 %v9449_v13  ;;  %v13459_v59 = vld [vmem:[#allocation2 + $0x2a4] sm:$0xf0] }
  0xff   :  { %v9576_v60 = vld [vmem:[#allocation2 + $0x488] sm:$0xf]  ;;  %v9321_v1 = vor.u32 %v13459_v59, %v9320_v57 }
 0x100   :  { %2882 = vmatpush.bf16.msrb.mxu2 %v9705_v14  ;;  %2857 = vmatpush.bf16.msrb.mxu0 %v9161_v26  ;;  %v13523_v61 = vld [vmem:[#allocation2 + $0x4a4] sm:$0xf0] }
 0x101   :  { %v9832_v62 = vld [vmem:[#allocation2 + $0x688] sm:$0xf]  ;;  %v9577_v2 = vor.u32 %v13523_v61, %v9576_v60 }
 0x102   :  { %2895 = vmatpush.bf16.msrb.mxu3 %v9961_v19  ;;  %2870 = vmatpush.bf16.msrb.mxu1 %v9417_v27  ;;  %v13587_v63 = vld [vmem:[#allocation2 + $0x6a4] sm:$0xf0] }
 0x103   :  { %v9032_v3 = vld [vmem:[#allocation2 + $0x48] sm:$0xf]  ;;  %v9833_v6 = vor.u32 %v13587_v63, %v9832_v62  ;;  %v13415_v62 = vld [vmem:[#allocation2 + $0x14c] sm:$0xf] }
 0x104   :  { %2883 = vmatpush.bf16.msrb.mxu2 %v9673_v28  ;;  %2858 = vmatpush.bf16.msrb.mxu0 %v9129_v40  ;;  %v13387_v4 = vld [vmem:[#allocation2 + $0x64] sm:$0xf0]  ;;  %v9482_v40 = vld [vmem:[#allocation2 + $0x3e8] sm:$0xf0] }
 0x105   :  { %v9288_v5 = vld [vmem:[#allocation2 + $0x248] sm:$0xf]  ;;  %v9033_v14 = vor.u32 %v13387_v4, %v9032_v3  ;;  %v9485_v48 = vor.u32 %v13495_v39, %v9482_v40  ;;  %v9162_v63 = vld [vmem:[#allocation2 + $0x168] sm:$0xf0] }
 0x106   :  { %2896 = vmatpush.bf16.msrb.mxu3 %v9929_v33  ;;  %2871 = vmatpush.bf16.msrb.mxu1 %v9385_v41  ;;  %v13451_v7 = vld [vmem:[#allocation2 + $0x264] sm:$0xf0]  ;;  %v9165_v4 = vor.u32 %v13415_v62, %v9162_v63  ;;  %v13391_v40 = vld [vmem:[#allocation2 + $0x8c] sm:$0xf] }
 0x107   :  { %v9544_v10 = vld [vmem:[#allocation2 + $0x448] sm:$0xf]  ;;  %v9289_v18 = vor.u32 %v13451_v7, %v9288_v5  ;;  %v13375_v63 = vld [vmem:[#allocation2 + $0xc] sm:$0xf] }
 0x108   :  { %2884 = vmatpush.bf16.msrb.mxu2 %v9641_v42  ;;  %2859 = vmatpush.bf16.msrb.mxu0 %v9097_v52  ;;  %v13515_v11 = vld [vmem:[#allocation2 + $0x464] sm:$0xf0]  ;;  %v13487_v52 = vld [vmem:[#allocation2 + $0x38c] sm:$0xf] }
 0x109   :  { %v9800_v12 = vld [vmem:[#allocation2 + $0x648] sm:$0xf]  ;;  %v9545_v19 = vor.u32 %v13515_v11, %v9544_v10 }
 0x10a   :  { %2897 = vmatpush.bf16.msrb.mxu3 %v9897_v46  ;;  %2872 = vmatpush.bf16.msrb.mxu1 %v9353_v53  ;;  %v13579_v13 = vld [vmem:[#allocation2 + $0x664] sm:$0xf0]  ;;  %v9450_v53 = vld [vmem:[#allocation2 + $0x3a8] sm:$0xf0] }
 0x10b   :  { %v9000_v16 = vld [vmem:[#allocation2 + $0x8] sm:$0xf]  ;;  %v9801_v23 = vor.u32 %v13579_v13, %v9800_v12  ;;  %v9453_v60 = vor.u32 %v13487_v52, %v9450_v53  ;;  %v13407_v12 = vld [vmem:[#allocation2 + $0x10c] sm:$0xf] }
 0x10c   :  { %2885 = vmatpush.bf16.msrb.mxu2 %v9609_v54  ;;  %2860 = vmatpush.bf16.msrb.mxu0 %v9065_v0  ;;  %v13379_v17 = vld [vmem:[#allocation2 + $0x24] sm:$0xf0]  ;;  %v13479_v0 = vld [vmem:[#allocation2 + $0x34c] sm:$0xf] }
 0x10d   :  { %v9256_v20 = vld [vmem:[#allocation2 + $0x208] sm:$0xf]  ;;  %v9001_v31 = vor.u32 %v13379_v17, %v9000_v16  ;;  %v9130_v13 = vld [vmem:[#allocation2 + $0x128] sm:$0xf0] }
 0x10e   :  { %2898 = vmatpush.bf16.msrb.mxu3 %v9865_v58  ;;  %2873 = vmatpush.bf16.msrb.mxu1 %v9321_v1  ;;  %v13443_v21 = vld [vmem:[#allocation2 + $0x224] sm:$0xf0]  ;;  %v9418_v1 = vld [vmem:[#allocation2 + $0x368] sm:$0xf0] }
 0x10f   :  { %v9512_v22 = vld [vmem:[#allocation2 + $0x408] sm:$0xf]  ;;  %v9257_v37 = vor.u32 %v13443_v21, %v9256_v20  ;;  %v9421_v10 = vor.u32 %v13479_v0, %v9418_v1  ;;  %v9386_v16 = vld [vmem:[#allocation2 + $0x328] sm:$0xf0] }
 0x110   :  { %2886 = vmatpush.bf16.msrb.mxu2 %v9577_v2  ;;  %v13507_v24 = vld [vmem:[#allocation2 + $0x424] sm:$0xf0]  ;;  %2861 = vmatpush.bf16.msrb.mxu0 %v9033_v14  ;;  %v13471_v14 = vld [vmem:[#allocation2 + $0x30c] sm:$0xf] }
 0x111   :  { %v9768_v26 = vld [vmem:[#allocation2 + $0x608] sm:$0xf]  ;;  %v9513_v38 = vor.u32 %v13507_v24, %v9512_v22  ;;  %v13383_v52 = vld [vmem:[#allocation2 + $0x4c] sm:$0xf] }
 0x112   :  { %2899 = vmatpush.bf16.msrb.mxu3 %v9833_v6  ;;  %v13571_v27 = vld [vmem:[#allocation2 + $0x624] sm:$0xf0]  ;;  %2874 = vmatpush.bf16.msrb.mxu1 %v9289_v18  ;;  %v9034_v53 = vld [vmem:[#allocation2 + $0x68] sm:$0xf0] }
 0x113   :  { %v10248_v28 = vld [vmem:[#allocation2 + $0x9c8] sm:$0xf]  ;;  %v9769_v41 = vor.u32 %v13571_v27, %v9768_v26  ;;  %v13399_v26 = vld [vmem:[#allocation2 + $0xcc] sm:$0xf] }
 0x114   :  { %v13691_v29 = vld [vmem:[#allocation2 + $0x9e4] sm:$0xf0]  ;;  %2887 = vmatpush.bf16.msrb.mxu2 %v9545_v19  ;;  %2862 = vmatpush.bf16.msrb.mxu0 %v9001_v31  ;;  %v9133_v19 = vor.u32 %v13407_v12, %v9130_v13  ;;  %v9098_v27 = vld [vmem:[#allocation2 + $0xe8] sm:$0xf0] }
 0x115   :  { %v10504_v30 = vld [vmem:[#allocation2 + $0xbc8] sm:$0xf]  ;;  %v10249_v42 = vor.u32 %v13691_v29, %v10248_v28  ;;  %v13463_v28 = vld [vmem:[#allocation2 + $0x2cc] sm:$0xf] }
 0x116   :  { %v13755_v33 = vld [vmem:[#allocation2 + $0xbe4] sm:$0xf0]  ;;  %2900 = vmatpush.bf16.msrb.mxu3 %v9801_v23  ;;  %2875 = vmatpush.bf16.msrb.mxu1 %v9257_v37  ;;  %v9389_v23 = vor.u32 %v13471_v14, %v9386_v16  ;;  %v9354_v29 = vld [vmem:[#allocation2 + $0x2e8] sm:$0xf0] }
 0x117   :  { %v10505_v43 = vor.u32 %v13755_v33, %v10504_v30  ;;  %v10216_v45 = vld [vmem:[#allocation2 + $0x988] sm:$0xf]  ;;  %2863 = vmatmul.bf16.vlgmr.msrb.gmra.mxu0 %v15257_v9  ;;  %v9101_v33 = vor.u32 %v13399_v26, %v9098_v27  ;;  %v9002_v1 = vld [vmem:[#allocation2 + $0x28] sm:$0xf0] }
 0x118   :  { %v13683_v46 = vld [vmem:[#allocation2 + $0x9a4] sm:$0xf0]  ;;  %2888 = vmatpush.bf16.msrb.mxu2 %v9513_v38  ;;  %2907 = vmatpush.bf16.msra.mxu0 %v10249_v42  ;;  %v9357_v38 = vor.u32 %v13463_v28, %v9354_v29  ;;  %v13455_v42 = vld [vmem:[#allocation2 + $0x28c] sm:$0xf]  ;;  %v9005_v14 = vor.u32 %v13375_v63, %v9002_v1 }
 0x119   :  { %v10472_v47 = vld [vmem:[#allocation2 + $0xb88] sm:$0xf]  ;;  %v10217_v54 = vor.u32 %v13683_v46, %v10216_v45  ;;  %2876 = vmatmul.bf16.vlgmr.msrb.gmra.mxu1 %v15270_v25  ;;  %v10250_v12 = vld [vmem:[#allocation2 + $0x9e8] sm:$0xf0] }
 0x11a   :  { %v13747_v49 = vld [vmem:[#allocation2 + $0xba4] sm:$0xf0]  ;;  %2901 = vmatpush.bf16.msrb.mxu3 %v9769_v41  ;;  %2920 = vmatpush.bf16.msra.mxu1 %v10505_v43  ;;  %v9066_v41 = vld [vmem:[#allocation2 + $0xa8] sm:$0xf0] }
 0x11b   :  { %v10473_v55 = vor.u32 %v13747_v49, %v10472_v47  ;;  %v10184_v57 = vld [vmem:[#allocation2 + $0x948] sm:$0xf]  ;;  %2889 = vmatmul.bf16.vlgmr.msrb.gmra.mxu2 %v15255_v8  ;;  %v9322_v43 = vld [vmem:[#allocation2 + $0x2a8] sm:$0xf0]  ;;  %v9069_v46 = vor.u32 %v13391_v40, %v9066_v41 }
 0x11c   :  { %2933 = vmatpush.bf16.msra.mxu2 %v9229_v44  ;;  %v13675_v58 = vld [vmem:[#allocation2 + $0x964] sm:$0xf0]  ;;  %2908 = vmatpush.bf16.msra.mxu0 %v10217_v54  ;;  %v9325_v50 = vor.u32 %v13455_v42, %v9322_v43  ;;  %v13447_v54 = vld [vmem:[#allocation2 + $0x24c] sm:$0xf] }
 0x11d   :  { %v10440_v59 = vld [vmem:[#allocation2 + $0xb48] sm:$0xf]  ;;  %2902 = vmatmul.bf16.vlgmr.msrb.gmra.mxu3 %v15262_v15  ;;  %v10185_v2 = vor.u32 %v13675_v58, %v10184_v57  ;;  %v13751_v16 = vld [vmem:[#allocation2 + $0xbcc] sm:$0xf] }
 0x11e   :  { %2946 = vmatpush.bf16.msra.mxu3 %v9485_v48  ;;  %v13739_v61 = vld [vmem:[#allocation2 + $0xb64] sm:$0xf0]  ;;  %2921 = vmatpush.bf16.msra.mxu1 %v10473_v55  ;;  %v9290_v55 = vld [vmem:[#allocation2 + $0x268] sm:$0xf0] }
 0x11f   :  { %v10441_v3 = vor.u32 %v13739_v61, %v10440_v59  ;;  %v10152_v5 = vld [vmem:[#allocation2 + $0x908] sm:$0xf]  ;;  %v9293_v0 = vor.u32 %v13447_v54, %v9290_v55  ;;  %v9962_v27 = vld [vmem:[#allocation2 + $0x7a8] sm:$0xf0] }
 0x120   :  { %2934 = vmatpush.bf16.msra.mxu2 %v9197_v56  ;;  %v13667_v6 = vld [vmem:[#allocation2 + $0x924] sm:$0xf0]  ;;  %2909 = vmatpush.bf16.msra.mxu0 %v10185_v2  ;;  %v13439_v2 = vld [vmem:[#allocation2 + $0x20c] sm:$0xf] }
 0x121   :  { %v10408_v7 = vld [vmem:[#allocation2 + $0xb08] sm:$0xf]  ;;  %v10153_v17 = vor.u32 %v13667_v6, %v10152_v5  ;;  %v9738_v5 = vld [vmem:[#allocation2 + $0x5e8] sm:$0xf0] }
 0x122   :  { %2947 = vmatpush.bf16.msra.mxu3 %v9453_v60  ;;  %v13731_v11 = vld [vmem:[#allocation2 + $0xb24] sm:$0xf0]  ;;  %2922 = vmatpush.bf16.msra.mxu1 %v10441_v3  ;;  %v9037_v60 = vor.u32 %v13383_v52, %v9034_v53  ;;  %v9258_v3 = vld [vmem:[#allocation2 + $0x228] sm:$0xf0] }
 0x123   :  { %v10409_v18 = vor.u32 %v13731_v11, %v10408_v7  ;;  %v10120_v20 = vld [vmem:[#allocation2 + $0x8c8] sm:$0xf]  ;;  %v13623_v6 = vld [vmem:[#allocation2 + $0x7cc] sm:$0xf] }
 0x124   :  { %2935 = vmatpush.bf16.msra.mxu2 %v9165_v4  ;;  %v13659_v21 = vld [vmem:[#allocation2 + $0x8e4] sm:$0xf0]  ;;  %2910 = vmatpush.bf16.msra.mxu0 %v10153_v17  ;;  %v13559_v4 = vld [vmem:[#allocation2 + $0x5cc] sm:$0xf] }
 0x125   :  { %v10376_v22 = vld [vmem:[#allocation2 + $0xac8] sm:$0xf]  ;;  %v10121_v30 = vor.u32 %v13659_v21, %v10120_v20  ;;  %v13687_v11 = vld [vmem:[#allocation2 + $0x9cc] sm:$0xf] }
 0x126   :  { %2948 = vmatpush.bf16.msra.mxu3 %v9421_v10  ;;  %v13723_v24 = vld [vmem:[#allocation2 + $0xae4] sm:$0xf0]  ;;  %2923 = vmatpush.bf16.msra.mxu1 %v10409_v18  ;;  %v9994_v10 = vld [vmem:[#allocation2 + $0x7e8] sm:$0xf0]  ;;  %v9261_v18 = vor.u32 %v13439_v2, %v9258_v3  ;;  %v10253_v21 = vor.u32 %v13687_v11, %v10250_v12 }
 0x127   :  { %v10377_v31 = vor.u32 %v13723_v24, %v10376_v22  ;;  %v10088_v34 = vld [vmem:[#allocation2 + $0x888] sm:$0xf]  ;;  %v10506_v17 = vld [vmem:[#allocation2 + $0xbe8] sm:$0xf0]  ;;  %v9997_v20 = vor.u32 %v13623_v6, %v9994_v10 }
 0x128   :  { %2936 = vmatpush.bf16.msra.mxu2 %v9133_v19  ;;  %v13651_v36 = vld [vmem:[#allocation2 + $0x8a4] sm:$0xf0]  ;;  %2911 = vmatpush.bf16.msra.mxu0 %v10121_v30  ;;  %v9741_v19 = vor.u32 %v13559_v4, %v9738_v5  ;;  %v13551_v22 = vld [vmem:[#allocation2 + $0x58c] sm:$0xf]  ;;  %v10509_v26 = vor.u32 %v13751_v16, %v10506_v17 }
 0x129   :  { %v10344_v37 = vld [vmem:[#allocation2 + $0xa88] sm:$0xf]  ;;  %v10089_v44 = vor.u32 %v13651_v36, %v10088_v34  ;;  %v13615_v24 = vld [vmem:[#allocation2 + $0x78c] sm:$0xf] }
 0x12a   :  { %2949 = vmatpush.bf16.msra.mxu3 %v9389_v23  ;;  %v13715_v39 = vld [vmem:[#allocation2 + $0xaa4] sm:$0xf0]  ;;  %2924 = vmatpush.bf16.msra.mxu1 %v10377_v31  ;;  %v9706_v23 = vld [vmem:[#allocation2 + $0x5a8] sm:$0xf0]  ;;  %v9965_v34 = vor.u32 %v13615_v24, %v9962_v27  ;;  %v2721_v27 = vpop.f32.mrf.mxu1 }
 0x12b   :  { %v10345_v45 = vor.u32 %v13715_v39, %v10344_v37  ;;  %v10056_v47 = vld [vmem:[#allocation2 + $0x848] sm:$0xf]  ;;  %v13679_v28 = vld [vmem:[#allocation2 + $0x98c] sm:$0xf] }
 0x12c   :  { %2937 = vmatpush.bf16.msra.mxu2 %v9101_v33  ;;  %v13643_v48 = vld [vmem:[#allocation2 + $0x864] sm:$0xf0]  ;;  %2912 = vmatpush.bf16.msra.mxu0 %v10089_v44  ;;  %v10218_v29 = vld [vmem:[#allocation2 + $0x9a8] sm:$0xf0]  ;;  %v9709_v33 = vor.u32 %v13551_v22, %v9706_v23 }
 0x12d   :  { %v10312_v49 = vld [vmem:[#allocation2 + $0xa48] sm:$0xf]  ;;  %v10057_v56 = vor.u32 %v13643_v48, %v10056_v47  ;;  %v13743_v30 = vld [vmem:[#allocation2 + $0xb8c] sm:$0xf]  ;;  %v10221_v36 = vor.u32 %v13679_v28, %v10218_v29 }
 0x12e   :  { %2950 = vmatpush.bf16.msra.mxu3 %v9357_v38  ;;  %v13707_v51 = vld [vmem:[#allocation2 + $0xa64] sm:$0xf0]  ;;  %2925 = vmatpush.bf16.msra.mxu1 %v10345_v45  ;;  %v10474_v31 = vld [vmem:[#allocation2 + $0xba8] sm:$0xf0] }
 0x12f   :  { %v10024_v57 = vld [vmem:[#allocation2 + $0x808] sm:$0xf]  ;;  %v10313_v59 = vor.u32 %v13707_v51, %v10312_v49  ;;  %v13543_v37 = vld [vmem:[#allocation2 + $0x54c] sm:$0xf]  ;;  %v10477_v40 = vor.u32 %v13743_v30, %v10474_v31 }
 0x130   :  { %v13635_v58 = vld [vmem:[#allocation2 + $0x824] sm:$0xf0]  ;;  %2938 = vmatpush.bf16.msra.mxu2 %v9069_v46  ;;  %2913 = vmatpush.bf16.msra.mxu0 %v10057_v56  ;;  %v9674_v38 = vld [vmem:[#allocation2 + $0x568] sm:$0xf0]  ;;  %v15299_v56 = vld [vmem:[#allocation4] sm:$0xff] }
 0x131   :  { %v10280_v61 = vld [vmem:[#allocation2 + $0xa08] sm:$0xf]  ;;  %v10025_v7 = vor.u32 %v13635_v58, %v10024_v57  ;;  %v13607_v39 = vld [vmem:[#allocation2 + $0x74c] sm:$0xf]  ;;  %v9677_v46 = vor.u32 %v13543_v37, %v9674_v38  ;;  %v763_v1 = vperm.slane %v15299_v56, 0 }
 0x132   :  { %v13699_v62 = vld [vmem:[#allocation2 + $0xa24] sm:$0xf0]  ;;  %2951 = vmatpush.bf16.msra.mxu3 %v9325_v50  ;;  %2926 = vmatpush.bf16.msra.mxu1 %v10313_v59  ;;  %v9930_v41 = vld [vmem:[#allocation2 + $0x768] sm:$0xf0] }
 0x133   :  { %v10281_v13 = vor.u32 %v13699_v62, %v10280_v61  ;;  %v13671_v42 = vld [vmem:[#allocation2 + $0x94c] sm:$0xf]  ;;  %v9933_v48 = vor.u32 %v13607_v39, %v9930_v41 }
 0x134   :  { %2939 = vmatpush.bf16.msra.mxu2 %v9037_v60  ;;  %2914 = vmatpush.bf16.msra.mxu0 %v10025_v7  ;;  %v10186_v43 = vld [vmem:[#allocation2 + $0x968] sm:$0xf0] }
 0x135   :  { %v13735_v44 = vld [vmem:[#allocation2 + $0xb4c] sm:$0xf]  ;;  %v10189_v49 = vor.u32 %v13671_v42, %v10186_v43 }
 0x136   :  { %2952 = vmatpush.bf16.msra.mxu3 %v9293_v0  ;;  %2927 = vmatpush.bf16.msra.mxu1 %v10281_v13  ;;  %v10442_v45 = vld [vmem:[#allocation2 + $0xb68] sm:$0xf0] }
 0x137   :  { %2915 = vmatmul.bf16.vlgmr.msra.gmra.mxu0 %v15279_v32  ;;  %v13535_v47 = vld [vmem:[#allocation2 + $0x50c] sm:$0xf]  ;;  %v10445_v53 = vor.u32 %v13735_v44, %v10442_v45  ;;  %v2708_v11 = vpop.f32.mrf.mxu0  ;;  %v2747_v44 = vpop.f32.mrf.mxu3 }
 0x138   :  { %2940 = vmatpush.bf16.msra.mxu2 %v9005_v14  ;;  %2959 = vmatpush.bf16.msrb.mxu0 %v9741_v19  ;;  %v9642_v50 = vld [vmem:[#allocation2 + $0x528] sm:$0xf0] }
 0x139   :  { %2928 = vmatmul.bf16.vlgmr.msra.gmra.mxu1 %v15281_v35  ;;  %v13599_v51 = vld [vmem:[#allocation2 + $0x70c] sm:$0xf]  ;;  %v9645_v59 = vor.u32 %v13535_v47, %v9642_v50 }
 0x13a   :  { %2953 = vmatpush.bf16.msra.mxu3 %v9261_v18  ;;  %2972 = vmatpush.bf16.msrb.mxu1 %v9997_v20  ;;  %v9898_v52 = vld [vmem:[#allocation2 + $0x728] sm:$0xf0]  ;;  %v2709_v18 = vadd.f32 %v2708_v11, %v763_v1  ;;  %v9744_v1 = vld [vmem:[#allocation2 + $0x5d0] sm:$0xf] }
 0x13b   :  { %2941 = vmatmul.bf16.vlgmr.msra.gmra.mxu2 %v15257_v9  ;;  %v13663_v54 = vld [vmem:[#allocation2 + $0x90c] sm:$0xf]  ;;  %v9901_v61 = vor.u32 %v13599_v51, %v9898_v52 }
 0x13c   :  { %2985 = vmatpush.bf16.msrb.mxu2 %v10253_v21  ;;  %2960 = vmatpush.bf16.msrb.mxu0 %v9709_v33  ;;  %v10154_v55 = vld [vmem:[#allocation2 + $0x928] sm:$0xf0] }
 0x13d   :  { %2954 = vmatmul.bf16.vlgmr.msra.gmra.mxu3 %v15270_v25  ;;  %v13727_v57 = vld [vmem:[#allocation2 + $0xb0c] sm:$0xf]  ;;  %v10157_v62 = vor.u32 %v13663_v54, %v10154_v55 }
 0x13e   :  { %2998 = vmatpush.bf16.msrb.mxu3 %v10509_v26  ;;  %2973 = vmatpush.bf16.msrb.mxu1 %v9965_v34  ;;  %v10410_v58 = vld [vmem:[#allocation2 + $0xb28] sm:$0xf0]  ;;  %v2722_v34 = vadd.f32 %v2721_v27, %v2709_v18  ;;  %v9456_v18 = vld [vmem:[#allocation2 + $0x390] sm:$0xf] }
 0x13f   :  { %v13527_v60 = vld [vmem:[#allocation2 + $0x4cc] sm:$0xf]  ;;  %v10413_v2 = vor.u32 %v13727_v57, %v10410_v58 }
 0x140   :  { %2986 = vmatpush.bf16.msrb.mxu2 %v10221_v36  ;;  %2961 = vmatpush.bf16.msrb.mxu0 %v9677_v46  ;;  %v9610_v63 = vld [vmem:[#allocation2 + $0x4e8] sm:$0xf0] }
 0x141   :  { %v13591_v0 = vld [vmem:[#allocation2 + $0x6cc] sm:$0xf]  ;;  %v9613_v10 = vor.u32 %v13527_v60, %v9610_v63  ;;  %v9232_v60 = vld [vmem:[#allocation2 + $0x1d0] sm:$0xf] }
 0x142   :  { %2999 = vmatpush.bf16.msrb.mxu3 %v10477_v40  ;;  %2974 = vmatpush.bf16.msrb.mxu1 %v9933_v48  ;;  %v9866_v3 = vld [vmem:[#allocation2 + $0x6e8] sm:$0xf0]  ;;  %v2734_v40 = vpop.f32.mrf.mxu2  ;;  %v2710_v48 = vpop.f32.mrf.mxu0 }
 0x143   :  { %v13655_v4 = vld [vmem:[#allocation2 + $0x8cc] sm:$0xf]  ;;  %v9869_v12 = vor.u32 %v13591_v0, %v9866_v3  ;;  %v2735_v43 = vadd.f32 %v2734_v40, %v2722_v34  ;;  %v13500_v0 = vld [vmem:[#allocation2 + $0x3ec] sm:$0xf0]  ;;  %v2723_v3 = vpop.f32.mrf.mxu1 }
 0x144   :  { %2987 = vmatpush.bf16.msrb.mxu2 %v10189_v49  ;;  %v10122_v5 = vld [vmem:[#allocation2 + $0x8e8] sm:$0xf0]  ;;  %2962 = vmatpush.bf16.msrb.mxu0 %v9645_v59  ;;  %v13612_v40 = vld [vmem:[#allocation2 + $0x76c] sm:$0xf0] }
 0x145   :  { %v13719_v6 = vld [vmem:[#allocation2 + $0xacc] sm:$0xf]  ;;  %v10125_v13 = vor.u32 %v13655_v4, %v10122_v5  ;;  %v15302_v54 = vadd.f32 %v2747_v44, %v2735_v43  ;;  %v9136_v44 = vld [vmem:[#allocation2 + $0x110] sm:$0xf] }
 0x146   :  { %3000 = vmatpush.bf16.msrb.mxu3 %v10445_v53  ;;  %v10378_v7 = vld [vmem:[#allocation2 + $0xae8] sm:$0xf0]  ;;  %2975 = vmatpush.bf16.msrb.mxu1 %v9901_v61  ;;  %v13436_v61 = vld [vmem:[#allocation2 + $0x1ec] sm:$0xf0] }
 0x147   :  { %v13519_v14 = vld [vmem:[#allocation2 + $0x48c] sm:$0xf]  ;;  %v10381_v19 = vor.u32 %v13719_v6, %v10378_v7  ;;  %v10000_v6 = vld [vmem:[#allocation2 + $0x7d0] sm:$0xf]  ;;  %v9233_v11 = vor.u32 %v13436_v61, %v9232_v60 }
 0x148   :  { %2988 = vmatpush.bf16.msrb.mxu2 %v10157_v62  ;;  %v9578_v16 = vld [vmem:[#allocation2 + $0x4a8] sm:$0xf0]  ;;  %2963 = vmatpush.bf16.msrb.mxu0 %v9613_v10  ;;  %v9488_v62 = vld [vmem:[#allocation2 + $0x3d0] sm:$0xf] }
 0x149   :  { %v13583_v17 = vld [vmem:[#allocation2 + $0x68c] sm:$0xf]  ;;  %v9581_v26 = vor.u32 %v13519_v14, %v9578_v16  ;;  %v13628_v7 = vld [vmem:[#allocation2 + $0x7ec] sm:$0xf0] }
 0x14a   :  { %3001 = vmatpush.bf16.msrb.mxu3 %v10413_v2  ;;  %v9834_v20 = vld [vmem:[#allocation2 + $0x6a8] sm:$0xf0]  ;;  %2976 = vmatpush.bf16.msrb.mxu1 %v9869_v12  ;;  %v13564_v2 = vld [vmem:[#allocation2 + $0x5ec] sm:$0xf0]  ;;  %v2736_v12 = vpop.f32.mrf.mxu2 }
 0x14b   :  { %v13647_v21 = vld [vmem:[#allocation2 + $0x88c] sm:$0xf]  ;;  %v9837_v28 = vor.u32 %v13583_v17, %v9834_v20  ;;  %v9745_v14 = vor.u32 %v13564_v2, %v9744_v1  ;;  %v9200_v16 = vld [vmem:[#allocation2 + $0x190] sm:$0xf]  ;;  %v10001_v20 = vor.u32 %v13628_v7, %v10000_v6  ;;  %v764_v7 = vperm.slane %v15299_v56, 1 }
 0x14c   :  { %v10090_v22 = vld [vmem:[#allocation2 + $0x8a8] sm:$0xf0]  ;;  %2989 = vmatpush.bf16.msrb.mxu2 %v10125_v13  ;;  %2964 = vmatpush.bf16.msrb.mxu0 %v9581_v26  ;;  %v9489_v13 = vor.u32 %v13500_v0, %v9488_v62  ;;  %v13428_v17 = vld [vmem:[#allocation2 + $0x1ac] sm:$0xf0] }
 0x14d   :  { %v13711_v23 = vld [vmem:[#allocation2 + $0xa8c] sm:$0xf]  ;;  %v10093_v29 = vor.u32 %v13647_v21, %v10090_v22  ;;  %v13492_v21 = vld [vmem:[#allocation2 + $0x3ac] sm:$0xf0]  ;;  %v9201_v27 = vor.u32 %v13428_v17, %v9200_v16 }
 0x14e   :  { %v10346_v24 = vld [vmem:[#allocation2 + $0xaa8] sm:$0xf0]  ;;  %3002 = vmatpush.bf16.msrb.mxu3 %v10381_v19  ;;  %2977 = vmatpush.bf16.msrb.mxu1 %v9837_v28  ;;  %v2749_v19 = vpop.f32.mrf.mxu3  ;;  %v9712_v22 = vld [vmem:[#allocation2 + $0x590] sm:$0xf]  ;;  %v9457_v28 = vor.u32 %v13492_v21, %v9456_v18 }
 0x14f   :  { %v13511_v30 = vld [vmem:[#allocation2 + $0x44c] sm:$0xf]  ;;  %v10349_v36 = vor.u32 %v13711_v23, %v10346_v24  ;;  %v13556_v23 = vld [vmem:[#allocation2 + $0x5ac] sm:$0xf0] }
 0x150   :  { %v9546_v31 = vld [vmem:[#allocation2 + $0x468] sm:$0xf0]  ;;  %2990 = vmatpush.bf16.msrb.mxu2 %v10093_v29  ;;  %v9968_v24 = vld [vmem:[#allocation2 + $0x790] sm:$0xf]  ;;  %v9713_v29 = vor.u32 %v13556_v23, %v9712_v22 }
 0x151   :  { %v13575_v33 = vld [vmem:[#allocation2 + $0x64c] sm:$0xf]  ;;  %v9549_v45 = vor.u32 %v13511_v30, %v9546_v31  ;;  %v13620_v26 = vld [vmem:[#allocation2 + $0x7ac] sm:$0xf0] }
 0x152   :  { %v9802_v37 = vld [vmem:[#allocation2 + $0x668] sm:$0xf0]  ;;  %3003 = vmatpush.bf16.msrb.mxu3 %v10349_v36  ;;  %v9168_v30 = vld [vmem:[#allocation2 + $0x150] sm:$0xf]  ;;  %v9969_v34 = vor.u32 %v13620_v26, %v9968_v24 }
 0x153   :  { %v13639_v38 = vld [vmem:[#allocation2 + $0x84c] sm:$0xf]  ;;  %v9805_v49 = vor.u32 %v13575_v33, %v9802_v37  ;;  %2965 = vmatpush.bf16.msrb.mxu0 %v9549_v45  ;;  %v13420_v31 = vld [vmem:[#allocation2 + $0x16c] sm:$0xf0] }
 0x154   :  { %v10058_v39 = vld [vmem:[#allocation2 + $0x868] sm:$0xf0]  ;;  %v9424_v33 = vld [vmem:[#allocation2 + $0x350] sm:$0xf] }
 0x155   :  { %v13703_v41 = vld [vmem:[#allocation2 + $0xa4c] sm:$0xf]  ;;  %v10061_v50 = vor.u32 %v13639_v38, %v10058_v39  ;;  %2978 = vmatpush.bf16.msrb.mxu1 %v9805_v49  ;;  %v13484_v36 = vld [vmem:[#allocation2 + $0x36c] sm:$0xf0] }
 0x156   :  { %v10314_v42 = vld [vmem:[#allocation2 + $0xa68] sm:$0xf0]  ;;  %v9680_v37 = vld [vmem:[#allocation2 + $0x550] sm:$0xf]  ;;  %v2799_v24 = vpop.f32.mrf.mxu3 }
 0x157   :  { %v13503_v46 = vld [vmem:[#allocation2 + $0x40c] sm:$0xf]  ;;  %v10317_v55 = vor.u32 %v13703_v41, %v10314_v42  ;;  %2991 = vmatpush.bf16.msrb.mxu2 %v10061_v50  ;;  %v13548_v38 = vld [vmem:[#allocation2 + $0x56c] sm:$0xf0]  ;;  %v9169_v41 = vor.u32 %v13420_v31, %v9168_v30  ;;  %v9425_v42 = vor.u32 %v13484_v36, %v9424_v33 }
 0x158   :  { %v9514_v47 = vld [vmem:[#allocation2 + $0x428] sm:$0xf0]  ;;  %v9936_v39 = vld [vmem:[#allocation2 + $0x750] sm:$0xf]  ;;  %v9681_v43 = vor.u32 %v13548_v38, %v9680_v37 }
 0x159   :  { %v13567_v51 = vld [vmem:[#allocation2 + $0x60c] sm:$0xf]  ;;  %v9517_v63 = vor.u32 %v13503_v46, %v9514_v47  ;;  %3004 = vmatpush.bf16.msrb.mxu3 %v10317_v55  ;;  %v13412_v45 = vld [vmem:[#allocation2 + $0x12c] sm:$0xf0]  ;;  %v9937_v47 = vor.u32 %v13612_v40, %v9936_v39 }
 0x15a   :  { %v9770_v52 = vld [vmem:[#allocation2 + $0x628] sm:$0xf0]  ;;  %v9392_v46 = vld [vmem:[#allocation2 + $0x310] sm:$0xf]  ;;  %v9137_v55 = vor.u32 %v13412_v45, %v9136_v44 }
 0x15b   :  { %v13631_v53 = vld [vmem:[#allocation2 + $0x80c] sm:$0xf]  ;;  %v9773_v4 = vor.u32 %v13567_v51, %v9770_v52  ;;  %2966 = vmatpush.bf16.msrb.mxu0 %v9517_v63  ;;  %v13476_v48 = vld [vmem:[#allocation2 + $0x32c] sm:$0xf0] }
 0x15c   :  { %v10026_v57 = vld [vmem:[#allocation2 + $0x828] sm:$0xf0]  ;;  %v9648_v49 = vld [vmem:[#allocation2 + $0x510] sm:$0xf] }
 0x15d   :  { %v13695_v58 = vld [vmem:[#allocation2 + $0xa0c] sm:$0xf]  ;;  %v10029_v5 = vor.u32 %v13631_v53, %v10026_v57  ;;  %2979 = vmatpush.bf16.msrb.mxu1 %v9773_v4  ;;  %v13540_v50 = vld [vmem:[#allocation2 + $0x52c] sm:$0xf0]  ;;  %v2760_v53 = vpop.f32.mrf.mxu0 }
 0x15e   :  { %v10282_v59 = vld [vmem:[#allocation2 + $0xa28] sm:$0xf0]  ;;  %2967 = vmatmul.bf16.vlgmr.msrb.gmra.mxu0 %v15255_v8  ;;  %v9904_v51 = vld [vmem:[#allocation2 + $0x710] sm:$0xf]  ;;  %v2761_v57 = vadd.f32 %v2760_v53, %v15302_v54  ;;  %v9649_v60 = vor.u32 %v13540_v50, %v9648_v49 }
 0x15f   :  { %v10285_v10 = vor.u32 %v13695_v58, %v10282_v59  ;;  %2992 = vmatpush.bf16.msrb.mxu2 %v10029_v5  ;;  %3011 = vmatpush.bf16.msra.mxu0 %v9233_v11  ;;  %v13604_v52 = vld [vmem:[#allocation2 + $0x72c] sm:$0xf0]  ;;  %v2773_v58 = vpop.f32.mrf.mxu1  ;;  %v9393_v59 = vor.u32 %v13476_v48, %v9392_v46 }
 0x160   :  { %2980 = vmatmul.bf16.vlgmr.msrb.gmra.mxu1 %v15262_v15  ;;  %v9104_v61 = vld [vmem:[#allocation2 + $0xd0] sm:$0xf]  ;;  %v9905_v0 = vor.u32 %v13604_v52, %v9904_v51  ;;  %v15309_v4 = vadd.f32 %v2773_v58, %v2761_v57 }
 0x161   :  { %3005 = vmatpush.bf16.msrb.mxu3 %v10285_v10  ;;  %3024 = vmatpush.bf16.msra.mxu1 %v9489_v13  ;;  %v13404_v62 = vld [vmem:[#allocation2 + $0xec] sm:$0xf0] }
 0x162   :  { %2993 = vmatmul.bf16.vlgmr.msrb.gmra.mxu2 %v15279_v32  ;;  %v9360_v63 = vld [vmem:[#allocation2 + $0x2d0] sm:$0xf]  ;;  %v9105_v54 = vor.u32 %v13404_v62, %v9104_v61  ;;  %v2801_v61 = vpop.f32.mrf.mxu3 }
 0x163   :  { %3037 = vmatpush.bf16.msra.mxu2 %v9745_v14  ;;  %3012 = vmatpush.bf16.msra.mxu0 %v9201_v27  ;;  %v13468_v1 = vld [vmem:[#allocation2 + $0x2ec] sm:$0xf0] }
 0x164   :  { %3006 = vmatmul.bf16.vlgmr.msrb.gmra.mxu3 %v15281_v35  ;;  %v9616_v2 = vld [vmem:[#allocation2 + $0x4d0] sm:$0xf]  ;;  %v9361_v10 = vor.u32 %v13468_v1, %v9360_v63  ;;  %v9234_v1 = vld [vmem:[#allocation2 + $0x1f0] sm:$0xf0] }
 0x165   :  { %3050 = vmatpush.bf16.msra.mxu3 %v10001_v20  ;;  %3025 = vmatpush.bf16.msra.mxu1 %v9457_v28  ;;  %v13532_v3 = vld [vmem:[#allocation2 + $0x4ec] sm:$0xf0]  ;;  %v2786_v20 = vpop.f32.mrf.mxu2  ;;  %v2762_v26 = vpop.f32.mrf.mxu0 }
 0x166   :  { %v9872_v5 = vld [vmem:[#allocation2 + $0x6d0] sm:$0xf]  ;;  %v9617_v11 = vor.u32 %v13532_v3, %v9616_v2  ;;  %v2787_v23 = vadd.f32 %v2786_v20, %v764_v7  ;;  %v13488_v20 = vld [vmem:[#allocation2 + $0x394] sm:$0xf] }
 0x167   :  { %3038 = vmatpush.bf16.msra.mxu2 %v9713_v29  ;;  %3013 = vmatpush.bf16.msra.mxu0 %v9169_v41  ;;  %v13596_v6 = vld [vmem:[#allocation2 + $0x6ec] sm:$0xf0]  ;;  %v2775_v28 = vpop.f32.mrf.mxu1 }
 0x168   :  { %v9072_v12 = vld [vmem:[#allocation2 + $0x90] sm:$0xf]  ;;  %v9873_v16 = vor.u32 %v13596_v6, %v9872_v5  ;;  %v15312_v36 = vadd.f32 %v2799_v24, %v2787_v23  ;;  %v13496_v5 = vld [vmem:[#allocation2 + $0x3d4] sm:$0xf] }
 0x169   :  { %3051 = vmatpush.bf16.msra.mxu3 %v9969_v34  ;;  %3026 = vmatpush.bf16.msra.mxu1 %v9425_v42  ;;  %v13396_v13 = vld [vmem:[#allocation2 + $0xac] sm:$0xf0]  ;;  %v9490_v6 = vld [vmem:[#allocation2 + $0x3f0] sm:$0xf0] }
 0x16a   :  { %v9328_v14 = vld [vmem:[#allocation2 + $0x290] sm:$0xf]  ;;  %v9073_v27 = vor.u32 %v13396_v13, %v9072_v12 }
 0x16b   :  { %3039 = vmatpush.bf16.msra.mxu2 %v9681_v43  ;;  %3014 = vmatpush.bf16.msra.mxu0 %v9137_v55  ;;  %v13460_v17 = vld [vmem:[#allocation2 + $0x2ac] sm:$0xf0] }
 0x16c   :  { %v9584_v18 = vld [vmem:[#allocation2 + $0x490] sm:$0xf]  ;;  %v9329_v29 = vor.u32 %v13460_v17, %v9328_v14 }
 0x16d   :  { %3052 = vmatpush.bf16.msra.mxu3 %v9937_v47  ;;  %3027 = vmatpush.bf16.msra.mxu1 %v9393_v59  ;;  %v13524_v19 = vld [vmem:[#allocation2 + $0x4ac] sm:$0xf0]  ;;  %v2788_v57 = vpop.f32.mrf.mxu2 }
 0x16e   :  { %v9840_v21 = vld [vmem:[#allocation2 + $0x690] sm:$0xf]  ;;  %v9585_v30 = vor.u32 %v13524_v19, %v9584_v18  ;;  %v13424_v18 = vld [vmem:[#allocation2 + $0x194] sm:$0xf] }
 0x16f   :  { %3040 = vmatpush.bf16.msra.mxu2 %v9649_v60  ;;  %v13588_v22 = vld [vmem:[#allocation2 + $0x6ac] sm:$0xf0]  ;;  %3015 = vmatpush.bf16.msra.mxu0 %v9105_v54  ;;  %v9202_v19 = vld [vmem:[#allocation2 + $0x1b0] sm:$0xf0] }
 0x170   :  { %v9040_v31 = vld [vmem:[#allocation2 + $0x50] sm:$0xf]  ;;  %v9841_v37 = vor.u32 %v13588_v22, %v9840_v21  ;;  %v9458_v21 = vld [vmem:[#allocation2 + $0x3b0] sm:$0xf0]  ;;  %v9205_v24 = vor.u32 %v13424_v18, %v9202_v19 }
 0x171   :  { %3053 = vmatpush.bf16.msra.mxu3 %v9905_v0  ;;  %3028 = vmatpush.bf16.msra.mxu1 %v9361_v10  ;;  %v13388_v33 = vld [vmem:[#allocation2 + $0x6c] sm:$0xf0]  ;;  %v13432_v0 = vld [vmem:[#allocation2 + $0x1d4] sm:$0xf] }
 0x172   :  { %v9296_v34 = vld [vmem:[#allocation2 + $0x250] sm:$0xf]  ;;  %v9041_v43 = vor.u32 %v13388_v33, %v9040_v31  ;;  %v13416_v31 = vld [vmem:[#allocation2 + $0x154] sm:$0xf] }
 0x173   :  { %3041 = vmatpush.bf16.msra.mxu2 %v9617_v11  ;;  %v13452_v38 = vld [vmem:[#allocation2 + $0x26c] sm:$0xf0]  ;;  %3016 = vmatpush.bf16.msra.mxu0 %v9073_v27  ;;  %v9237_v11 = vor.u32 %v13432_v0, %v9234_v1  ;;  %v9170_v33 = vld [vmem:[#allocation2 + $0x170] sm:$0xf0] }
 0x174   :  { %v9552_v39 = vld [vmem:[#allocation2 + $0x450] sm:$0xf]  ;;  %v9297_v46 = vor.u32 %v13452_v38, %v9296_v34  ;;  %v13480_v34 = vld [vmem:[#allocation2 + $0x354] sm:$0xf] }
 0x175   :  { %3054 = vmatpush.bf16.msra.mxu3 %v9873_v16  ;;  %v13516_v40 = vld [vmem:[#allocation2 + $0x46c] sm:$0xf0]  ;;  %3029 = vmatpush.bf16.msra.mxu1 %v9329_v29  ;;  %v9493_v16 = vor.u32 %v13496_v5, %v9490_v6  ;;  %v9461_v29 = vor.u32 %v13488_v20, %v9458_v21  ;;  %v9106_v0 = vld [vmem:[#allocation2 + $0xf0] sm:$0xf0] }
 0x176   :  { %v9808_v41 = vld [vmem:[#allocation2 + $0x650] sm:$0xf]  ;;  %v9553_v47 = vor.u32 %v13516_v40, %v9552_v39  ;;  %v9173_v40 = vor.u32 %v13416_v31, %v9170_v33  ;;  %v13464_v1 = vld [vmem:[#allocation2 + $0x2d4] sm:$0xf] }
 0x177   :  { %v13580_v42 = vld [vmem:[#allocation2 + $0x66c] sm:$0xf0]  ;;  %3042 = vmatpush.bf16.msra.mxu2 %v9585_v30  ;;  %3017 = vmatpush.bf16.msra.mxu0 %v9041_v43  ;;  %v13456_v19 = vld [vmem:[#allocation2 + $0x294] sm:$0xf] }
 0x178   :  { %v9008_v44 = vld [vmem:[#allocation2 + $0x10] sm:$0xf]  ;;  %v9809_v51 = vor.u32 %v13580_v42, %v9808_v41  ;;  %v9330_v20 = vld [vmem:[#allocation2 + $0x2b0] sm:$0xf0] }
 0x179   :  { %v13380_v45 = vld [vmem:[#allocation2 + $0x2c] sm:$0xf0]  ;;  %3055 = vmatpush.bf16.msra.mxu3 %v9841_v37  ;;  %3030 = vmatpush.bf16.msra.mxu1 %v9297_v46  ;;  %v9426_v37 = vld [vmem:[#allocation2 + $0x370] sm:$0xf0]  ;;  %v9333_v31 = vor.u32 %v13456_v19, %v9330_v20 }
 0x17a   :  { %v9264_v48 = vld [vmem:[#allocation2 + $0x210] sm:$0xf]  ;;  %v9009_v62 = vor.u32 %v13380_v45, %v9008_v44  ;;  %v9429_v44 = vor.u32 %v13480_v34, %v9426_v37  ;;  %v13408_v46 = vld [vmem:[#allocation2 + $0x114] sm:$0xf] }
 0x17b   :  { %v13444_v49 = vld [vmem:[#allocation2 + $0x22c] sm:$0xf0]  ;;  %3043 = vmatpush.bf16.msra.mxu2 %v9553_v47  ;;  %v9138_v47 = vld [vmem:[#allocation2 + $0x130] sm:$0xf0] }
 0x17c   :  { %v9520_v50 = vld [vmem:[#allocation2 + $0x410] sm:$0xf]  ;;  %v9265_v2 = vor.u32 %v13444_v49, %v9264_v48  ;;  %3018 = vmatpush.bf16.msra.mxu0 %v9009_v62  ;;  %v13472_v48 = vld [vmem:[#allocation2 + $0x314] sm:$0xf] }
 0x17d   :  { %v13508_v52 = vld [vmem:[#allocation2 + $0x42c] sm:$0xf0]  ;;  %3056 = vmatpush.bf16.msra.mxu3 %v9809_v51  ;;  %v9394_v49 = vld [vmem:[#allocation2 + $0x330] sm:$0xf0]  ;;  %v2812_v51 = vpop.f32.mrf.mxu0 }
 0x17e   :  { %v9776_v53 = vld [vmem:[#allocation2 + $0x610] sm:$0xf]  ;;  %v9521_v3 = vor.u32 %v13508_v52, %v9520_v50  ;;  %3031 = vmatpush.bf16.msra.mxu1 %v9265_v2  ;;  %v9397_v61 = vor.u32 %v13472_v48, %v9394_v49  ;;  %v9362_v2 = vld [vmem:[#allocation2 + $0x2f0] sm:$0xf0] }
 0x17f   :  { %v13572_v55 = vld [vmem:[#allocation2 + $0x62c] sm:$0xf0]  ;;  %3019 = vmatmul.bf16.vlgmr.msra.gmra.mxu0 %v15257_v9  ;;  %v13384_v34 = vld [vmem:[#allocation2 + $0x54] sm:$0xf] }
 0x180   :  { %v10256_v58 = vld [vmem:[#allocation2 + $0x9d0] sm:$0xf]  ;;  %v9777_v7 = vor.u32 %v13572_v55, %v9776_v53  ;;  %3044 = vmatpush.bf16.msra.mxu2 %v9521_v3  ;;  %v9141_v53 = vor.u32 %v13408_v46, %v9138_v47  ;;  %v2851_v18 = vpop.f32.mrf.mxu3  ;;  %v9042_v37 = vld [vmem:[#allocation2 + $0x70] sm:$0xf0] }
 0x181   :  { %v13692_v59 = vld [vmem:[#allocation2 + $0x9ec] sm:$0xf0]  ;;  %3032 = vmatmul.bf16.vlgmr.msra.gmra.mxu1 %v15270_v25  ;;  %v13376_v47 = vld [vmem:[#allocation2 + $0x14] sm:$0xf] }
 0x182   :  { %v10512_v60 = vld [vmem:[#allocation2 + $0xbd0] sm:$0xf]  ;;  %v10257_v54 = vor.u32 %v13692_v59, %v10256_v58  ;;  %3057 = vmatpush.bf16.msra.mxu3 %v9777_v7  ;;  %v2813_v59 = vadd.f32 %v2812_v51, %v15312_v36  ;;  %v9365_v36 = vor.u32 %v13464_v1, %v9362_v2  ;;  %v13440_v51 = vld [vmem:[#allocation2 + $0x214] sm:$0xf] }
 0x183   :  { %v13756_v63 = vld [vmem:[#allocation2 + $0xbec] sm:$0xf0]  ;;  %3045 = vmatmul.bf16.vlgmr.msra.gmra.mxu2 %v15255_v8  ;;  %v13752_v1 = vld [vmem:[#allocation2 + $0xbd4] sm:$0xf] }
 0x184   :  { %v10513_v10 = vor.u32 %v13756_v63, %v10512_v60  ;;  %v10224_v12 = vld [vmem:[#allocation2 + $0x990] sm:$0xf]  ;;  %3063 = vmatpush.bf16.msrb.mxu0 %v10257_v54  ;;  %3089 = vmatpush.bf16.msrb.mxu2 %v9237_v11  ;;  %v2825_v60 = vpop.f32.mrf.mxu1  ;;  %v13400_v63 = vld [vmem:[#allocation2 + $0xd4] sm:$0xf] }
 0x185   :  { %v13684_v13 = vld [vmem:[#allocation2 + $0x9ac] sm:$0xf0]  ;;  %3058 = vmatmul.bf16.vlgmr.msra.gmra.mxu3 %v15262_v15  ;;  %v2826_v3 = vadd.f32 %v2825_v60, %v2813_v59  ;;  %v9109_v7 = vor.u32 %v13400_v63, %v9106_v0  ;;  %v10002_v60 = vld [vmem:[#allocation2 + $0x7f0] sm:$0xf0] }
 0x186   :  { %v10480_v14 = vld [vmem:[#allocation2 + $0xb90] sm:$0xf]  ;;  %v10225_v22 = vor.u32 %v13684_v13, %v10224_v12  ;;  %3076 = vmatpush.bf16.msrb.mxu1 %v10513_v10  ;;  %3102 = vmatpush.bf16.msrb.mxu3 %v9493_v16  ;;  %v2838_v12 = vpop.f32.mrf.mxu2  ;;  %v9074_v16 = vld [vmem:[#allocation2 + $0xb0] sm:$0xf0] }
 0x187   :  { %v13748_v17 = vld [vmem:[#allocation2 + $0xbac] sm:$0xf0]  ;;  %v10514_v2 = vld [vmem:[#allocation2 + $0xbf0] sm:$0xf0] }
 0x188   :  { %v10481_v23 = vor.u32 %v13748_v17, %v10480_v14  ;;  %v10192_v26 = vld [vmem:[#allocation2 + $0x950] sm:$0xf]  ;;  %3064 = vmatpush.bf16.msrb.mxu0 %v10225_v22  ;;  %3090 = vmatpush.bf16.msrb.mxu2 %v9205_v24  ;;  %v13392_v14 = vld [vmem:[#allocation2 + $0x94] sm:$0xf]  ;;  %v2839_v17 = vadd.f32 %v2838_v12, %v2826_v3  ;;  %v10517_v12 = vor.u32 %v13752_v1, %v10514_v2 }
 0x189   :  { %v13676_v27 = vld [vmem:[#allocation2 + $0x96c] sm:$0xf0] }
 0x18a   :  { %v10448_v28 = vld [vmem:[#allocation2 + $0xb50] sm:$0xf]  ;;  %v10193_v38 = vor.u32 %v13676_v27, %v10192_v26  ;;  %3077 = vmatpush.bf16.msrb.mxu1 %v10481_v23  ;;  %3103 = vmatpush.bf16.msrb.mxu3 %v9461_v29  ;;  %v15319_v22 = vadd.f32 %v2851_v18, %v2839_v17  ;;  %v2814_v23 = vpop.f32.mrf.mxu0  ;;  %v9077_v26 = vor.u32 %v13392_v14, %v9074_v16  ;;  %v10226_v14 = vld [vmem:[#allocation2 + $0x9b0] sm:$0xf0] }
 0x18b   :  { %v13740_v30 = vld [vmem:[#allocation2 + $0xb6c] sm:$0xf0]  ;;  %v13744_v16 = vld [vmem:[#allocation2 + $0xb94] sm:$0xf] }
 0x18c   :  { %v10449_v39 = vor.u32 %v13740_v30, %v10448_v28  ;;  %v10160_v41 = vld [vmem:[#allocation2 + $0x910] sm:$0xf]  ;;  %3065 = vmatpush.bf16.msrb.mxu0 %v10193_v38  ;;  %3091 = vmatpush.bf16.msrb.mxu2 %v9173_v40  ;;  %v2827_v30 = vpop.f32.mrf.mxu1  ;;  %v13448_v38 = vld [vmem:[#allocation2 + $0x254] sm:$0xf] }
 0x18d   :  { %v13668_v42 = vld [vmem:[#allocation2 + $0x92c] sm:$0xf0]  ;;  %v10482_v17 = vld [vmem:[#allocation2 + $0xbb0] sm:$0xf0] }
 0x18e   :  { %v10416_v43 = vld [vmem:[#allocation2 + $0xb10] sm:$0xf]  ;;  %v10161_v50 = vor.u32 %v13668_v42, %v10160_v41  ;;  %3078 = vmatpush.bf16.msrb.mxu1 %v10449_v39  ;;  %3104 = vmatpush.bf16.msrb.mxu3 %v9429_v44  ;;  %v9298_v39 = vld [vmem:[#allocation2 + $0x270] sm:$0xf0]  ;;  %v9045_v44 = vor.u32 %v13384_v34, %v9042_v37  ;;  %v2840_v48 = vpop.f32.mrf.mxu2 }
 0x18f   :  { %v13732_v45 = vld [vmem:[#allocation2 + $0xb2c] sm:$0xf0]  ;;  %v9301_v49 = vor.u32 %v13448_v38, %v9298_v39  ;;  %v9682_v23 = vld [vmem:[#allocation2 + $0x570] sm:$0xf0] }
 0x190   :  { %v10417_v52 = vor.u32 %v13732_v45, %v10416_v43  ;;  %v10128_v55 = vld [vmem:[#allocation2 + $0x8d0] sm:$0xf]  ;;  %3066 = vmatpush.bf16.msrb.mxu0 %v10161_v50  ;;  %3092 = vmatpush.bf16.msrb.mxu2 %v9141_v53  ;;  %v9010_v50 = vld [vmem:[#allocation2 + $0x30] sm:$0xf0]  ;;  %v2853_v53 = vpop.f32.mrf.mxu3 }
 0x191   :  { %v13660_v57 = vld [vmem:[#allocation2 + $0x8ec] sm:$0xf0]  ;;  %v9013_v0 = vor.u32 %v13376_v47, %v9010_v50  ;;  %v13736_v30 = vld [vmem:[#allocation2 + $0xb54] sm:$0xf] }
 0x192   :  { %v10384_v58 = vld [vmem:[#allocation2 + $0xad0] sm:$0xf]  ;;  %v10129_v5 = vor.u32 %v13660_v57, %v10128_v55  ;;  %3079 = vmatpush.bf16.msrb.mxu1 %v10417_v52  ;;  %3105 = vmatpush.bf16.msrb.mxu3 %v9397_v61  ;;  %v9266_v52 = vld [vmem:[#allocation2 + $0x230] sm:$0xf0] }
 0x193   :  { %v13724_v62 = vld [vmem:[#allocation2 + $0xaec] sm:$0xf0]  ;;  %v13560_v55 = vld [vmem:[#allocation2 + $0x5d4] sm:$0xf]  ;;  %v9269_v3 = vor.u32 %v13440_v51, %v9266_v52 }
 0x194   :  { %v10385_v6 = vor.u32 %v13724_v62, %v10384_v58  ;;  %v10096_v54 = vld [vmem:[#allocation2 + $0x890] sm:$0xf]  ;;  %3067 = vmatpush.bf16.msrb.mxu0 %v10129_v5  ;;  %3093 = vmatpush.bf16.msrb.mxu2 %v9109_v7  ;;  %v9746_v57 = vld [vmem:[#allocation2 + $0x5f0] sm:$0xf0] }
 0x195   :  { %v13652_v10 = vld [vmem:[#allocation2 + $0x8ac] sm:$0xf0]  ;;  %v13624_v58 = vld [vmem:[#allocation2 + $0x7d4] sm:$0xf]  ;;  %v9749_v5 = vor.u32 %v13560_v55, %v9746_v57 }
 0x196   :  { %v10352_v11 = vld [vmem:[#allocation2 + $0xa90] sm:$0xf]  ;;  %v10097_v21 = vor.u32 %v13652_v10, %v10096_v54  ;;  %3080 = vmatpush.bf16.msrb.mxu1 %v10385_v6  ;;  %3106 = vmatpush.bf16.msrb.mxu3 %v9365_v36  ;;  %v13688_v61 = vld [vmem:[#allocation2 + $0x9d4] sm:$0xf]  ;;  %v10005_v6 = vor.u32 %v13624_v58, %v10002_v60  ;;  %v2877_v58 = vpop.f32.mrf.mxu1 }
 0x197   :  { %v13716_v13 = vld [vmem:[#allocation2 + $0xaac] sm:$0xf0]  ;;  %v10258_v62 = vld [vmem:[#allocation2 + $0x9f0] sm:$0xf0] }
 0x198   :  { %v10353_v24 = vor.u32 %v13716_v13, %v10352_v11  ;;  %v10064_v27 = vld [vmem:[#allocation2 + $0x850] sm:$0xf]  ;;  %3068 = vmatpush.bf16.msrb.mxu0 %v10097_v21  ;;  %3094 = vmatpush.bf16.msrb.mxu2 %v9077_v26  ;;  %v10261_v7 = vor.u32 %v13688_v61, %v10258_v62  ;;  %v13552_v54 = vld [vmem:[#allocation2 + $0x594] sm:$0xf]  ;;  %v10485_v26 = vor.u32 %v13744_v16, %v10482_v17 }
 0x199   :  { %v13644_v28 = vld [vmem:[#allocation2 + $0x86c] sm:$0xf0]  ;;  %v9714_v10 = vld [vmem:[#allocation2 + $0x5b0] sm:$0xf0] }
 0x19a   :  { %v10320_v29 = vld [vmem:[#allocation2 + $0xa50] sm:$0xf]  ;;  %v10065_v40 = vor.u32 %v13644_v28, %v10064_v27  ;;  %3081 = vmatpush.bf16.msrb.mxu1 %v10353_v24  ;;  %3107 = vmatpush.bf16.msrb.mxu3 %v9333_v31  ;;  %v13616_v11 = vld [vmem:[#allocation2 + $0x794] sm:$0xf]  ;;  %v9717_v18 = vor.u32 %v13552_v54, %v9714_v10 }
 0x19b   :  { %v13708_v33 = vld [vmem:[#allocation2 + $0xa6c] sm:$0xf0]  ;;  %v9970_v36 = vld [vmem:[#allocation2 + $0x7b0] sm:$0xf0] }
 0x19c   :  { %v10032_v41 = vld [vmem:[#allocation2 + $0x810] sm:$0xf]  ;;  %v10321_v43 = vor.u32 %v13708_v33, %v10320_v29  ;;  %3069 = vmatpush.bf16.msrb.mxu0 %v10065_v40  ;;  %3095 = vmatpush.bf16.msrb.mxu2 %v9045_v44  ;;  %v13680_v13 = vld [vmem:[#allocation2 + $0x994] sm:$0xf]  ;;  %v9973_v19 = vor.u32 %v13616_v11, %v9970_v36 }
 0x19d   :  { %v13636_v42 = vld [vmem:[#allocation2 + $0x82c] sm:$0xf0]  ;;  %v10229_v20 = vor.u32 %v13680_v13, %v10226_v14  ;;  %v13544_v21 = vld [vmem:[#allocation2 + $0x554] sm:$0xf] }
 0x19e   :  { %v10288_v45 = vld [vmem:[#allocation2 + $0xa10] sm:$0xf]  ;;  %v10033_v59 = vor.u32 %v13636_v42, %v10032_v41  ;;  %3082 = vmatpush.bf16.msrb.mxu1 %v10321_v43  ;;  %3108 = vmatpush.bf16.msrb.mxu3 %v9301_v49  ;;  %v13608_v24 = vld [vmem:[#allocation2 + $0x754] sm:$0xf]  ;;  %v9685_v33 = vor.u32 %v13544_v21, %v9682_v23  ;;  %v765_v41 = vperm.slane %v15299_v56, 2  ;;  %v2864_v49 = vpop.f32.mrf.mxu0  ;;  %v2890_v54 = vpop.f32.mrf.mxu2 }
 0x19f   :  { %v13700_v46 = vld [vmem:[#allocation2 + $0xa2c] sm:$0xf0]  ;;  %v9938_v27 = vld [vmem:[#allocation2 + $0x770] sm:$0xf0] }
 0x1a0   :  { %v10289_v63 = vor.u32 %v13700_v46, %v10288_v45  ;;  %3070 = vmatpush.bf16.msrb.mxu0 %v10033_v59  ;;  %3096 = vmatpush.bf16.msrb.mxu2 %v9013_v0  ;;  %v13672_v28 = vld [vmem:[#allocation2 + $0x954] sm:$0xf]  ;;  %v9941_v37 = vor.u32 %v13608_v24, %v9938_v27  ;;  %v2865_v57 = vadd.f32 %v2864_v49, %v765_v41  ;;  %v2903_v14 = vpop.f32.mrf.mxu3 }
 0x1a1   :  { %v10194_v29 = vld [vmem:[#allocation2 + $0x970] sm:$0xf0] }
 0x1a2   :  { %3083 = vmatpush.bf16.msrb.mxu1 %v10289_v63  ;;  %3109 = vmatpush.bf16.msrb.mxu3 %v9269_v3  ;;  %v10450_v31 = vld [vmem:[#allocation2 + $0xb70] sm:$0xf0]  ;;  %v10197_v38 = vor.u32 %v13672_v28, %v10194_v29  ;;  %v2878_v0 = vadd.f32 %v2877_v58, %v2865_v57  ;;  %v2879_v28 = vpop.f32.mrf.mxu1  ;;  %v13501_v58 = vld [vmem:[#allocation2 + $0x3f4] sm:$0xf0] }
 0x1a3   :  { %3071 = vmatmul.bf16.vlgmr.msrb.gmra.mxu0 %v15279_v32  ;;  %3097 = vmatmul.bf16.vlgmr.msrb.gmra.mxu2 %v15257_v9  ;;  %v13536_v34 = vld [vmem:[#allocation2 + $0x514] sm:$0xf]  ;;  %v10453_v42 = vor.u32 %v13736_v30, %v10450_v31  ;;  %v9944_v28 = vld [vmem:[#allocation2 + $0x758] sm:$0xf] }
 0x1a4   :  { %3115 = vmatpush.bf16.msra.mxu0 %v9749_v5  ;;  %3141 = vmatpush.bf16.msra.mxu2 %v10261_v7  ;;  %v9650_v39 = vld [vmem:[#allocation2 + $0x530] sm:$0xf0]  ;;  %v2891_v13 = vadd.f32 %v2890_v54, %v2878_v0 }
 0x1a5   :  { %3084 = vmatmul.bf16.vlgmr.msrb.gmra.mxu1 %v15281_v35  ;;  %3110 = vmatmul.bf16.vlgmr.msrb.gmra.mxu3 %v15270_v25  ;;  %v13600_v40 = vld [vmem:[#allocation2 + $0x714] sm:$0xf]  ;;  %v9653_v48 = vor.u32 %v13536_v34, %v9650_v39 }
 0x1a6   :  { %3128 = vmatpush.bf16.msra.mxu1 %v10005_v6  ;;  %3154 = vmatpush.bf16.msra.mxu3 %v10517_v12  ;;  %v9906_v43 = vld [vmem:[#allocation2 + $0x730] sm:$0xf0] }
 0x1a7   :  { %v13664_v44 = vld [vmem:[#allocation2 + $0x914] sm:$0xf]  ;;  %v9909_v50 = vor.u32 %v13600_v40, %v9906_v43 }
 0x1a8   :  { %3116 = vmatpush.bf16.msra.mxu0 %v9717_v18  ;;  %3142 = vmatpush.bf16.msra.mxu2 %v10229_v20  ;;  %v10162_v45 = vld [vmem:[#allocation2 + $0x930] sm:$0xf0]  ;;  %v2866_v20 = vpop.f32.mrf.mxu0 }
 0x1a9   :  { %v13728_v46 = vld [vmem:[#allocation2 + $0xb14] sm:$0xf]  ;;  %v10165_v51 = vor.u32 %v13664_v44, %v10162_v45  ;;  %v13421_v20 = vld [vmem:[#allocation2 + $0x174] sm:$0xf0] }
 0x1aa   :  { %3129 = vmatpush.bf16.msra.mxu1 %v9973_v19  ;;  %3155 = vmatpush.bf16.msra.mxu3 %v10485_v26  ;;  %v10418_v47 = vld [vmem:[#allocation2 + $0xb30] sm:$0xf0]  ;;  %v15326_v19 = vadd.f32 %v2903_v14, %v2891_v13  ;;  %v13621_v13 = vld [vmem:[#allocation2 + $0x7b4] sm:$0xf0] }
 0x1ab   :  { %v13528_v52 = vld [vmem:[#allocation2 + $0x4d4] sm:$0xf]  ;;  %v10421_v56 = vor.u32 %v13728_v46, %v10418_v47  ;;  %v2892_v46 = vpop.f32.mrf.mxu2 }
 0x1ac   :  { %3117 = vmatpush.bf16.msra.mxu0 %v9685_v33  ;;  %3143 = vmatpush.bf16.msra.mxu2 %v10197_v38  ;;  %v9618_v53 = vld [vmem:[#allocation2 + $0x4f0] sm:$0xf0] }
 0x1ad   :  { %v13592_v55 = vld [vmem:[#allocation2 + $0x6d4] sm:$0xf]  ;;  %v9621_v1 = vor.u32 %v13528_v52, %v9618_v53  ;;  %v9240_v52 = vld [vmem:[#allocation2 + $0x1d8] sm:$0xf] }
 0x1ae   :  { %3130 = vmatpush.bf16.msra.mxu1 %v9941_v37  ;;  %3156 = vmatpush.bf16.msra.mxu3 %v10453_v42  ;;  %v9874_v59 = vld [vmem:[#allocation2 + $0x6f0] sm:$0xf0]  ;;  %v13437_v53 = vld [vmem:[#allocation2 + $0x1f4] sm:$0xf0] }
 0x1af   :  { %v13656_v60 = vld [vmem:[#allocation2 + $0x8d4] sm:$0xf]  ;;  %v9877_v2 = vor.u32 %v13592_v55, %v9874_v59  ;;  %v9496_v55 = vld [vmem:[#allocation2 + $0x3d8] sm:$0xf] }
 0x1b0   :  { %v10130_v61 = vld [vmem:[#allocation2 + $0x8f0] sm:$0xf0]  ;;  %3118 = vmatpush.bf16.msra.mxu0 %v9653_v48  ;;  %3144 = vmatpush.bf16.msra.mxu2 %v10165_v51  ;;  %v2905_v51 = vpop.f32.mrf.mxu3  ;;  %v13565_v59 = vld [vmem:[#allocation2 + $0x5f4] sm:$0xf0] }
 0x1b1   :  { %v13720_v62 = vld [vmem:[#allocation2 + $0xad4] sm:$0xf]  ;;  %v10133_v3 = vor.u32 %v13656_v60, %v10130_v61  ;;  %v9112_v51 = vld [vmem:[#allocation2 + $0xd8] sm:$0xf] }
 0x1b2   :  { %v10386_v63 = vld [vmem:[#allocation2 + $0xaf0] sm:$0xf0]  ;;  %3131 = vmatpush.bf16.msra.mxu1 %v9909_v50  ;;  %3157 = vmatpush.bf16.msra.mxu3 %v10421_v56  ;;  %v9752_v56 = vld [vmem:[#allocation2 + $0x5d8] sm:$0xf] }
 0x1b3   :  { %v13520_v5 = vld [vmem:[#allocation2 + $0x494] sm:$0xf]  ;;  %v10389_v10 = vor.u32 %v13720_v62, %v10386_v63  ;;  %v10008_v62 = vld [vmem:[#allocation2 + $0x7d8] sm:$0xf] }
 0x1b4   :  { %v9586_v6 = vld [vmem:[#allocation2 + $0x4b0] sm:$0xf0]  ;;  %3119 = vmatpush.bf16.msra.mxu0 %v9621_v1  ;;  %3145 = vmatpush.bf16.msra.mxu2 %v10133_v3  ;;  %v13629_v63 = vld [vmem:[#allocation2 + $0x7f4] sm:$0xf0]  ;;  %v9241_v1 = vor.u32 %v13437_v53, %v9240_v52  ;;  %v9753_v3 = vor.u32 %v13565_v59, %v9752_v56 }
 0x1b5   :  { %v13584_v7 = vld [vmem:[#allocation2 + $0x694] sm:$0xf]  ;;  %v9589_v18 = vor.u32 %v13520_v5, %v9586_v6  ;;  %v9208_v5 = vld [vmem:[#allocation2 + $0x198] sm:$0xf]  ;;  %v10009_v54 = vor.u32 %v13629_v63, %v10008_v62  ;;  %v15335_v62 = vld [vmem:[#allocation4] sm:$0xff] }
 0x1b6   :  { %v9842_v11 = vld [vmem:[#allocation2 + $0x6b0] sm:$0xf0]  ;;  %3132 = vmatpush.bf16.msra.mxu1 %v9877_v2  ;;  %3158 = vmatpush.bf16.msra.mxu3 %v10389_v10  ;;  %v9497_v2 = vor.u32 %v13501_v58, %v9496_v55  ;;  %v13429_v6 = vld [vmem:[#allocation2 + $0x1b4] sm:$0xf0] }
 0x1b7   :  { %v13648_v12 = vld [vmem:[#allocation2 + $0x894] sm:$0xf]  ;;  %v9845_v21 = vor.u32 %v13584_v7, %v9842_v11  ;;  %v9464_v7 = vld [vmem:[#allocation2 + $0x398] sm:$0xf]  ;;  %v9209_v14 = vor.u32 %v13429_v6, %v9208_v5 }
 0x1b8   :  { %v10098_v36 = vld [vmem:[#allocation2 + $0x8b0] sm:$0xf0]  ;;  %3120 = vmatpush.bf16.msra.mxu0 %v9589_v18  ;;  %v13493_v10 = vld [vmem:[#allocation2 + $0x3b4] sm:$0xf0] }
 0x1b9   :  { %v13712_v16 = vld [vmem:[#allocation2 + $0xa94] sm:$0xf]  ;;  %v10101_v23 = vor.u32 %v13648_v12, %v10098_v36  ;;  %v9720_v11 = vld [vmem:[#allocation2 + $0x598] sm:$0xf] }
 0x1ba   :  { %v10354_v17 = vld [vmem:[#allocation2 + $0xab0] sm:$0xf0]  ;;  %3133 = vmatpush.bf16.msra.mxu1 %v9845_v21  ;;  %v13557_v12 = vld [vmem:[#allocation2 + $0x5b4] sm:$0xf0] }
 0x1bb   :  { %v13512_v24 = vld [vmem:[#allocation2 + $0x454] sm:$0xf]  ;;  %v10357_v29 = vor.u32 %v13712_v16, %v10354_v17  ;;  %3146 = vmatpush.bf16.msra.mxu2 %v10101_v23  ;;  %v9976_v36 = vld [vmem:[#allocation2 + $0x798] sm:$0xf]  ;;  %v9465_v16 = vor.u32 %v13493_v10, %v9464_v7  ;;  %v9721_v17 = vor.u32 %v13557_v12, %v9720_v11 }
 0x1bc   :  { %v9554_v26 = vld [vmem:[#allocation2 + $0x470] sm:$0xf0]  ;;  %v9176_v18 = vld [vmem:[#allocation2 + $0x158] sm:$0xf]  ;;  %v9977_v23 = vor.u32 %v13621_v13, %v9976_v36 }
 0x1bd   :  { %v13576_v27 = vld [vmem:[#allocation2 + $0x654] sm:$0xf]  ;;  %v9557_v38 = vor.u32 %v13512_v24, %v9554_v26  ;;  %3159 = vmatpush.bf16.msra.mxu3 %v10357_v29  ;;  %v9432_v21 = vld [vmem:[#allocation2 + $0x358] sm:$0xf] }
 0x1be   :  { %v9810_v30 = vld [vmem:[#allocation2 + $0x670] sm:$0xf0]  ;;  %v13485_v24 = vld [vmem:[#allocation2 + $0x374] sm:$0xf0]  ;;  %v2942_v11 = vpop.f32.mrf.mxu2 }
 0x1bf   :  { %v13640_v31 = vld [vmem:[#allocation2 + $0x854] sm:$0xf]  ;;  %v9813_v41 = vor.u32 %v13576_v27, %v9810_v30  ;;  %3121 = vmatpush.bf16.msra.mxu0 %v9557_v38  ;;  %v9688_v26 = vld [vmem:[#allocation2 + $0x558] sm:$0xf]  ;;  %v9177_v30 = vor.u32 %v13421_v20, %v9176_v18 }
 0x1c0   :  { %v10066_v33 = vld [vmem:[#allocation2 + $0x870] sm:$0xf0]  ;;  %v13549_v27 = vld [vmem:[#allocation2 + $0x574] sm:$0xf0] }
 0x1c1   :  { %v13704_v34 = vld [vmem:[#allocation2 + $0xa54] sm:$0xf]  ;;  %v10069_v42 = vor.u32 %v13640_v31, %v10066_v33  ;;  %3134 = vmatpush.bf16.msra.mxu1 %v9813_v41  ;;  %v13613_v29 = vld [vmem:[#allocation2 + $0x774] sm:$0xf0]  ;;  %v9433_v31 = vor.u32 %v13485_v24, %v9432_v21  ;;  %v9689_v33 = vor.u32 %v13549_v27, %v9688_v26 }
 0x1c2   :  { %v10322_v37 = vld [vmem:[#allocation2 + $0xa70] sm:$0xf0]  ;;  %v9400_v38 = vld [vmem:[#allocation2 + $0x318] sm:$0xf] }
 0x1c3   :  { %v13504_v39 = vld [vmem:[#allocation2 + $0x414] sm:$0xf]  ;;  %v10325_v47 = vor.u32 %v13704_v34, %v10322_v37  ;;  %3147 = vmatpush.bf16.msra.mxu2 %v10069_v42  ;;  %v9144_v34 = vld [vmem:[#allocation2 + $0x118] sm:$0xf] }
 0x1c4   :  { %v9522_v40 = vld [vmem:[#allocation2 + $0x430] sm:$0xf0]  ;;  %v13413_v37 = vld [vmem:[#allocation2 + $0x134] sm:$0xf0] }
 0x1c5   :  { %v13568_v43 = vld [vmem:[#allocation2 + $0x614] sm:$0xf]  ;;  %v9525_v57 = vor.u32 %v13504_v39, %v9522_v40  ;;  %3160 = vmatpush.bf16.msra.mxu3 %v10325_v47  ;;  %v9945_v39 = vor.u32 %v13613_v29, %v9944_v28  ;;  %v13477_v40 = vld [vmem:[#allocation2 + $0x334] sm:$0xf0]  ;;  %v9145_v46 = vor.u32 %v13413_v37, %v9144_v34 }
 0x1c6   :  { %v9778_v44 = vld [vmem:[#allocation2 + $0x630] sm:$0xf0]  ;;  %v9656_v41 = vld [vmem:[#allocation2 + $0x518] sm:$0xf] }
 0x1c7   :  { %v13632_v45 = vld [vmem:[#allocation2 + $0x814] sm:$0xf]  ;;  %v9781_v60 = vor.u32 %v13568_v43, %v9778_v44  ;;  %3122 = vmatpush.bf16.msra.mxu0 %v9525_v57  ;;  %v13541_v42 = vld [vmem:[#allocation2 + $0x534] sm:$0xf0] }
 0x1c8   :  { %v10034_v48 = vld [vmem:[#allocation2 + $0x830] sm:$0xf0]  ;;  %v9912_v43 = vld [vmem:[#allocation2 + $0x718] sm:$0xf] }
 0x1c9   :  { %v13696_v49 = vld [vmem:[#allocation2 + $0xa14] sm:$0xf]  ;;  %v10037_v61 = vor.u32 %v13632_v45, %v10034_v48  ;;  %3135 = vmatpush.bf16.msra.mxu1 %v9781_v60  ;;  %v13605_v44 = vld [vmem:[#allocation2 + $0x734] sm:$0xf0]  ;;  %v2916_v45 = vpop.f32.mrf.mxu0  ;;  %v2929_v48 = vpop.f32.mrf.mxu1 }
 0x1ca   :  { %v10290_v50 = vld [vmem:[#allocation2 + $0xa30] sm:$0xf0]  ;;  %3123 = vmatmul.bf16.vlgmr.msra.gmra.mxu0 %v15255_v8  ;;  %v2917_v47 = vadd.f32 %v2916_v45, %v15326_v19  ;;  %v13405_v52 = vld [vmem:[#allocation2 + $0xf4] sm:$0xf0]  ;;  %v9913_v55 = vor.u32 %v13605_v44, %v9912_v43  ;;  %v766_v19 = vperm.slane %v15335_v62, 3 }
 0x1cb   :  { %v10293_v0 = vor.u32 %v13696_v49, %v10290_v50  ;;  %3148 = vmatpush.bf16.msra.mxu2 %v10037_v61  ;;  %3167 = vmatpush.bf16.msrb.mxu0 %v9241_v1  ;;  %v9401_v49 = vor.u32 %v13477_v40, %v9400_v38  ;;  %v9657_v50 = vor.u32 %v13541_v42, %v9656_v41  ;;  %v9368_v53 = vld [vmem:[#allocation2 + $0x2d8] sm:$0xf] }
 0x1cc   :  { %3136 = vmatmul.bf16.vlgmr.msra.gmra.mxu1 %v15262_v15  ;;  %v13469_v57 = vld [vmem:[#allocation2 + $0x2f4] sm:$0xf0]  ;;  %v15333_v59 = vadd.f32 %v2929_v48, %v2917_v47  ;;  %v9113_v63 = vor.u32 %v13405_v52, %v9112_v51  ;;  %v2943_v13 = vadd.f32 %v2942_v11, %v766_v19  ;;  %v13497_v19 = vld [vmem:[#allocation2 + $0x3dc] sm:$0xf] }
 0x1cd   :  { %3161 = vmatpush.bf16.msra.mxu3 %v10293_v0  ;;  %3180 = vmatpush.bf16.msrb.mxu1 %v9497_v2  ;;  %v9624_v58 = vld [vmem:[#allocation2 + $0x4d8] sm:$0xf]  ;;  %v9369_v0 = vor.u32 %v13469_v57, %v9368_v53  ;;  %v13425_v11 = vld [vmem:[#allocation2 + $0x19c] sm:$0xf] }
 0x1ce   :  { %3149 = vmatmul.bf16.vlgmr.msra.gmra.mxu2 %v15279_v32  ;;  %v13533_v56 = vld [vmem:[#allocation2 + $0x4f4] sm:$0xf0] }
 0x1cf   :  { %3193 = vmatpush.bf16.msrb.mxu2 %v9753_v3  ;;  %3168 = vmatpush.bf16.msrb.mxu0 %v9209_v14  ;;  %v9880_v60 = vld [vmem:[#allocation2 + $0x6d8] sm:$0xf]  ;;  %v9625_v1 = vor.u32 %v13533_v56, %v9624_v58  ;;  %v2955_v14 = vpop.f32.mrf.mxu3  ;;  %v13433_v58 = vld [vmem:[#allocation2 + $0x1dc] sm:$0xf] }
 0x1d0   :  { %3162 = vmatmul.bf16.vlgmr.msra.gmra.mxu3 %v15281_v35  ;;  %v13597_v61 = vld [vmem:[#allocation2 + $0x6f4] sm:$0xf0]  ;;  %v15338_v27 = vadd.f32 %v2955_v14, %v2943_v13  ;;  %v9242_v56 = vld [vmem:[#allocation2 + $0x1f8] sm:$0xf0] }
 0x1d1   :  { %3206 = vmatpush.bf16.msrb.mxu3 %v10009_v54  ;;  %3181 = vmatpush.bf16.msrb.mxu1 %v9465_v16  ;;  %v9080_v2 = vld [vmem:[#allocation2 + $0x98] sm:$0xf]  ;;  %v9881_v6 = vor.u32 %v13597_v61, %v9880_v60  ;;  %v2918_v16 = vpop.f32.mrf.mxu0  ;;  %v2931_v18 = vpop.f32.mrf.mxu1  ;;  %v9466_v13 = vld [vmem:[#allocation2 + $0x3b8] sm:$0xf0] }
 0x1d2   :  { %v13397_v3 = vld [vmem:[#allocation2 + $0xb4] sm:$0xf0] }
 0x1d3   :  { %3194 = vmatpush.bf16.msrb.mxu2 %v9721_v17  ;;  %3169 = vmatpush.bf16.msrb.mxu0 %v9177_v30  ;;  %v9336_v5 = vld [vmem:[#allocation2 + $0x298] sm:$0xf]  ;;  %v9081_v17 = vor.u32 %v13397_v3, %v9080_v2  ;;  %v9245_v3 = vor.u32 %v13433_v58, %v9242_v56  ;;  %v13401_v56 = vld [vmem:[#allocation2 + $0xdc] sm:$0xf] }
 0x1d4   :  { %v13461_v7 = vld [vmem:[#allocation2 + $0x2b4] sm:$0xf0] }
 0x1d5   :  { %3207 = vmatpush.bf16.msrb.mxu3 %v9977_v23  ;;  %3182 = vmatpush.bf16.msrb.mxu1 %v9433_v31  ;;  %v9592_v54 = vld [vmem:[#allocation2 + $0x498] sm:$0xf]  ;;  %v9337_v20 = vor.u32 %v13461_v7, %v9336_v5 }
 0x1d6   :  { %v13525_v10 = vld [vmem:[#allocation2 + $0x4b4] sm:$0xf0] }
 0x1d7   :  { %3195 = vmatpush.bf16.msrb.mxu2 %v9689_v33  ;;  %3170 = vmatpush.bf16.msrb.mxu0 %v9145_v46  ;;  %v9848_v12 = vld [vmem:[#allocation2 + $0x698] sm:$0xf]  ;;  %v9593_v21 = vor.u32 %v13525_v10, %v9592_v54  ;;  %v2957_v53 = vpop.f32.mrf.mxu3 }
 0x1d8   :  { %v13589_v36 = vld [vmem:[#allocation2 + $0x6b4] sm:$0xf0] }
 0x1d9   :  { %3208 = vmatpush.bf16.msrb.mxu3 %v9945_v39  ;;  %3183 = vmatpush.bf16.msrb.mxu1 %v9401_v49  ;;  %v9048_v23 = vld [vmem:[#allocation2 + $0x58] sm:$0xf]  ;;  %v9849_v28 = vor.u32 %v13589_v36, %v9848_v12  ;;  %v2944_v49 = vpop.f32.mrf.mxu2  ;;  %v9210_v12 = vld [vmem:[#allocation2 + $0x1b8] sm:$0xf0] }
 0x1da   :  { %v13389_v24 = vld [vmem:[#allocation2 + $0x74] sm:$0xf0]  ;;  %v13489_v36 = vld [vmem:[#allocation2 + $0x39c] sm:$0xf] }
 0x1db   :  { %3196 = vmatpush.bf16.msrb.mxu2 %v9657_v50  ;;  %3171 = vmatpush.bf16.msrb.mxu0 %v9113_v63  ;;  %v9304_v26 = vld [vmem:[#allocation2 + $0x258] sm:$0xf]  ;;  %v9049_v37 = vor.u32 %v13389_v24, %v9048_v23  ;;  %v9498_v63 = vld [vmem:[#allocation2 + $0x3f8] sm:$0xf0]  ;;  %v9469_v23 = vor.u32 %v13489_v36, %v9466_v13 }
 0x1dc   :  { %v13453_v29 = vld [vmem:[#allocation2 + $0x274] sm:$0xf0]  ;;  %v9501_v54 = vor.u32 %v13497_v19, %v9498_v63  ;;  %v9370_v19 = vld [vmem:[#allocation2 + $0x2f8] sm:$0xf0] }
 0x1dd   :  { %3209 = vmatpush.bf16.msrb.mxu3 %v9913_v55  ;;  %3184 = vmatpush.bf16.msrb.mxu1 %v9369_v0  ;;  %v9560_v30 = vld [vmem:[#allocation2 + $0x458] sm:$0xf]  ;;  %v9305_v40 = vor.u32 %v13453_v29, %v9304_v26  ;;  %v13417_v26 = vld [vmem:[#allocation2 + $0x15c] sm:$0xf] }
 0x1de   :  { %v13517_v31 = vld [vmem:[#allocation2 + $0x474] sm:$0xf0]  ;;  %v13481_v29 = vld [vmem:[#allocation2 + $0x35c] sm:$0xf] }
 0x1df   :  { %3197 = vmatpush.bf16.msrb.mxu2 %v9625_v1  ;;  %v9816_v33 = vld [vmem:[#allocation2 + $0x658] sm:$0xf]  ;;  %3172 = vmatpush.bf16.msrb.mxu0 %v9081_v17  ;;  %v9561_v41 = vor.u32 %v13517_v31, %v9560_v30  ;;  %v9213_v17 = vor.u32 %v13425_v11, %v9210_v12  ;;  %v9434_v30 = vld [vmem:[#allocation2 + $0x378] sm:$0xf0] }
 0x1e0   :  { %v13581_v34 = vld [vmem:[#allocation2 + $0x674] sm:$0xf0]  ;;  %v9082_v11 = vld [vmem:[#allocation2 + $0xb8] sm:$0xf0] }
 0x1e1   :  { %3210 = vmatpush.bf16.msrb.mxu3 %v9881_v6  ;;  %v9016_v38 = vld [vmem:[#allocation2 + $0x18] sm:$0xf]  ;;  %3185 = vmatpush.bf16.msrb.mxu1 %v9337_v20  ;;  %v9817_v45 = vor.u32 %v13581_v34, %v9816_v33  ;;  %v13457_v13 = vld [vmem:[#allocation2 + $0x29c] sm:$0xf] }
 0x1e2   :  { %v13381_v39 = vld [vmem:[#allocation2 + $0x34] sm:$0xf0] }
 0x1e3   :  { %3198 = vmatpush.bf16.msrb.mxu2 %v9593_v21  ;;  %v9272_v42 = vld [vmem:[#allocation2 + $0x218] sm:$0xf]  ;;  %3173 = vmatpush.bf16.msrb.mxu0 %v9049_v37  ;;  %v9017_v55 = vor.u32 %v13381_v39, %v9016_v38 }
 0x1e4   :  { %v13445_v43 = vld [vmem:[#allocation2 + $0x234] sm:$0xf0] }
 0x1e5   :  { %v9528_v44 = vld [vmem:[#allocation2 + $0x418] sm:$0xf]  ;;  %3211 = vmatpush.bf16.msrb.mxu3 %v9849_v28  ;;  %3186 = vmatpush.bf16.msrb.mxu1 %v9305_v40  ;;  %v9273_v60 = vor.u32 %v13445_v43, %v9272_v42  ;;  %v9178_v28 = vld [vmem:[#allocation2 + $0x178] sm:$0xf0]  ;;  %v9437_v40 = vor.u32 %v13481_v29, %v9434_v30 }
 0x1e6   :  { %v13509_v46 = vld [vmem:[#allocation2 + $0x434] sm:$0xf0]  ;;  %v9181_v34 = vor.u32 %v13417_v26, %v9178_v28  ;;  %v13409_v42 = vld [vmem:[#allocation2 + $0x11c] sm:$0xf] }
 0x1e7   :  { %v9784_v47 = vld [vmem:[#allocation2 + $0x618] sm:$0xf]  ;;  %3199 = vmatpush.bf16.msrb.mxu2 %v9561_v41  ;;  %v9529_v61 = vor.u32 %v13509_v46, %v9528_v44  ;;  %3174 = vmatpush.bf16.msrb.mxu0 %v9017_v55  ;;  %v9146_v43 = vld [vmem:[#allocation2 + $0x138] sm:$0xf0]  ;;  %v2981_v55 = vpop.f32.mrf.mxu1  ;;  %v3007_v36 = vpop.f32.mrf.mxu3 }
 0x1e8   :  { %v13573_v48 = vld [vmem:[#allocation2 + $0x634] sm:$0xf0]  ;;  %v13473_v44 = vld [vmem:[#allocation2 + $0x31c] sm:$0xf]  ;;  %v9149_v49 = vor.u32 %v13409_v42, %v9146_v43 }
 0x1e9   :  { %v10264_v50 = vld [vmem:[#allocation2 + $0x9d8] sm:$0xf]  ;;  %3212 = vmatpush.bf16.msrb.mxu3 %v9817_v45  ;;  %v9785_v0 = vor.u32 %v13573_v48, %v9784_v47  ;;  %3187 = vmatpush.bf16.msrb.mxu1 %v9273_v60  ;;  %v9402_v45 = vld [vmem:[#allocation2 + $0x338] sm:$0xf0]  ;;  %v2968_v47 = vpop.f32.mrf.mxu0 }
 0x1ea   :  { %v13693_v51 = vld [vmem:[#allocation2 + $0x9f4] sm:$0xf0]  ;;  %3175 = vmatmul.bf16.vlgmr.msrb.gmra.mxu0 %v15257_v9  ;;  %v2969_v53 = vadd.f32 %v2968_v47, %v15338_v27  ;;  %v9114_v60 = vld [vmem:[#allocation2 + $0xf8] sm:$0xf0] }
 0x1eb   :  { %v10520_v52 = vld [vmem:[#allocation2 + $0xbd8] sm:$0xf]  ;;  %v10265_v1 = vor.u32 %v13693_v51, %v10264_v50  ;;  %3200 = vmatpush.bf16.msrb.mxu2 %v9529_v61  ;;  %v13465_v61 = vld [vmem:[#allocation2 + $0x2dc] sm:$0xf] }
 0x1ec   :  { %v13757_v57 = vld [vmem:[#allocation2 + $0xbf4] sm:$0xf0]  ;;  %3188 = vmatmul.bf16.vlgmr.msrb.gmra.mxu1 %v15270_v25  ;;  %v2982_v63 = vadd.f32 %v2981_v55, %v2969_v53  ;;  %v9373_v27 = vor.u32 %v13465_v61, %v9370_v19  ;;  %v9754_v53 = vld [vmem:[#allocation2 + $0x5f8] sm:$0xf0] }
 0x1ed   :  { %v10521_v2 = vor.u32 %v13757_v57, %v10520_v52  ;;  %v10232_v5 = vld [vmem:[#allocation2 + $0x998] sm:$0xf]  ;;  %3213 = vmatpush.bf16.msrb.mxu3 %v9785_v0  ;;  %3219 = vmatpush.bf16.msra.mxu0 %v10265_v1  ;;  %v9405_v57 = vor.u32 %v13473_v44, %v9402_v45  ;;  %v13377_v45 = vld [vmem:[#allocation2 + $0x1c] sm:$0xf] }
 0x1ee   :  { %v13685_v6 = vld [vmem:[#allocation2 + $0x9b4] sm:$0xf0]  ;;  %3201 = vmatmul.bf16.vlgmr.msrb.gmra.mxu2 %v15255_v8  ;;  %v13625_v55 = vld [vmem:[#allocation2 + $0x7dc] sm:$0xf] }
 0x1ef   :  { %v10488_v7 = vld [vmem:[#allocation2 + $0xb98] sm:$0xf]  ;;  %v10233_v14 = vor.u32 %v13685_v6, %v10232_v5  ;;  %3232 = vmatpush.bf16.msra.mxu1 %v10521_v2  ;;  %3245 = vmatpush.bf16.msra.mxu2 %v9245_v3  ;;  %v9117_v2 = vor.u32 %v13401_v56, %v9114_v60  ;;  %v2983_v28 = vpop.f32.mrf.mxu1  ;;  %v13689_v56 = vld [vmem:[#allocation2 + $0x9dc] sm:$0xf] }
 0x1f0   :  { %v13749_v10 = vld [vmem:[#allocation2 + $0xbb4] sm:$0xf0]  ;;  %3214 = vmatmul.bf16.vlgmr.msrb.gmra.mxu3 %v15262_v15  ;;  %v10266_v60 = vld [vmem:[#allocation2 + $0x9f8] sm:$0xf0] }
 0x1f1   :  { %v10489_v16 = vor.u32 %v13749_v10, %v10488_v7  ;;  %v10200_v18 = vld [vmem:[#allocation2 + $0x958] sm:$0xf]  ;;  %3258 = vmatpush.bf16.msra.mxu3 %v9501_v54  ;;  %3220 = vmatpush.bf16.msra.mxu0 %v10233_v14  ;;  %v2994_v7 = vpop.f32.mrf.mxu2  ;;  %v13393_v10 = vld [vmem:[#allocation2 + $0x9c] sm:$0xf] }
 0x1f2   :  { %v13677_v20 = vld [vmem:[#allocation2 + $0x974] sm:$0xf0]  ;;  %v2995_v12 = vadd.f32 %v2994_v7, %v2982_v63  ;;  %v9338_v14 = vld [vmem:[#allocation2 + $0x2b8] sm:$0xf0] }
 0x1f3   :  { %v10456_v21 = vld [vmem:[#allocation2 + $0xb58] sm:$0xf]  ;;  %v10201_v31 = vor.u32 %v13677_v20, %v10200_v18  ;;  %3233 = vmatpush.bf16.msra.mxu1 %v10489_v16  ;;  %3246 = vmatpush.bf16.msra.mxu2 %v9213_v17  ;;  %v2970_v18 = vpop.f32.mrf.mxu0  ;;  %v9341_v29 = vor.u32 %v13457_v13, %v9338_v14  ;;  %v13753_v63 = vld [vmem:[#allocation2 + $0xbdc] sm:$0xf] }
 0x1f4   :  { %v13741_v24 = vld [vmem:[#allocation2 + $0xb74] sm:$0xf0]  ;;  %v15345_v17 = vadd.f32 %v3007_v36, %v2995_v12  ;;  %v9722_v7 = vld [vmem:[#allocation2 + $0x5b8] sm:$0xf0] }
 0x1f5   :  { %v10457_v33 = vor.u32 %v13741_v24, %v10456_v21  ;;  %v10168_v37 = vld [vmem:[#allocation2 + $0x918] sm:$0xf]  ;;  %3259 = vmatpush.bf16.msra.mxu3 %v9469_v23  ;;  %3221 = vmatpush.bf16.msra.mxu0 %v10201_v31  ;;  %v9085_v21 = vor.u32 %v13393_v10, %v9082_v11  ;;  %v13385_v31 = vld [vmem:[#allocation2 + $0x5c] sm:$0xf] }
 0x1f6   :  { %v13669_v38 = vld [vmem:[#allocation2 + $0x934] sm:$0xf0]  ;;  %v9978_v10 = vld [vmem:[#allocation2 + $0x7b8] sm:$0xf0] }
 0x1f7   :  { %v10424_v39 = vld [vmem:[#allocation2 + $0xb18] sm:$0xf]  ;;  %v10169_v46 = vor.u32 %v13669_v38, %v10168_v37  ;;  %3234 = vmatpush.bf16.msra.mxu1 %v10457_v33  ;;  %3247 = vmatpush.bf16.msra.mxu2 %v9181_v34  ;;  %v9050_v33 = vld [vmem:[#allocation2 + $0x78] sm:$0xf0] }
 0x1f8   :  { %v13733_v41 = vld [vmem:[#allocation2 + $0xb34] sm:$0xf0]  ;;  %v13449_v34 = vld [vmem:[#allocation2 + $0x25c] sm:$0xf]  ;;  %v9053_v42 = vor.u32 %v13385_v31, %v9050_v33 }
 0x1f9   :  { %v10425_v48 = vor.u32 %v13733_v41, %v10424_v39  ;;  %v10136_v50 = vld [vmem:[#allocation2 + $0x8d8] sm:$0xf]  ;;  %3260 = vmatpush.bf16.msra.mxu3 %v9437_v40  ;;  %3222 = vmatpush.bf16.msra.mxu0 %v10169_v46  ;;  %v9306_v37 = vld [vmem:[#allocation2 + $0x278] sm:$0xf0]  ;;  %v2996_v46 = vpop.f32.mrf.mxu2 }
 0x1fa   :  { %v13661_v51 = vld [vmem:[#allocation2 + $0x8f4] sm:$0xf0]  ;;  %v9309_v47 = vor.u32 %v13449_v34, %v9306_v37  ;;  %v13681_v11 = vld [vmem:[#allocation2 + $0x99c] sm:$0xf] }
 0x1fb   :  { %v10392_v52 = vld [vmem:[#allocation2 + $0xad8] sm:$0xf]  ;;  %v10137_v0 = vor.u32 %v13661_v51, %v10136_v50  ;;  %3235 = vmatpush.bf16.msra.mxu1 %v10425_v48  ;;  %3248 = vmatpush.bf16.msra.mxu2 %v9149_v49  ;;  %v9018_v48 = vld [vmem:[#allocation2 + $0x38] sm:$0xf0]  ;;  %v3009_v51 = vpop.f32.mrf.mxu3 }
 0x1fc   :  { %v13725_v58 = vld [vmem:[#allocation2 + $0xaf4] sm:$0xf0]  ;;  %v13441_v49 = vld [vmem:[#allocation2 + $0x21c] sm:$0xf]  ;;  %v9021_v19 = vor.u32 %v13377_v45, %v9018_v48  ;;  %v3020_v48 = vpop.f32.mrf.mxu0 }
 0x1fd   :  { %v10393_v1 = vor.u32 %v13725_v58, %v10392_v52  ;;  %v10104_v3 = vld [vmem:[#allocation2 + $0x898] sm:$0xf]  ;;  %3261 = vmatpush.bf16.msra.mxu3 %v9405_v57  ;;  %3223 = vmatpush.bf16.msra.mxu0 %v10137_v0  ;;  %v9274_v50 = vld [vmem:[#allocation2 + $0x238] sm:$0xf0] }
 0x1fe   :  { %v13653_v5 = vld [vmem:[#allocation2 + $0x8b4] sm:$0xf0]  ;;  %v13561_v52 = vld [vmem:[#allocation2 + $0x5dc] sm:$0xf] }
 0x1ff   :  { %v10360_v6 = vld [vmem:[#allocation2 + $0xa98] sm:$0xf]  ;;  %v10105_v16 = vor.u32 %v13653_v5, %v10104_v3  ;;  %3236 = vmatpush.bf16.msra.mxu1 %v10393_v1  ;;  %3249 = vmatpush.bf16.msra.mxu2 %v9117_v2  ;;  %v10010_v58 = vld [vmem:[#allocation2 + $0x7f8] sm:$0xf0]  ;;  %v9277_v1 = vor.u32 %v13441_v49, %v9274_v50  ;;  %v9757_v2 = vor.u32 %v13561_v52, %v9754_v53 }
 0x200   :  { %v13717_v54 = vld [vmem:[#allocation2 + $0xab4] sm:$0xf0]  ;;  %v10522_v0 = vld [vmem:[#allocation2 + $0xbf8] sm:$0xf0]  ;;  %v10013_v3 = vor.u32 %v13625_v55, %v10010_v58  ;;  %v10269_v5 = vor.u32 %v13689_v56, %v10266_v60  ;;  %v3033_v55 = vpop.f32.mrf.mxu1 }
 0x201   :  { %v10361_v20 = vor.u32 %v13717_v54, %v10360_v6  ;;  %v10072_v23 = vld [vmem:[#allocation2 + $0x858] sm:$0xf]  ;;  %3262 = vmatpush.bf16.msra.mxu3 %v9373_v27  ;;  %3224 = vmatpush.bf16.msra.mxu0 %v10105_v16  ;;  %v13553_v6 = vld [vmem:[#allocation2 + $0x59c] sm:$0xf]  ;;  %v10525_v54 = vor.u32 %v13753_v63, %v10522_v0 }
 0x202   :  { %v13645_v24 = vld [vmem:[#allocation2 + $0x874] sm:$0xf0]  ;;  %v13617_v27 = vld [vmem:[#allocation2 + $0x79c] sm:$0xf]  ;;  %v9725_v14 = vor.u32 %v13553_v6, %v9722_v7 }
 0x203   :  { %v10328_v26 = vld [vmem:[#allocation2 + $0xa58] sm:$0xf]  ;;  %v10073_v38 = vor.u32 %v13645_v24, %v10072_v23  ;;  %3237 = vmatpush.bf16.msra.mxu1 %v10361_v20  ;;  %3250 = vmatpush.bf16.msra.mxu2 %v9085_v21  ;;  %v10234_v12 = vld [vmem:[#allocation2 + $0x9b8] sm:$0xf0]  ;;  %v9981_v16 = vor.u32 %v13617_v27, %v9978_v10 }
 0x204   :  { %v13709_v30 = vld [vmem:[#allocation2 + $0xa74] sm:$0xf0]  ;;  %v13745_v36 = vld [vmem:[#allocation2 + $0xb9c] sm:$0xf]  ;;  %v10237_v18 = vor.u32 %v13681_v11, %v10234_v12 }
 0x205   :  { %v10040_v39 = vld [vmem:[#allocation2 + $0x818] sm:$0xf]  ;;  %v10329_v41 = vor.u32 %v13709_v30, %v10328_v26  ;;  %3263 = vmatpush.bf16.msra.mxu3 %v9341_v29  ;;  %3225 = vmatpush.bf16.msra.mxu0 %v10073_v38  ;;  %v10490_v13 = vld [vmem:[#allocation2 + $0xbb8] sm:$0xf0] }
 0x206   :  { %v13637_v40 = vld [vmem:[#allocation2 + $0x834] sm:$0xf0]  ;;  %v13545_v20 = vld [vmem:[#allocation2 + $0x55c] sm:$0xf]  ;;  %v10493_v24 = vor.u32 %v13745_v36, %v10490_v13  ;;  %v3046_v7 = vpop.f32.mrf.mxu2 }
 0x207   :  { %v10296_v43 = vld [vmem:[#allocation2 + $0xa18] sm:$0xf]  ;;  %v10041_v57 = vor.u32 %v13637_v40, %v10040_v39  ;;  %3238 = vmatpush.bf16.msra.mxu1 %v10329_v41  ;;  %3251 = vmatpush.bf16.msra.mxu2 %v9053_v42  ;;  %v9690_v21 = vld [vmem:[#allocation2 + $0x578] sm:$0xf0]  ;;  %v767_v41 = vperm.slane %v15335_v62, 4 }
 0x208   :  { %v13701_v44 = vld [vmem:[#allocation2 + $0xa34] sm:$0xf0]  ;;  %v13609_v23 = vld [vmem:[#allocation2 + $0x75c] sm:$0xf]  ;;  %v9693_v33 = vor.u32 %v13545_v20, %v9690_v21  ;;  %v3059_v36 = vpop.f32.mrf.mxu3  ;;  %v3022_v20 = vpop.f32.mrf.mxu0 }
 0x209   :  { %v10297_v61 = vor.u32 %v13701_v44, %v10296_v43  ;;  %3264 = vmatpush.bf16.msra.mxu3 %v9309_v47  ;;  %3226 = vmatpush.bf16.msra.mxu0 %v10041_v57  ;;  %v9946_v26 = vld [vmem:[#allocation2 + $0x778] sm:$0xf0]  ;;  %v3021_v53 = vadd.f32 %v3020_v48, %v767_v41  ;;  %v10568_v20 = vld [vmem:[#allocation6 + $0x50] sm:$0xf] }
 0x20a   :  { %v13673_v28 = vld [vmem:[#allocation2 + $0x95c] sm:$0xf]  ;;  %v9949_v37 = vor.u32 %v13609_v23, %v9946_v26 }
 0x20b   :  { %3239 = vmatpush.bf16.msra.mxu1 %v10297_v61  ;;  %3252 = vmatpush.bf16.msra.mxu2 %v9021_v19  ;;  %v10202_v29 = vld [vmem:[#allocation2 + $0x978] sm:$0xf0]  ;;  %v3034_v63 = vadd.f32 %v3033_v55, %v3021_v53  ;;  %v10648_v53 = vld [vmem:[#allocation6 + $0xf0] sm:$0xf] }
 0x20c   :  { %3227 = vmatmul.bf16.vlgmr.msra.gmra.mxu0 %v15279_v32  ;;  %v13737_v30 = vld [vmem:[#allocation2 + $0xb5c] sm:$0xf]  ;;  %v10205_v38 = vor.u32 %v13673_v28, %v10202_v29  ;;  %v3035_v29 = vpop.f32.mrf.mxu1 }
 0x20d   :  { %3265 = vmatpush.bf16.msra.mxu3 %v9277_v1  ;;  %3271 = vmatpush.bf16.msrb.mxu0 %v9757_v2  ;;  %v10458_v31 = vld [vmem:[#allocation2 + $0xb78] sm:$0xf0]  ;;  %v3047_v12 = vadd.f32 %v3046_v7, %v3034_v63  ;;  %v13821_v63 = vld [vmem:[#allocation6 + $0x1f4] sm:$0xf0]  ;;  %v10640_v7 = vld [vmem:[#allocation6 + $0xe0] sm:$0xf] }
 0x20e   :  { %3240 = vmatmul.bf16.vlgmr.msra.gmra.mxu1 %v15281_v35  ;;  %3253 = vmatmul.bf16.vlgmr.msra.gmra.mxu2 %v15257_v9  ;;  %v13537_v34 = vld [vmem:[#allocation2 + $0x51c] sm:$0xf]  ;;  %v10461_v42 = vor.u32 %v13737_v30, %v10458_v31  ;;  %v13801_v29 = vld [vmem:[#allocation6 + $0x154] sm:$0xf0] }
 0x20f   :  { %3284 = vmatpush.bf16.msrb.mxu1 %v10013_v3  ;;  %3297 = vmatpush.bf16.msrb.mxu2 %v10269_v5  ;;  %v9658_v39 = vld [vmem:[#allocation2 + $0x538] sm:$0xf0] }
 0x210   :  { %3266 = vmatmul.bf16.vlgmr.msra.gmra.mxu3 %v15270_v25  ;;  %v13601_v40 = vld [vmem:[#allocation2 + $0x71c] sm:$0xf]  ;;  %v9661_v47 = vor.u32 %v13537_v34, %v9658_v39 }
 0x211   :  { %3310 = vmatpush.bf16.msrb.mxu3 %v10525_v54  ;;  %3272 = vmatpush.bf16.msrb.mxu0 %v9725_v14  ;;  %v9914_v43 = vld [vmem:[#allocation2 + $0x738] sm:$0xf0] }
 0x212   :  { %v13665_v44 = vld [vmem:[#allocation2 + $0x91c] sm:$0xf]  ;;  %v9917_v25 = vor.u32 %v13601_v40, %v9914_v43 }
 0x213   :  { %3285 = vmatpush.bf16.msrb.mxu1 %v9981_v16  ;;  %3298 = vmatpush.bf16.msrb.mxu2 %v10237_v18  ;;  %v10170_v9 = vld [vmem:[#allocation2 + $0x938] sm:$0xf0]  ;;  %v15352_v18 = vadd.f32 %v3059_v36, %v3047_v12  ;;  %v10768_v12 = vld [vmem:[#allocation6 + $0x1e0] sm:$0xf]  ;;  %v13819_v36 = vld [vmem:[#allocation6 + $0x1e4] sm:$0xf0] }
 0x214   :  { %v13729_v45 = vld [vmem:[#allocation2 + $0xb1c] sm:$0xf]  ;;  %v10173_v49 = vor.u32 %v13665_v44, %v10170_v9 }
 0x215   :  { %3311 = vmatpush.bf16.msrb.mxu3 %v10493_v24  ;;  %v10426_v46 = vld [vmem:[#allocation2 + $0xb38] sm:$0xf0]  ;;  %3273 = vmatpush.bf16.msrb.mxu0 %v9693_v33 }
 0x216   :  { %v13529_v50 = vld [vmem:[#allocation2 + $0x4dc] sm:$0xf]  ;;  %v10429_v57 = vor.u32 %v13729_v45, %v10426_v46  ;;  %v3048_v46 = vpop.f32.mrf.mxu2 }
 0x217   :  { %3286 = vmatpush.bf16.msrb.mxu1 %v9949_v37  ;;  %3299 = vmatpush.bf16.msrb.mxu2 %v10205_v38  ;;  %v9626_v51 = vld [vmem:[#allocation2 + $0x4f8] sm:$0xf0] }
 0x218   :  { %v13593_v52 = vld [vmem:[#allocation2 + $0x6dc] sm:$0xf]  ;;  %v9629_v0 = vor.u32 %v13529_v50, %v9626_v51  ;;  %v3061_v50 = vpop.f32.mrf.mxu3  ;;  %v10584_v51 = vld [vmem:[#allocation6 + $0x70] sm:$0xf] }
 0x219   :  { %3312 = vmatpush.bf16.msrb.mxu3 %v10461_v42  ;;  %v9882_v58 = vld [vmem:[#allocation2 + $0x6f8] sm:$0xf0]  ;;  %3274 = vmatpush.bf16.msrb.mxu0 %v9661_v47  ;;  %v13781_v50 = vld [vmem:[#allocation6 + $0xb4] sm:$0xf0] }
 0x21a   :  { %v13657_v56 = vld [vmem:[#allocation2 + $0x8dc] sm:$0xf]  ;;  %v9885_v1 = vor.u32 %v13593_v52, %v9882_v58  ;;  %v13773_v52 = vld [vmem:[#allocation6 + $0x74] sm:$0xf0]  ;;  %v10712_v58 = vld [vmem:[#allocation6 + $0x170] sm:$0xf] }
 0x21b   :  { %v10138_v60 = vld [vmem:[#allocation2 + $0x8f8] sm:$0xf0]  ;;  %3287 = vmatpush.bf16.msrb.mxu1 %v9917_v25  ;;  %3300 = vmatpush.bf16.msrb.mxu2 %v10173_v49 }
 0x21c   :  { %v13721_v61 = vld [vmem:[#allocation2 + $0xadc] sm:$0xf]  ;;  %v10141_v2 = vor.u32 %v13657_v56, %v10138_v60  ;;  %v13805_v56 = vld [vmem:[#allocation6 + $0x174] sm:$0xf0] }
 0x21d   :  { %v10394_v19 = vld [vmem:[#allocation2 + $0xaf8] sm:$0xf0]  ;;  %3313 = vmatpush.bf16.msrb.mxu3 %v10429_v57  ;;  %3275 = vmatpush.bf16.msrb.mxu0 %v9629_v0  ;;  %v13789_v57 = vld [vmem:[#allocation6 + $0xf4] sm:$0xf0] }
 0x21e   :  { %v13521_v3 = vld [vmem:[#allocation2 + $0x49c] sm:$0xf]  ;;  %v10397_v27 = vor.u32 %v13721_v61, %v10394_v19  ;;  %v10776_v19 = vld [vmem:[#allocation6 + $0x1f0] sm:$0xf] }
 0x21f   :  { %v9594_v5 = vld [vmem:[#allocation2 + $0x4b8] sm:$0xf0]  ;;  %3288 = vmatpush.bf16.msrb.mxu1 %v9885_v1  ;;  %3301 = vmatpush.bf16.msrb.mxu2 %v10141_v2  ;;  %v10585_v1 = vor.u32 %v13773_v52, %v10584_v51  ;;  %v10649_v2 = vor.u32 %v13789_v57, %v10648_v53  ;;  %v10680_v51 = vld [vmem:[#allocation6 + $0x130] sm:$0xf]  ;;  %v13797_v52 = vld [vmem:[#allocation6 + $0x134] sm:$0xf0] }
 0x220   :  { %v13585_v6 = vld [vmem:[#allocation2 + $0x69c] sm:$0xf]  ;;  %v9597_v16 = vor.u32 %v13521_v3, %v9594_v5  ;;  %v10713_v3 = vor.u32 %v13805_v56, %v10712_v58  ;;  %v10576_v5 = vld [vmem:[#allocation6 + $0x60] sm:$0xf]  ;;  %v10744_v53 = vld [vmem:[#allocation6 + $0x1b0] sm:$0xf]  ;;  %v10681_v56 = vor.u32 %v13797_v52, %v10680_v51 }
 0x221   :  { %v9850_v54 = vld [vmem:[#allocation2 + $0x6b8] sm:$0xf0]  ;;  %3314 = vmatpush.bf16.msrb.mxu3 %v10397_v27  ;;  %v10777_v27 = vor.u32 %v13821_v63, %v10776_v19  ;;  %v10608_v19 = vld [vmem:[#allocation6 + $0xa0] sm:$0xf] }
 0x222   :  { %v13649_v10 = vld [vmem:[#allocation2 + $0x89c] sm:$0xf]  ;;  %v9853_v21 = vor.u32 %v13585_v6, %v9850_v54  ;;  %3276 = vmatpush.bf16.msrb.mxu0 %v9597_v16  ;;  %v13771_v6 = vld [vmem:[#allocation6 + $0x64] sm:$0xf0] }
 0x223   :  { %v10106_v11 = vld [vmem:[#allocation2 + $0x8b8] sm:$0xf0]  ;;  %v13787_v54 = vld [vmem:[#allocation6 + $0xe4] sm:$0xf0] }
 0x224   :  { %v13713_v13 = vld [vmem:[#allocation2 + $0xa9c] sm:$0xf]  ;;  %v10109_v23 = vor.u32 %v13649_v10, %v10106_v11  ;;  %3289 = vmatpush.bf16.msrb.mxu1 %v9853_v21  ;;  %v10704_v10 = vld [vmem:[#allocation6 + $0x160] sm:$0xf]  ;;  %v13803_v11 = vld [vmem:[#allocation6 + $0x164] sm:$0xf0] }
 0x225   :  { %v10362_v14 = vld [vmem:[#allocation2 + $0xab8] sm:$0xf0]  ;;  %v10705_v16 = vor.u32 %v13803_v11, %v10704_v10  ;;  %v13769_v21 = vld [vmem:[#allocation6 + $0x54] sm:$0xf0] }
 0x226   :  { %v13513_v24 = vld [vmem:[#allocation2 + $0x45c] sm:$0xf]  ;;  %v10365_v30 = vor.u32 %v13713_v13, %v10362_v14  ;;  %3302 = vmatpush.bf16.msrb.mxu2 %v10109_v23  ;;  %v10577_v13 = vor.u32 %v13771_v6, %v10576_v5  ;;  %v10641_v14 = vor.u32 %v13787_v54, %v10640_v7  ;;  %v10632_v23 = vld [vmem:[#allocation6 + $0xd0] sm:$0xf]  ;;  %v10736_v5 = vld [vmem:[#allocation6 + $0x1a0] sm:$0xf] }
 0x227   :  { %v9562_v26 = vld [vmem:[#allocation2 + $0x478] sm:$0xf0]  ;;  %v13811_v6 = vld [vmem:[#allocation6 + $0x1a4] sm:$0xf0] }
 0x228   :  { %v13577_v28 = vld [vmem:[#allocation2 + $0x65c] sm:$0xf]  ;;  %v9565_v39 = vor.u32 %v13513_v24, %v9562_v26  ;;  %3315 = vmatpush.bf16.msrb.mxu3 %v10365_v30  ;;  %v10769_v24 = vor.u32 %v13819_v36, %v10768_v12  ;;  %v13785_v26 = vld [vmem:[#allocation6 + $0xd4] sm:$0xf0]  ;;  %v10760_v30 = vld [vmem:[#allocation6 + $0x1d0] sm:$0xf]  ;;  %v15364_v7 = vpop.f32.mrf.mxu3 }
 0x229   :  { %v9818_v31 = vld [vmem:[#allocation2 + $0x678] sm:$0xf0]  ;;  %v10536_v36 = vld [vmem:[#allocation6 + $0x10] sm:$0xf] }
 0x22a   :  { %v13641_v33 = vld [vmem:[#allocation2 + $0x85c] sm:$0xf]  ;;  %v9821_v42 = vor.u32 %v13577_v28, %v9818_v31  ;;  %3277 = vmatpush.bf16.msrb.mxu0 %v9565_v39  ;;  %v10696_v28 = vld [vmem:[#allocation6 + $0x150] sm:$0xf]  ;;  %v13817_v31 = vld [vmem:[#allocation6 + $0x1d4] sm:$0xf0] }
 0x22b   :  { %v10074_v34 = vld [vmem:[#allocation2 + $0x878] sm:$0xf0]  ;;  %v10624_v39 = vld [vmem:[#allocation6 + $0xc0] sm:$0xf] }
 0x22c   :  { %v13705_v37 = vld [vmem:[#allocation2 + $0xa5c] sm:$0xf]  ;;  %v10077_v43 = vor.u32 %v13641_v33, %v10074_v34  ;;  %3290 = vmatpush.bf16.msrb.mxu1 %v9821_v42  ;;  %v10569_v33 = vor.u32 %v13769_v21, %v10568_v20  ;;  %v10633_v34 = vor.u32 %v13785_v26, %v10632_v23  ;;  %v10688_v42 = vld [vmem:[#allocation6 + $0x140] sm:$0xf]  ;;  %v13777_v20 = vld [vmem:[#allocation6 + $0x94] sm:$0xf0] }
 0x22d   :  { %v10330_v38 = vld [vmem:[#allocation2 + $0xa78] sm:$0xf0]  ;;  %v10664_v21 = vld [vmem:[#allocation6 + $0x110] sm:$0xf]  ;;  %v13793_v23 = vld [vmem:[#allocation6 + $0x114] sm:$0xf0] }
 0x22e   :  { %v13505_v40 = vld [vmem:[#allocation2 + $0x41c] sm:$0xf]  ;;  %v10333_v47 = vor.u32 %v13705_v37, %v10330_v38  ;;  %3303 = vmatpush.bf16.msrb.mxu2 %v10077_v43  ;;  %v10697_v37 = vor.u32 %v13801_v29, %v10696_v28  ;;  %v10560_v38 = vld [vmem:[#allocation6 + $0x40] sm:$0xf]  ;;  %v13809_v26 = vld [vmem:[#allocation6 + $0x194] sm:$0xf0] }
 0x22f   :  { %v9530_v41 = vld [vmem:[#allocation2 + $0x438] sm:$0xf0]  ;;  %v10752_v43 = vld [vmem:[#allocation6 + $0x1c0] sm:$0xf] }
 0x230   :  { %v13569_v44 = vld [vmem:[#allocation2 + $0x61c] sm:$0xf]  ;;  %v9533_v55 = vor.u32 %v13505_v40, %v9530_v41  ;;  %3316 = vmatpush.bf16.msrb.mxu3 %v10333_v47  ;;  %v10761_v40 = vor.u32 %v13817_v31, %v10760_v30  ;;  %v13783_v41 = vld [vmem:[#allocation6 + $0xc4] sm:$0xf0]  ;;  %v10552_v47 = vld [vmem:[#allocation6 + $0x30] sm:$0xf]  ;;  %v10665_v31 = vor.u32 %v13793_v23, %v10664_v21 }
 0x231   :  { %v9786_v9 = vld [vmem:[#allocation2 + $0x638] sm:$0xf0]  ;;  %v10528_v29 = vld [vmem:[#allocation6] sm:$0xf]  ;;  %v13831_v21 = vld [vmem:[#allocation6 + $0x244] sm:$0xf0] }
 0x232   :  { %v13633_v45 = vld [vmem:[#allocation2 + $0x81c] sm:$0xf]  ;;  %v9789_v60 = vor.u32 %v13569_v44, %v9786_v9  ;;  %3278 = vmatpush.bf16.msrb.mxu0 %v9533_v55  ;;  %v15358_v44 = vpop.f32.mrf.mxu0  ;;  %v15360_v9 = vpop.f32.mrf.mxu1  ;;  %v13813_v55 = vld [vmem:[#allocation6 + $0x1b4] sm:$0xf0]  ;;  %v10880_v23 = vld [vmem:[#allocation6 + $0x2c0] sm:$0xf] }
 0x233   :  { %v10042_v48 = vld [vmem:[#allocation2 + $0x838] sm:$0xf0]  ;;  %v10745_v63 = vor.u32 %v13813_v55, %v10744_v53  ;;  %v10968_v53 = vld [vmem:[#allocation6 + $0x370] sm:$0xf]  ;;  %v13869_v55 = vld [vmem:[#allocation6 + $0x374] sm:$0xf0] }
 0x234   :  { %v13697_v25 = vld [vmem:[#allocation2 + $0xa1c] sm:$0xf]  ;;  %v10045_v61 = vor.u32 %v13633_v45, %v10042_v48  ;;  %3291 = vmatpush.bf16.msrb.mxu1 %v9789_v60  ;;  %v10625_v45 = vor.u32 %v13783_v41, %v10624_v39  ;;  %v13765_v48 = vld [vmem:[#allocation6 + $0x34] sm:$0xf0]  ;;  %v10544_v60 = vld [vmem:[#allocation6 + $0x20] sm:$0xf] }
 0x235   :  { %v10298_v49 = vld [vmem:[#allocation2 + $0xa38] sm:$0xf0]  ;;  %3279 = vmatmul.bf16.vlgmr.msrb.gmra.mxu0 %v15255_v8  ;;  %v13767_v8 = vld [vmem:[#allocation6 + $0x44] sm:$0xf0]  ;;  %v10553_v57 = vor.u32 %v13765_v48, %v10552_v47  ;;  %v3323_v47 = vmax.f32 %v15309_v4, 0.0  ;;  %v768_v4 = vperm.slane %v15335_v62, 5 }
 0x236   :  { %v10301_v0 = vor.u32 %v13697_v25, %v10298_v49  ;;  %3304 = vmatpush.bf16.msrb.mxu2 %v10045_v61  ;;  %4113 = vmatpush.bf16.msra.mxu0 %v10585_v1  ;;  %v10616_v25 = vld [vmem:[#allocation6 + $0xb0] sm:$0xf]  ;;  %v13763_v61 = vld [vmem:[#allocation6 + $0x24] sm:$0xf0]  ;;  %v10672_v1 = vld [vmem:[#allocation6 + $0x120] sm:$0xf] }
 0x237   :  { %3292 = vmatmul.bf16.vlgmr.msrb.gmra.mxu1 %v15262_v15  ;;  %v13799_v15 = vld [vmem:[#allocation6 + $0x144] sm:$0xf0]  ;;  %v10617_v58 = vor.u32 %v13781_v50, %v10616_v25  ;;  %v10545_v54 = vor.u32 %v13763_v61, %v10544_v60  ;;  %v3325_v50 = vmax.f32 %v15333_v59, 0.0  ;;  %v10896_v61 = vld [vmem:[#allocation6 + $0x2e0] sm:$0xf] }
 0x238   :  { %3317 = vmatpush.bf16.msrb.mxu3 %v10301_v0  ;;  %4126 = vmatpush.bf16.msra.mxu1 %v10649_v2  ;;  %v10689_v46 = vor.u32 %v13799_v15, %v10688_v42  ;;  %v13779_v0 = vld [vmem:[#allocation6 + $0xa4] sm:$0xf0]  ;;  %v10840_v15 = vld [vmem:[#allocation6 + $0x270] sm:$0xf] }
 0x239   :  { %3305 = vmatmul.bf16.vlgmr.msrb.gmra.mxu2 %v15279_v32  ;;  %v13815_v32 = vld [vmem:[#allocation6 + $0x1c4] sm:$0xf0]  ;;  %v10609_v11 = vor.u32 %v13779_v0, %v10608_v19  ;;  %v15375_v0 = vpack.c.bf16 %v3325_v50, %v3325_v50  ;;  %v3073_v50 = vadd.f32 %v15358_v44, %v15352_v18 }
 0x23a   :  { %4139 = vmatpush.bf16.msra.mxu2 %v10713_v3  ;;  %4114 = vmatpush.bf16.msra.mxu0 %v10577_v13  ;;  %v10753_v49 = vor.u32 %v13815_v32, %v10752_v43  ;;  %v13795_v2 = vld [vmem:[#allocation6 + $0x124] sm:$0xf0]  ;;  %v15362_v3 = vpop.f32.mrf.mxu2  ;;  %v3087_v10 = vpop.f32.mrf.mxu1  ;;  %v13761_v13 = vld [vmem:[#allocation6 + $0x14] sm:$0xf0] }
 0x23b   :  { %3318 = vmatmul.bf16.vlgmr.msrb.gmra.mxu3 %v15281_v35  ;;  %v10561_v35 = vor.u32 %v13767_v8, %v10560_v38  ;;  %v10673_v12 = vor.u32 %v13795_v2, %v10672_v1  ;;  %v10537_v28 = vor.u32 %v13761_v13, %v10536_v36  ;;  %v10656_v8 = vld [vmem:[#allocation6 + $0x100] sm:$0xf]  ;;  %v13791_v39 = vld [vmem:[#allocation6 + $0x104] sm:$0xf0]  ;;  %v13837_v43 = vld [vmem:[#allocation6 + $0x274] sm:$0xf0]  ;;  %v3113_v32 = vpop.f32.mrf.mxu3 }
 0x23c   :  { %4152 = vmatpush.bf16.msra.mxu3 %v10777_v27  ;;  %4127 = vmatpush.bf16.msra.mxu1 %v10641_v14  ;;  %v3074_v27 = vpop.f32.mrf.mxu0  ;;  %v10600_v14 = vld [vmem:[#allocation6 + $0x90] sm:$0xf]  ;;  %v13807_v42 = vld [vmem:[#allocation6 + $0x184] sm:$0xf0]  ;;  %v10657_v25 = vor.u32 %v13791_v39, %v10656_v8  ;;  %v10841_v52 = vor.u32 %v13837_v43, %v10840_v15  ;;  %v10960_v1 = vld [vmem:[#allocation6 + $0x360] sm:$0xf] }
 0x23d   :  { %v10601_v30 = vor.u32 %v13777_v20, %v10600_v14  ;;  %v13835_v60 = vld [vmem:[#allocation6 + $0x264] sm:$0xf0]  ;;  %v10824_v27 = vld [vmem:[#allocation6 + $0x250] sm:$0xf]  ;;  %v13865_v14 = vld [vmem:[#allocation6 + $0x354] sm:$0xf0] }
 0x23e   :  { %4140 = vmatpush.bf16.msra.mxu2 %v10705_v16  ;;  %4115 = vmatpush.bf16.msra.mxu0 %v10569_v33  ;;  %v10737_v16 = vor.u32 %v13811_v6, %v10736_v5  ;;  %v13759_v33 = vld [vmem:[#allocation6 + $0x4] sm:$0xf0]  ;;  %v3099_v6 = vadd.f32 %v15362_v3, %v768_v4  ;;  %v10888_v10 = vld [vmem:[#allocation6 + $0x2d0] sm:$0xf]  ;;  %v10816_v20 = vld [vmem:[#allocation6 + $0x240] sm:$0xf] }
 0x23f   :  { %v13851_v19 = vld [vmem:[#allocation6 + $0x2e4] sm:$0xf0]  ;;  %v10952_v13 = vld [vmem:[#allocation6 + $0x350] sm:$0xf]  ;;  %v13861_v43 = vld [vmem:[#allocation6 + $0x334] sm:$0xf0] }
 0x240   :  { %4153 = vmatpush.bf16.msra.mxu3 %v10769_v24  ;;  %4128 = vmatpush.bf16.msra.mxu1 %v10633_v34  ;;  %v10728_v24 = vld [vmem:[#allocation6 + $0x190] sm:$0xf]  ;;  %v10592_v34 = vld [vmem:[#allocation6 + $0x80] sm:$0xf]  ;;  %v13867_v2 = vld [vmem:[#allocation6 + $0x364] sm:$0xf0]  ;;  %v10897_v62 = vor.u32 %v13851_v19, %v10896_v61 }
 0x241   :  { %v10729_v38 = vor.u32 %v13809_v26, %v10728_v24  ;;  %v13847_v24 = vld [vmem:[#allocation6 + $0x2c4] sm:$0xf0]  ;;  %v10953_v26 = vor.u32 %v13865_v14, %v10952_v13  ;;  %v10872_v39 = vld [vmem:[#allocation6 + $0x2b0] sm:$0xf]  ;;  %v13841_v19 = vld [vmem:[#allocation6 + $0x294] sm:$0xf0] }
 0x242   :  { %4141 = vmatpush.bf16.msra.mxu2 %v10697_v37  ;;  %4116 = vmatpush.bf16.msra.mxu0 %v10561_v35  ;;  %v13775_v37 = vld [vmem:[#allocation6 + $0x84] sm:$0xf0]  ;;  %v3100_v41 = vpop.f32.mrf.mxu2  ;;  %v10529_v35 = vor.u32 %v13759_v33, %v10528_v29  ;;  %v10881_v33 = vor.u32 %v13847_v24, %v10880_v23  ;;  %v10936_v15 = vld [vmem:[#allocation6 + $0x330] sm:$0xf] }
 0x243   :  { %v10593_v48 = vor.u32 %v13775_v37, %v10592_v34  ;;  %v10808_v34 = vld [vmem:[#allocation6 + $0x230] sm:$0xf]  ;;  %v13829_v37 = vld [vmem:[#allocation6 + $0x234] sm:$0xf0] }
 0x244   :  { %4154 = vmatpush.bf16.msra.mxu3 %v10761_v40  ;;  %4129 = vmatpush.bf16.msra.mxu1 %v10625_v45  ;;  %v10720_v40 = vld [vmem:[#allocation6 + $0x180] sm:$0xf]  ;;  %v10904_v45 = vld [vmem:[#allocation6 + $0x2f0] sm:$0xf]  ;;  %v10809_v41 = vor.u32 %v13829_v37, %v10808_v34  ;;  %v13804_v34 = vld [vmem:[#allocation6 + $0x174] sm:$0xf] }
 0x245   :  { %v10721_v51 = vor.u32 %v13807_v42, %v10720_v40  ;;  %v10856_v61 = vld [vmem:[#allocation6 + $0x290] sm:$0xf]  ;;  %v10714_v37 = vld [vmem:[#allocation6 + $0x178] sm:$0xf0] }
 0x246   :  { %4142 = vmatpush.bf16.msra.mxu2 %v10689_v46  ;;  %4117 = vmatpush.bf16.msra.mxu0 %v10553_v57  ;;  %v13853_v46 = vld [vmem:[#allocation6 + $0x2f4] sm:$0xf0]  ;;  %v3326_v57 = vmax.f32 %v15345_v17, 0.0  ;;  %v11032_v14 = vld [vmem:[#allocation6 + $0x3f0] sm:$0xf] }
 0x247   :  { %v3124_v29 = vpop.f32.mrf.mxu0 }
 0x248   :  { %4155 = vmatpush.bf16.msra.mxu3 %v10753_v49  ;;  %4130 = vmatpush.bf16.msra.mxu1 %v10617_v58  ;;  %v3324_v49 = vmax.f32 %v15319_v22, 0.0  ;;  %v10905_v58 = vor.u32 %v13853_v46, %v10904_v45  ;;  %v10969_v22 = vor.u32 %v13869_v55, %v10968_v53  ;;  %v15377_v5 = vpack.c.bf16 %v3326_v57, %v3326_v57  ;;  %v13827_v45 = vld [vmem:[#allocation6 + $0x224] sm:$0xf0]  ;;  %v10928_v55 = vld [vmem:[#allocation6 + $0x320] sm:$0xf] }
 0x249   :  { %v3137_v8 = vpop.f32.mrf.mxu1  ;;  %v13859_v57 = vld [vmem:[#allocation6 + $0x324] sm:$0xf0] }
 0x24a   :  { %4143 = vmatpush.bf16.msra.mxu2 %v10681_v56  ;;  %4118 = vmatpush.bf16.msra.mxu0 %v10545_v54  ;;  %v10832_v56 = vld [vmem:[#allocation6 + $0x260] sm:$0xf]  ;;  %v15373_v59 = vpack.c.bf16 %v3324_v49, %v3324_v49  ;;  %v13833_v54 = vld [vmem:[#allocation6 + $0x254] sm:$0xf0]  ;;  %v10937_v49 = vor.u32 %v13861_v43, %v10936_v15 }
 0x24b   :  { %v10833_v17 = vor.u32 %v13835_v60, %v10832_v56  ;;  %v10825_v36 = vor.u32 %v13833_v54, %v10824_v27  ;;  %v10792_v56 = vld [vmem:[#allocation6 + $0x210] sm:$0xf]  ;;  %v13825_v60 = vld [vmem:[#allocation6 + $0x214] sm:$0xf0]  ;;  %v10857_v27 = vor.u32 %v13841_v19, %v10856_v61  ;;  %v10848_v54 = vld [vmem:[#allocation6 + $0x280] sm:$0xf] }
 0x24c   :  { %4156 = vmatpush.bf16.msra.mxu3 %v10745_v63  ;;  %4131 = vmatpush.bf16.msra.mxu1 %v10609_v11  ;;  %v15371_v63 = vpack.c.bf16 %v3323_v47, %v3323_v47  ;;  %v13849_v11 = vld [vmem:[#allocation6 + $0x2d4] sm:$0xf0]  ;;  %v10864_v47 = vld [vmem:[#allocation6 + $0x2a0] sm:$0xf]  ;;  %v10793_v44 = vor.u32 %v13825_v60, %v10792_v56  ;;  %v13766_v56 = vld [vmem:[#allocation6 + $0x44] sm:$0xf] }
 0x24d   :  { %v10889_v3 = vor.u32 %v13849_v11, %v10888_v10  ;;  %v13839_v10 = vld [vmem:[#allocation6 + $0x284] sm:$0xf0]  ;;  %v13772_v11 = vld [vmem:[#allocation6 + $0x74] sm:$0xf]  ;;  %v10562_v19 = vld [vmem:[#allocation6 + $0x48] sm:$0xf0] }
 0x24e   :  { %4144 = vmatpush.bf16.msra.mxu2 %v10673_v12  ;;  %4119 = vmatpush.bf16.msra.mxu0 %v10537_v28  ;;  %v10961_v12 = vor.u32 %v13867_v2, %v10960_v1  ;;  %v10817_v28 = vor.u32 %v13831_v21, %v10816_v20  ;;  %v3086_v1 = vadd.f32 %v15360_v9, %v3073_v50  ;;  %v13823_v2 = vld [vmem:[#allocation6 + $0x204] sm:$0xf0]  ;;  %v10650_v20 = vld [vmem:[#allocation6 + $0xf8] sm:$0xf0]  ;;  %v11016_v50 = vld [vmem:[#allocation6 + $0x3d0] sm:$0xf] }
 0x24f   :  { %v3126_v53 = vpop.f32.mrf.mxu0  ;;  %v13800_v60 = vld [vmem:[#allocation6 + $0x154] sm:$0xf] }
 0x250   :  { %4157 = vmatpush.bf16.msra.mxu3 %v10737_v16  ;;  %4132 = vmatpush.bf16.msra.mxu1 %v10601_v30  ;;  %v3112_v16 = vadd.f32 %v15364_v7, %v3099_v6  ;;  %v10944_v30 = vld [vmem:[#allocation6 + $0x340] sm:$0xf]  ;;  %v13845_v7 = vld [vmem:[#allocation6 + $0x2b4] sm:$0xf0]  ;;  %v3327_v23 = vmax.f32 %v3086_v1, 0.0 }
 0x251   :  { %v10873_v32 = vor.u32 %v13845_v7, %v10872_v39  ;;  %v3150_v46 = vpop.f32.mrf.mxu2  ;;  %v3139_v4 = vpop.f32.mrf.mxu1  ;;  %v13857_v6 = vld [vmem:[#allocation6 + $0x314] sm:$0xf0]  ;;  %v11024_v39 = vld [vmem:[#allocation6 + $0x3e0] sm:$0xf]  ;;  %v13883_v7 = vld [vmem:[#allocation6 + $0x3e4] sm:$0xf0] }
 0x252   :  { %4145 = vmatpush.bf16.msra.mxu2 %v10665_v31  ;;  %4120 = vmatpush.bf16.msra.mxu0 %v10529_v35  ;;  %v13863_v31 = vld [vmem:[#allocation6 + $0x344] sm:$0xf0]  ;;  %v10800_v35 = vld [vmem:[#allocation6 + $0x220] sm:$0xf]  ;;  %v11025_v15 = vor.u32 %v13883_v7, %v11024_v39  ;;  %v10634_v53 = vld [vmem:[#allocation6 + $0xd8] sm:$0xf0] }
 0x253   :  { %v10945_v40 = vor.u32 %v13863_v31, %v10944_v30  ;;  %v10849_v30 = vor.u32 %v13839_v10, %v10848_v54  ;;  %v10698_v4 = vld [vmem:[#allocation6 + $0x158] sm:$0xf0]  ;;  %v13782_v1 = vld [vmem:[#allocation6 + $0xc4] sm:$0xf]  ;;  %v10690_v10 = vld [vmem:[#allocation6 + $0x148] sm:$0xf0] }
 0x254   :  { %4158 = vmatpush.bf16.msra.mxu3 %v10729_v38  ;;  %4133 = vmatpush.bf16.msra.mxu1 %v10593_v48  ;;  %v3125_v38 = vadd.f32 %v3124_v29, %v3112_v16  ;;  %v13843_v48 = vld [vmem:[#allocation6 + $0x2a4] sm:$0xf0]  ;;  %v13885_v16 = vld [vmem:[#allocation6 + $0x3f4] sm:$0xf0]  ;;  %v13798_v54 = vld [vmem:[#allocation6 + $0x144] sm:$0xf] }
 0x255   :  { %4121 = vmatmul.bf16.vlgmr.msra.gmra.mxu0 %v15371_v63  ;;  %v11033_v21 = vor.u32 %v13885_v16, %v11032_v14  ;;  %v13855_v29 = vld [vmem:[#allocation6 + $0x304] sm:$0xf0]  ;;  %v13877_v14 = vld [vmem:[#allocation6 + $0x3b4] sm:$0xf0]  ;;  %v13780_v16 = vld [vmem:[#allocation6 + $0xb4] sm:$0xf] }
 0x256   :  { %4146 = vmatpush.bf16.msra.mxu2 %v10657_v25  ;;  %4165 = vmatpush.bf16.msrb.mxu0 %v10841_v52  ;;  %v3138_v42 = vadd.f32 %v3137_v8, %v3125_v38  ;;  %v3163_v25 = vpop.f32.mrf.mxu3  ;;  %v10578_v8 = vld [vmem:[#allocation6 + $0x68] sm:$0xf0] }
 0x257   :  { %4134 = vmatmul.bf16.vlgmr.msra.gmra.mxu1 %v15373_v59 }
 0x258   :  { %4159 = vmatpush.bf16.msra.mxu3 %v10721_v51  ;;  %4178 = vmatpush.bf16.msrb.mxu1 %v10905_v58  ;;  %v10801_v51 = vor.u32 %v13827_v45, %v10800_v35  ;;  %v3151_v52 = vadd.f32 %v3150_v46, %v3138_v42  ;;  %v10865_v58 = vor.u32 %v13843_v48, %v10864_v47  ;;  %v13768_v46 = vld [vmem:[#allocation6 + $0x54] sm:$0xf]  ;;  %v13802_v47 = vld [vmem:[#allocation6 + $0x164] sm:$0xf]  ;;  %v10706_v48 = vld [vmem:[#allocation6 + $0x168] sm:$0xf0] }
 0x259   :  { %4147 = vmatmul.bf16.vlgmr.msra.gmra.mxu2 %v15375_v0  ;;  %v15390_v35 = vpack.c.bf16 %v3327_v23, %v3327_v23  ;;  %v13762_v23 = vld [vmem:[#allocation6 + $0x24] sm:$0xf] }
 0x25a   :  { %4191 = vmatpush.bf16.msrb.mxu2 %v10969_v22  ;;  %4166 = vmatpush.bf16.msrb.mxu0 %v10833_v17  ;;  %v10784_v22 = vld [vmem:[#allocation6 + $0x200] sm:$0xf]  ;;  %v10929_v17 = vor.u32 %v13859_v57, %v10928_v55  ;;  %v3164_v18 = vadd.f32 %v3163_v25, %v3151_v52  ;;  %v13784_v52 = vld [vmem:[#allocation6 + $0xd4] sm:$0xf]  ;;  %v10709_v57 = vor.u32 %v13802_v47, %v10706_v48  ;;  %v10984_v47 = vld [vmem:[#allocation6 + $0x390] sm:$0xf] }
 0x25b   :  { %4160 = vmatmul.bf16.vlgmr.msra.gmra.mxu3 %v15377_v5  ;;  %v10637_v61 = vor.u32 %v13784_v52, %v10634_v53  ;;  %v13776_v48 = vld [vmem:[#allocation6 + $0x94] sm:$0xf]  ;;  %v13758_v52 = vld [vmem:[#allocation6 + $0x4] sm:$0xf]  ;;  %v10530_v53 = vld [vmem:[#allocation6 + $0x8] sm:$0xf0] }
 0x25c   :  { %4179 = vmatpush.bf16.msrb.mxu1 %v10897_v62  ;;  %v10920_v62 = vld [vmem:[#allocation6 + $0x310] sm:$0xf]  ;;  %v3328_v24 = vmax.f32 %v3164_v18, 0.0  ;;  %4204 = vmatpush.bf16.msrb.mxu3 %v11033_v21  ;;  %v10626_v18 = vld [vmem:[#allocation6 + $0xc8] sm:$0xf0] }
 0x25d   :  { %v10921_v9 = vor.u32 %v13857_v6, %v10920_v62  ;;  %v10565_v62 = vor.u32 %v13766_v56, %v10562_v19  ;;  %v13764_v6 = vld [vmem:[#allocation6 + $0x34] sm:$0xf]  ;;  %v13774_v56 = vld [vmem:[#allocation6 + $0x84] sm:$0xf] }
 0x25e   :  { %4192 = vmatpush.bf16.msrb.mxu2 %v10961_v12  ;;  %4167 = vmatpush.bf16.msrb.mxu0 %v10825_v36  ;;  %v3152_v12 = vpop.f32.mrf.mxu2  ;;  %v10586_v36 = vld [vmem:[#allocation6 + $0x78] sm:$0xf0]  ;;  %v3165_v13 = vpop.f32.mrf.mxu3  ;;  %v15388_v43 = vpack.c.bf16 %v3328_v24, %v3328_v24  ;;  %v13796_v24 = vld [vmem:[#allocation6 + $0x134] sm:$0xf] }
 0x25f   :  { %v10589_v31 = vor.u32 %v13772_v11, %v10586_v36  ;;  %v10629_v11 = vor.u32 %v13782_v1, %v10626_v18  ;;  %v10554_v12 = vld [vmem:[#allocation6 + $0x38] sm:$0xf0]  ;;  %v11000_v13 = vld [vmem:[#allocation6 + $0x3b0] sm:$0xf]  ;;  %v13871_v1 = vld [vmem:[#allocation6 + $0x384] sm:$0xf0] }
 0x260   :  { %4180 = vmatpush.bf16.msrb.mxu1 %v10889_v3  ;;  %v13788_v3 = vld [vmem:[#allocation6 + $0xf4] sm:$0xf]  ;;  %4205 = vmatpush.bf16.msrb.mxu3 %v11025_v15  ;;  %v10557_v21 = vor.u32 %v13764_v6, %v10554_v12  ;;  %v10842_v18 = vld [vmem:[#allocation6 + $0x278] sm:$0xf0] }
 0x261   :  { %v10653_v38 = vor.u32 %v13788_v3, %v10650_v20  ;;  %v10618_v3 = vld [vmem:[#allocation6 + $0xb8] sm:$0xf0]  ;;  %v11001_v20 = vor.u32 %v13877_v14, %v11000_v13  ;;  %v10533_v14 = vor.u32 %v13758_v52, %v10530_v53 }
 0x262   :  { %4193 = vmatpush.bf16.msrb.mxu2 %v10953_v26  ;;  %4168 = vmatpush.bf16.msrb.mxu0 %v10817_v28  ;;  %v10785_v26 = vor.u32 %v13823_v2, %v10784_v22  ;;  %v10912_v28 = vld [vmem:[#allocation6 + $0x300] sm:$0xf]  ;;  %v10701_v2 = vor.u32 %v13800_v60, %v10698_v4  ;;  %v10594_v60 = vld [vmem:[#allocation6 + $0x88] sm:$0xf0]  ;;  %v13792_v4 = vld [vmem:[#allocation6 + $0x114] sm:$0xf] }
 0x263   :  { %v10913_v42 = vor.u32 %v13855_v29, %v10912_v28  ;;  %v11008_v22 = vld [vmem:[#allocation6 + $0x3c0] sm:$0xf]  ;;  %v10621_v28 = vor.u32 %v13780_v16, %v10618_v3  ;;  %v10546_v29 = vld [vmem:[#allocation6 + $0x28] sm:$0xf0]  ;;  %v13790_v3 = vld [vmem:[#allocation6 + $0x104] sm:$0xf] }
 0x264   :  { %4181 = vmatpush.bf16.msrb.mxu1 %v10881_v33  ;;  %v13770_v33 = vld [vmem:[#allocation6 + $0x64] sm:$0xf]  ;;  %v10549_v39 = vor.u32 %v13762_v23, %v10546_v29 }
 0x265   :  { %v10581_v45 = vor.u32 %v13770_v33, %v10578_v8  ;;  %v13778_v33 = vld [vmem:[#allocation6 + $0xa4] sm:$0xf] }
 0x266   :  { %4194 = vmatpush.bf16.msrb.mxu2 %v10945_v40  ;;  %4169 = vmatpush.bf16.msrb.mxu0 %v10809_v41  ;;  %v13786_v40 = vld [vmem:[#allocation6 + $0xe4] sm:$0xf]  ;;  %v10642_v41 = vld [vmem:[#allocation6 + $0xe8] sm:$0xf0] }
 0x267   :  { %v10645_v25 = vor.u32 %v13786_v40, %v10642_v41  ;;  %v13794_v41 = vld [vmem:[#allocation6 + $0x124] sm:$0xf] }
 0x268   :  { %4182 = vmatpush.bf16.msrb.mxu1 %v10873_v32  ;;  %v10717_v32 = vor.u32 %v13804_v34, %v10714_v37  ;;  %v10610_v34 = vld [vmem:[#allocation6 + $0xa8] sm:$0xf0]  ;;  %v13834_v23 = vld [vmem:[#allocation6 + $0x264] sm:$0xf] }
 0x269   :  { %v15396_v36 = vpop.f32.mrf.mxu1  ;;  %v10613_v15 = vor.u32 %v13778_v33, %v10610_v34 }
 0x26a   :  { %4195 = vmatpush.bf16.msrb.mxu2 %v10937_v49  ;;  %4170 = vmatpush.bf16.msrb.mxu0 %v10801_v51  ;;  %v10570_v49 = vld [vmem:[#allocation6 + $0x58] sm:$0xf0]  ;;  %v13881_v51 = vld [vmem:[#allocation6 + $0x3d4] sm:$0xf0] }
 0x26b   :  { %v11017_v55 = vor.u32 %v13881_v51, %v11016_v50  ;;  %v15402_v50 = vld [vmem:[#allocation4] sm:$0xff] }
 0x26c   :  { %4183 = vmatpush.bf16.msrb.mxu1 %v10865_v58  ;;  %v10573_v58 = vor.u32 %v13768_v46, %v10570_v49  ;;  %v13873_v49 = vld [vmem:[#allocation6 + $0x394] sm:$0xf0]  ;;  %v769_v51 = vperm.slane %v15402_v50, 6 }
 0x26d   :  { %4206 = vmatpush.bf16.msrb.mxu3 %v11017_v55 }
 0x26e   :  { %4196 = vmatpush.bf16.msrb.mxu2 %v10929_v17  ;;  %4171 = vmatpush.bf16.msrb.mxu0 %v10793_v44  ;;  %v13879_v17 = vld [vmem:[#allocation6 + $0x3c4] sm:$0xf0] }
 0x26f   :  { %v11009_v44 = vor.u32 %v13879_v17, %v11008_v22  ;;  %v13836_v22 = vld [vmem:[#allocation6 + $0x274] sm:$0xf]  ;;  %v10976_v17 = vld [vmem:[#allocation6 + $0x380] sm:$0xf] }
 0x270   :  { %4184 = vmatpush.bf16.msrb.mxu1 %v10857_v27  ;;  %v15394_v27 = vpop.f32.mrf.mxu0 }
 0x271   :  { %4207 = vmatpush.bf16.msrb.mxu3 %v11009_v44  ;;  %v3191_v46 = vpop.f32.mrf.mxu1  ;;  %v10977_v44 = vor.u32 %v13871_v1, %v10976_v17  ;;  %v3177_v6 = vadd.f32 %v15394_v27, %v769_v51  ;;  %v13818_v27 = vld [vmem:[#allocation6 + $0x1e4] sm:$0xf]  ;;  %v10818_v51 = vld [vmem:[#allocation6 + $0x248] sm:$0xf0]  ;;  %v10874_v17 = vld [vmem:[#allocation6 + $0x2b8] sm:$0xf0] }
 0x272   :  { %4197 = vmatpush.bf16.msrb.mxu2 %v10921_v9  ;;  %4172 = vmatpush.bf16.msrb.mxu0 %v10785_v26  ;;  %v10693_v9 = vor.u32 %v13798_v54, %v10690_v10  ;;  %v10682_v26 = vld [vmem:[#allocation6 + $0x138] sm:$0xf0]  ;;  %v13852_v54 = vld [vmem:[#allocation6 + $0x2f4] sm:$0xf]  ;;  %v13814_v46 = vld [vmem:[#allocation6 + $0x1c4] sm:$0xf] }
 0x273   :  { %v10685_v8 = vor.u32 %v13796_v24, %v10682_v26  ;;  %v15400_v40 = vpop.f32.mrf.mxu3  ;;  %v10906_v10 = vld [vmem:[#allocation6 + $0x2f8] sm:$0xf0]  ;;  %v10834_v26 = vld [vmem:[#allocation6 + $0x268] sm:$0xf0]  ;;  %v3190_v29 = vadd.f32 %v15396_v36, %v3177_v6 }
 0x274   :  { %4185 = vmatpush.bf16.msrb.mxu1 %v10849_v30  ;;  %v10992_v30 = vld [vmem:[#allocation6 + $0x3a0] sm:$0xf]  ;;  %v10909_v24 = vor.u32 %v13852_v54, %v10906_v10  ;;  %v10802_v54 = vld [vmem:[#allocation6 + $0x228] sm:$0xf0]  ;;  %v13810_v10 = vld [vmem:[#allocation6 + $0x1a4] sm:$0xf] }
 0x275   :  { %4173 = vmatmul.bf16.vlgmr.msrb.gmra.mxu0 %v15390_v35  ;;  %4208 = vmatpush.bf16.msrb.mxu3 %v11001_v20  ;;  %v10658_v20 = vld [vmem:[#allocation6 + $0x108] sm:$0xf0] }
 0x276   :  { %4217 = vmatpush.bf16.msra.mxu0 %v10589_v31  ;;  %4198 = vmatpush.bf16.msrb.mxu2 %v10913_v42  ;;  %v13875_v31 = vld [vmem:[#allocation6 + $0x3a4] sm:$0xf0]  ;;  %v10674_v42 = vld [vmem:[#allocation6 + $0x128] sm:$0xf0]  ;;  %v10661_v33 = vor.u32 %v13790_v3, %v10658_v20 }
 0x277   :  { %4186 = vmatmul.bf16.vlgmr.msrb.gmra.mxu1 %v15388_v43  ;;  %v10993_v37 = vor.u32 %v13875_v31, %v10992_v30  ;;  %v10677_v55 = vor.u32 %v13794_v41, %v10674_v42  ;;  %v13850_v30 = vld [vmem:[#allocation6 + $0x2e4] sm:$0xf]  ;;  %v10898_v31 = vld [vmem:[#allocation6 + $0x2e8] sm:$0xf0]  ;;  %v13832_v41 = vld [vmem:[#allocation6 + $0x254] sm:$0xf] }
 0x278   :  { %4230 = vmatpush.bf16.msra.mxu1 %v10653_v38  ;;  %v15398_v38 = vpop.f32.mrf.mxu2  ;;  %v3178_v7 = vpop.f32.mrf.mxu0  ;;  %v10826_v42 = vld [vmem:[#allocation6 + $0x258] sm:$0xf0] }
 0x279   :  { %4209 = vmatpush.bf16.msrb.mxu3 %v10993_v37  ;;  %v10837_v37 = vor.u32 %v13834_v23, %v10834_v26  ;;  %v10901_v7 = vor.u32 %v13850_v30, %v10898_v31  ;;  %v3203_v36 = vadd.f32 %v15398_v38, %v3190_v29  ;;  %v13824_v23 = vld [vmem:[#allocation6 + $0x214] sm:$0xf]  ;;  %v10962_v26 = vld [vmem:[#allocation6 + $0x368] sm:$0xf0]  ;;  %v10794_v29 = vld [vmem:[#allocation6 + $0x218] sm:$0xf0] }
 0x27a   :  { %4243 = vmatpush.bf16.msra.mxu2 %v10717_v32  ;;  %4218 = vmatpush.bf16.msra.mxu0 %v10581_v45  ;;  %v13760_v32 = vld [vmem:[#allocation6 + $0x14] sm:$0xf]  ;;  %v10538_v45 = vld [vmem:[#allocation6 + $0x18] sm:$0xf0] }
 0x27b   :  { %v3217_v16 = vpop.f32.mrf.mxu3  ;;  %v3216_v53 = vadd.f32 %v15400_v40, %v3203_v36  ;;  %v13808_v31 = vld [vmem:[#allocation6 + $0x194] sm:$0xf]  ;;  %v10954_v36 = vld [vmem:[#allocation6 + $0x358] sm:$0xf0] }
 0x27c   :  { %4231 = vmatpush.bf16.msra.mxu1 %v10645_v25  ;;  %v10602_v25 = vld [vmem:[#allocation6 + $0x98] sm:$0xf0] }
 0x27d   :  { %v10605_v19 = vor.u32 %v13776_v48, %v10602_v25  ;;  %v10829_v48 = vor.u32 %v13832_v41, %v10826_v42  ;;  %v10797_v41 = vor.u32 %v13824_v23, %v10794_v29  ;;  %v13822_v42 = vld [vmem:[#allocation6 + $0x204] sm:$0xf] }
 0x27e   :  { %4244 = vmatpush.bf16.msra.mxu2 %v10709_v57  ;;  %4219 = vmatpush.bf16.msra.mxu0 %v10573_v58  ;;  %v10985_v57 = vor.u32 %v13873_v49, %v10984_v47  ;;  %v10541_v58 = vor.u32 %v13760_v32, %v10538_v45  ;;  %v13848_v32 = vld [vmem:[#allocation6 + $0x2d4] sm:$0xf]  ;;  %v10890_v45 = vld [vmem:[#allocation6 + $0x2d8] sm:$0xf0]  ;;  %v10754_v47 = vld [vmem:[#allocation6 + $0x1c8] sm:$0xf0] }
 0x27f   :  { %v10893_v25 = vor.u32 %v13848_v32, %v10890_v45  ;;  %v13830_v49 = vld [vmem:[#allocation6 + $0x244] sm:$0xf]  ;;  %v10757_v52 = vor.u32 %v13814_v46, %v10754_v47  ;;  %v10786_v45 = vld [vmem:[#allocation6 + $0x208] sm:$0xf0] }
 0x280   :  { %4232 = vmatpush.bf16.msra.mxu1 %v10637_v61  ;;  %v10666_v61 = vld [vmem:[#allocation6 + $0x118] sm:$0xf0]  ;;  %4210 = vmatpush.bf16.msrb.mxu3 %v10985_v57  ;;  %v10821_v38 = vor.u32 %v13830_v49, %v10818_v51  ;;  %v13828_v57 = vld [vmem:[#allocation6 + $0x234] sm:$0xf]  ;;  %v13806_v46 = vld [vmem:[#allocation6 + $0x184] sm:$0xf] }
 0x281   :  { %v10669_v12 = vor.u32 %v13792_v4, %v10666_v61  ;;  %v10746_v4 = vld [vmem:[#allocation6 + $0x1b8] sm:$0xf0]  ;;  %v10722_v47 = vld [vmem:[#allocation6 + $0x188] sm:$0xf0] }
 0x282   :  { %4245 = vmatpush.bf16.msra.mxu2 %v10701_v2  ;;  %4220 = vmatpush.bf16.msra.mxu0 %v10565_v62  ;;  %v13820_v2 = vld [vmem:[#allocation6 + $0x1f4] sm:$0xf]  ;;  %v10778_v62 = vld [vmem:[#allocation6 + $0x1f8] sm:$0xf0]  ;;  %v10725_v49 = vor.u32 %v13806_v46, %v10722_v47  ;;  %v10994_v46 = vld [vmem:[#allocation6 + $0x3a8] sm:$0xf0] }
 0x283   :  { %v10781_v13 = vor.u32 %v13820_v2, %v10778_v62  ;;  %v13868_v2 = vld [vmem:[#allocation6 + $0x374] sm:$0xf]  ;;  %v10970_v62 = vld [vmem:[#allocation6 + $0x378] sm:$0xf0] }
 0x284   :  { %4233 = vmatpush.bf16.msra.mxu1 %v10629_v11  ;;  %v3204_v11 = vpop.f32.mrf.mxu2  ;;  %4211 = vmatpush.bf16.msrb.mxu3 %v10977_v44  ;;  %v13826_v44 = vld [vmem:[#allocation6 + $0x224] sm:$0xf]  ;;  %v10973_v3 = vor.u32 %v13868_v2, %v10970_v62 }
 0x285   :  { %v10738_v11 = vld [vmem:[#allocation6 + $0x1a8] sm:$0xf0]  ;;  %v13854_v62 = vld [vmem:[#allocation6 + $0x304] sm:$0xf] }
 0x286   :  { %4246 = vmatpush.bf16.msra.mxu2 %v10693_v9  ;;  %4221 = vmatpush.bf16.msra.mxu0 %v10557_v21  ;;  %v10597_v9 = vor.u32 %v13774_v56, %v10594_v60  ;;  %v10845_v21 = vor.u32 %v13836_v22, %v10842_v18  ;;  %v10810_v56 = vld [vmem:[#allocation6 + $0x238] sm:$0xf0]  ;;  %v13812_v60 = vld [vmem:[#allocation6 + $0x1b4] sm:$0xf]  ;;  %v10741_v16 = vor.u32 %v13810_v10, %v10738_v11 }
 0x287   :  { %v13844_v22 = vld [vmem:[#allocation6 + $0x2b4] sm:$0xf]  ;;  %v10749_v1 = vor.u32 %v13812_v60, %v10746_v4  ;;  %v10813_v40 = vor.u32 %v13828_v57, %v10810_v56  ;;  %v10938_v56 = vld [vmem:[#allocation6 + $0x338] sm:$0xf0]  ;;  %v770_v60 = vperm.slane %v15402_v50, 7 }
 0x288   :  { %4234 = vmatpush.bf16.msra.mxu1 %v10621_v28  ;;  %4256 = vmatpush.bf16.msra.mxu3 %v10781_v13  ;;  %v10770_v28 = vld [vmem:[#allocation6 + $0x1e8] sm:$0xf0]  ;;  %v10877_v6 = vor.u32 %v13844_v22, %v10874_v17  ;;  %v13842_v13 = vld [vmem:[#allocation6 + $0x2a4] sm:$0xf] }
 0x289   :  { %v10773_v34 = vor.u32 %v13818_v27, %v10770_v28 }
 0x28a   :  { %4247 = vmatpush.bf16.msra.mxu2 %v10685_v8  ;;  %4222 = vmatpush.bf16.msra.mxu0 %v10549_v39  ;;  %v13816_v8 = vld [vmem:[#allocation6 + $0x1d4] sm:$0xf]  ;;  %v10762_v39 = vld [vmem:[#allocation6 + $0x1d8] sm:$0xf0] }
 0x28c   :  { %4235 = vmatpush.bf16.msra.mxu1 %v10613_v15  ;;  %4257 = vmatpush.bf16.msra.mxu3 %v10773_v34  ;;  %v10765_v15 = vor.u32 %v13816_v8, %v10762_v39  ;;  %v13840_v34 = vld [vmem:[#allocation6 + $0x294] sm:$0xf] }
 0x28e   :  { %4248 = vmatpush.bf16.msra.mxu2 %v10677_v55  ;;  %4223 = vmatpush.bf16.msra.mxu0 %v10541_v58  ;;  %v10882_v55 = vld [vmem:[#allocation6 + $0x2c8] sm:$0xf0]  ;;  %v3228_v58 = vpop.f32.mrf.mxu0 }
 0x28f   :  { %v3229_v61 = vadd.f32 %v3228_v58, %v3216_v53 }
 0x290   :  { %4236 = vmatpush.bf16.msra.mxu1 %v10605_v19  ;;  %4258 = vmatpush.bf16.msra.mxu3 %v10765_v15  ;;  %v3241_v19 = vpop.f32.mrf.mxu1  ;;  %v13864_v15 = vld [vmem:[#allocation6 + $0x354] sm:$0xf] }
 0x291   :  { %v3242_v18 = vadd.f32 %v3241_v19, %v3229_v61  ;;  %v10957_v51 = vor.u32 %v13864_v15, %v10954_v36  ;;  %v13858_v61 = vld [vmem:[#allocation6 + $0x324] sm:$0xf]  ;;  %v10930_v19 = vld [vmem:[#allocation6 + $0x328] sm:$0xf0] }
 0x292   :  { %4249 = vmatpush.bf16.msra.mxu2 %v10669_v12  ;;  %4224 = vmatpush.bf16.msra.mxu0 %v10533_v14  ;;  %v10866_v14 = vld [vmem:[#allocation6 + $0x2a8] sm:$0xf0]  ;;  %v10933_v17 = vor.u32 %v13858_v61, %v10930_v19 }
 0x293   :  { %v3329_v12 = vmax.f32 %v3242_v18, 0.0  ;;  %v10869_v27 = vor.u32 %v13842_v13, %v10866_v14  ;;  %v3267_v28 = vpop.f32.mrf.mxu3  ;;  %v10922_v18 = vld [vmem:[#allocation6 + $0x318] sm:$0xf0] }
 0x294   :  { %4237 = vmatpush.bf16.msra.mxu1 %v10597_v9  ;;  %4259 = vmatpush.bf16.msra.mxu3 %v10757_v52  ;;  %v10805_v9 = vor.u32 %v13826_v44, %v10802_v54  ;;  %v10789_v52 = vor.u32 %v13822_v42, %v10786_v45  ;;  %v13874_v45 = vld [vmem:[#allocation6 + $0x3a4] sm:$0xf] }
 0x295   :  { %4225 = vmatmul.bf16.vlgmr.msra.gmra.mxu0 %v15371_v63  ;;  %v13846_v63 = vld [vmem:[#allocation6 + $0x2c4] sm:$0xf]  ;;  %v15411_v20 = vpack.c.bf16 %v3329_v12, %v3329_v12 }
 0x296   :  { %4269 = vmatpush.bf16.msrb.mxu0 %v10845_v21  ;;  %4250 = vmatpush.bf16.msra.mxu2 %v10661_v33  ;;  %v3254_v21 = vpop.f32.mrf.mxu2  ;;  %v3230_v30 = vpop.f32.mrf.mxu0  ;;  %v10730_v33 = vld [vmem:[#allocation6 + $0x198] sm:$0xf0] }
 0x297   :  { %4238 = vmatmul.bf16.vlgmr.msra.gmra.mxu1 %v15373_v59  ;;  %v10885_v59 = vor.u32 %v13846_v63, %v10882_v55  ;;  %4199 = vmatmul.bf16.vlgmr.msrb.gmra.mxu2 %v15411_v20  ;;  %v10733_v39 = vor.u32 %v13808_v31, %v10730_v33  ;;  %v13862_v63 = vld [vmem:[#allocation6 + $0x344] sm:$0xf]  ;;  %v10946_v55 = vld [vmem:[#allocation6 + $0x348] sm:$0xf0]  ;;  %v3255_v22 = vadd.f32 %v3254_v21, %v770_v60  ;;  %v13880_v30 = vld [vmem:[#allocation6 + $0x3d4] sm:$0xf] }
 0x298   :  { %4282 = vmatpush.bf16.msrb.mxu1 %v10909_v24  ;;  %4260 = vmatpush.bf16.msra.mxu3 %v10749_v1  ;;  %v13866_v24 = vld [vmem:[#allocation6 + $0x364] sm:$0xf]  ;;  %v3243_v8 = vpop.f32.mrf.mxu1  ;;  %v10949_v58 = vor.u32 %v13862_v63, %v10946_v55  ;;  %v13856_v1 = vld [vmem:[#allocation6 + $0x314] sm:$0xf]  ;;  %v11018_v31 = vld [vmem:[#allocation6 + $0x3d8] sm:$0xf0] }
 0x299   :  { %v10925_v2 = vor.u32 %v13856_v1, %v10922_v18  ;;  %v11021_v33 = vor.u32 %v13880_v30, %v11018_v31  ;;  %v3467_v8 = vld [vmem:[#allocation7] sm:$0x3]  ;;  %v13898_v30 = vld [vmem:[#allocation9 + $0x60] sm:$0xff] }
 0x29a   :  { %4270 = vmatpush.bf16.msrb.mxu0 %v10837_v37  ;;  %v10858_v37 = vld [vmem:[#allocation6 + $0x298] sm:$0xf0]  ;;  %4295 = vmatpush.bf16.msrb.mxu2 %v10973_v3  ;;  %v3470_v18 = vperm.slane %v3467_v8, 1 }
 0x29b   :  { %v10861_v32 = vor.u32 %v13840_v34, %v10858_v37  ;;  %v3269_v57 = vpop.f32.mrf.mxu3  ;;  %v11034_v3 = vld [vmem:[#allocation6 + $0x3f8] sm:$0xf0]  ;;  %v13878_v34 = vld [vmem:[#allocation6 + $0x3c4] sm:$0xf]  ;;  %v11010_v37 = vld [vmem:[#allocation6 + $0x3c8] sm:$0xf0] }
 0x29c   :  { %4283 = vmatpush.bf16.msrb.mxu1 %v10901_v7  ;;  %4261 = vmatpush.bf16.msra.mxu3 %v10741_v16  ;;  %v10965_v7 = vor.u32 %v13866_v24, %v10962_v26  ;;  %v13884_v16 = vld [vmem:[#allocation6 + $0x3f4] sm:$0xf]  ;;  %v13882_v24 = vld [vmem:[#allocation6 + $0x3e4] sm:$0xf]  ;;  %v11026_v26 = vld [vmem:[#allocation6 + $0x3e8] sm:$0xf0] }
 0x29d   :  { %v11037_v21 = vor.u32 %v13884_v16, %v11034_v3  ;;  %v11029_v29 = vor.u32 %v13882_v24, %v11026_v26  ;;  %v13870_v57 = vld [vmem:[#allocation6 + $0x384] sm:$0xf]  ;;  %v13897_v31 = vld [vmem:[#allocation9 + $0x58] sm:$0xff] }
 0x29e   :  { %4271 = vmatpush.bf16.msrb.mxu0 %v10829_v48  ;;  %v13838_v48 = vld [vmem:[#allocation6 + $0x284] sm:$0xf]  ;;  %4296 = vmatpush.bf16.msrb.mxu2 %v10965_v7  ;;  %v3256_v53 = vpop.f32.mrf.mxu2  ;;  %v13876_v7 = vld [vmem:[#allocation6 + $0x3b4] sm:$0xf] }
 0x2a0   :  { %4284 = vmatpush.bf16.msrb.mxu1 %v10893_v25  ;;  %4262 = vmatpush.bf16.msra.mxu3 %v10733_v39  ;;  %v10850_v25 = vld [vmem:[#allocation6 + $0x288] sm:$0xf0]  ;;  %v11013_v39 = vor.u32 %v13878_v34, %v11010_v37 }
 0x2a2   :  { %4272 = vmatpush.bf16.msrb.mxu0 %v10821_v38  ;;  %v10853_v38 = vor.u32 %v13838_v48, %v10850_v25  ;;  %4297 = vmatpush.bf16.msrb.mxu2 %v10957_v51  ;;  %v10997_v48 = vor.u32 %v13874_v45, %v10994_v46  ;;  %v13872_v25 = vld [vmem:[#allocation6 + $0x394] sm:$0xf] }
 0x2a4   :  { %4285 = vmatpush.bf16.msrb.mxu1 %v10885_v59  ;;  %4263 = vmatpush.bf16.msra.mxu3 %v10725_v49  ;;  %v13860_v59 = vld [vmem:[#allocation6 + $0x334] sm:$0xf]  ;;  %v10986_v49 = vld [vmem:[#allocation6 + $0x398] sm:$0xf0] }
 0x2a5   :  { %v10941_v4 = vor.u32 %v13860_v59, %v10938_v56  ;;  %v10989_v55 = vor.u32 %v13872_v25, %v10986_v49 }
 0x2a6   :  { %4273 = vmatpush.bf16.msrb.mxu0 %v10813_v40  ;;  %4298 = vmatpush.bf16.msrb.mxu2 %v10949_v58  ;;  %v3268_v40 = vadd.f32 %v3267_v28, %v3255_v22  ;;  %v10978_v58 = vld [vmem:[#allocation6 + $0x388] sm:$0xf0] }
 0x2a7   :  { %4251 = vmatmul.bf16.vlgmr.msra.gmra.mxu2 %v15375_v0  ;;  %v10981_v56 = vor.u32 %v13870_v57, %v10978_v58  ;;  %v13908_v57 = vld [vmem:[#allocation12 + $0x30] sm:$0xff]  ;;  %v13907_v58 = vld [vmem:[#allocation12 + $0x28] sm:$0xff] }
 0x2a8   :  { %4286 = vmatpush.bf16.msrb.mxu1 %v10877_v6 }
 0x2aa   :  { %4274 = vmatpush.bf16.msrb.mxu0 %v10805_v9  ;;  %4299 = vmatpush.bf16.msrb.mxu2 %v10941_v4 }
 0x2ac   :  { %4287 = vmatpush.bf16.msrb.mxu1 %v10869_v27 }
 0x2ae   :  { %4275 = vmatpush.bf16.msrb.mxu0 %v10797_v41  ;;  %4300 = vmatpush.bf16.msrb.mxu2 %v10933_v17  ;;  %v11002_v41 = vld [vmem:[#allocation6 + $0x3b8] sm:$0xf0] }
 0x2af   :  { %v11005_v15 = vor.u32 %v13876_v7, %v11002_v41 }
 0x2b0   :  { %4288 = vmatpush.bf16.msrb.mxu1 %v10861_v32 }
 0x2b2   :  { %4276 = vmatpush.bf16.msrb.mxu0 %v10789_v52  ;;  %v3280_v44 = vpop.f32.mrf.mxu0  ;;  %4301 = vmatpush.bf16.msrb.mxu2 %v10925_v2 }
 0x2b3   :  { %v3281_v6 = vadd.f32 %v3280_v44, %v3268_v40  ;;  %v13893_v40 = vld [vmem:[#allocation9 + $0x38] sm:$0xff] }
 0x2b4   :  { %4289 = vmatpush.bf16.msrb.mxu1 %v10853_v38  ;;  %v3293_v50 = vpop.f32.mrf.mxu1 }
 0x2b5   :  { %4277 = vmatmul.bf16.vlgmr.msrb.gmra.mxu0 %v15390_v35  ;;  %v10914_v35 = vld [vmem:[#allocation6 + $0x308] sm:$0xf0] }
 0x2b6   :  { %v10917_v54 = vor.u32 %v13854_v62, %v10914_v35  ;;  %4457 = vmatpush.bf16.msra.mxu0 %v13893_v40  ;;  %v13892_v35 = vld [vmem:[#allocation9 + $0x30] sm:$0xff]  ;;  %v11194_v40 = vld [vmem:[#allocation15 + $0x78] sm:$0xf0] }
 0x2b7   :  { %4290 = vmatmul.bf16.vlgmr.msrb.gmra.mxu1 %v15388_v43  ;;  %v3294_v43 = vadd.f32 %v3293_v50, %v3281_v6 }
 0x2b8   :  { %4302 = vmatpush.bf16.msrb.mxu2 %v10917_v54  ;;  %v13891_v54 = vld [vmem:[#allocation9 + $0x28] sm:$0xff] }
 0x2ba   :  { %v3282_v0 = vpop.f32.mrf.mxu0  ;;  %4458 = vmatpush.bf16.msra.mxu0 %v13892_v35  ;;  %v11186_v35 = vld [vmem:[#allocation15 + $0x68] sm:$0xf0] }
 0x2bb   :  { %4303 = vmatmul.bf16.vlgmr.msrb.gmra.mxu2 %v15411_v20  ;;  %v3469_v20 = vperm.slane %v3467_v8, 0  ;;  %v13895_v8 = vld [vmem:[#allocation9 + $0x48] sm:$0xff] }
 0x2bc   :  { %v3306_v10 = vpop.f32.mrf.mxu2  ;;  %v3295_v13 = vpop.f32.mrf.mxu1 }
 0x2bd   :  { %v3307_v11 = vadd.f32 %v3306_v10, %v3294_v43  ;;  %v13890_v10 = vld [vmem:[#allocation9 + $0x20] sm:$0xff]  ;;  %v13887_v13 = vld [vmem:[#allocation9 + $0x8] sm:$0xff] }
 0x2be   :  { %v3319_v12 = vpop.f32.mrf.mxu3  ;;  %4459 = vmatpush.bf16.msra.mxu0 %v13891_v54 }
 0x2bf   :  { %v3320_v14 = vadd.f32 %v3319_v12, %v3307_v11  ;;  %v13889_v11 = vld [vmem:[#allocation9 + $0x18] sm:$0xff]  ;;  %v13888_v12 = vld [vmem:[#allocation9 + $0x10] sm:$0xff] }
 0x2c1   :  { %v3330_v9 = vmax.f32 %v3320_v14, 0.0 }
 0x2c2   :  { %4460 = vmatpush.bf16.msra.mxu0 %v13890_v10  ;;  %v13921_v10 = vld [vmem:[#allocation15 + $0x54] sm:$0xf0] }
 0x2c3   :  { %v3338_v23 = vpack.c.bf16 %v3330_v9, %v3330_v9  ;;  %v13886_v9 = vld [vmem:[#allocation9] sm:$0xff] }
 0x2c4   :  { %v3308_v27 = vpop.f32.mrf.mxu2 }
 0x2c5   :  { %4212 = vmatmul.bf16.vlgmr.msrb.gmra.mxu3 %v3338_v23 }
 0x2c6   :  { %v3321_v28 = vpop.f32.mrf.mxu3  ;;  %4308 = vmatpush.bf16.msrb.mxu3 %v11037_v21  ;;  %4461 = vmatpush.bf16.msra.mxu0 %v13889_v11  ;;  %v13901_v21 = vld [vmem:[#allocation9 + $0x78] sm:$0xff] }
 0x2c7   :  { %4470 = vmatpush.bf16.msra.mxu1 %v13901_v21  ;;  %v13899_v28 = vld [vmem:[#allocation9 + $0x68] sm:$0xff]  ;;  %v13920_v11 = vld [vmem:[#allocation15 + $0x54] sm:$0xf] }
 0x2ca   :  { %4309 = vmatpush.bf16.msrb.mxu3 %v11029_v29  ;;  %4462 = vmatpush.bf16.msra.mxu0 %v13888_v12  ;;  %v11178_v12 = vld [vmem:[#allocation15 + $0x58] sm:$0xf0] }
 0x2ce   :  { %4310 = vmatpush.bf16.msrb.mxu3 %v11021_v33  ;;  %4463 = vmatpush.bf16.msra.mxu0 %v13887_v13  ;;  %v13896_v33 = vld [vmem:[#allocation9 + $0x50] sm:$0xff]  ;;  %v11181_v13 = vor.u32 %v13920_v11, %v11178_v12 }
 0x2d2   :  { %4311 = vmatpush.bf16.msrb.mxu3 %v11013_v39  ;;  %v4122_v42 = vpop.f32.mrf.mxu0  ;;  %4464 = vmatpush.bf16.msra.mxu0 %v13886_v9  ;;  %v11170_v9 = vld [vmem:[#allocation15 + $0x48] sm:$0xf0] }
 0x2d3   :  { %v4123_v36 = vadd.f32 %v4122_v42, %v3469_v20  ;;  %v13894_v42 = vld [vmem:[#allocation9 + $0x40] sm:$0xff] }
 0x2d4   :  { %v4135_v32 = vpop.f32.mrf.mxu1 }
 0x2d5   :  { %v4136_v47 = vadd.f32 %v4135_v32, %v4123_v36  ;;  %4264 = vmatmul.bf16.vlgmr.msra.gmra.mxu3 %v15377_v5 }
 0x2d6   :  { %4312 = vmatpush.bf16.msrb.mxu3 %v11005_v15 }
 0x2da   :  { %4313 = vmatpush.bf16.msrb.mxu3 %v10997_v48  ;;  %v4124_v63 = vpop.f32.mrf.mxu0 }
 0x2dc   :  { %v4148_v51 = vpop.f32.mrf.mxu2  ;;  %v4137_v38 = vpop.f32.mrf.mxu1 }
 0x2dd   :  { %v4149_v52 = vadd.f32 %v4148_v51, %v4136_v47  ;;  %v13909_v38 = vld [vmem:[#allocation12 + $0x38] sm:$0xff] }
 0x2de   :  { %v4161_v53 = vpop.f32.mrf.mxu3  ;;  %4314 = vmatpush.bf16.msrb.mxu3 %v10989_v55  ;;  %4553 = vmatpush.bf16.msra.mxu2 %v13909_v38 }
 0x2df   :  { %v4162_v59 = vadd.f32 %v4161_v53, %v4149_v52 }
 0x2e2   :  { %4315 = vmatpush.bf16.msrb.mxu3 %v10981_v56  ;;  %4554 = vmatpush.bf16.msra.mxu2 %v13908_v57  ;;  %v13905_v56 = vld [vmem:[#allocation12 + $0x18] sm:$0xff] }
 0x2e3   :  { %v13933_v57 = vld [vmem:[#allocation18 + $0x38] sm:$0xff] }
 0x2e4   :  { %v4150_v60 = vpop.f32.mrf.mxu2 }
 0x2e5   :  { %4316 = vmatmul.bf16.vlgmr.msrb.gmra.mxu3 %v3338_v23  ;;  %v13900_v23 = vld [vmem:[#allocation9 + $0x70] sm:$0xff] }
 0x2e6   :  { %v4163_v4 = vpop.f32.mrf.mxu3  ;;  %4471 = vmatpush.bf16.msra.mxu1 %v13900_v23  ;;  %4555 = vmatpush.bf16.msra.mxu2 %v13907_v58  ;;  %v13904_v60 = vld [vmem:[#allocation12 + $0x10] sm:$0xff] }
 0x2e7   :  { %v13903_v4 = vld [vmem:[#allocation12 + $0x8] sm:$0xff]  ;;  %v13932_v58 = vld [vmem:[#allocation18 + $0x30] sm:$0xff] }
 0x2ea   :  { %4472 = vmatpush.bf16.msra.mxu1 %v13899_v28  ;;  %v11162_v28 = vld [vmem:[#allocation15 + $0x38] sm:$0xf0] }
 0x2ee   :  { %4473 = vmatpush.bf16.msra.mxu1 %v13898_v30 }
 0x2f2   :  { %v4174_v5 = vpop.f32.mrf.mxu0  ;;  %4474 = vmatpush.bf16.msra.mxu1 %v13897_v31  ;;  %v11152_v31 = vld [vmem:[#allocation15 + $0x20] sm:$0xf] }
 0x2f3   :  { %v4175_v61 = vadd.f32 %v4174_v5, %v4162_v59  ;;  %v13906_v59 = vld [vmem:[#allocation12 + $0x20] sm:$0xff] }
 0x2f4   :  { %v4187_v19 = vpop.f32.mrf.mxu1  ;;  %4556 = vmatpush.bf16.msra.mxu2 %v13906_v59  ;;  %v13931_v59 = vld [vmem:[#allocation18 + $0x28] sm:$0xff] }
 0x2f5   :  { %v4188_v22 = vadd.f32 %v4187_v19, %v4175_v61  ;;  %v13902_v61 = vld [vmem:[#allocation12] sm:$0xff] }
 0x2f6   :  { %4475 = vmatpush.bf16.msra.mxu1 %v13896_v33  ;;  %v13915_v33 = vld [vmem:[#allocation15 + $0x24] sm:$0xf0] }
 0x2f8   :  { %4557 = vmatpush.bf16.msra.mxu2 %v13905_v56  ;;  %v14499_v56 = vld [vmem:[#allocation13] ss:$0 sm:$0xff] }
 0x2fa   :  { %v4176_v17 = vpop.f32.mrf.mxu0  ;;  %4476 = vmatpush.bf16.msra.mxu1 %v13895_v8  ;;  %v14498_v8 = vld [vmem:[#allocation10] ss:$0 sm:$0xff] }
 0x2fb   :  { %v13925_v17 = vld [vmem:[#allocation15 + $0x74] sm:$0xf0] }
 0x2fc   :  { %v4189_v1 = vpop.f32.mrf.mxu1  ;;  %4558 = vmatpush.bf16.msra.mxu2 %v13904_v60 }
 0x2fd   :  { %v13924_v1 = vld [vmem:[#allocation15 + $0x74] sm:$0xf] }
 0x2fe   :  { %4477 = vmatpush.bf16.msra.mxu1 %v13894_v42 }
 0x300   :  { %4559 = vmatpush.bf16.msra.mxu2 %v13903_v4 }
 0x302   :  { %4771 = vmatpush.bf16.msrb.mxu1 %v13933_v57  ;;  %v13948_v57 = vld [vmem:[#allocation24 + $0x34] sm:$0xf] }
 0x304   :  { %4560 = vmatpush.bf16.msra.mxu2 %v13902_v61 }
 0x306   :  { %4772 = vmatpush.bf16.msrb.mxu1 %v13932_v58  ;;  %v11290_v58 = vld [vmem:[#allocation24 + $0x38] sm:$0xf0] }
 0x30a   :  { %4773 = vmatpush.bf16.msrb.mxu1 %v13931_v59 }
 0x312   :  { %v4226_v44 = vpop.f32.mrf.mxu0 }
 0x313   :  { %v4227_v2 = vadd.f32 %v4226_v44, %v3470_v18  ;;  %v11184_v44 = vld [vmem:[#allocation15 + $0x60] sm:$0xf] }
 0x314   :  { %v4239_v50 = vpop.f32.mrf.mxu1 }
 0x315   :  { %v4240_v62 = vadd.f32 %v4239_v50, %v4227_v2  ;;  %v13923_v2 = vld [vmem:[#allocation15 + $0x64] sm:$0xf0]  ;;  %v11197_v50 = vor.u32 %v13924_v1, %v11194_v40  ;;  %v13928_v1 = vld [vmem:[#allocation18 + $0x10] sm:$0xff] }
 0x316   :  { %v13926_v40 = vld [vmem:[#allocation18] sm:$0xff] }
 0x317   :  { %4683 = vmatpush.bf16.msrb.mxu0 %v11197_v50  ;;  %v4584_v50 = vld [vmem:[#allocation16] sm:$0x3] }
 0x318   :  { %v4586_v12 = vperm.slane %v4584_v50, 0 }
 0x31a   :  { %v4228_v6 = vpop.f32.mrf.mxu0  ;;  %v4200_v0 = vpop.f32.mrf.mxu2 }
 0x31b   :  { %v4201_v37 = vadd.f32 %v4200_v0, %v4188_v22  ;;  %v11192_v22 = vld [vmem:[#allocation15 + $0x70] sm:$0xf]  ;;  %v11185_v6 = vor.u32 %v13923_v2, %v11184_v44  ;;  %v13941_v44 = vld [vmem:[#allocation21 + $0x38] sm:$0xff]  ;;  %v13940_v2 = vld [vmem:[#allocation21 + $0x30] sm:$0xff] }
 0x31c   :  { %v4241_v43 = vpop.f32.mrf.mxu1  ;;  %v11193_v18 = vor.u32 %v13925_v17, %v11192_v22  ;;  %v13930_v22 = vld [vmem:[#allocation18 + $0x20] sm:$0xff]  ;;  %v13929_v17 = vld [vmem:[#allocation18 + $0x18] sm:$0xff]  ;;  %4854 = vmatpush.bf16.msrb.mxu2 %v13941_v44 }
 0x31d   :  { %v11176_v43 = vld [vmem:[#allocation15 + $0x50] sm:$0xf]  ;;  %4774 = vmatpush.bf16.msrb.mxu1 %v13930_v22 }
 0x31e   :  { %4670 = vmatpush.bf16.msra.mxu3 %v11193_v18  ;;  %v11177_v0 = vor.u32 %v13921_v10, %v11176_v43  ;;  %v13927_v18 = vld [vmem:[#allocation18 + $0x8] sm:$0xff]  ;;  %v13937_v10 = vld [vmem:[#allocation21 + $0x18] sm:$0xff] }
 0x320   :  { %4855 = vmatpush.bf16.msrb.mxu2 %v13940_v2 }
 0x321   :  { %4775 = vmatpush.bf16.msrb.mxu1 %v13929_v17  ;;  %v14500_v17 = vld [vmem:[#allocation19] ss:$0 sm:$0xff] }
 0x322   :  { %v4202_v3 = vpop.f32.mrf.mxu2  ;;  %4671 = vmatpush.bf16.msra.mxu3 %v11185_v6  ;;  %v13938_v6 = vld [vmem:[#allocation21 + $0x20] sm:$0xff] }
 0x323   :  { %v13918_v3 = vld [vmem:[#allocation15 + $0x44] sm:$0xf] }
 0x324   :  { %v11173_v23 = vor.u32 %v13918_v3, %v11170_v9  ;;  %v4699_v9 = vld [vmem:[%s15654_s16] sm:$0xff] }
 0x325   :  { %4776 = vmatpush.bf16.msrb.mxu1 %v13928_v1 }
 0x326   :  { %4672 = vmatpush.bf16.msra.mxu3 %v11177_v0 }
 0x329   :  { %4777 = vmatpush.bf16.msrb.mxu1 %v13927_v18 }
 0x32a   :  { %v4252_v27 = vpop.f32.mrf.mxu2 }
 0x32b   :  { %v4253_v45 = vadd.f32 %v4252_v27, %v4240_v62  ;;  %v13922_v62 = vld [vmem:[#allocation15 + $0x64] sm:$0xf]  ;;  %v13916_v27 = vld [vmem:[#allocation15 + $0x34] sm:$0xf] }
 0x32c   :  { %v11189_v54 = vor.u32 %v13922_v62, %v11186_v35  ;;  %v11165_v30 = vor.u32 %v13916_v27, %v11162_v28  ;;  %v13939_v62 = vld [vmem:[#allocation21 + $0x28] sm:$0xff]  ;;  %v4587_v35 = vperm.slane %v4584_v50, 1  ;;  %v11272_v50 = vld [vmem:[#allocation24 + $0x10] sm:$0xf] }
 0x32d   :  { %4778 = vmatpush.bf16.msrb.mxu1 %v13926_v40  ;;  %4856 = vmatpush.bf16.msrb.mxu2 %v13939_v62  ;;  %v13935_v28 = vld [vmem:[#allocation21 + $0x8] sm:$0xff]  ;;  %v13945_v62 = vld [vmem:[#allocation24 + $0x14] sm:$0xf0] }
 0x32e   :  { %4684 = vmatpush.bf16.msrb.mxu0 %v11189_v54 }
 0x331   :  { %4857 = vmatpush.bf16.msrb.mxu2 %v13938_v6  ;;  %v11273_v6 = vor.u32 %v13945_v62, %v11272_v50  ;;  %v11424_v50 = vld [vmem:[#allocation27 + $0xc0] sm:$0xf] }
 0x332   :  { %v4278_v14 = vpop.f32.mrf.mxu0  ;;  %v4254_v29 = vpop.f32.mrf.mxu2  ;;  %4685 = vmatpush.bf16.msrb.mxu0 %v11181_v13 }
 0x334   :  { %v4291_v16 = vpop.f32.mrf.mxu1 }
 0x335   :  { %4858 = vmatpush.bf16.msrb.mxu2 %v13937_v10  ;;  %v11264_v10 = vld [vmem:[#allocation24] sm:$0xf] }
 0x336   :  { %4686 = vmatpush.bf16.msrb.mxu0 %v11173_v23 }
 0x33a   :  { %v4280_v24 = vpop.f32.mrf.mxu0  ;;  %4687 = vmatpush.bf16.msrb.mxu0 %v11165_v30  ;;  %v11320_v30 = vld [vmem:[#allocation24 + $0x70] sm:$0xf] }
 0x33b   :  { %v11160_v24 = vld [vmem:[#allocation15 + $0x30] sm:$0xf] }
 0x33c   :  { %v4293_v26 = vpop.f32.mrf.mxu1 }
 0x33d   :  { %v13917_v26 = vld [vmem:[#allocation15 + $0x34] sm:$0xf0] }
 0x33e   :  { %v4304_v34 = vpop.f32.mrf.mxu2  ;;  %v11161_v29 = vor.u32 %v13917_v26, %v11160_v24 }
 0x346   :  { %v4306_v41 = vpop.f32.mrf.mxu2 }
 0x348   :  { %v4213_v39 = vpop.f32.mrf.mxu3 }
 0x349   :  { %v4214_v20 = vadd.f32 %v4213_v39, %v4201_v37  ;;  %v11154_v37 = vld [vmem:[#allocation15 + $0x28] sm:$0xf0]  ;;  %v11153_v39 = vor.u32 %v13915_v33, %v11152_v31  ;;  %v13957_v31 = vld [vmem:[#allocation24 + $0x74] sm:$0xf0]  ;;  %v13956_v33 = vld [vmem:[#allocation24 + $0x74] sm:$0xf] }
 0x34b   :  { %v4321_v7 = vmax.f32 %v4214_v20, 0.0 }
 0x34d   :  { %v4323_v15 = vpack.c.bf16 %v4321_v7, %v4321_v7 }
 0x34f   :  { %4465 = vmatmul.bf16.vlgmr.msra.gmra.mxu0 %v4323_v15 }
 0x350   :  { %v4215_v36 = vpop.f32.mrf.mxu3 }
 0x358   :  { %v4265_v32 = vpop.f32.mrf.mxu3 }
 0x359   :  { %v4266_v46 = vadd.f32 %v4265_v32, %v4253_v45  ;;  %v11144_v45 = vld [vmem:[#allocation15 + $0x10] sm:$0xf] }
 0x35b   :  { %v4279_v47 = vadd.f32 %v4278_v14, %v4266_v46  ;;  %v11168_v14 = vld [vmem:[#allocation15 + $0x40] sm:$0xf]  ;;  %v13913_v46 = vld [vmem:[#allocation15 + $0x14] sm:$0xf0] }
 0x35d   :  { %v4292_v25 = vadd.f32 %v4291_v16, %v4279_v47  ;;  %v13919_v16 = vld [vmem:[#allocation15 + $0x44] sm:$0xf0]  ;;  %v13912_v47 = vld [vmem:[#allocation15 + $0x14] sm:$0xf] }
 0x35e   :  { %v11169_v21 = vor.u32 %v13919_v16, %v11168_v14  ;;  %v13936_v14 = vld [vmem:[#allocation21 + $0x10] sm:$0xff] }
 0x35f   :  { %v4305_v49 = vadd.f32 %v4304_v34, %v4292_v25  ;;  %v13914_v34 = vld [vmem:[#allocation15 + $0x24] sm:$0xf]  ;;  %v11146_v25 = vld [vmem:[#allocation15 + $0x18] sm:$0xf0]  ;;  %4859 = vmatpush.bf16.msrb.mxu2 %v13936_v14 }
 0x360   :  { %v4267_v48 = vpop.f32.mrf.mxu3  ;;  %4673 = vmatpush.bf16.msra.mxu3 %v11169_v21  ;;  %v11157_v20 = vor.u32 %v13914_v34, %v11154_v37  ;;  %v11321_v34 = vor.u32 %v13957_v31, %v11320_v30  ;;  %v11322_v37 = vld [vmem:[#allocation24 + $0x78] sm:$0xf0]  ;;  %v11552_v30 = vld [vmem:[#allocation27 + $0x1c0] sm:$0xf] }
 0x361   :  { %v11145_v48 = vor.u32 %v13913_v46, %v11144_v45  ;;  %v13952_v45 = vld [vmem:[#allocation24 + $0x54] sm:$0xf]  ;;  %v11306_v46 = vld [vmem:[#allocation24 + $0x58] sm:$0xf0] }
 0x362   :  { %4688 = vmatpush.bf16.msrb.mxu0 %v11157_v20  ;;  %v11325_v20 = vor.u32 %v13956_v33, %v11322_v37  ;;  %v14018_v33 = vld [vmem:[#allocation27 + $0x1dc] sm:$0xf0]  ;;  %v11554_v37 = vld [vmem:[#allocation27 + $0x1e0] sm:$0xf0] }
 0x363   :  { %4860 = vmatpush.bf16.msrb.mxu2 %v13935_v28  ;;  %v14070_v28 = vld [vmem:[#allocation27 + $0x384] sm:$0xf] }
 0x364   :  { %4674 = vmatpush.bf16.msra.mxu3 %v11161_v29  ;;  %v13934_v29 = vld [vmem:[#allocation21] sm:$0xff] }
 0x367   :  { %4861 = vmatpush.bf16.msrb.mxu2 %v13934_v29  ;;  %v11778_v29 = vld [vmem:[#allocation27 + $0x3a0] sm:$0xf0] }
 0x368   :  { %v4317_v51 = vpop.f32.mrf.mxu3  ;;  %4675 = vmatpush.bf16.msra.mxu3 %v11153_v39  ;;  %v13955_v39 = vld [vmem:[#allocation24 + $0x64] sm:$0xf0] }
 0x369   :  { %v4318_v52 = vadd.f32 %v4317_v51, %v4305_v49  ;;  %v11149_v49 = vor.u32 %v13912_v47, %v11146_v25  ;;  %v11136_v51 = vld [vmem:[#allocation15] sm:$0xf]  ;;  %v11296_v25 = vld [vmem:[#allocation24 + $0x40] sm:$0xf] }
 0x36b   :  { %v4322_v53 = vmax.f32 %v4318_v52, 0.0  ;;  %4689 = vmatpush.bf16.msrb.mxu0 %v11149_v49  ;;  %v13911_v52 = vld [vmem:[#allocation15 + $0x4] sm:$0xf0]  ;;  %v13951_v49 = vld [vmem:[#allocation24 + $0x44] sm:$0xf0] }
 0x36c   :  { %4676 = vmatpush.bf16.msra.mxu3 %v11145_v48  ;;  %v11309_v48 = vor.u32 %v13952_v45, %v11306_v46  ;;  %v14006_v46 = vld [vmem:[#allocation27 + $0x184] sm:$0xf] }
 0x36d   :  { %v4324_v63 = vpack.c.bf16 %v4322_v53, %v4322_v53  ;;  %v13910_v53 = vld [vmem:[#allocation15 + $0x4] sm:$0xf] }
 0x36f   :  { %4478 = vmatmul.bf16.vlgmr.msra.gmra.mxu1 %v4324_v63  ;;  %v11137_v63 = vor.u32 %v13911_v52, %v11136_v51  ;;  %v13950_v51 = vld [vmem:[#allocation24 + $0x44] sm:$0xf]  ;;  %v11298_v52 = vld [vmem:[#allocation24 + $0x48] sm:$0xf0] }
 0x370   :  { %v4319_v55 = vpop.f32.mrf.mxu3 }
 0x371   :  { %v11138_v55 = vld [vmem:[#allocation15 + $0x8] sm:$0xf0]  ;;  %4677 = vmatpush.bf16.msra.mxu3 %v11137_v63  ;;  %v11301_v63 = vor.u32 %v13950_v51, %v11298_v52  ;;  %v14058_v51 = vld [vmem:[#allocation27 + $0x31c] sm:$0xf0] }
 0x372   :  { %v11141_v38 = vor.u32 %v13910_v53, %v11138_v55  ;;  %v11297_v53 = vor.u32 %v13951_v49, %v11296_v25  ;;  %v11288_v55 = vld [vmem:[#allocation24 + $0x30] sm:$0xf]  ;;  %v11712_v49 = vld [vmem:[#allocation27 + $0x300] sm:$0xf] }
 0x374   :  { %4690 = vmatpush.bf16.msrb.mxu0 %v11141_v38  ;;  %v13949_v38 = vld [vmem:[#allocation24 + $0x34] sm:$0xf0] }
 0x375   :  { %4971 = vmatpush.bf16.msrb.mxu3 %v11321_v34  ;;  %v11289_v59 = vor.u32 %v13949_v38, %v11288_v55  ;;  %v14014_v34 = vld [vmem:[#allocation27 + $0x1c4] sm:$0xf] }
 0x376   :  { %v13998_v55 = vld [vmem:[#allocation27 + $0x144] sm:$0xf] }
 0x377   :  { %v14054_v38 = vld [vmem:[#allocation27 + $0x304] sm:$0xf] }
 0x378   :  { %4984 = vmatpush.bf16.msra.mxu0 %v11325_v20  ;;  %v11557_v20 = vor.u32 %v14014_v34, %v11554_v37  ;;  %v11360_v34 = vld [vmem:[#allocation27 + $0x40] sm:$0xf] }
 0x3cc   :  { %v4466_v5 = vpop.f32.mrf.mxu0 }
 0x3cd   :  { %v4467_v7 = vadd.f32 %v14498_v8, %v4466_v5  ;;  %v11312_v8 = vld [vmem:[#allocation24 + $0x60] sm:$0xf] }
 0x3d4   :  { %v4468_v19 = vpop.f32.mrf.mxu0 }
 0x3ec   :  { %v4479_v41 = vpop.f32.mrf.mxu1 }
 0x3ed   :  { %v4480_v42 = vadd.f32 %v4479_v41, %v4467_v7  ;;  %v13954_v7 = vld [vmem:[#allocation24 + $0x64] sm:$0xf]  ;;  %v11314_v41 = vld [vmem:[#allocation24 + $0x68] sm:$0xf0] }
 0x3ef   :  { %v4483_v15 = vmax.f32 %v4480_v42, 0.0  ;;  %v11313_v42 = vor.u32 %v13955_v39, %v11312_v8  ;;  %v11781_v8 = vor.u32 %v14070_v28, %v11778_v29  ;;  %v11553_v39 = vor.u32 %v14018_v33, %v11552_v30  ;;  %v14501_v28 = vld [vmem:[#allocation22] ss:$0 sm:$0xff]  ;;  %v14030_v29 = vld [vmem:[#allocation27 + $0x244] sm:$0xf] }
 0x3f0   :  { %v11618_v30 = vld [vmem:[#allocation27 + $0x260] sm:$0xf0] }
 0x3f1   :  { %v4484_v36 = vpack.c.bf16 %v4483_v15, %v4483_v15  ;;  %v11317_v15 = vor.u32 %v13954_v7, %v11314_v41  ;;  %4972 = vmatpush.bf16.msrb.mxu3 %v11313_v42  ;;  %v11744_v7 = vld [vmem:[#allocation27 + $0x340] sm:$0xf]  ;;  %v14062_v42 = vld [vmem:[#allocation27 + $0x344] sm:$0xf]  ;;  %5787 = vmatpush.bf16.msra.mxu1 %v11553_v39 }
 0x3f2   :  { %v14066_v41 = vld [vmem:[#allocation27 + $0x35c] sm:$0xf0] }
 0x3f3   :  { %4561 = vmatmul.bf16.vlgmr.msra.gmra.mxu2 %v4484_v36  ;;  %v11304_v36 = vld [vmem:[#allocation24 + $0x50] sm:$0xf]  ;;  %4985 = vmatpush.bf16.msra.mxu0 %v11317_v15  ;;  %v11746_v15 = vld [vmem:[#allocation27 + $0x360] sm:$0xf0]  ;;  %v14026_v39 = vld [vmem:[#allocation27 + $0x21c] sm:$0xf0] }
 0x3f4   :  { %v4481_v32 = vpop.f32.mrf.mxu1  ;;  %v11749_v52 = vor.u32 %v14062_v42, %v11746_v15  ;;  %v11621_v15 = vor.u32 %v14030_v29, %v11618_v30  ;;  %v14059_v29 = vld [vmem:[#allocation27 + $0x324] sm:$0xf0]  ;;  %v14055_v30 = vld [vmem:[#allocation27 + $0x30c] sm:$0xf] }
 0x3f5   :  { %v13953_v32 = vld [vmem:[#allocation24 + $0x54] sm:$0xf0] }
 0x3f6   :  { %v11305_v47 = vor.u32 %v13953_v32, %v11304_v36  ;;  %v11520_v36 = vld [vmem:[#allocation27 + $0x180] sm:$0xf] }
 0x3f7   :  { %4986 = vmatpush.bf16.msra.mxu0 %v11309_v48  ;;  %v14010_v32 = vld [vmem:[#allocation27 + $0x19c] sm:$0xf0]  ;;  %v11745_v48 = vor.u32 %v14066_v41, %v11744_v7  ;;  %v13966_v7 = vld [vmem:[#allocation27 + $0x44] sm:$0xf] }
 0x3f8   :  { %4973 = vmatpush.bf16.msrb.mxu3 %v11305_v47  ;;  %v11521_v45 = vor.u32 %v14010_v32, %v11520_v36  ;;  %v11522_v47 = vld [vmem:[#allocation27 + $0x1a0] sm:$0xf0] }
 0x3f9   :  { %v11525_v25 = vor.u32 %v14006_v46, %v11522_v47  ;;  %v11362_v41 = vld [vmem:[#allocation27 + $0x60] sm:$0xf0]  ;;  %v14083_v47 = vld [vmem:[#allocation27 + $0x3e4] sm:$0xf0] }
 0x3fa   :  { %5788 = vmatpush.bf16.msra.mxu1 %v11521_v45  ;;  %v14022_v36 = vld [vmem:[#allocation27 + $0x204] sm:$0xf]  ;;  %v11816_v45 = vld [vmem:[#allocation27 + $0x3c8] sm:$0xf] }
 0x3fb   :  { %4987 = vmatpush.bf16.msra.mxu0 %v11301_v63  ;;  %v14002_v63 = vld [vmem:[#allocation27 + $0x15c] sm:$0xf0]  ;;  %v11586_v32 = vld [vmem:[#allocation27 + $0x220] sm:$0xf0] }
 0x3fc   :  { %4974 = vmatpush.bf16.msrb.mxu3 %v11297_v53  ;;  %v11488_v53 = vld [vmem:[#allocation27 + $0x140] sm:$0xf] }
 0x400   :  { %4975 = vmatpush.bf16.msrb.mxu3 %v11289_v59  ;;  %v11489_v59 = vor.u32 %v14002_v63, %v11488_v53  ;;  %v13962_v53 = vld [vmem:[#allocation27 + $0x1c] sm:$0xf0]  ;;  %v13958_v63 = vld [vmem:[#allocation27 + $0x4] sm:$0xf] }
 0x402   :  { %5789 = vmatpush.bf16.msra.mxu1 %v11489_v59  ;;  %v11589_v59 = vor.u32 %v14022_v36, %v11586_v32  ;;  %v14047_v36 = vld [vmem:[#allocation27 + $0x2cc] sm:$0xf] }
 0x403   :  { %v11690_v32 = vld [vmem:[#allocation27 + $0x2e8] sm:$0xf0] }
 0x476   :  { %v4562_v60 = vpop.f32.mrf.mxu2 }
 0x477   :  { %v4563_v4 = vadd.f32 %v14499_v56, %v4562_v60  ;;  %v11293_v56 = vor.u32 %v13948_v57, %v11290_v58  ;;  %v11280_v60 = vld [vmem:[#allocation24 + $0x20] sm:$0xf]  ;;  %v11714_v57 = vld [vmem:[#allocation27 + $0x320] sm:$0xf0] }
 0x478   :  { %v11490_v58 = vld [vmem:[#allocation27 + $0x160] sm:$0xf0] }
 0x479   :  { %v4566_v5 = vmax.f32 %v4563_v4, 0.0  ;;  %v13947_v4 = vld [vmem:[#allocation24 + $0x24] sm:$0xf0]  ;;  %4988 = vmatpush.bf16.msra.mxu0 %v11293_v56  ;;  %v11493_v56 = vor.u32 %v13998_v55, %v11490_v58 }
 0x47b   :  { %v4567_v61 = vpack.c.bf16 %v4566_v5, %v4566_v5  ;;  %v13946_v5 = vld [vmem:[#allocation24 + $0x24] sm:$0xf] }
 0x47d   :  { %4678 = vmatmul.bf16.vlgmr.msra.gmra.mxu3 %v4567_v61  ;;  %4691 = vmatmul.bf16.vlgmr.msrb.gmra.mxu0 %v4567_v61  ;;  %v11282_v61 = vld [vmem:[#allocation24 + $0x28] sm:$0xf0] }
 0x47e   :  { %v4564_v19 = vpop.f32.mrf.mxu2  ;;  %v11285_v22 = vor.u32 %v13946_v5, %v11282_v61  ;;  %v13994_v5 = vld [vmem:[#allocation27 + $0x11c] sm:$0xf0]  ;;  %v13990_v61 = vld [vmem:[#allocation27 + $0x104] sm:$0xf] }
 0x47f   :  { %v11281_v19 = vor.u32 %v13947_v4, %v11280_v60  ;;  %v11456_v60 = vld [vmem:[#allocation27 + $0x100] sm:$0xf]  ;;  %v11713_v4 = vor.u32 %v14058_v51, %v11712_v49  ;;  %v11365_v51 = vor.u32 %v13966_v7, %v11362_v41 }
 0x480   :  { %4989 = vmatpush.bf16.msra.mxu0 %v11285_v22  ;;  %v11717_v22 = vor.u32 %v14054_v38, %v11714_v57  ;;  %v11330_v38 = vld [vmem:[#allocation27 + $0x20] sm:$0xf0]  ;;  %v11560_v57 = vld [vmem:[#allocation27 + $0x1c8] sm:$0xf] }
 0x481   :  { %4976 = vmatpush.bf16.msrb.mxu3 %v11281_v19  ;;  %v11458_v19 = vld [vmem:[#allocation27 + $0x120] sm:$0xf0] }
 0x485   :  { %4977 = vmatpush.bf16.msrb.mxu3 %v11273_v6  ;;  %v13982_v6 = vld [vmem:[#allocation27 + $0xc4] sm:$0xf] }
 0x4fa   :  { %v4692_v54 = vpop.f32.mrf.mxu0 }
 0x4fb   :  { %v4693_v43 = vadd.f32 %v4692_v54, %v4587_v35  ;;  %v13944_v35 = vld [vmem:[#allocation24 + $0x14] sm:$0xf]  ;;  %v11274_v54 = vld [vmem:[#allocation24 + $0x18] sm:$0xf0] }
 0x4fd   :  { %v4696_v11 = vmul.f32 0.5, %v4693_v43  ;;  %v11277_v43 = vor.u32 %v13944_v35, %v11274_v54  ;;  %v13986_v35 = vld [vmem:[#allocation27 + $0xdc] sm:$0xf0]  ;;  %v11426_v54 = vld [vmem:[#allocation27 + $0xe0] sm:$0xf0] }
 0x4ff   :  { %v4697_v0 = vmul.f32 1.442695, %v4696_v11  ;;  %4990 = vmatpush.bf16.msra.mxu0 %v11277_v43  ;;  %v13943_v11 = vld [vmem:[#allocation24 + $0x4] sm:$0xf0] }
 0x500   :  { %v4679_v13 = vpop.f32.mrf.mxu3 }
 0x501   :  { %14502 = vpow2.f32 %v4697_v0  ;;  %v4680_v16 = vadd.f32 %v4679_v13, %v4586_v12  ;;  %v13942_v12 = vld [vmem:[#allocation24 + $0x4] sm:$0xf]  ;;  %v11265_v0 = vor.u32 %v13943_v11, %v11264_v10  ;;  %v11266_v13 = vld [vmem:[#allocation24 + $0x8] sm:$0xf0] }
 0x502   :  { %v4694_v3 = vpop.f32.mrf.mxu0  ;;  %v11269_v14 = vor.u32 %v13942_v12, %v11266_v13  ;;  %v11648_v10 = vld [vmem:[#allocation27 + $0x280] sm:$0xf]  ;;  %v14038_v12 = vld [vmem:[#allocation27 + $0x284] sm:$0xf]  ;;  %v11425_v13 = vor.u32 %v13986_v35, %v11424_v50 }
 0x503   :  { %8965 = vst [vmem:[%s15631_s23] sm:$0xff] %v4680_v16  ;;  %4978 = vmatpush.bf16.msrb.mxu3 %v11265_v0  ;;  %v14082_v3 = vld [vmem:[#allocation27 + $0x3dc] sm:$0xf0]  ;;  %v11650_v0 = vld [vmem:[#allocation27 + $0x2a0] sm:$0xf0] }
 0x504   :  { %4991 = vmatpush.bf16.msra.mxu0 %v11269_v14  ;;  %v14042_v11 = vld [vmem:[#allocation27 + $0x29c] sm:$0xf0]  ;;  %v11429_v14 = vor.u32 %v13982_v6, %v11426_v54  ;;  %v14011_v6 = vld [vmem:[#allocation27 + $0x1a4] sm:$0xf0]  ;;  %v14007_v54 = vld [vmem:[#allocation27 + $0x18c] sm:$0xf] }
 0x507   :  { %v14503_v21 = vpop.eup %14502  ;;  %5813 = vmatpush.bf16.msra.mxu3 %v11557_v20  ;;  %v13970_v20 = vld [vmem:[#allocation27 + $0x5c] sm:$0xf0] }
 0x508   :  { %8966 = vst [vmem:[%s15655_s13] sm:$0xff] %v14503_v21  ;;  %v4700_v23 = vmul.f32 %v14503_v21, %v4699_v9  ;;  %v4681_v24 = vpop.f32.mrf.mxu3  ;;  %v14078_v9 = vld [vmem:[#allocation27 + $0x3c4] sm:$0xf]  ;;  %v11361_v49 = vor.u32 %v13970_v20, %v11360_v34  ;;  %v11466_v20 = vld [vmem:[#allocation27 + $0x128] sm:$0xf0] }
 0x509   :  { %v11776_v24 = vld [vmem:[#allocation27 + $0x380] sm:$0xf] }
 0x50a   :  { %v4701_v26 = vadd.f32 %v4700_v23, %v4680_v16  ;;  %v11808_v16 = vld [vmem:[#allocation27 + $0x3c0] sm:$0xf]  ;;  %v11810_v23 = vld [vmem:[#allocation27 + $0x3e0] sm:$0xf0] }
 0x50b   :  { %v11809_v21 = vor.u32 %v14082_v3, %v11808_v16  ;;  %5814 = vmatpush.bf16.msra.mxu3 %v11525_v25  ;;  %v11392_v16 = vld [vmem:[#allocation27 + $0x80] sm:$0xf]  ;;  %v11649_v3 = vor.u32 %v14042_v11, %v11648_v10  ;;  %v11818_v25 = vld [vmem:[#allocation27 + $0x3e8] sm:$0xf0] }
 0x50c   :  { %v4702_v27 = vpack.c.bf16 %v4701_v26, %v4701_v26  ;;  %v14074_v26 = vld [vmem:[#allocation27 + $0x39c] sm:$0xf0] }
 0x50d   :  { %5800 = vmatpush.bf16.msra.mxu2 %v11809_v21  ;;  %v11777_v31 = vor.u32 %v14074_v26, %v11776_v24  ;;  %v13974_v21 = vld [vmem:[#allocation27 + $0x84] sm:$0xf]  ;;  %v11653_v24 = vor.u32 %v14038_v12, %v11650_v0  ;;  %v11616_v26 = vld [vmem:[#allocation27 + $0x240] sm:$0xf]  ;;  %v11752_v12 = vld [vmem:[#allocation27 + $0x348] sm:$0xf] }
 0x50e   :  { %4779 = vmatmul.bf16.vlgmr.msrb.gmra.mxu1 %v4702_v27  ;;  %v11813_v27 = vor.u32 %v14078_v9, %v11810_v23  ;;  %v13978_v9 = vld [vmem:[#allocation27 + $0x9c] sm:$0xf0]  ;;  %v11394_v23 = vld [vmem:[#allocation27 + $0xa0] sm:$0xf0]  ;;  %v14067_v0 = vld [vmem:[#allocation27 + $0x364] sm:$0xf0] }
 0x50f   :  { %5815 = vmatpush.bf16.msra.mxu3 %v11493_v56  ;;  %v11397_v33 = vor.u32 %v13974_v21, %v11394_v23  ;;  %v14019_v56 = vld [vmem:[#allocation27 + $0x1e4] sm:$0xf0]  ;;  %v13999_v23 = vld [vmem:[#allocation27 + $0x14c] sm:$0xf] }
 0x510   :  { %5826 = vmatpush.bf16.msrb.mxu0 %v11813_v27  ;;  %v14034_v27 = vld [vmem:[#allocation27 + $0x25c] sm:$0xf0]  ;;  %v14003_v21 = vld [vmem:[#allocation27 + $0x164] sm:$0xf0] }
 0x511   :  { %5801 = vmatpush.bf16.msra.mxu2 %v11777_v31  ;;  %v11393_v31 = vor.u32 %v13978_v9, %v11392_v16  ;;  %v11617_v37 = vor.u32 %v14034_v27, %v11616_v26  ;;  %v11496_v9 = vld [vmem:[#allocation27 + $0x148] sm:$0xf]  ;;  %v11753_v26 = vor.u32 %v14067_v0, %v11752_v12  ;;  %v13967_v12 = vld [vmem:[#allocation27 + $0x4c] sm:$0xf] }
 0x514   :  { %5827 = vmatpush.bf16.msrb.mxu0 %v11781_v8  ;;  %v11584_v8 = vld [vmem:[#allocation27 + $0x200] sm:$0xf] }
 0x515   :  { %5802 = vmatpush.bf16.msra.mxu2 %v11745_v48  ;;  %v14079_v48 = vld [vmem:[#allocation27 + $0x3cc] sm:$0xf]  ;;  %v11585_v58 = vor.u32 %v14026_v39, %v11584_v8  ;;  %v13995_v8 = vld [vmem:[#allocation27 + $0x124] sm:$0xf0] }
 0x516   :  { %v13991_v39 = vld [vmem:[#allocation27 + $0x10c] sm:$0xf] }
 0x518   :  { %5828 = vmatpush.bf16.msrb.mxu0 %v11749_v52  ;;  %v11328_v52 = vld [vmem:[#allocation27] sm:$0xf] }
 0x519   :  { %5803 = vmatpush.bf16.msra.mxu2 %v11713_v4  ;;  %v11562_v4 = vld [vmem:[#allocation27 + $0x1e8] sm:$0xf0] }
 0x51c   :  { %5829 = vmatpush.bf16.msrb.mxu0 %v11717_v22  ;;  %v11784_v22 = vld [vmem:[#allocation27 + $0x388] sm:$0xf] }
 0x58b   :  { %v4780_v1 = vpop.f32.mrf.mxu1 }
 0x58c   :  { %v4781_v18 = vadd.f32 %v14500_v17, %v4780_v1  ;;  %v11680_v17 = vld [vmem:[#allocation27 + $0x2c0] sm:$0xf] }
 0x58d   :  { %v14050_v1 = vld [vmem:[#allocation27 + $0x2dc] sm:$0xf0] }
 0x58e   :  { %v4784_v40 = vmax.f32 %v4781_v18, 0.0  ;;  %v14046_v18 = vld [vmem:[#allocation27 + $0x2c4] sm:$0xf]  ;;  %v11681_v62 = vor.u32 %v14050_v1, %v11680_v17  ;;  %v14075_v17 = vld [vmem:[#allocation27 + $0x3a4] sm:$0xf0] }
 0x58f   :  { %v14071_v1 = vld [vmem:[#allocation27 + $0x38c] sm:$0xf]  ;;  %v11785_v10 = vor.u32 %v14075_v17, %v11784_v22  ;;  %v11400_v17 = vld [vmem:[#allocation27 + $0x88] sm:$0xf] }
 0x590   :  { %v4785_v44 = vpack.c.bf16 %v4784_v40, %v4784_v40  ;;  %v11682_v40 = vld [vmem:[#allocation27 + $0x2e0] sm:$0xf0]  ;;  %5804 = vmatpush.bf16.msra.mxu2 %v11681_v62  ;;  %v11528_v62 = vld [vmem:[#allocation27 + $0x188] sm:$0xf] }
 0x591   :  { %v11685_v43 = vor.u32 %v14046_v18, %v11682_v40  ;;  %v11786_v18 = vld [vmem:[#allocation27 + $0x3a8] sm:$0xf0]  ;;  %v11329_v40 = vor.u32 %v13962_v53, %v11328_v52  ;;  %v11529_v16 = vor.u32 %v14011_v6, %v11528_v62  ;;  %v14027_v62 = vld [vmem:[#allocation27 + $0x224] sm:$0xf0] }
 0x592   :  { %4862 = vmatmul.bf16.vlgmr.msrb.gmra.mxu2 %v4785_v44  ;;  %v11457_v44 = vor.u32 %v13994_v5, %v11456_v60  ;;  %v14015_v60 = vld [vmem:[#allocation27 + $0x1cc] sm:$0xf]  ;;  %v11789_v11 = vor.u32 %v14071_v1, %v11786_v18  ;;  %v13979_v1 = vld [vmem:[#allocation27 + $0xa4] sm:$0xf0] }
 0x593   :  { %v4782_v2 = vpop.f32.mrf.mxu1  ;;  %5830 = vmatpush.bf16.msrb.mxu0 %v11685_v43  ;;  %v11565_v50 = vor.u32 %v14015_v60, %v11562_v4  ;;  %v11530_v43 = vld [vmem:[#allocation27 + $0x1a8] sm:$0xf0]  ;;  %v11624_v60 = vld [vmem:[#allocation27 + $0x248] sm:$0xf] }
 0x594   :  { %v11461_v2 = vor.u32 %v13990_v61, %v11458_v19  ;;  %5790 = vmatpush.bf16.msra.mxu1 %v11457_v44  ;;  %5805 = vmatpush.bf16.msra.mxu2 %v11649_v3  ;;  %v11817_v61 = vor.u32 %v14083_v47, %v11816_v45  ;;  %v11821_v19 = vor.u32 %v14079_v48, %v11818_v25  ;;  %v11656_v25 = vld [vmem:[#allocation27 + $0x288] sm:$0xf]  ;;  %v11658_v52 = vld [vmem:[#allocation27 + $0x2a8] sm:$0xf0] }
 0x595   :  { %v11333_v44 = vor.u32 %v13958_v63, %v11330_v38  ;;  %v11533_v3 = vor.u32 %v14007_v54, %v11530_v43  ;;  %v11693_v48 = vor.u32 %v14047_v36, %v11690_v32  ;;  %v13987_v38 = vld [vmem:[#allocation27 + $0xe4] sm:$0xf0]  ;;  %v13975_v18 = vld [vmem:[#allocation27 + $0x8c] sm:$0xf]  ;;  %v11794_v36 = vld [vmem:[#allocation27 + $0x3b0] sm:$0xf0] }
 0x596   :  { %5816 = vmatpush.bf16.msra.mxu3 %v11461_v2  ;;  %v11561_v2 = vor.u32 %v14019_v56, %v11560_v57  ;;  %v13983_v57 = vld [vmem:[#allocation27 + $0xcc] sm:$0xf]  ;;  %v14035_v4 = vld [vmem:[#allocation27 + $0x264] sm:$0xf0] }
 0x597   :  { %5831 = vmatpush.bf16.msrb.mxu0 %v11653_v24  ;;  %v11498_v24 = vld [vmem:[#allocation27 + $0x168] sm:$0xf0] }
 0x598   :  { %5791 = vmatpush.bf16.msra.mxu1 %v11425_v13  ;;  %5806 = vmatpush.bf16.msra.mxu2 %v11617_v37  ;;  %v14063_v13 = vld [vmem:[#allocation27 + $0x34c] sm:$0xf]  ;;  %v11501_v34 = vor.u32 %v13999_v23, %v11498_v24  ;;  %v11464_v37 = vld [vmem:[#allocation27 + $0x108] sm:$0xf] }
 0x599   :  { %v11465_v45 = vor.u32 %v13995_v8, %v11464_v37  ;;  %v11594_v54 = vld [vmem:[#allocation27 + $0x228] sm:$0xf0] }
 0x59a   :  { %5817 = vmatpush.bf16.msra.mxu3 %v11429_v14  ;;  %v11754_v14 = vld [vmem:[#allocation27 + $0x368] sm:$0xf0] }
 0x59b   :  { %5832 = vmatpush.bf16.msrb.mxu0 %v11621_v15  ;;  %v11757_v27 = vor.u32 %v14063_v13, %v11754_v14  ;;  %v14051_v15 = vld [vmem:[#allocation27 + $0x2e4] sm:$0xf0]  ;;  %v11370_v13 = vld [vmem:[#allocation27 + $0x68] sm:$0xf0] }
 0x59c   :  { %5792 = vmatpush.bf16.msra.mxu1 %v11393_v31  ;;  %5807 = vmatpush.bf16.msra.mxu2 %v11585_v58  ;;  %v11722_v31 = vld [vmem:[#allocation27 + $0x328] sm:$0xf0]  ;;  %v11373_v14 = vor.u32 %v13967_v12, %v11370_v13  ;;  %v14052_v12 = vld [vmem:[#allocation27 + $0x2ec] sm:$0xf0]  ;;  %v11698_v13 = vld [vmem:[#allocation27 + $0x2f0] sm:$0xf0] }
 0x59d   :  { %v11725_v41 = vor.u32 %v14055_v30, %v11722_v31  ;;  %v11338_v23 = vld [vmem:[#allocation27 + $0x28] sm:$0xf0]  ;;  %v14084_v31 = vld [vmem:[#allocation27 + $0x3ec] sm:$0xf0] }
 0x59e   :  { %5818 = vmatpush.bf16.msra.mxu3 %v11397_v33  ;;  %v11497_v33 = vor.u32 %v14003_v21, %v11496_v9  ;;  %v13959_v21 = vld [vmem:[#allocation27 + $0xc] sm:$0xf] }
 0x59f   :  { %5833 = vmatpush.bf16.msrb.mxu0 %v11589_v59  ;;  %v11434_v59 = vld [vmem:[#allocation27 + $0xe8] sm:$0xf0]  ;;  %v11341_v24 = vor.u32 %v13959_v21, %v11338_v23  ;;  %v13992_v21 = vld [vmem:[#allocation27 + $0x114] sm:$0xf] }
 0x5a0   :  { %5793 = vmatpush.bf16.msra.mxu1 %v11361_v49  ;;  %5852 = vmatpush.bf16.msrb.mxu2 %v11817_v61  ;;  %v14043_v49 = vld [vmem:[#allocation27 + $0x2a4] sm:$0xf0]  ;;  %v11437_v56 = vor.u32 %v13983_v57, %v11434_v59  ;;  %v11625_v61 = vor.u32 %v14035_v4, %v11624_v60  ;;  %v11762_v57 = vld [vmem:[#allocation27 + $0x370] sm:$0xf0]  ;;  %v14012_v4 = vld [vmem:[#allocation27 + $0x1ac] sm:$0xf0] }
 0x5a1   :  { %v11657_v53 = vor.u32 %v14043_v49, %v11656_v25  ;;  %v11570_v25 = vld [vmem:[#allocation27 + $0x1f0] sm:$0xf0] }
 0x5a2   :  { %5819 = vmatpush.bf16.msra.mxu3 %v11365_v51  ;;  %v14039_v51 = vld [vmem:[#allocation27 + $0x28c] sm:$0xf]  ;;  %v11474_v23 = vld [vmem:[#allocation27 + $0x130] sm:$0xf0] }
 0x5a3   :  { %v11661_v63 = vor.u32 %v14039_v51, %v11658_v52 }
 0x5a4   :  { %5794 = vmatpush.bf16.msra.mxu1 %v11329_v40  ;;  %5853 = vmatpush.bf16.msrb.mxu2 %v11785_v10  ;;  %v11401_v40 = vor.u32 %v13979_v1, %v11400_v17  ;;  %v11368_v10 = vld [vmem:[#allocation27 + $0x48] sm:$0xf]  ;;  %v11728_v17 = vld [vmem:[#allocation27 + $0x310] sm:$0xf] }
 0x5a5   :  { %v14060_v1 = vld [vmem:[#allocation27 + $0x32c] sm:$0xf0] }
 0x5a6   :  { %5820 = vmatpush.bf16.msra.mxu3 %v11333_v44  ;;  %v11402_v44 = vld [vmem:[#allocation27 + $0xa8] sm:$0xf0] }
 0x5a8   :  { %5839 = vmatpush.bf16.msrb.mxu1 %v11561_v2  ;;  %5854 = vmatpush.bf16.msrb.mxu2 %v11753_v26  ;;  %v11405_v2 = vor.u32 %v13975_v18, %v11402_v44  ;;  %v4885_v26 = vld [vmem:[#allocation25] sm:$0x3]  ;;  %v14056_v18 = vld [vmem:[#allocation27 + $0x314] sm:$0xf] }
 0x5a9   :  { %v4887_v8 = vperm.slane %v4885_v26, 0 }
 0x5ac   :  { %5840 = vmatpush.bf16.msrb.mxu1 %v11529_v16  ;;  %v11336_v16 = vld [vmem:[#allocation27 + $0x8] sm:$0xf] }
 0x5b0   :  { %5841 = vmatpush.bf16.msrb.mxu1 %v11497_v33  ;;  %v14080_v33 = vld [vmem:[#allocation27 + $0x3d4] sm:$0xf] }
 0x5b4   :  { %5842 = vmatpush.bf16.msrb.mxu1 %v11465_v45  ;;  %v11568_v45 = vld [vmem:[#allocation27 + $0x1d0] sm:$0xf] }
 0x615   :  { %v4863_v42 = vpop.f32.mrf.mxu2 }
 0x616   :  { %v4864_v46 = vadd.f32 %v14501_v28, %v4863_v42  ;;  %v11720_v28 = vld [vmem:[#allocation27 + $0x308] sm:$0xf] }
 0x617   :  { %v11721_v7 = vor.u32 %v14059_v29, %v11720_v28  ;;  %v11688_v42 = vld [vmem:[#allocation27 + $0x2c8] sm:$0xf]  ;;  %v11824_v29 = vld [vmem:[#allocation27 + $0x3d0] sm:$0xf] }
 0x618   :  { %v4867_v55 = vmax.f32 %v4864_v46, 0.0  ;;  %v11469_v46 = vor.u32 %v13991_v39, %v11466_v20  ;;  %v11689_v47 = vor.u32 %v14051_v15, %v11688_v42  ;;  %v11825_v39 = vor.u32 %v14084_v31, %v11824_v29  ;;  %v14076_v42 = vld [vmem:[#allocation27 + $0x3ac] sm:$0xf0]  ;;  %v14072_v15 = vld [vmem:[#allocation27 + $0x394] sm:$0xf] }
 0x619   :  { %5855 = vmatpush.bf16.msrb.mxu2 %v11721_v7  ;;  %v11792_v7 = vld [vmem:[#allocation27 + $0x390] sm:$0xf]  ;;  %v11797_v52 = vor.u32 %v14072_v15, %v11794_v36  ;;  %v14040_v29 = vld [vmem:[#allocation27 + $0x294] sm:$0xf] }
 0x61a   :  { %v4868_v5 = vpack.c.bf16 %v4867_v55, %v4867_v55  ;;  %v11432_v55 = vld [vmem:[#allocation27 + $0xc8] sm:$0xf]  ;;  %v11793_v51 = vor.u32 %v14076_v42, %v11792_v7  ;;  %v11632_v42 = vld [vmem:[#allocation27 + $0x250] sm:$0xf]  ;;  %v14032_v36 = vld [vmem:[#allocation27 + $0x254] sm:$0xf] }
 0x61b   :  { %v11433_v58 = vor.u32 %v13987_v38, %v11432_v55  ;;  %v14064_v38 = vld [vmem:[#allocation27 + $0x354] sm:$0xf]  ;;  %v14036_v15 = vld [vmem:[#allocation27 + $0x26c] sm:$0xf0] }
 0x61c   :  { %4979 = vmatmul.bf16.vlgmr.msrb.gmra.mxu3 %v4868_v5  ;;  %4992 = vmatmul.bf16.vlgmr.msra.gmra.mxu0 %v4868_v5  ;;  %v14031_v5 = vld [vmem:[#allocation27 + $0x24c] sm:$0xf] }
 0x61d   :  { %v4865_v35 = vpop.f32.mrf.mxu2  ;;  %5878 = vmatpush.bf16.msra.mxu0 %v11821_v19  ;;  %5865 = vmatpush.bf16.msrb.mxu3 %v11565_v50  ;;  %v11626_v19 = vld [vmem:[#allocation27 + $0x268] sm:$0xf0]  ;;  %v11592_v50 = vld [vmem:[#allocation27 + $0x208] sm:$0xf] }
 0x61e   :  { %5856 = vmatpush.bf16.msrb.mxu2 %v11689_v47  ;;  %5843 = vmatpush.bf16.msrb.mxu1 %v11433_v58  ;;  %v11629_v22 = vor.u32 %v14031_v5, %v11626_v19  ;;  %v14023_v35 = vld [vmem:[#allocation27 + $0x20c] sm:$0xf]  ;;  %v11593_v6 = vor.u32 %v14027_v62, %v11592_v50  ;;  %v14020_v47 = vld [vmem:[#allocation27 + $0x1ec] sm:$0xf0]  ;;  %v14008_v5 = vld [vmem:[#allocation27 + $0x194] sm:$0xf] }
 0x61f   :  { %v11597_v43 = vor.u32 %v14023_v35, %v11594_v54  ;;  %v11569_v58 = vor.u32 %v14020_v47, %v11568_v45  ;;  %v11504_v62 = vld [vmem:[#allocation27 + $0x150] sm:$0xf]  ;;  %v11506_v54 = vld [vmem:[#allocation27 + $0x170] sm:$0xf0] }
 0x620   :  { %v14004_v35 = vld [vmem:[#allocation27 + $0x16c] sm:$0xf0] }
 0x621   :  { %5879 = vmatpush.bf16.msra.mxu0 %v11789_v11  ;;  %5866 = vmatpush.bf16.msrb.mxu3 %v11533_v3  ;;  %v13971_v11 = vld [vmem:[#allocation27 + $0x64] sm:$0xf0]  ;;  %v11408_v47 = vld [vmem:[#allocation27 + $0x90] sm:$0xf] }
 0x622   :  { %5857 = vmatpush.bf16.msrb.mxu2 %v11657_v53  ;;  %5844 = vmatpush.bf16.msrb.mxu1 %v11401_v40  ;;  %v11369_v0 = vor.u32 %v13971_v11, %v11368_v10  ;;  %v13963_v3 = vld [vmem:[#allocation27 + $0x24] sm:$0xf0]  ;;  %v11760_v53 = vld [vmem:[#allocation27 + $0x350] sm:$0xf]  ;;  %v11730_v40 = vld [vmem:[#allocation27 + $0x330] sm:$0xf0] }
 0x623   :  { %v11337_v9 = vor.u32 %v13963_v3, %v11336_v16  ;;  %v11733_v10 = vor.u32 %v14056_v18, %v11730_v40  ;;  %v11696_v11 = vld [vmem:[#allocation27 + $0x2d0] sm:$0xf] }
 0x624   :  { %v11472_v3 = vld [vmem:[#allocation27 + $0x110] sm:$0xf] }
 0x625   :  { %5880 = vmatpush.bf16.msra.mxu0 %v11757_v27  ;;  %5867 = vmatpush.bf16.msrb.mxu3 %v11501_v34  ;;  %v4888_v27 = vperm.slane %v4885_v26, 1  ;;  %v11826_v34 = vld [vmem:[#allocation27 + $0x3f0] sm:$0xf0] }
 0x626   :  { %5858 = vmatpush.bf16.msrb.mxu2 %v11625_v61  ;;  %5845 = vmatpush.bf16.msrb.mxu1 %v11369_v0  ;;  %v11829_v20 = vor.u32 %v14080_v33, %v11826_v34  ;;  %v11538_v61 = vld [vmem:[#allocation27 + $0x1b0] sm:$0xf0]  ;;  %v11477_v33 = vor.u32 %v13992_v21, %v11474_v23  ;;  %v11440_v34 = vld [vmem:[#allocation27 + $0xd0] sm:$0xf]  ;;  %v11768_v21 = vld [vmem:[#allocation27 + $0x358] sm:$0xf] }
 0x627   :  { %v11541_v50 = vor.u32 %v14008_v5, %v11538_v61  ;;  %v14048_v0 = vld [vmem:[#allocation27 + $0x2d4] sm:$0xf]  ;;  %v11834_v5 = vld [vmem:[#allocation27 + $0x3f8] sm:$0xf0]  ;;  %v11376_v61 = vld [vmem:[#allocation27 + $0x50] sm:$0xf] }
 0x628   :  { %v11701_v26 = vor.u32 %v14048_v0, %v11698_v13  ;;  %v11576_v0 = vld [vmem:[#allocation27 + $0x1d8] sm:$0xf] }
 0x629   :  { %5881 = vmatpush.bf16.msra.mxu0 %v11725_v41  ;;  %5868 = vmatpush.bf16.msrb.mxu3 %v11469_v46  ;;  %v14021_v13 = vld [vmem:[#allocation27 + $0x1f4] sm:$0xf0] }
 0x62a   :  { %5859 = vmatpush.bf16.msrb.mxu2 %v11593_v6  ;;  %5846 = vmatpush.bf16.msrb.mxu1 %v11337_v9  ;;  %v14000_v6 = vld [vmem:[#allocation27 + $0x154] sm:$0xf]  ;;  %v13996_v9 = vld [vmem:[#allocation27 + $0x12c] sm:$0xf0] }
 0x62b   :  { %v11509_v16 = vor.u32 %v14000_v6, %v11506_v54  ;;  %v11473_v31 = vor.u32 %v13996_v9, %v11472_v3  ;;  %v11802_v54 = vld [vmem:[#allocation27 + $0x3b8] sm:$0xf0] }
 0x62d   :  { %5882 = vmatpush.bf16.msra.mxu0 %v11693_v48  ;;  %5869 = vmatpush.bf16.msrb.mxu3 %v11437_v56  ;;  %v14016_v48 = vld [vmem:[#allocation27 + $0x1d4] sm:$0xf]  ;;  %v11536_v56 = vld [vmem:[#allocation27 + $0x190] sm:$0xf] }
 0x62e   :  { %v11573_v59 = vor.u32 %v14016_v48, %v11570_v25  ;;  %v13980_v48 = vld [vmem:[#allocation27 + $0xac] sm:$0xf0]  ;;  %v13976_v25 = vld [vmem:[#allocation27 + $0x94] sm:$0xf] }
 0x631   :  { %5883 = vmatpush.bf16.msra.mxu0 %v11661_v63  ;;  %5870 = vmatpush.bf16.msrb.mxu3 %v11405_v2  ;;  %v14068_v63 = vld [vmem:[#allocation27 + $0x36c] sm:$0xf0]  ;;  %v11537_v2 = vor.u32 %v14012_v4, %v11536_v56  ;;  %v14081_v4 = vld [vmem:[#allocation27 + $0x3dc] sm:$0xf] }
 0x632   :  { %v11761_v19 = vor.u32 %v14068_v63, %v11760_v53  ;;  %v11600_v53 = vld [vmem:[#allocation27 + $0x210] sm:$0xf] }
 0x633   :  { %v14028_v63 = vld [vmem:[#allocation27 + $0x22c] sm:$0xf0] }
 0x635   :  { %5884 = vmatpush.bf16.msra.mxu0 %v11629_v22  ;;  %5871 = vmatpush.bf16.msrb.mxu3 %v11373_v14  ;;  %v11765_v22 = vor.u32 %v14064_v38, %v11762_v57  ;;  %v11505_v14 = vor.u32 %v14004_v35, %v11504_v62  ;;  %v11602_v38 = vld [vmem:[#allocation27 + $0x230] sm:$0xf0]  ;;  %v11832_v57 = vld [vmem:[#allocation27 + $0x3d8] sm:$0xf]  ;;  %v14073_v62 = vld [vmem:[#allocation27 + $0x39c] sm:$0xf] }
 0x636   :  { %v11805_v9 = vor.u32 %v14073_v62, %v11802_v54  ;;  %v14037_v54 = vld [vmem:[#allocation27 + $0x274] sm:$0xf0] }
 0x639   :  { %5885 = vmatpush.bf16.msra.mxu0 %v11597_v43  ;;  %5872 = vmatpush.bf16.msrb.mxu3 %v11341_v24  ;;  %v11729_v43 = vor.u32 %v14060_v1, %v11728_v17  ;;  %v11697_v24 = vor.u32 %v14052_v12, %v11696_v11  ;;  %v11378_v17 = vld [vmem:[#allocation27 + $0x70] sm:$0xf0]  ;;  %v11601_v1 = vor.u32 %v14028_v63, %v11600_v53  ;;  %v14049_v53 = vld [vmem:[#allocation27 + $0x2dc] sm:$0xf] }
 0x63a   :  { %v13960_v11 = vld [vmem:[#allocation27 + $0x14] sm:$0xf]  ;;  %v11706_v63 = vld [vmem:[#allocation27 + $0x2f8] sm:$0xf0] }
 0x63b   :  { %v11346_v12 = vld [vmem:[#allocation27 + $0x30] sm:$0xf0] }
 0x699   :  { %v4993_v28 = vpop.f32.mrf.mxu0 }
 0x69a   :  { %v4994_v30 = vadd.f32 %v4993_v28, %v4888_v27  ;;  %v11664_v27 = vld [vmem:[#allocation27 + $0x290] sm:$0xf] }
 0x69b   :  { %v14044_v28 = vld [vmem:[#allocation27 + $0x2ac] sm:$0xf0] }
 0x69c   :  { %v4998_v37 = vmax.f32 %v4994_v30, 0.0  ;;  %v11666_v30 = vld [vmem:[#allocation27 + $0x2b0] sm:$0xf0] }
 0x69d   :  { %v11669_v7 = vor.u32 %v14040_v29, %v11666_v30  ;;  %v11577_v29 = vor.u32 %v14021_v13, %v11576_v0  ;;  %v11416_v0 = vld [vmem:[#allocation27 + $0x98] sm:$0xf] }
 0x69e   :  { %v15429_v41 = vpack.c.bf16 %v4998_v37, %v4998_v37  ;;  %v13988_v37 = vld [vmem:[#allocation27 + $0xec] sm:$0xf0]  ;;  %v13981_v13 = vld [vmem:[#allocation27 + $0xb4] sm:$0xf0] }
 0x69f   :  { %v4980_v32 = vpop.f32.mrf.mxu3  ;;  %v11441_v45 = vor.u32 %v13988_v37, %v11440_v34  ;;  %v14009_v34 = vld [vmem:[#allocation27 + $0x19c] sm:$0xf] }
 0x6a0   :  { %v4981_v46 = vadd.f32 %v4980_v32, %v4887_v8  ;;  %5808 = vmatmul.bf16.vlgmr.msra.gmra.mxu2 %v15429_v41  ;;  %5834 = vmatmul.bf16.vlgmr.msrb.gmra.mxu0 %v15429_v41  ;;  %v13984_v8 = vld [vmem:[#allocation27 + $0xd4] sm:$0xf]  ;;  %v11546_v37 = vld [vmem:[#allocation27 + $0x1b8] sm:$0xf0] }
 0x6a1   :  { %5904 = vmatpush.bf16.msra.mxu2 %v11825_v39  ;;  %5930 = vmatpush.bf16.msrb.mxu0 %v11829_v20  ;;  %v4995_v49 = vpop.f32.mrf.mxu0  ;;  %v11442_v39 = vld [vmem:[#allocation27 + $0xf0] sm:$0xf0]  ;;  %v11665_v20 = vor.u32 %v14044_v28, %v11664_v27  ;;  %v14065_v27 = vld [vmem:[#allocation27 + $0x35c] sm:$0xf] }
 0x6a2   :  { %v4997_v55 = vmax.f32 %v4981_v46, 0.0  ;;  %v11634_v32 = vld [vmem:[#allocation27 + $0x270] sm:$0xf0]  ;;  %v11445_v46 = vor.u32 %v13984_v8, %v11442_v39  ;;  %v11770_v28 = vld [vmem:[#allocation27 + $0x378] sm:$0xf0] }
 0x6a3   :  { %v11410_v49 = vld [vmem:[#allocation27 + $0xb0] sm:$0xf0]  ;;  %v11773_v39 = vor.u32 %v14065_v27, %v11770_v28  ;;  %v11417_v27 = vor.u32 %v13981_v13, %v11416_v0  ;;  %v12560_v0 = vld [vmem:[#allocation30 + $0x5a0] sm:$0xf]  ;;  %v14269_v13 = vld [vmem:[#allocation30 + $0x5b4] sm:$0xf0] }
 0x6a4   :  { %v15433_v60 = vpack.c.bf16 %v4997_v55, %v4997_v55  ;;  %v14024_v55 = vld [vmem:[#allocation27 + $0x214] sm:$0xf]  ;;  %v11413_v56 = vor.u32 %v13976_v25, %v11410_v49 }
 0x6a5   :  { %5905 = vmatpush.bf16.msra.mxu2 %v11793_v51  ;;  %5931 = vmatpush.bf16.msrb.mxu0 %v11797_v52  ;;  %v11633_v51 = vor.u32 %v14036_v15, %v11632_v42  ;;  %v11637_v52 = vor.u32 %v14032_v36, %v11634_v32  ;;  %v11605_v18 = vor.u32 %v14024_v55, %v11602_v38  ;;  %v14057_v42 = vld [vmem:[#allocation27 + $0x31c] sm:$0xf] }
 0x6a6   :  { %5795 = vmatmul.bf16.vlgmr.msra.gmra.mxu1 %v15433_v60  ;;  %5821 = vmatmul.bf16.vlgmr.msra.gmra.mxu3 %v15433_v60  ;;  %v11738_v15 = vld [vmem:[#allocation27 + $0x338] sm:$0xf0]  ;;  %v11549_v32 = vor.u32 %v14009_v34, %v11546_v37 }
 0x6a7   :  { %5891 = vmatpush.bf16.msra.mxu1 %v11569_v58  ;;  %5917 = vmatpush.bf16.msra.mxu3 %v11573_v59  ;;  %v4982_v44 = vpop.f32.mrf.mxu3  ;;  %v14085_v58 = vld [vmem:[#allocation27 + $0x3f4] sm:$0xf0]  ;;  %v11409_v59 = vor.u32 %v13980_v48, %v11408_v47  ;;  %v14001_v47 = vld [vmem:[#allocation27 + $0x15c] sm:$0xf]  ;;  %v11741_v49 = vor.u32 %v14057_v42, %v11738_v15 }
 0x6a8   :  { %v11833_v40 = vor.u32 %v14085_v58, %v11832_v57  ;;  %v11837_v44 = vor.u32 %v14081_v4, %v11834_v5  ;;  %v11514_v48 = vld [vmem:[#allocation27 + $0x178] sm:$0xf0]  ;;  %v11480_v57 = vld [vmem:[#allocation27 + $0x118] sm:$0xf]  ;;  %v11709_v5 = vor.u32 %v14049_v53, %v11706_v63 }
 0x6a9   :  { %5906 = vmatpush.bf16.msra.mxu2 %v11761_v19  ;;  %5932 = vmatpush.bf16.msrb.mxu0 %v11765_v22  ;;  %v13972_v19 = vld [vmem:[#allocation27 + $0x6c] sm:$0xf0]  ;;  %v13968_v22 = vld [vmem:[#allocation27 + $0x54] sm:$0xf]  ;;  %v11517_v38 = vor.u32 %v14001_v47, %v11514_v48  ;;  %v13997_v58 = vld [vmem:[#allocation27 + $0x134] sm:$0xf0] }
 0x6aa   :  { %v11377_v35 = vor.u32 %v13972_v19, %v11376_v61  ;;  %v11381_v6 = vor.u32 %v13968_v22, %v11378_v17  ;;  %v11672_v61 = vld [vmem:[#allocation27 + $0x298] sm:$0xf]  ;;  %v14041_v22 = vld [vmem:[#allocation27 + $0x29c] sm:$0xf] }
 0x6ab   :  { %5892 = vmatpush.bf16.msra.mxu1 %v11537_v2  ;;  %5918 = vmatpush.bf16.msra.mxu3 %v11541_v50  ;;  %v11800_v2 = vld [vmem:[#allocation27 + $0x398] sm:$0xf]  ;;  %v11674_v17 = vld [vmem:[#allocation27 + $0x2b8] sm:$0xf0] }
 0x6ac   :  { %v14077_v50 = vld [vmem:[#allocation27 + $0x3b4] sm:$0xf0]  ;;  %v13969_v34 = vld [vmem:[#allocation27 + $0x5c] sm:$0xf] }
 0x6ad   :  { %5907 = vmatpush.bf16.msra.mxu2 %v11729_v43  ;;  %5933 = vmatpush.bf16.msrb.mxu0 %v11733_v10  ;;  %v11344_v43 = vld [vmem:[#allocation27 + $0x10] sm:$0xf]  ;;  %v11801_v3 = vor.u32 %v14077_v50, %v11800_v2  ;;  %v14045_v19 = vld [vmem:[#allocation27 + $0x2b4] sm:$0xf0]  ;;  %v13985_v2 = vld [vmem:[#allocation27 + $0xdc] sm:$0xf] }
 0x6ae   :  { %v13964_v10 = vld [vmem:[#allocation27 + $0x2c] sm:$0xf0]  ;;  %v11450_v50 = vld [vmem:[#allocation27 + $0xf8] sm:$0xf0]  ;;  %v11673_v62 = vor.u32 %v14045_v19, %v11672_v61  ;;  %v11352_v15 = vld [vmem:[#allocation27 + $0x18] sm:$0xf] }
 0x6af   :  { %5893 = vmatpush.bf16.msra.mxu1 %v11505_v14  ;;  %5919 = vmatpush.bf16.msra.mxu3 %v11509_v16  ;;  %v14017_v14 = vld [vmem:[#allocation27 + $0x1dc] sm:$0xf]  ;;  %v11345_v23 = vor.u32 %v13964_v10, %v11344_v43  ;;  %v12008_v48 = vld [vmem:[#allocation30 + $0x150] sm:$0xf] }
 0x6b0   :  { %5860 = vmatmul.bf16.vlgmr.msrb.gmra.mxu2 %v15429_v41  ;;  %5886 = vmatmul.bf16.vlgmr.msra.gmra.mxu0 %v15429_v41  ;;  %v11578_v16 = vld [vmem:[#allocation27 + $0x1f8] sm:$0xf0]  ;;  %v12152_v53 = vld [vmem:[#allocation30 + $0x270] sm:$0xf] }
 0x6b1   :  { %5908 = vmatpush.bf16.msra.mxu2 %v11697_v24  ;;  %5934 = vmatpush.bf16.msrb.mxu0 %v11701_v26  ;;  %v11349_v24 = vor.u32 %v13960_v11, %v11346_v12  ;;  %v14069_v26 = vld [vmem:[#allocation27 + $0x374] sm:$0xf0]  ;;  %v11581_v30 = vor.u32 %v14017_v14, %v11578_v16  ;;  %v14033_v43 = vld [vmem:[#allocation27 + $0x25c] sm:$0xf]  ;;  %v11453_v12 = vor.u32 %v13985_v2, %v11450_v50 }
 0x6b2   :  { %v11769_v8 = vor.u32 %v14069_v26, %v11768_v21  ;;  %v11642_v10 = vld [vmem:[#allocation27 + $0x278] sm:$0xf0]  ;;  %v11608_v21 = vld [vmem:[#allocation27 + $0x218] sm:$0xf] }
 0x6b3   :  { %5894 = vmatpush.bf16.msra.mxu1 %v11473_v31  ;;  %5920 = vmatpush.bf16.msra.mxu3 %v11477_v33  ;;  %v11544_v31 = vld [vmem:[#allocation27 + $0x198] sm:$0xf]  ;;  %v13977_v14 = vld [vmem:[#allocation27 + $0x9c] sm:$0xf] }
 0x6b4   :  { %v14013_v33 = vld [vmem:[#allocation27 + $0x1b4] sm:$0xf0]  ;;  %v11418_v16 = vld [vmem:[#allocation27 + $0xb8] sm:$0xf0] }
 0x6b5   :  { %5909 = vmatpush.bf16.msra.mxu2 %v11665_v20  ;;  %5935 = vmatpush.bf16.msrb.mxu0 %v11669_v7  ;;  %v11736_v20 = vld [vmem:[#allocation27 + $0x318] sm:$0xf]  ;;  %v11545_v36 = vor.u32 %v14013_v33, %v11544_v31  ;;  %v11610_v26 = vld [vmem:[#allocation27 + $0x238] sm:$0xf0]  ;;  %v11421_v28 = vor.u32 %v13977_v14, %v11418_v16  ;;  %v14179_v31 = vld [vmem:[#allocation30 + $0x2e4] sm:$0xf0]  ;;  %v12561_v14 = vor.u32 %v14269_v13, %v12560_v0 }
 0x6b6   :  { %5847 = vmatmul.bf16.vlgmr.msrb.gmra.mxu1 %v15433_v60  ;;  %5873 = vmatmul.bf16.vlgmr.msrb.gmra.mxu3 %v15433_v60  ;;  %v14061_v7 = vld [vmem:[#allocation27 + $0x334] sm:$0xf0]  ;;  %v11386_v37 = vld [vmem:[#allocation27 + $0x78] sm:$0xf0]  ;;  %v14251_v13 = vld [vmem:[#allocation30 + $0x524] sm:$0xf0] }
 0x6b7   :  { %5895 = vmatpush.bf16.msra.mxu1 %v11441_v45  ;;  %5921 = vmatpush.bf16.msra.mxu3 %v11445_v46  ;;  %v11512_v45 = vld [vmem:[#allocation27 + $0x158] sm:$0xf]  ;;  %v11737_v25 = vor.u32 %v14061_v7, %v11736_v20  ;;  %v11389_v42 = vor.u32 %v13969_v34, %v11386_v37  ;;  %v11354_v47 = vld [vmem:[#allocation27 + $0x38] sm:$0xf0]  ;;  %v12032_v37 = vld [vmem:[#allocation30 + $0x180] sm:$0xf] }
 0x6b8   :  { %v14005_v46 = vld [vmem:[#allocation27 + $0x174] sm:$0xf0] }
 0x6b9   :  { %5910 = vmatpush.bf16.msra.mxu2 %v11633_v51  ;;  %5936 = vmatpush.bf16.msrb.mxu0 %v11637_v52  ;;  %v11704_v51 = vld [vmem:[#allocation27 + $0x2d8] sm:$0xf]  ;;  %v11513_v55 = vor.u32 %v14005_v46, %v11512_v45  ;;  %v13961_v46 = vld [vmem:[#allocation27 + $0x1c] sm:$0xf] }
 0x6ba   :  { %v14053_v52 = vld [vmem:[#allocation27 + $0x2f4] sm:$0xf0] }
 0x6bb   :  { %5896 = vmatpush.bf16.msra.mxu1 %v11409_v59  ;;  %5922 = vmatpush.bf16.msra.mxu3 %v11413_v56  ;;  %v13993_v59 = vld [vmem:[#allocation27 + $0x11c] sm:$0xf]  ;;  %v11705_v4 = vor.u32 %v14053_v52, %v11704_v51  ;;  %v13973_v33 = vld [vmem:[#allocation27 + $0x74] sm:$0xf0]  ;;  %v11357_v52 = vor.u32 %v13961_v46, %v11354_v47  ;;  %v12944_v46 = vld [vmem:[#allocation30 + $0x8a0] sm:$0xf] }
 0x6bc   :  { %v11482_v56 = vld [vmem:[#allocation27 + $0x138] sm:$0xf0]  ;;  %v13965_v45 = vld [vmem:[#allocation27 + $0x34] sm:$0xf0]  ;;  %v14365_v47 = vld [vmem:[#allocation30 + $0x8b4] sm:$0xf0] }
 0x6bd   :  { %5911 = vmatpush.bf16.msra.mxu2 %v11601_v1  ;;  %5937 = vmatpush.bf16.msrb.mxu0 %v11605_v18  ;;  %v11481_v1 = vor.u32 %v13997_v58, %v11480_v57  ;;  %v11485_v18 = vor.u32 %v13993_v59, %v11482_v56  ;;  %v11353_v51 = vor.u32 %v13965_v45, %v11352_v15  ;;  %v14227_v57 = vld [vmem:[#allocation30 + $0x464] sm:$0xf0]  ;;  %v11984_v58 = vld [vmem:[#allocation30 + $0x120] sm:$0xf]  ;;  %v14125_v59 = vld [vmem:[#allocation30 + $0x134] sm:$0xf0] }
 0x6be   :  { %v11985_v19 = vor.u32 %v14125_v59, %v11984_v58  ;;  %v11864_v34 = vld [vmem:[#allocation30 + $0x30] sm:$0xf]  ;;  %v14089_v45 = vld [vmem:[#allocation30 + $0x14] sm:$0xf0]  ;;  %v14263_v59 = vld [vmem:[#allocation30 + $0x584] sm:$0xf0] }
 0x6bf   :  { %5897 = vmatpush.bf16.msra.mxu1 %v11377_v35  ;;  %5923 = vmatpush.bf16.msra.mxu3 %v11381_v6  ;;  %v11677_v35 = vor.u32 %v14041_v22, %v11674_v17  ;;  %v11640_v6 = vld [vmem:[#allocation27 + $0x258] sm:$0xf]  ;;  %v12128_v22 = vld [vmem:[#allocation30 + $0x240] sm:$0xf]  ;;  %v14161_v17 = vld [vmem:[#allocation30 + $0x254] sm:$0xf0] }
 0x6c0   :  { %5912 = vmatmul.bf16.vlgmr.msra.gmra.mxu2 %v15429_v41  ;;  %5938 = vmatmul.bf16.vlgmr.msrb.gmra.mxu0 %v15429_v41  ;;  %v12129_v2 = vor.u32 %v14161_v17, %v12128_v22  ;;  %v12536_v58 = vld [vmem:[#allocation30 + $0x570] sm:$0xf]  ;;  %v14203_v22 = vld [vmem:[#allocation30 + $0x3a4] sm:$0xf0] }
 0x6c1   :  { %5956 = vmatpush.bf16.msrb.mxu2 %v11833_v40  ;;  %5982 = vmatpush.bf16.msra.mxu0 %v11837_v44  ;;  %v11448_v40 = vld [vmem:[#allocation27 + $0xd8] sm:$0xf] }
 0x6c2   :  { %v13989_v44 = vld [vmem:[#allocation27 + $0xf4] sm:$0xf0] }
 0x6c3   :  { %5898 = vmatpush.bf16.msra.mxu1 %v11345_v23  ;;  %5924 = vmatpush.bf16.msra.mxu3 %v11349_v24  ;;  %v11449_v11 = vor.u32 %v13989_v44, %v11448_v40  ;;  %v14029_v23 = vld [vmem:[#allocation27 + $0x234] sm:$0xf0]  ;;  %v14025_v24 = vld [vmem:[#allocation27 + $0x21c] sm:$0xf]  ;;  %v14275_v44 = vld [vmem:[#allocation30 + $0x5e4] sm:$0xf0] }
 0x6c4   :  { %v12584_v40 = vld [vmem:[#allocation30 + $0x5d0] sm:$0xf] }
 0x6c5   :  { %5957 = vmatpush.bf16.msrb.mxu2 %v11801_v3  ;;  %5983 = vmatpush.bf16.msra.mxu0 %v11805_v9  ;;  %v11641_v3 = vor.u32 %v14037_v54, %v11640_v6  ;;  %v11645_v9 = vor.u32 %v14033_v43, %v11642_v10  ;;  %v12585_v50 = vor.u32 %v14275_v44, %v12584_v40  ;;  %v11936_v54 = vld [vmem:[#allocation30 + $0xc0] sm:$0xf]  ;;  %v12104_v43 = vld [vmem:[#allocation30 + $0x210] sm:$0xf]  ;;  %v14155_v10 = vld [vmem:[#allocation30 + $0x224] sm:$0xf0] }
 0x6c6   :  { %5899 = vmatmul.bf16.vlgmr.msra.gmra.mxu1 %v15433_v60  ;;  %5925 = vmatmul.bf16.vlgmr.msra.gmra.mxu3 %v15433_v60  ;;  %v12728_v17 = vld [vmem:[#allocation30 + $0x6f0] sm:$0xf]  ;;  %v12512_v40 = vld [vmem:[#allocation30 + $0x540] sm:$0xf]  ;;  %v14257_v44 = vld [vmem:[#allocation30 + $0x554] sm:$0xf0] }
 0x6c7   :  { %5943 = vmatpush.bf16.msrb.mxu1 %v11577_v29  ;;  %5969 = vmatpush.bf16.msrb.mxu3 %v11581_v30  ;;  %v11384_v29 = vld [vmem:[#allocation27 + $0x58] sm:$0xf] }
 0x6c8   :  { %v12200_v30 = vld [vmem:[#allocation30 + $0x2d0] sm:$0xf]  ;;  %v11385_v7 = vor.u32 %v13973_v33, %v11384_v29  ;;  %v11888_v29 = vld [vmem:[#allocation30 + $0x60] sm:$0xf] }
 0x6c9   :  { %5958 = vmatpush.bf16.msrb.mxu2 %v11769_v8  ;;  %5984 = vmatpush.bf16.msra.mxu0 %v11773_v39  ;;  %v11609_v8 = vor.u32 %v14029_v23, %v11608_v21  ;;  %v11613_v39 = vor.u32 %v14025_v24, %v11610_v26  ;;  %v12201_v20 = vor.u32 %v14179_v31, %v12200_v30  ;;  %v11912_v21 = vld [vmem:[#allocation30 + $0x90] sm:$0xf]  ;;  %v14107_v23 = vld [vmem:[#allocation30 + $0xa4] sm:$0xf0]  ;;  %v14101_v30 = vld [vmem:[#allocation30 + $0x74] sm:$0xf0] }
 0x6ca   :  { %v11913_v26 = vor.u32 %v14107_v23, %v11912_v21  ;;  %v11889_v33 = vor.u32 %v14101_v30, %v11888_v29  ;;  %v12488_v0 = vld [vmem:[#allocation30 + $0x510] sm:$0xf]  ;;  %v14299_v21 = vld [vmem:[#allocation30 + $0x6a4] sm:$0xf0]  ;;  %v14245_v29 = vld [vmem:[#allocation30 + $0x4f4] sm:$0xf0] }
 0x6cb   :  { %5944 = vmatpush.bf16.msrb.mxu1 %v11545_v36  ;;  %5970 = vmatpush.bf16.msrb.mxu3 %v11549_v32  ;;  %v12176_v36 = vld [vmem:[#allocation30 + $0x2a0] sm:$0xf]  ;;  %v14173_v32 = vld [vmem:[#allocation30 + $0x2b4] sm:$0xf0] }
 0x6cd   :  { %5959 = vmatpush.bf16.msrb.mxu2 %v11737_v25  ;;  %5985 = vmatpush.bf16.msra.mxu0 %v11741_v49  ;;  %v14131_v25 = vld [vmem:[#allocation30 + $0x164] sm:$0xf0]  ;;  %v12177_v49 = vor.u32 %v14173_v32, %v12176_v36  ;;  %v11840_v36 = vld [vmem:[#allocation30] sm:$0xf] }
 0x6ce   :  { %v12009_v63 = vor.u32 %v14131_v25, %v12008_v48  ;;  %v12776_v48 = vld [vmem:[#allocation30 + $0x750] sm:$0xf]  ;;  %v14323_v25 = vld [vmem:[#allocation30 + $0x764] sm:$0xf0] }
 0x6cf   :  { %5945 = vmatpush.bf16.msrb.mxu1 %v11513_v55  ;;  %5971 = vmatpush.bf16.msrb.mxu3 %v11517_v38  ;;  %v14167_v55 = vld [vmem:[#allocation30 + $0x284] sm:$0xf0]  ;;  %v12392_v38 = vld [vmem:[#allocation30 + $0x450] sm:$0xf] }
 0x6d0   :  { %v12393_v56 = vor.u32 %v14227_v57, %v12392_v38  ;;  %v12153_v61 = vor.u32 %v14167_v55, %v12152_v53  ;;  %v12752_v53 = vld [vmem:[#allocation30 + $0x720] sm:$0xf]  ;;  %v14209_v38 = vld [vmem:[#allocation30 + $0x3d4] sm:$0xf0] }
 0x6d1   :  { %5960 = vmatpush.bf16.msrb.mxu2 %v11705_v4  ;;  %5986 = vmatpush.bf16.msra.mxu0 %v11709_v5  ;;  %v12368_v4 = vld [vmem:[#allocation30 + $0x420] sm:$0xf]  ;;  %v14221_v5 = vld [vmem:[#allocation30 + $0x434] sm:$0xf0] }
 0x6d2   :  { %v12320_v55 = vld [vmem:[#allocation30 + $0x3c0] sm:$0xf] }
 0x6d3   :  { %5946 = vmatpush.bf16.msrb.mxu1 %v11481_v1  ;;  %5972 = vmatpush.bf16.msrb.mxu3 %v11485_v18  ;;  %v12369_v1 = vor.u32 %v14221_v5, %v12368_v4  ;;  %v14119_v18 = vld [vmem:[#allocation30 + $0x104] sm:$0xf0]  ;;  %v12321_v57 = vor.u32 %v14209_v38, %v12320_v55  ;;  %v12537_v5 = vor.u32 %v14263_v59, %v12536_v58  ;;  %v14413_v55 = vld [vmem:[#allocation30 + $0xa34] sm:$0xf0] }
 0x6d4   :  { %v14233_v58 = vld [vmem:[#allocation30 + $0x494] sm:$0xf0] }
 0x6d5   :  { %5961 = vmatpush.bf16.msrb.mxu2 %v11673_v62  ;;  %5987 = vmatpush.bf16.msra.mxu0 %v11677_v35  ;;  %v12344_v62 = vld [vmem:[#allocation30 + $0x3f0] sm:$0xf]  ;;  %v14215_v35 = vld [vmem:[#allocation30 + $0x404] sm:$0xf0] }
 0x6d7   :  { %5947 = vmatpush.bf16.msrb.mxu1 %v11449_v11  ;;  %5973 = vmatpush.bf16.msrb.mxu3 %v11453_v12  ;;  %v12345_v11 = vor.u32 %v14215_v35, %v12344_v62  ;;  %v14113_v12 = vld [vmem:[#allocation30 + $0xd4] sm:$0xf0]  ;;  %v12513_v62 = vor.u32 %v14257_v44, %v12512_v40  ;;  %v12896_v35 = vld [vmem:[#allocation30 + $0x840] sm:$0xf]  ;;  %v14407_v40 = vld [vmem:[#allocation30 + $0xa04] sm:$0xf0] }
 0x6d8   :  { %v11937_v16 = vor.u32 %v14113_v12, %v11936_v54  ;;  %v14305_v54 = vld [vmem:[#allocation30 + $0x6d4] sm:$0xf0] }
 0x6d9   :  { %5962 = vmatpush.bf16.msrb.mxu2 %v11641_v3  ;;  %5988 = vmatpush.bf16.msra.mxu0 %v11645_v9  ;;  %v12080_v3 = vld [vmem:[#allocation30 + $0x1e0] sm:$0xf]  ;;  %v14149_v9 = vld [vmem:[#allocation30 + $0x1f4] sm:$0xf0] }
 0x6da   :  { %v12081_v24 = vor.u32 %v14149_v9, %v12080_v3  ;;  %v12872_v3 = vld [vmem:[#allocation30 + $0x810] sm:$0xf]  ;;  %v14347_v9 = vld [vmem:[#allocation30 + $0x824] sm:$0xf0] }
 0x6db   :  { %5948 = vmatpush.bf16.msrb.mxu1 %v11417_v27  ;;  %5974 = vmatpush.bf16.msrb.mxu3 %v11421_v28  ;;  %v12056_v27 = vld [vmem:[#allocation30 + $0x1b0] sm:$0xf]  ;;  %v14143_v28 = vld [vmem:[#allocation30 + $0x1c4] sm:$0xf0]  ;;  %v12873_v23 = vor.u32 %v14347_v9, %v12872_v3  ;;  %v13280_v3 = vld [vmem:[#allocation30 + $0xb40] sm:$0xf] }
 0x6dc   :  { %v12057_v31 = vor.u32 %v14143_v28, %v12056_v27  ;;  %v12464_v28 = vld [vmem:[#allocation30 + $0x4e0] sm:$0xf]  ;;  %v14449_v9 = vld [vmem:[#allocation30 + $0xb54] sm:$0xf0] }
 0x6dd   :  { %5963 = vmatpush.bf16.msrb.mxu2 %v11609_v8  ;;  %5989 = vmatpush.bf16.msra.mxu0 %v11613_v39  ;;  %v14137_v8 = vld [vmem:[#allocation30 + $0x194] sm:$0xf0]  ;;  %v14095_v39 = vld [vmem:[#allocation30 + $0x44] sm:$0xf0] }
 0x6de   :  { %v11865_v15 = vor.u32 %v14095_v39, %v11864_v34  ;;  %v12848_v34 = vld [vmem:[#allocation30 + $0x7e0] sm:$0xf] }
 0x6df   :  { %5949 = vmatpush.bf16.msrb.mxu1 %v11385_v7  ;;  %5975 = vmatpush.bf16.msrb.mxu3 %v11389_v42  ;;  %v14371_v7 = vld [vmem:[#allocation30 + $0x8e4] sm:$0xf0]  ;;  %v12033_v42 = vor.u32 %v14137_v8, %v12032_v37  ;;  %v14341_v37 = vld [vmem:[#allocation30 + $0x7f4] sm:$0xf0] }
 0x6e0   :  { %5964 = vmatmul.bf16.vlgmr.msrb.gmra.mxu2 %v15429_v41  ;;  %5990 = vmatmul.bf16.vlgmr.msra.gmra.mxu0 %v15429_v41  ;;  %v11960_v41 = vld [vmem:[#allocation30 + $0xf0] sm:$0xf]  ;;  %v14293_v8 = vld [vmem:[#allocation30 + $0x674] sm:$0xf0]  ;;  %v12849_v39 = vor.u32 %v14341_v37, %v12848_v34 }
 0x6e1   :  { %8342 = vmatpush.bf16.msra.mxu2 %v12201_v20  ;;  %v11961_v6 = vor.u32 %v14119_v18, %v11960_v41  ;;  %8368 = vmatpush.bf16.msrb.mxu0 %v12585_v50  ;;  %v12968_v20 = vld [vmem:[#allocation30 + $0x8d0] sm:$0xf]  ;;  %v12704_v50 = vld [vmem:[#allocation30 + $0x6c0] sm:$0xf] }
 0x6e2   :  { %v12969_v32 = vor.u32 %v14371_v7, %v12968_v20  ;;  %v12224_v20 = vld [vmem:[#allocation30 + $0x300] sm:$0xf]  ;;  %v14185_v7 = vld [vmem:[#allocation30 + $0x314] sm:$0xf0]  ;;  %v13016_v37 = vld [vmem:[#allocation30 + $0x930] sm:$0xf] }
 0x6e3   :  { %5950 = vmatpush.bf16.msrb.mxu1 %v11353_v51  ;;  %5976 = vmatpush.bf16.msrb.mxu3 %v11357_v52  ;;  %v12945_v51 = vor.u32 %v14365_v47, %v12944_v46  ;;  %v12777_v52 = vor.u32 %v14323_v25, %v12776_v48  ;;  %v12824_v25 = vld [vmem:[#allocation30 + $0x7b0] sm:$0xf] }
 0x6e5   :  { %8343 = vmatpush.bf16.msra.mxu2 %v12177_v49  ;;  %8369 = vmatpush.bf16.msrb.mxu0 %v12561_v14  ;;  %v11841_v49 = vor.u32 %v14089_v45, %v11840_v36  ;;  %v12705_v14 = vor.u32 %v14305_v54, %v12704_v50  ;;  %v14419_v36 = vld [vmem:[#allocation30 + $0xa64] sm:$0xf0]  ;;  %v13328_v50 = vld [vmem:[#allocation30 + $0xba0] sm:$0xf]  ;;  %v14401_v54 = vld [vmem:[#allocation30 + $0x9d4] sm:$0xf0] }
 0x6e6   :  { %5951 = vmatmul.bf16.vlgmr.msrb.gmra.mxu1 %v15433_v60  ;;  %5977 = vmatmul.bf16.vlgmr.msrb.gmra.mxu3 %v15433_v60  ;;  %v12105_v60 = vor.u32 %v14155_v10, %v12104_v43  ;;  %v12272_v10 = vld [vmem:[#allocation30 + $0x360] sm:$0xf]  ;;  %v14239_v45 = vld [vmem:[#allocation30 + $0x4c4] sm:$0xf0] }
 0x6e7   :  { %8329 = vmatpush.bf16.msra.mxu1 %v12009_v63  ;;  %8355 = vmatpush.bf16.msra.mxu3 %v12393_v56  ;;  %v14317_v63 = vld [vmem:[#allocation30 + $0x734] sm:$0xf0]  ;;  %v12920_v56 = vld [vmem:[#allocation30 + $0x870] sm:$0xf] }
 0x6e8   :  { %v12753_v4 = vor.u32 %v14317_v63, %v12752_v53  ;;  %v13136_v63 = vld [vmem:[#allocation30 + $0xa20] sm:$0xf] }
 0x6e9   :  { %8344 = vmatpush.bf16.msra.mxu2 %v12153_v61  ;;  %v14359_v61 = vld [vmem:[#allocation30 + $0x884] sm:$0xf0]  ;;  %8370 = vmatpush.bf16.msrb.mxu0 %v12537_v5  ;;  %v13137_v38 = vor.u32 %v14413_v55, %v13136_v63  ;;  %v14122_v55 = vld [vmem:[#allocation30 + $0x124] sm:$0xf] }
 0x6ea   :  { %v12921_v41 = vor.u32 %v14359_v61, %v12920_v56  ;;  %v12608_v56 = vld [vmem:[#allocation30 + $0x600] sm:$0xf] }
 0x6eb   :  { %8330 = vmatpush.bf16.msra.mxu1 %v11985_v19  ;;  %8356 = vmatpush.bf16.msra.mxu3 %v12369_v1  ;;  %v12296_v19 = vld [vmem:[#allocation30 + $0x390] sm:$0xf]  ;;  %v14311_v1 = vld [vmem:[#allocation30 + $0x704] sm:$0xf0]  ;;  %v12800_v61 = vld [vmem:[#allocation30 + $0x780] sm:$0xf] }
 0x6ec   :  { %v12297_v18 = vor.u32 %v14203_v22, %v12296_v19  ;;  %v14329_v19 = vld [vmem:[#allocation30 + $0x794] sm:$0xf0]  ;;  %v13352_v22 = vld [vmem:[#allocation30 + $0xbd0] sm:$0xf] }
 0x6ed   :  { %8345 = vmatpush.bf16.msra.mxu2 %v12129_v2  ;;  %v12729_v2 = vor.u32 %v14311_v1, %v12728_v17  ;;  %8371 = vmatpush.bf16.msrb.mxu0 %v12513_v62  ;;  %v14467_v17 = vld [vmem:[#allocation30 + $0xbe4] sm:$0xf0]  ;;  %v12801_v1 = vor.u32 %v14329_v19, %v12800_v61  ;;  %v14461_v62 = vld [vmem:[#allocation30 + $0xbb4] sm:$0xf0]  ;;  %v12202_v61 = vld [vmem:[#allocation30 + $0x2e8] sm:$0xf0] }
 0x6ef   :  { %8331 = vmatpush.bf16.msra.mxu1 %v11961_v6  ;;  %8357 = vmatpush.bf16.msra.mxu3 %v12345_v11  ;;  %v14353_v6 = vld [vmem:[#allocation30 + $0x854] sm:$0xf0] }
 0x6f0   :  { %v12897_v43 = vor.u32 %v14353_v6, %v12896_v35  ;;  %v14197_v11 = vld [vmem:[#allocation30 + $0x374] sm:$0xf0]  ;;  %v13329_v35 = vor.u32 %v14461_v62, %v13328_v50  ;;  %v13088_v6 = vld [vmem:[#allocation30 + $0x9c0] sm:$0xf] }
 0x6f1   :  { %8346 = vmatpush.bf16.msra.mxu2 %v12105_v60  ;;  %v12273_v12 = vor.u32 %v14197_v11, %v12272_v10  ;;  %v12680_v60 = vld [vmem:[#allocation30 + $0x690] sm:$0xf]  ;;  %v14455_v11 = vld [vmem:[#allocation30 + $0xb84] sm:$0xf0] }
 0x6f2   :  { %v12681_v30 = vor.u32 %v14299_v21, %v12680_v60  ;;  %v13304_v10 = vld [vmem:[#allocation30 + $0xb70] sm:$0xf]  ;;  %v15449_v60 = vld [vmem:[#allocation28] sm:$0xff]  ;;  %v13281_v21 = vor.u32 %v14449_v9, %v13280_v3  ;;  %v14164_v3 = vld [vmem:[#allocation30 + $0x274] sm:$0xf] }
 0x6f3   :  { %8332 = vmatpush.bf16.msra.mxu1 %v11937_v16  ;;  %8358 = vmatpush.bf16.msra.mxu3 %v12321_v57  ;;  %v12489_v16 = vor.u32 %v14251_v13, %v12488_v0  ;;  %v12416_v57 = vld [vmem:[#allocation30 + $0x480] sm:$0xf]  ;;  %v13064_v0 = vld [vmem:[#allocation30 + $0x990] sm:$0xf]  ;;  %v14395_v13 = vld [vmem:[#allocation30 + $0x9a4] sm:$0xf0] }
 0x6f4   :  { %v12417_v5 = vor.u32 %v14233_v58, %v12416_v57  ;;  %v13208_v57 = vld [vmem:[#allocation30 + $0xab0] sm:$0xf]  ;;  %v5133_v62 = vperm.slane %v15449_v60, 2  ;;  %v12154_v9 = vld [vmem:[#allocation30 + $0x288] sm:$0xf0] }
 0x6f5   :  { %8347 = vmatpush.bf16.msra.mxu2 %v12081_v24  ;;  %v12248_v24 = vld [vmem:[#allocation30 + $0x330] sm:$0xf]  ;;  %8372 = vmatpush.bf16.msrb.mxu0 %v12489_v16  ;;  %v13065_v16 = vor.u32 %v14395_v13, %v13064_v0 }
 0x6f7   :  { %8333 = vmatpush.bf16.msra.mxu1 %v11913_v26  ;;  %8359 = vmatpush.bf16.msra.mxu3 %v12297_v18  ;;  %v14191_v26 = vld [vmem:[#allocation30 + $0x344] sm:$0xf0]  ;;  %v13112_v18 = vld [vmem:[#allocation30 + $0x9f0] sm:$0xf] }
 0x6f8   :  { %v12249_v27 = vor.u32 %v14191_v26, %v12248_v24  ;;  %v13040_v24 = vld [vmem:[#allocation30 + $0x960] sm:$0xf]  ;;  %v14389_v26 = vld [vmem:[#allocation30 + $0x974] sm:$0xf0] }
 0x6f9   :  { %8348 = vmatpush.bf16.msra.mxu2 %v12057_v31  ;;  %v12656_v31 = vld [vmem:[#allocation30 + $0x660] sm:$0xf] }
 0x6fa   :  { %v12657_v46 = vor.u32 %v14293_v8, %v12656_v31  ;;  %v14383_v8 = vld [vmem:[#allocation30 + $0x944] sm:$0xf0] }
 0x6fb   :  { %8334 = vmatpush.bf16.msra.mxu1 %v11889_v33  ;;  %8360 = vmatpush.bf16.msra.mxu3 %v12273_v12  ;;  %v12465_v33 = vor.u32 %v14245_v29, %v12464_v28  ;;  %v13305_v12 = vor.u32 %v14455_v11, %v13304_v10  ;;  %v13256_v28 = vld [vmem:[#allocation30 + $0xb10] sm:$0xf]  ;;  %v14443_v29 = vld [vmem:[#allocation30 + $0xb24] sm:$0xf0]  ;;  %v14110_v11 = vld [vmem:[#allocation30 + $0xc4] sm:$0xf] }
 0x6fd   :  { %8349 = vmatpush.bf16.msra.mxu2 %v12033_v42  ;;  %8373 = vmatpush.bf16.msrb.mxu0 %v12465_v33  ;;  %v12225_v42 = vor.u32 %v14185_v7, %v12224_v20  ;;  %v13257_v33 = vor.u32 %v14443_v29, %v13256_v28  ;;  %v5132_v20 = vperm.slane %v15449_v60, 1  ;;  %v14128_v7 = vld [vmem:[#allocation30 + $0x154] sm:$0xf]  ;;  %v11914_v28 = vld [vmem:[#allocation30 + $0xa8] sm:$0xf0] }
 0x6fe   :  { %v14224_v29 = vld [vmem:[#allocation30 + $0x454] sm:$0xf] }
 0x6ff   :  { %8335 = vmatpush.bf16.msra.mxu1 %v11865_v15  ;;  %8361 = vmatpush.bf16.msra.mxu3 %v12249_v27  ;;  %v13160_v15 = vld [vmem:[#allocation30 + $0xa50] sm:$0xf]  ;;  %v13041_v27 = vor.u32 %v14389_v26, %v13040_v24  ;;  %v14104_v26 = vld [vmem:[#allocation30 + $0x94] sm:$0xf] }
 0x700   :  { %v13161_v47 = vor.u32 %v14419_v36, %v13160_v15  ;;  %v12010_v36 = vld [vmem:[#allocation30 + $0x168] sm:$0xf0] }
 0x701   :  { %8394 = vmatpush.bf16.msrb.mxu2 %v12969_v32  ;;  %v12440_v32 = vld [vmem:[#allocation30 + $0x4b0] sm:$0xf] }
 0x702   :  { %v12441_v48 = vor.u32 %v14239_v45, %v12440_v32  ;;  %v13232_v32 = vld [vmem:[#allocation30 + $0xae0] sm:$0xf]  ;;  %v14437_v45 = vld [vmem:[#allocation30 + $0xaf4] sm:$0xf0] }
 0x703   :  { %8336 = vmatpush.bf16.msra.mxu1 %v11841_v49  ;;  %8362 = vmatpush.bf16.msra.mxu3 %v12225_v42  ;;  %v12632_v49 = vld [vmem:[#allocation30 + $0x630] sm:$0xf]  ;;  %v13017_v42 = vor.u32 %v14383_v8, %v13016_v37  ;;  %v12130_v37 = vld [vmem:[#allocation30 + $0x258] sm:$0xf0] }
 0x704   :  { %8374 = vmatpush.bf16.msrb.mxu0 %v12441_v48  ;;  %v12992_v48 = vld [vmem:[#allocation30 + $0x900] sm:$0xf] }
 0x705   :  { %8395 = vmatpush.bf16.msrb.mxu2 %v12945_v51  ;;  %v14287_v51 = vld [vmem:[#allocation30 + $0x644] sm:$0xf0] }
 0x706   :  { %v12633_v59 = vor.u32 %v14287_v51, %v12632_v49  ;;  %v12013_v51 = vor.u32 %v14128_v7, %v12010_v36  ;;  %v11890_v36 = vld [vmem:[#allocation30 + $0x78] sm:$0xf0] }
 0x707   :  { %8381 = vmatpush.bf16.msrb.mxu1 %v12777_v52  ;;  %v14335_v52 = vld [vmem:[#allocation30 + $0x7c4] sm:$0xf0]  ;;  %8407 = vmatpush.bf16.msrb.mxu3 %v13161_v47 }
 0x708   :  { %v12825_v53 = vor.u32 %v14335_v52, %v12824_v25  ;;  %8375 = vmatpush.bf16.msrb.mxu0 %v12417_v5  ;;  %v14377_v25 = vld [vmem:[#allocation30 + $0x914] sm:$0xf0]  ;;  %v14176_v5 = vld [vmem:[#allocation30 + $0x2d4] sm:$0xf] }
 0x709   :  { %8396 = vmatpush.bf16.msrb.mxu2 %v12921_v41  ;;  %v13353_v41 = vor.u32 %v14467_v17, %v13352_v22  ;;  %v12993_v52 = vor.u32 %v14377_v25, %v12992_v48  ;;  %v14152_v25 = vld [vmem:[#allocation30 + $0x214] sm:$0xf] }
 0x70b   :  { %8382 = vmatpush.bf16.msrb.mxu1 %v12753_v4  ;;  %v14281_v4 = vld [vmem:[#allocation30 + $0x614] sm:$0xf0]  ;;  %8408 = vmatpush.bf16.msrb.mxu3 %v13137_v38  ;;  %v11986_v38 = vld [vmem:[#allocation30 + $0x138] sm:$0xf0] }
 0x70c   :  { %v12609_v44 = vor.u32 %v14281_v4, %v12608_v56  ;;  %8420 = vmatpush.bf16.msra.mxu0 %v13353_v41  ;;  %v14431_v56 = vld [vmem:[#allocation30 + $0xac4] sm:$0xf0]  ;;  %v11989_v17 = vor.u32 %v14122_v55, %v11986_v38  ;;  %v14116_v41 = vld [vmem:[#allocation30 + $0xf4] sm:$0xf] }
 0x70d   :  { %8397 = vmatpush.bf16.msrb.mxu2 %v12897_v43  ;;  %v13089_v43 = vor.u32 %v14401_v54, %v13088_v6  ;;  %v13209_v19 = vor.u32 %v14431_v56, %v13208_v57  ;;  %v12178_v6 = vld [vmem:[#allocation30 + $0x2b8] sm:$0xf0]  ;;  %v14092_v57 = vld [vmem:[#allocation30 + $0x34] sm:$0xf] }
 0x70f   :  { %8383 = vmatpush.bf16.msrb.mxu1 %v12729_v2  ;;  %v13113_v2 = vor.u32 %v14407_v40, %v13112_v18  ;;  %v11962_v18 = vld [vmem:[#allocation30 + $0x108] sm:$0xf0]  ;;  %v12205_v40 = vor.u32 %v14176_v5, %v12202_v61 }
 0x710   :  { %8421 = vmatpush.bf16.msra.mxu0 %v13329_v35  ;;  %v14170_v35 = vld [vmem:[#allocation30 + $0x2a4] sm:$0xf]  ;;  %v11965_v10 = vor.u32 %v14116_v41, %v11962_v18  ;;  %v12346_v5 = vld [vmem:[#allocation30 + $0x408] sm:$0xf0]  ;;  %v12562_v18 = vld [vmem:[#allocation30 + $0x5b8] sm:$0xf0] }
 0x711   :  { %8398 = vmatpush.bf16.msrb.mxu2 %v12873_v23  ;;  %8409 = vmatpush.bf16.msrb.mxu3 %v13113_v2  ;;  %v5131_v23 = vperm.slane %v15449_v60, 0  ;;  %v14425_v2 = vld [vmem:[#allocation30 + $0xa94] sm:$0xf0]  ;;  %v14266_v41 = vld [vmem:[#allocation30 + $0x5a4] sm:$0xf] }
 0x713   :  { %8384 = vmatpush.bf16.msrb.mxu1 %v12705_v14 }
 0x714   :  { %8422 = vmatpush.bf16.msra.mxu0 %v13305_v12  ;;  %v11938_v12 = vld [vmem:[#allocation30 + $0xd8] sm:$0xf0] }
 0x715   :  { %8399 = vmatpush.bf16.msrb.mxu2 %v12849_v39  ;;  %8410 = vmatpush.bf16.msrb.mxu3 %v13089_v43  ;;  %v11941_v24 = vor.u32 %v14110_v11, %v11938_v12  ;;  %v14140_v12 = vld [vmem:[#allocation30 + $0x1b4] sm:$0xf] }
 0x717   :  { %8385 = vmatpush.bf16.msrb.mxu1 %v12681_v30 }
 0x718   :  { %8423 = vmatpush.bf16.msra.mxu0 %v13281_v21 }
 0x719   :  { %8400 = vmatpush.bf16.msrb.mxu2 %v12825_v53  ;;  %8411 = vmatpush.bf16.msrb.mxu3 %v13065_v16 }
 0x71b   :  { %8386 = vmatpush.bf16.msrb.mxu1 %v12657_v46  ;;  %v13233_v46 = vor.u32 %v14437_v45, %v13232_v32  ;;  %v14218_v32 = vld [vmem:[#allocation30 + $0x424] sm:$0xf]  ;;  %v12370_v45 = vld [vmem:[#allocation30 + $0x438] sm:$0xf0] }
 0x71c   :  { %8424 = vmatpush.bf16.msra.mxu0 %v13257_v33 }
 0x71d   :  { %8401 = vmatpush.bf16.msrb.mxu2 %v12801_v1  ;;  %v5835_v14 = vpop.f32.mrf.mxu0  ;;  %8412 = vmatpush.bf16.msrb.mxu3 %v13041_v27 }
 0x71f   :  { %8387 = vmatpush.bf16.msrb.mxu1 %v12633_v59 }
 0x720   :  { %8425 = vmatpush.bf16.msra.mxu0 %v13233_v46 }
 0x721   :  { %8413 = vmatpush.bf16.msrb.mxu3 %v13017_v42 }
 0x723   :  { %8388 = vmatpush.bf16.msrb.mxu1 %v12609_v44  ;;  %v5796_v30 = vpop.f32.mrf.mxu1  ;;  %v5809_v31 = vpop.f32.mrf.mxu2  ;;  %v13184_v44 = vld [vmem:[#allocation30 + $0xa80] sm:$0xf] }
 0x724   :  { %v5797_v34 = vadd.f32 %v5796_v30, %v5131_v23  ;;  %8426 = vmatpush.bf16.msra.mxu0 %v13209_v19  ;;  %v13185_v54 = vor.u32 %v14425_v2, %v13184_v44  ;;  %v5134_v23 = vperm.slane %v15449_v60, 3  ;;  %v12394_v30 = vld [vmem:[#allocation30 + $0x468] sm:$0xf0]  ;;  %v14146_v19 = vld [vmem:[#allocation30 + $0x1e4] sm:$0xf]  ;;  %v5135_v44 = vperm.slane %v15449_v60, 4 }
 0x725   :  { %v5837_v39 = vpop.f32.mrf.mxu0  ;;  %8414 = vmatpush.bf16.msrb.mxu3 %v12993_v52  ;;  %v12397_v7 = vor.u32 %v14224_v29, %v12394_v30  ;;  %v14272_v52 = vld [vmem:[#allocation30 + $0x5d4] sm:$0xf]  ;;  %v12298_v29 = vld [vmem:[#allocation30 + $0x3a8] sm:$0xf0] }
 0x726   :  { %v5810_v15 = vadd.f32 %v5809_v31, %v5797_v34  ;;  %v12157_v31 = vor.u32 %v14164_v3, %v12154_v9  ;;  %v14158_v34 = vld [vmem:[#allocation30 + $0x244] sm:$0xf]  ;;  %v11917_v39 = vor.u32 %v14104_v26, %v11914_v28  ;;  %v12538_v3 = vld [vmem:[#allocation30 + $0x588] sm:$0xf0]  ;;  %v14200_v28 = vld [vmem:[#allocation30 + $0x394] sm:$0xf] }
 0x727   :  { %v12133_v48 = vor.u32 %v14158_v34, %v12130_v37  ;;  %v14134_v34 = vld [vmem:[#allocation30 + $0x184] sm:$0xf]  ;;  %v12034_v37 = vld [vmem:[#allocation30 + $0x198] sm:$0xf0] }
 0x728   :  { %v5995_v47 = vmax.f32 %v5810_v15, 0.0  ;;  %8427 = vmatpush.bf16.msra.mxu0 %v13185_v54  ;;  %v14206_v54 = vld [vmem:[#allocation30 + $0x3c4] sm:$0xf] }
 0x729   :  { %v5822_v49 = vpop.f32.mrf.mxu3 }
 0x72a   :  { %v15453_v53 = vpack.c.bf16 %v5995_v47, %v5995_v47  ;;  %v5823_v63 = vadd.f32 %v5822_v49, %v5132_v20  ;;  %v14098_v20 = vld [vmem:[#allocation30 + $0x64] sm:$0xf] }
 0x72b   :  { %v5798_v58 = vpop.f32.mrf.mxu1  ;;  %v5811_v59 = vpop.f32.mrf.mxu2  ;;  %v11893_v38 = vor.u32 %v14098_v20, %v11890_v36  ;;  %v12514_v20 = vld [vmem:[#allocation30 + $0x558] sm:$0xf0] }
 0x72c   :  { %v5836_v4 = vadd.f32 %v5835_v14, %v5823_v63  ;;  %8337 = vmatmul.bf16.vlgmr.msra.gmra.mxu1 %v15453_v53  ;;  %v12181_v14 = vor.u32 %v14170_v35, %v12178_v6  ;;  %v12586_v63 = vld [vmem:[#allocation30 + $0x5e8] sm:$0xf0]  ;;  %v12373_v59 = vor.u32 %v14218_v32, %v12370_v45  ;;  %v11842_v6 = vld [vmem:[#allocation30 + $0x18] sm:$0xf0]  ;;  %v12037_v45 = vor.u32 %v14134_v34, %v12034_v37  ;;  %v14350_v34 = vld [vmem:[#allocation30 + $0x844] sm:$0xf] }
 0x72d   :  { %v5887_v22 = vpop.f32.mrf.mxu0  ;;  %8433 = vmatpush.bf16.msra.mxu1 %v12013_v51  ;;  %v12106_v51 = vld [vmem:[#allocation30 + $0x228] sm:$0xf0]  ;;  %v12898_v37 = vld [vmem:[#allocation30 + $0x858] sm:$0xf0] }
 0x72e   :  { %v5996_v1 = vmax.f32 %v5836_v4, 0.0  ;;  %v11866_v58 = vld [vmem:[#allocation30 + $0x48] sm:$0xf0]  ;;  %v14212_v4 = vld [vmem:[#allocation30 + $0x3f4] sm:$0xf]  ;;  %v12109_v61 = vor.u32 %v14152_v25, %v12106_v51 }
 0x72f   :  { %v11869_v2 = vor.u32 %v14092_v57, %v11866_v58  ;;  %v12349_v35 = vor.u32 %v14212_v4, %v12346_v5  ;;  %v14314_v51 = vld [vmem:[#allocation30 + $0x724] sm:$0xf]  ;;  %v14248_v57 = vld [vmem:[#allocation30 + $0x514] sm:$0xf]  ;;  %v12490_v58 = vld [vmem:[#allocation30 + $0x528] sm:$0xf0] }
 0x730   :  { %v15456_v50 = vpack.c.bf16 %v5996_v1, %v5996_v1  ;;  %v12082_v1 = vld [vmem:[#allocation30 + $0x1f8] sm:$0xf0]  ;;  %v12970_v4 = vld [vmem:[#allocation30 + $0x8e8] sm:$0xf0] }
 0x731   :  { %v5824_v43 = vpop.f32.mrf.mxu3  ;;  %8434 = vmatpush.bf16.msra.mxu1 %v11989_v17  ;;  %v12085_v11 = vor.u32 %v14146_v19, %v12082_v1  ;;  %v14188_v19 = vld [vmem:[#allocation30 + $0x334] sm:$0xf] }
 0x732   :  { %8350 = vmatmul.bf16.vlgmr.msra.gmra.mxu2 %v15456_v50  ;;  %v12322_v43 = vld [vmem:[#allocation30 + $0x3d8] sm:$0xf0] }
 0x733   :  { %v5848_v0 = vpop.f32.mrf.mxu1  ;;  %v5861_v13 = vpop.f32.mrf.mxu2  ;;  %8446 = vmatpush.bf16.msra.mxu2 %v12205_v40  ;;  %v12325_v26 = vor.u32 %v14206_v54, %v12322_v43 }
 0x734   :  { %v5849_v16 = vadd.f32 %v5848_v0, %v5133_v62  ;;  %v14086_v62 = vld [vmem:[#allocation30 + $0x4] sm:$0xf]  ;;  %v12565_v0 = vor.u32 %v14266_v41, %v12562_v18  ;;  %v14308_v41 = vld [vmem:[#allocation30 + $0x6f4] sm:$0xf]  ;;  %v12730_v18 = vld [vmem:[#allocation30 + $0x708] sm:$0xf0] }
 0x735   :  { %v5889_v21 = vpop.f32.mrf.mxu0  ;;  %8435 = vmatpush.bf16.msra.mxu1 %v11965_v10 }
 0x736   :  { %v5862_v27 = vadd.f32 %v5861_v13, %v5849_v16  ;;  %v14260_v16 = vld [vmem:[#allocation30 + $0x574] sm:$0xf] }
 0x737   :  { %8447 = vmatpush.bf16.msra.mxu2 %v12181_v14  ;;  %v12058_v14 = vld [vmem:[#allocation30 + $0x1c8] sm:$0xf0] }
 0x738   :  { %v5997_v33 = vmax.f32 %v5862_v27, 0.0  ;;  %v14320_v27 = vld [vmem:[#allocation30 + $0x754] sm:$0xf] }
 0x739   :  { %v5874_v8 = vpop.f32.mrf.mxu3  ;;  %8436 = vmatpush.bf16.msra.mxu1 %v11941_v24  ;;  %v11845_v24 = vor.u32 %v14086_v62, %v11842_v6  ;;  %v12466_v62 = vld [vmem:[#allocation30 + $0x4f8] sm:$0xf0] }
 0x73a   :  { %v15461_v42 = vpack.c.bf16 %v5997_v33, %v5997_v33  ;;  %v5875_v15 = vadd.f32 %v5874_v8, %v5134_v23  ;;  %v5136_v23 = vperm.slane %v15449_v60, 5  ;;  %v12061_v33 = vor.u32 %v14140_v12, %v12058_v14  ;;  %v12946_v6 = vld [vmem:[#allocation30 + $0x8b8] sm:$0xf0] }
 0x73b   :  { %v5850_v46 = vpop.f32.mrf.mxu1  ;;  %v5863_v47 = vpop.f32.mrf.mxu2  ;;  %8448 = vmatpush.bf16.msra.mxu2 %v12157_v31  ;;  %v12778_v31 = vld [vmem:[#allocation30 + $0x768] sm:$0xf0]  ;;  %v12541_v8 = vor.u32 %v14260_v16, %v12538_v3  ;;  %v12226_v12 = vld [vmem:[#allocation30 + $0x318] sm:$0xf0]  ;;  %v14236_v3 = vld [vmem:[#allocation30 + $0x4b4] sm:$0xf] }
 0x73c   :  { %v5888_v49 = vadd.f32 %v5887_v22, %v5875_v15  ;;  %8363 = vmatmul.bf16.vlgmr.msra.gmra.mxu3 %v15461_v42  ;;  %v12589_v22 = vor.u32 %v14272_v52, %v12586_v63  ;;  %v12301_v15 = vor.u32 %v14200_v28, %v12298_v29  ;;  %v12781_v32 = vor.u32 %v14320_v27, %v12778_v31  ;;  %v14194_v46 = vld [vmem:[#allocation30 + $0x364] sm:$0xf]  ;;  %v12274_v47 = vld [vmem:[#allocation30 + $0x378] sm:$0xf0]  ;;  %v14296_v27 = vld [vmem:[#allocation30 + $0x694] sm:$0xf] }
 0x73d   :  { %v15464_v55 = vpop.f32.mrf.mxu0  ;;  %8437 = vmatpush.bf16.msra.mxu1 %v11917_v39  ;;  %8459 = vmatpush.bf16.msra.mxu3 %v12397_v7  ;;  %v14254_v39 = vld [vmem:[#allocation30 + $0x544] sm:$0xf]  ;;  %v12754_v52 = vld [vmem:[#allocation30 + $0x738] sm:$0xf0]  ;;  %v12277_v5 = vor.u32 %v14194_v46, %v12274_v47  ;;  %v12682_v28 = vld [vmem:[#allocation30 + $0x6a8] sm:$0xf0] }
 0x73e   :  { %v5998_v56 = vmax.f32 %v5888_v49, 0.0  ;;  %v12517_v63 = vor.u32 %v14254_v39, %v12514_v20  ;;  %v14230_v31 = vld [vmem:[#allocation30 + $0x484] sm:$0xf]  ;;  %v12685_v39 = vor.u32 %v14296_v27, %v12682_v28  ;;  %v12874_v46 = vld [vmem:[#allocation30 + $0x828] sm:$0xf0] }
 0x73f   :  { %8449 = vmatpush.bf16.msra.mxu2 %v12133_v48  ;;  %v14290_v20 = vld [vmem:[#allocation30 + $0x664] sm:$0xf]  ;;  %v12208_v28 = vld [vmem:[#allocation30 + $0x2d8] sm:$0xf] }
 0x740   :  { %v15466_v17 = vpack.c.bf16 %v5998_v56, %v5998_v56  ;;  %v14368_v56 = vld [vmem:[#allocation30 + $0x8d4] sm:$0xf] }
 0x741   :  { %v5876_v40 = vpop.f32.mrf.mxu3  ;;  %8438 = vmatpush.bf16.msra.mxu1 %v11893_v38  ;;  %8460 = vmatpush.bf16.msra.mxu3 %v12373_v59 }
 0x742   :  { %8376 = vmatmul.bf16.vlgmr.msrb.gmra.mxu0 %v15466_v17  ;;  %v12493_v40 = vor.u32 %v14248_v57, %v12490_v58  ;;  %v14338_v57 = vld [vmem:[#allocation30 + $0x7e4] sm:$0xf]  ;;  %v12850_v58 = vld [vmem:[#allocation30 + $0x7f8] sm:$0xf0] }
 0x743   :  { %v5913_v10 = vpop.f32.mrf.mxu2  ;;  %8450 = vmatpush.bf16.msra.mxu2 %v12109_v61  ;;  %8472 = vmatpush.bf16.msrb.mxu0 %v12589_v22  ;;  %v5900_v13 = vpop.f32.mrf.mxu1  ;;  %v12757_v61 = vor.u32 %v14314_v51, %v12754_v52  ;;  %v12250_v22 = vld [vmem:[#allocation30 + $0x348] sm:$0xf0] }
 0x744   :  { %v5901_v9 = vadd.f32 %v5900_v13, %v5135_v44  ;;  %v12973_v44 = vor.u32 %v14368_v56, %v12970_v4  ;;  %v12253_v54 = vor.u32 %v14188_v19, %v12250_v22  ;;  %v12706_v13 = vld [vmem:[#allocation30 + $0x6d8] sm:$0xf0]  ;;  %v5138_v4 = vperm.slane %v15449_v60, 7  ;;  %v14416_v22 = vld [vmem:[#allocation30 + $0xa54] sm:$0xf] }
 0x745   :  { %v5941_v21 = vpop.f32.mrf.mxu0  ;;  %8439 = vmatpush.bf16.msra.mxu1 %v11869_v2  ;;  %8461 = vmatpush.bf16.msra.mxu3 %v12349_v35  ;;  %v14242_v2 = vld [vmem:[#allocation30 + $0x4e4] sm:$0xf]  ;;  %v12610_v19 = vld [vmem:[#allocation30 + $0x618] sm:$0xf0] }
 0x746   :  { %v5914_v30 = vadd.f32 %v5913_v10, %v5901_v9  ;;  %v14362_v35 = vld [vmem:[#allocation30 + $0x8a4] sm:$0xf]  ;;  %v12733_v10 = vor.u32 %v14308_v41, %v12730_v18  ;;  %v12469_v14 = vor.u32 %v14242_v2, %v12466_v62  ;;  %v12442_v9 = vld [vmem:[#allocation30 + $0x4c8] sm:$0xf0]  ;;  %v14356_v21 = vld [vmem:[#allocation30 + $0x874] sm:$0xf]  ;;  %v12853_v41 = vor.u32 %v14338_v57, %v12850_v58 }
 0x747   :  { %8451 = vmatpush.bf16.msra.mxu2 %v12085_v11  ;;  %8473 = vmatpush.bf16.msrb.mxu0 %v12565_v0  ;;  %v14182_v11 = vld [vmem:[#allocation30 + $0x304] sm:$0xf]  ;;  %v12949_v16 = vor.u32 %v14362_v35, %v12946_v6  ;;  %v12445_v29 = vor.u32 %v14236_v3, %v12442_v9  ;;  %v12016_v18 = vld [vmem:[#allocation30 + $0x158] sm:$0xf]  ;;  %v14332_v2 = vld [vmem:[#allocation30 + $0x7b4] sm:$0xf] }
 0x748   :  { %v5999_v7 = vmax.f32 %v5914_v30, 0.0  ;;  %v14302_v0 = vld [vmem:[#allocation30 + $0x6c4] sm:$0xf]  ;;  %v12826_v62 = vld [vmem:[#allocation30 + $0x7c8] sm:$0xf0] }
 0x749   :  { %8440 = vmatpush.bf16.msra.mxu1 %v11845_v24  ;;  %8462 = vmatpush.bf16.msra.mxu3 %v12325_v26  ;;  %v5926_v36 = vpop.f32.mrf.mxu3  ;;  %v12229_v24 = vor.u32 %v14182_v11, %v12226_v12  ;;  %v12709_v26 = vor.u32 %v14302_v0, %v12706_v13  ;;  %v14410_v11 = vld [vmem:[#allocation30 + $0xa24] sm:$0xf]  ;;  %v13138_v12 = vld [vmem:[#allocation30 + $0xa38] sm:$0xf0]  ;;  %v14126_v3 = vld [vmem:[#allocation30 + $0x13c] sm:$0xf0] }
 0x74a   :  { %v15471_v48 = vpack.c.bf16 %v5999_v7, %v5999_v7  ;;  %v5927_v25 = vadd.f32 %v5926_v36, %v5136_v23  ;;  %v12922_v23 = vld [vmem:[#allocation30 + $0x888] sm:$0xf0]  ;;  %v12658_v7 = vld [vmem:[#allocation30 + $0x678] sm:$0xf0]  ;;  %v12901_v36 = vor.u32 %v14350_v34, %v12898_v37  ;;  %v14326_v9 = vld [vmem:[#allocation30 + $0x784] sm:$0xf]  ;;  %v13141_v27 = vor.u32 %v14410_v11, %v13138_v12 }
 0x74b   :  { %v5915_v49 = vpop.f32.mrf.mxu2  ;;  %8452 = vmatpush.bf16.msra.mxu2 %v12061_v33  ;;  %8474 = vmatpush.bf16.msrb.mxu0 %v12541_v8  ;;  %v5902_v38 = vpop.f32.mrf.mxu1  ;;  %v12925_v30 = vor.u32 %v14356_v21, %v12922_v23  ;;  %v12418_v33 = vld [vmem:[#allocation30 + $0x498] sm:$0xf0]  ;;  %v12661_v47 = vor.u32 %v14290_v20, %v12658_v7  ;;  %v13114_v34 = vld [vmem:[#allocation30 + $0xa08] sm:$0xf0]  ;;  %v11968_v20 = vld [vmem:[#allocation30 + $0xf8] sm:$0xf] }
 0x74c   :  { %v5940_v59 = vadd.f32 %v15464_v55, %v5927_v25  ;;  %8389 = vmatmul.bf16.vlgmr.msrb.gmra.mxu1 %v15471_v48  ;;  %v14284_v25 = vld [vmem:[#allocation30 + $0x634] sm:$0xf]  ;;  %v12634_v49 = vld [vmem:[#allocation30 + $0x648] sm:$0xf0]  ;;  %v12802_v23 = vld [vmem:[#allocation30 + $0x798] sm:$0xf0] }
 0x74d   :  { %8463 = vmatpush.bf16.msra.mxu3 %v12301_v15  ;;  %8485 = vmatpush.bf16.msrb.mxu1 %v12781_v32  ;;  %v12421_v15 = vor.u32 %v14230_v31, %v12418_v33  ;;  %v5137_v32 = vperm.slane %v15449_v60, 6  ;;  %v12637_v56 = vor.u32 %v14284_v25, %v12634_v49  ;;  %v14404_v33 = vld [vmem:[#allocation30 + $0x9f4] sm:$0xf]  ;;  %v12805_v37 = vor.u32 %v14326_v9, %v12802_v23  ;;  %v14174_v25 = vld [vmem:[#allocation30 + $0x2bc] sm:$0xf0] }
 0x74e   :  { %v6000_v1 = vmax.f32 %v5940_v59, 0.0  ;;  %v14114_v57 = vld [vmem:[#allocation30 + $0xdc] sm:$0xf0]  ;;  %v13042_v11 = vld [vmem:[#allocation30 + $0x978] sm:$0xf0] }
 0x74f   :  { %8453 = vmatpush.bf16.msra.mxu2 %v12037_v45  ;;  %8475 = vmatpush.bf16.msrb.mxu0 %v12517_v63  ;;  %v14344_v45 = vld [vmem:[#allocation30 + $0x814] sm:$0xf]  ;;  %v14156_v23 = vld [vmem:[#allocation30 + $0x22c] sm:$0xf0] }
 0x750   :  { %v15475_v55 = vpack.c.bf16 %v6000_v1, %v6000_v1  ;;  %v12877_v63 = vor.u32 %v14344_v45, %v12874_v46  ;;  %v13162_v1 = vld [vmem:[#allocation30 + $0xa68] sm:$0xf0]  ;;  %v13117_v46 = vor.u32 %v14404_v33, %v13114_v34  ;;  %v14434_v33 = vld [vmem:[#allocation30 + $0xae4] sm:$0xf]  ;;  %v13234_v34 = vld [vmem:[#allocation30 + $0xaf8] sm:$0xf0] }
 0x751   :  { %8464 = vmatpush.bf16.msra.mxu3 %v12277_v5  ;;  %8486 = vmatpush.bf16.msrb.mxu1 %v12757_v61  ;;  %v5928_v43 = vpop.f32.mrf.mxu3  ;;  %v14278_v5 = vld [vmem:[#allocation30 + $0x604] sm:$0xf] }
 0x752   :  { %8402 = vmatmul.bf16.vlgmr.msrb.gmra.mxu2 %v15475_v55  ;;  %v12613_v6 = vor.u32 %v14278_v5, %v12610_v19  ;;  %v12160_v5 = vld [vmem:[#allocation30 + $0x278] sm:$0xf] }
 0x753   :  { %8476 = vmatpush.bf16.msrb.mxu0 %v12493_v40  ;;  %8498 = vmatpush.bf16.msrb.mxu2 %v12973_v44  ;;  %v14132_v40 = vld [vmem:[#allocation30 + $0x16c] sm:$0xf0] }
 0x755   :  { %8465 = vmatpush.bf16.msra.mxu3 %v12253_v54  ;;  %8487 = vmatpush.bf16.msrb.mxu1 %v12733_v10  ;;  %v13165_v54 = vor.u32 %v14416_v22, %v13162_v1  ;;  %v12017_v10 = vor.u32 %v14132_v40, %v12016_v18  ;;  %v14392_v22 = vld [vmem:[#allocation30 + $0x994] sm:$0xf]  ;;  %v13066_v1 = vld [vmem:[#allocation30 + $0x9a8] sm:$0xf0]  ;;  %v11920_v18 = vld [vmem:[#allocation30 + $0x98] sm:$0xf] }
 0x756   :  { %v14108_v40 = vld [vmem:[#allocation30 + $0xac] sm:$0xf0] }
 0x757   :  { %8477 = vmatpush.bf16.msrb.mxu0 %v12469_v14  ;;  %8499 = vmatpush.bf16.msrb.mxu2 %v12949_v16  ;;  %v12829_v14 = vor.u32 %v14332_v2, %v12826_v62  ;;  %v11992_v16 = vld [vmem:[#allocation30 + $0x128] sm:$0xf]  ;;  %v14446_v2 = vld [vmem:[#allocation30 + $0xb44] sm:$0xf]  ;;  %v13282_v62 = vld [vmem:[#allocation30 + $0xb58] sm:$0xf0] }
 0x758   :  { %v11993_v31 = vor.u32 %v14126_v3, %v11992_v16  ;;  %v13285_v12 = vor.u32 %v14446_v2, %v13282_v62  ;;  %v14440_v16 = vld [vmem:[#allocation30 + $0xb14] sm:$0xf]  ;;  %v13258_v3 = vld [vmem:[#allocation30 + $0xb28] sm:$0xf0]  ;;  %v12040_v2 = vld [vmem:[#allocation30 + $0x188] sm:$0xf] }
 0x759   :  { %8466 = vmatpush.bf16.msra.mxu3 %v12229_v24  ;;  %8488 = vmatpush.bf16.msrb.mxu1 %v12709_v26  ;;  %v14464_v24 = vld [vmem:[#allocation30 + $0xbd4] sm:$0xf]  ;;  %v13354_v26 = vld [vmem:[#allocation30 + $0xbe8] sm:$0xf0]  ;;  %v14138_v62 = vld [vmem:[#allocation30 + $0x19c] sm:$0xf0] }
 0x75b   :  { %8478 = vmatpush.bf16.msrb.mxu0 %v12445_v29  ;;  %8500 = vmatpush.bf16.msrb.mxu2 %v12925_v30  ;;  %v14180_v29 = vld [vmem:[#allocation30 + $0x2ec] sm:$0xf0] }
 0x75c   :  { %8441 = vmatmul.bf16.vlgmr.msra.gmra.mxu1 %v15453_v53 }
 0x75d   :  { %v5991_v8 = vpop.f32.mrf.mxu0  ;;  %8489 = vmatpush.bf16.msrb.mxu1 %v12685_v39  ;;  %v13357_v39 = vor.u32 %v14464_v24, %v13354_v26  ;;  %v14380_v26 = vld [vmem:[#allocation30 + $0x934] sm:$0xf] }
 0x75f   :  { %8479 = vmatpush.bf16.msrb.mxu0 %v12421_v15  ;;  %8501 = vmatpush.bf16.msrb.mxu2 %v12901_v36  ;;  %v12209_v15 = vor.u32 %v14180_v29, %v12208_v28  ;;  %v14458_v36 = vld [vmem:[#allocation30 + $0xba4] sm:$0xf]  ;;  %v13261_v28 = vor.u32 %v14440_v16, %v13258_v3  ;;  %v11872_v29 = vld [vmem:[#allocation30 + $0x38] sm:$0xf] }
 0x760   :  { %v12736_v3 = vld [vmem:[#allocation30 + $0x6f8] sm:$0xf] }
 0x761   :  { %8490 = vmatpush.bf16.msrb.mxu1 %v12661_v47  ;;  %v12184_v47 = vld [vmem:[#allocation30 + $0x2a8] sm:$0xf] }
 0x762   :  { %8454 = vmatmul.bf16.vlgmr.msra.gmra.mxu2 %v15456_v50  ;;  %v12185_v58 = vor.u32 %v14174_v25, %v12184_v47  ;;  %v12400_v47 = vld [vmem:[#allocation30 + $0x458] sm:$0xf]  ;;  %v14228_v25 = vld [vmem:[#allocation30 + $0x46c] sm:$0xf0] }
 0x763   :  { %v5952_v51 = vpop.f32.mrf.mxu1  ;;  %v5965_v52 = vpop.f32.mrf.mxu2  ;;  %8502 = vmatpush.bf16.msrb.mxu2 %v12877_v63 }
 0x764   :  { %v5953_v38 = vadd.f32 %v5952_v51, %v5137_v32  ;;  %v13330_v32 = vld [vmem:[#allocation30 + $0xbb8] sm:$0xf0]  ;;  %v14398_v51 = vld [vmem:[#allocation30 + $0x9c4] sm:$0xf] }
 0x765   :  { %v5993_v59 = vpop.f32.mrf.mxu0  ;;  %8491 = vmatpush.bf16.msrb.mxu1 %v12637_v56  ;;  %v13333_v63 = vor.u32 %v14458_v36, %v13330_v32  ;;  %v13306_v56 = vld [vmem:[#allocation30 + $0xb88] sm:$0xf0]  ;;  %v12994_v36 = vld [vmem:[#allocation30 + $0x918] sm:$0xf0]  ;;  %v11848_v32 = vld [vmem:[#allocation30 + $0x8] sm:$0xf] }
 0x766   :  { %v5966_v61 = vadd.f32 %v5965_v52, %v5953_v38  ;;  %v13090_v52 = vld [vmem:[#allocation30 + $0x9d8] sm:$0xf0]  ;;  %v11944_v38 = vld [vmem:[#allocation30 + $0xc8] sm:$0xf]  ;;  %v14452_v59 = vld [vmem:[#allocation30 + $0xb74] sm:$0xf] }
 0x767   :  { %8503 = vmatpush.bf16.msrb.mxu2 %v12853_v41  ;;  %v11945_v19 = vor.u32 %v14114_v57, %v11944_v38  ;;  %v13309_v41 = vor.u32 %v14452_v59, %v13306_v56  ;;  %v14324_v38 = vld [vmem:[#allocation30 + $0x76c] sm:$0xf0] }
 0x768   :  { %v6001_v44 = vmax.f32 %v5966_v61, 0.0  ;;  %v14168_v61 = vld [vmem:[#allocation30 + $0x28c] sm:$0xf0] }
 0x769   :  { %v5978_v35 = vpop.f32.mrf.mxu3  ;;  %8492 = vmatpush.bf16.msrb.mxu1 %v12613_v6  ;;  %v12136_v6 = vld [vmem:[#allocation30 + $0x248] sm:$0xf]  ;;  %v14144_v59 = vld [vmem:[#allocation30 + $0x1cc] sm:$0xf0] }
 0x76a   :  { %v15482_v43 = vpack.c.bf16 %v6001_v44, %v6001_v44  ;;  %v5979_v60 = vadd.f32 %v5978_v35, %v5138_v4  ;;  %v13093_v4 = vor.u32 %v14398_v51, %v13090_v52  ;;  %v12161_v44 = vor.u32 %v14168_v61, %v12160_v5  ;;  %v13210_v52 = vld [vmem:[#allocation30 + $0xac8] sm:$0xf0]  ;;  %v12376_v5 = vld [vmem:[#allocation30 + $0x428] sm:$0xf] }
 0x76b   :  { %v5954_v0 = vpop.f32.mrf.mxu1  ;;  %v5967_v13 = vpop.f32.mrf.mxu2  ;;  %8504 = vmatpush.bf16.msrb.mxu2 %v12829_v14  ;;  %v13069_v35 = vor.u32 %v14392_v22, %v13066_v1  ;;  %v14222_v22 = vld [vmem:[#allocation30 + $0x43c] sm:$0xf0]  ;;  %v14422_v1 = vld [vmem:[#allocation30 + $0xa84] sm:$0xf] }
 0x76c   :  { %v5992_v21 = vadd.f32 %v5991_v8, %v5979_v60  ;;  %8415 = vmatmul.bf16.vlgmr.msrb.gmra.mxu3 %v15482_v43  ;;  %v14120_v8 = vld [vmem:[#allocation30 + $0x10c] sm:$0xf0]  ;;  %8493 = vmatmul.bf16.vlgmr.msrb.gmra.mxu1 %v15471_v48  ;;  %v11921_v60 = vor.u32 %v14108_v40, %v11920_v18  ;;  %v11896_v0 = vld [vmem:[#allocation30 + $0x68] sm:$0xf]  ;;  %v14102_v13 = vld [vmem:[#allocation30 + $0x7c] sm:$0xf0] }
 0x76d   :  { %8511 = vmatpush.bf16.msrb.mxu3 %v13165_v54  ;;  %8537 = vmatpush.bf16.msra.mxu1 %v12017_v10  ;;  %v11969_v49 = vor.u32 %v14120_v8, %v11968_v20  ;;  %v14162_v54 = vld [vmem:[#allocation30 + $0x25c] sm:$0xf0]  ;;  %v14386_v10 = vld [vmem:[#allocation30 + $0x964] sm:$0xf]  ;;  %v11897_v24 = vor.u32 %v14102_v13, %v11896_v0  ;;  %v12760_v40 = vld [vmem:[#allocation30 + $0x728] sm:$0xf] }
 0x76e   :  { %v6002_v30 = vmax.f32 %v5992_v21, 0.0  ;;  %v12137_v14 = vor.u32 %v14162_v54, %v12136_v6  ;;  %v13045_v9 = vor.u32 %v14386_v10, %v13042_v11  ;;  %v12112_v21 = vld [vmem:[#allocation30 + $0x218] sm:$0xf]  ;;  %v14150_v20 = vld [vmem:[#allocation30 + $0x1fc] sm:$0xf0]  ;;  %v12377_v54 = vor.u32 %v14222_v22, %v12376_v5 }
 0x76f   :  { %8505 = vmatpush.bf16.msrb.mxu2 %v12805_v37  ;;  %v14374_v8 = vld [vmem:[#allocation30 + $0x904] sm:$0xf]  ;;  %v14276_v6 = vld [vmem:[#allocation30 + $0x5ec] sm:$0xf0]  ;;  %v12352_v0 = vld [vmem:[#allocation30 + $0x3f8] sm:$0xf] }
 0x770   :  { %v15485_v7 = vpack.c.bf16 %v6002_v30, %v6002_v30  ;;  %v14096_v30 = vld [vmem:[#allocation30 + $0x4c] sm:$0xf0]  ;;  %v12997_v57 = vor.u32 %v14374_v8, %v12994_v36  ;;  %v12928_v36 = vld [vmem:[#allocation30 + $0x878] sm:$0xf]  ;;  %v14198_v5 = vld [vmem:[#allocation30 + $0x37c] sm:$0xf0] }
 0x771   :  { %8512 = vmatpush.bf16.msrb.mxu3 %v13141_v27  ;;  %v5980_v45 = vpop.f32.mrf.mxu3  ;;  %8538 = vmatpush.bf16.msra.mxu1 %v11993_v31  ;;  %v13018_v27 = vld [vmem:[#allocation30 + $0x948] sm:$0xf0]  ;;  %v12113_v31 = vor.u32 %v14156_v23, %v12112_v21  ;;  %v14372_v10 = vld [vmem:[#allocation30 + $0x8ec] sm:$0xf0]  ;;  %v12568_v23 = vld [vmem:[#allocation30 + $0x5a8] sm:$0xf] }
 0x772   :  { %8428 = vmatmul.bf16.vlgmr.msra.gmra.mxu0 %v15485_v7  ;;  %8506 = vmatmul.bf16.vlgmr.msrb.gmra.mxu2 %v15475_v55  ;;  %v13021_v37 = vor.u32 %v14380_v26, %v13018_v27  ;;  %v14090_v45 = vld [vmem:[#allocation30 + $0x1c] sm:$0xf0]  ;;  %v14216_v13 = vld [vmem:[#allocation30 + $0x40c] sm:$0xf0]  ;;  %v12952_v27 = vld [vmem:[#allocation30 + $0x8a8] sm:$0xf] }
 0x773   :  { %8524 = vmatpush.bf16.msra.mxu0 %v13357_v39  ;;  %8550 = vmatpush.bf16.msra.mxu2 %v12209_v15  ;;  %v12088_v39 = vld [vmem:[#allocation30 + $0x1e8] sm:$0xf]  ;;  %v11873_v15 = vor.u32 %v14096_v30, %v11872_v29  ;;  %v11849_v56 = vor.u32 %v14090_v45, %v11848_v32  ;;  %v12353_v26 = vor.u32 %v14216_v13, %v12352_v0  ;;  %v14264_v8 = vld [vmem:[#allocation30 + $0x58c] sm:$0xf0]  ;;  %v14294_v22 = vld [vmem:[#allocation30 + $0x67c] sm:$0xf0] }
 0x774   :  { %v12089_v51 = vor.u32 %v14150_v20, %v12088_v39  ;;  %v12328_v30 = vld [vmem:[#allocation30 + $0x3c8] sm:$0xf]  ;;  %v12544_v20 = vld [vmem:[#allocation30 + $0x578] sm:$0xf]  ;;  %v14360_v32 = vld [vmem:[#allocation30 + $0x88c] sm:$0xf0] }
 0x775   :  { %8513 = vmatpush.bf16.msrb.mxu3 %v13117_v46  ;;  %8539 = vmatpush.bf16.msra.mxu1 %v11969_v49  ;;  %v13237_v46 = vor.u32 %v14434_v33, %v13234_v34  ;;  %v14428_v49 = vld [vmem:[#allocation30 + $0xab4] sm:$0xf]  ;;  %v12712_v34 = vld [vmem:[#allocation30 + $0x6c8] sm:$0xf]  ;;  %v14246_v0 = vld [vmem:[#allocation30 + $0x4fc] sm:$0xf0] }
 0x776   :  { %v13213_v61 = vor.u32 %v14428_v49, %v13210_v52  ;;  %v12688_v49 = vld [vmem:[#allocation30 + $0x698] sm:$0xf]  ;;  %v12929_v52 = vor.u32 %v14360_v32, %v12928_v36  ;;  %v13144_v36 = vld [vmem:[#allocation30 + $0xa28] sm:$0xf] }
 0x777   :  { %8525 = vmatpush.bf16.msra.mxu0 %v13333_v63  ;;  %8551 = vmatpush.bf16.msra.mxu2 %v12185_v58  ;;  %v12784_v63 = vld [vmem:[#allocation30 + $0x758] sm:$0xf] }
 0x778   :  { %v12064_v58 = vld [vmem:[#allocation30 + $0x1b8] sm:$0xf] }
 0x779   :  { %8514 = vmatpush.bf16.msrb.mxu3 %v13093_v4  ;;  %8540 = vmatpush.bf16.msra.mxu1 %v11945_v19  ;;  %v12401_v4 = vor.u32 %v14228_v25, %v12400_v47  ;;  %v12785_v19 = vor.u32 %v14324_v38, %v12784_v63  ;;  %v12065_v18 = vor.u32 %v14144_v59, %v12064_v58  ;;  %v14204_v47 = vld [vmem:[#allocation30 + $0x3ac] sm:$0xf0]  ;;  %v12520_v63 = vld [vmem:[#allocation30 + $0x548] sm:$0xf]  ;;  %v14258_v38 = vld [vmem:[#allocation30 + $0x55c] sm:$0xf0] }
 0x77a   :  { %v12545_v25 = vor.u32 %v14264_v8, %v12544_v20  ;;  %v12904_v58 = vld [vmem:[#allocation30 + $0x848] sm:$0xf]  ;;  %v14354_v59 = vld [vmem:[#allocation30 + $0x85c] sm:$0xf0]  ;;  %v14336_v20 = vld [vmem:[#allocation30 + $0x7cc] sm:$0xf0] }
 0x77b   :  { %8526 = vmatpush.bf16.msra.mxu0 %v13309_v41  ;;  %8552 = vmatpush.bf16.msra.mxu2 %v12161_v44  ;;  %v13186_v41 = vld [vmem:[#allocation30 + $0xa98] sm:$0xf0]  ;;  %v14318_v44 = vld [vmem:[#allocation30 + $0x73c] sm:$0xf0] }
 0x77c   :  { %8467 = vmatmul.bf16.vlgmr.msra.gmra.mxu3 %v15461_v42  ;;  %v13189_v11 = vor.u32 %v14422_v1, %v13186_v41  ;;  %v12905_v1 = vor.u32 %v14354_v59, %v12904_v58  ;;  %v12496_v41 = vld [vmem:[#allocation30 + $0x518] sm:$0xf]  ;;  %v14468_v58 = vld [vmem:[#allocation30 + $0xbec] sm:$0xf0] }
 0x77d   :  { %8515 = vmatpush.bf16.msrb.mxu3 %v13069_v35  ;;  %8541 = vmatpush.bf16.msra.mxu1 %v11921_v60  ;;  %v12592_v35 = vld [vmem:[#allocation30 + $0x5d8] sm:$0xf] }
 0x77e   :  { %v12976_v60 = vld [vmem:[#allocation30 + $0x8d8] sm:$0xf]  ;;  %v12593_v16 = vor.u32 %v14276_v6, %v12592_v35  ;;  %v14192_v6 = vld [vmem:[#allocation30 + $0x34c] sm:$0xf0] }
 0x77f   :  { %8527 = vmatpush.bf16.msra.mxu0 %v13285_v12  ;;  %8553 = vmatpush.bf16.msra.mxu2 %v12137_v14  ;;  %v12761_v12 = vor.u32 %v14318_v44, %v12760_v40  ;;  %v12041_v14 = vor.u32 %v14138_v62, %v12040_v2  ;;  %v12977_v21 = vor.u32 %v14372_v10, %v12976_v60  ;;  %v12880_v44 = vld [vmem:[#allocation30 + $0x818] sm:$0xf]  ;;  %v14348_v2 = vld [vmem:[#allocation30 + $0x82c] sm:$0xf0] }
 0x780   :  { %v12256_v35 = vld [vmem:[#allocation30 + $0x338] sm:$0xf]  ;;  %v14288_v10 = vld [vmem:[#allocation30 + $0x64c] sm:$0xf0] }
 0x781   :  { %8516 = vmatpush.bf16.msrb.mxu3 %v13045_v9  ;;  %8542 = vmatpush.bf16.msra.mxu1 %v11897_v24  ;;  %v14312_v9 = vld [vmem:[#allocation30 + $0x70c] sm:$0xf0]  ;;  %v14270_v24 = vld [vmem:[#allocation30 + $0x5bc] sm:$0xf0]  ;;  %v12640_v60 = vld [vmem:[#allocation30 + $0x638] sm:$0xf]  ;;  %v12257_v13 = vor.u32 %v14192_v6, %v12256_v35 }
 0x782   :  { %8480 = vmatmul.bf16.vlgmr.msrb.gmra.mxu0 %v15466_v17  ;;  %v12737_v29 = vor.u32 %v14312_v9, %v12736_v3  ;;  %v12569_v33 = vor.u32 %v14270_v24, %v12568_v23  ;;  %v12232_v3 = vld [vmem:[#allocation30 + $0x308] sm:$0xf]  ;;  %v12641_v9 = vor.u32 %v14288_v10, %v12640_v60  ;;  %v14282_v24 = vld [vmem:[#allocation30 + $0x61c] sm:$0xf0]  ;;  %v14171_v6 = vld [vmem:[#allocation30 + $0x2ac] sm:$0xf] }
 0x783   :  { %8528 = vmatpush.bf16.msra.mxu0 %v13261_v28  ;;  %8554 = vmatpush.bf16.msra.mxu2 %v12113_v31  ;;  %v14366_v28 = vld [vmem:[#allocation30 + $0x8bc] sm:$0xf0]  ;;  %v12616_v23 = vld [vmem:[#allocation30 + $0x608] sm:$0xf] }
 0x784   :  { %v14210_v31 = vld [vmem:[#allocation30 + $0x3dc] sm:$0xf0]  ;;  %v12953_v39 = vor.u32 %v14366_v28, %v12952_v27  ;;  %v13168_v27 = vld [vmem:[#allocation30 + $0xa58] sm:$0xf]  ;;  %v14420_v28 = vld [vmem:[#allocation30 + $0xa6c] sm:$0xf0]  ;;  %v12617_v8 = vor.u32 %v14282_v24, %v12616_v23 }
 0x785   :  { %8517 = vmatpush.bf16.msrb.mxu3 %v13021_v37  ;;  %8543 = vmatpush.bf16.msra.mxu1 %v11873_v15  ;;  %v14306_v37 = vld [vmem:[#allocation30 + $0x6dc] sm:$0xf0]  ;;  %v12329_v15 = vor.u32 %v14210_v31, %v12328_v30  ;;  %v14240_v31 = vld [vmem:[#allocation30 + $0x4cc] sm:$0xf0]  ;;  %v14165_v23 = vld [vmem:[#allocation30 + $0x27c] sm:$0xf] }
 0x786   :  { %v12713_v45 = vor.u32 %v14306_v37, %v12712_v34  ;;  %v12018_v34 = vld [vmem:[#allocation30 + $0x170] sm:$0xf0] }
 0x787   :  { %8529 = vmatpush.bf16.msra.mxu0 %v13237_v46  ;;  %8555 = vmatpush.bf16.msra.mxu2 %v12089_v51  ;;  %v12304_v46 = vld [vmem:[#allocation30 + $0x398] sm:$0xf]  ;;  %v14300_v51 = vld [vmem:[#allocation30 + $0x6ac] sm:$0xf0]  ;;  %v12162_v24 = vld [vmem:[#allocation30 + $0x290] sm:$0xf0] }
 0x789   :  { %8518 = vmatpush.bf16.msrb.mxu3 %v12997_v57  ;;  %8544 = vmatpush.bf16.msra.mxu1 %v11849_v56  ;;  %v12305_v57 = vor.u32 %v14204_v47, %v12304_v46  ;;  %v12689_v56 = vor.u32 %v14300_v51, %v12688_v49  ;;  %v14414_v46 = vld [vmem:[#allocation30 + $0xa3c] sm:$0xf0]  ;;  %v12424_v47 = vld [vmem:[#allocation30 + $0x488] sm:$0xf]  ;;  %v14123_v51 = vld [vmem:[#allocation30 + $0x12c] sm:$0xf] }
 0x78a   :  { %v13145_v59 = vor.u32 %v14414_v46, %v13144_v36 }
 0x78b   :  { %8530 = vmatpush.bf16.msra.mxu0 %v13213_v61  ;;  %8556 = vmatpush.bf16.msra.mxu2 %v12065_v18  ;;  %v12521_v61 = vor.u32 %v14258_v38, %v12520_v63  ;;  %v14252_v18 = vld [vmem:[#allocation30 + $0x52c] sm:$0xf0]  ;;  %v12808_v63 = vld [vmem:[#allocation30 + $0x788] sm:$0xf]  ;;  %v14330_v38 = vld [vmem:[#allocation30 + $0x79c] sm:$0xf0] }
 0x78c   :  { %8519 = vmatmul.bf16.vlgmr.msrb.gmra.mxu3 %v15482_v43  ;;  %8545 = vmatmul.bf16.vlgmr.msra.gmra.mxu1 %v15453_v53 }
 0x78d   :  { %8563 = vmatpush.bf16.msra.mxu3 %v12401_v4  ;;  %8589 = vmatpush.bf16.msrb.mxu1 %v12785_v19  ;;  %v12280_v4 = vld [vmem:[#allocation30 + $0x368] sm:$0xf] }
 0x78e   :  { %v12664_v19 = vld [vmem:[#allocation30 + $0x668] sm:$0xf]  ;;  %v12281_v40 = vor.u32 %v14198_v5, %v12280_v4  ;;  %v12210_v4 = vld [vmem:[#allocation30 + $0x2f0] sm:$0xf0] }
 0x78f   :  { %8531 = vmatpush.bf16.msra.mxu0 %v13189_v11  ;;  %8557 = vmatpush.bf16.msra.mxu2 %v12041_v14  ;;  %v12665_v62 = vor.u32 %v14294_v22, %v12664_v19  ;;  %v12881_v11 = vor.u32 %v14348_v2, %v12880_v44  ;;  %v12856_v14 = vld [vmem:[#allocation30 + $0x7e8] sm:$0xf]  ;;  %v13120_v19 = vld [vmem:[#allocation30 + $0x9f8] sm:$0xf]  ;;  %v14408_v22 = vld [vmem:[#allocation30 + $0xa0c] sm:$0xf0] }
 0x790   :  { %v13336_v2 = vld [vmem:[#allocation30 + $0xba8] sm:$0xf]  ;;  %v13121_v35 = vor.u32 %v14408_v22, %v13120_v19  ;;  %v11874_v19 = vld [vmem:[#allocation30 + $0x50] sm:$0xf0] }
 0x791   :  { %8564 = vmatpush.bf16.msra.mxu3 %v12377_v54  ;;  %8590 = vmatpush.bf16.msrb.mxu1 %v12761_v12  ;;  %v12497_v54 = vor.u32 %v14252_v18, %v12496_v41  ;;  %v12472_v12 = vld [vmem:[#allocation30 + $0x4e8] sm:$0xf]  ;;  %v14117_v18 = vld [vmem:[#allocation30 + $0xfc] sm:$0xf] }
 0x792   :  { %8532 = vmatmul.bf16.vlgmr.msra.gmra.mxu0 %v15485_v7  ;;  %8558 = vmatmul.bf16.vlgmr.msra.gmra.mxu2 %v15456_v50 }
 0x793   :  { %8576 = vmatpush.bf16.msrb.mxu0 %v12593_v16  ;;  %8602 = vmatpush.bf16.msrb.mxu2 %v12977_v21  ;;  %v14342_v16 = vld [vmem:[#allocation30 + $0x7fc] sm:$0xf0] }
 0x794   :  { %v14186_v21 = vld [vmem:[#allocation30 + $0x31c] sm:$0xf0]  ;;  %v12857_v30 = vor.u32 %v14342_v16, %v12856_v14  ;;  %v11946_v14 = vld [vmem:[#allocation30 + $0xe0] sm:$0xf0] }
 0x795   :  { %8565 = vmatpush.bf16.msra.mxu3 %v12353_v26  ;;  %8591 = vmatpush.bf16.msrb.mxu1 %v12737_v29  ;;  %v12473_v26 = vor.u32 %v14246_v0, %v12472_v12  ;;  %v12448_v29 = vld [vmem:[#allocation30 + $0x4b8] sm:$0xf]  ;;  %v12233_v37 = vor.u32 %v14186_v21, %v12232_v3  ;;  %v14402_v12 = vld [vmem:[#allocation30 + $0x9dc] sm:$0xf0] }
 0x796   :  { %v12449_v32 = vor.u32 %v14240_v31, %v12448_v29  ;;  %v13312_v3 = vld [vmem:[#allocation30 + $0xb78] sm:$0xf]  ;;  %v11922_v31 = vld [vmem:[#allocation30 + $0xb0] sm:$0xf0] }
 0x797   :  { %8577 = vmatpush.bf16.msrb.mxu0 %v12569_v33  ;;  %8603 = vmatpush.bf16.msrb.mxu2 %v12953_v39  ;;  %v14129_v33 = vld [vmem:[#allocation30 + $0x15c] sm:$0xf]  ;;  %v12832_v39 = vld [vmem:[#allocation30 + $0x7b8] sm:$0xf] }
 0x798   :  { %v12833_v49 = vor.u32 %v14336_v20, %v12832_v39  ;;  %v14159_v20 = vld [vmem:[#allocation30 + $0x24c] sm:$0xf] }
 0x799   :  { %8566 = vmatpush.bf16.msra.mxu3 %v12329_v15  ;;  %8592 = vmatpush.bf16.msrb.mxu1 %v12713_v45  ;;  %v13169_v15 = vor.u32 %v14420_v28, %v13168_v27  ;;  %v12021_v45 = vor.u32 %v14129_v33, %v12018_v34  ;;  %v13072_v27 = vld [vmem:[#allocation30 + $0x998] sm:$0xf]  ;;  %v14396_v28 = vld [vmem:[#allocation30 + $0x9ac] sm:$0xf0]  ;;  %v12165_v33 = vor.u32 %v14165_v23, %v12162_v24  ;;  %v13288_v34 = vld [vmem:[#allocation30 + $0xb48] sm:$0xf] }
 0x79a   :  { %v13073_v39 = vor.u32 %v14396_v28, %v13072_v27  ;;  %v12066_v23 = vld [vmem:[#allocation30 + $0x1d0] sm:$0xf0]  ;;  %v14219_v28 = vld [vmem:[#allocation30 + $0x42c] sm:$0xf] }
 0x79b   :  { %8578 = vmatpush.bf16.msrb.mxu0 %v12545_v25  ;;  %8604 = vmatpush.bf16.msrb.mxu2 %v12929_v52  ;;  %v14234_v25 = vld [vmem:[#allocation30 + $0x49c] sm:$0xf0]  ;;  %v11994_v52 = vld [vmem:[#allocation30 + $0x140] sm:$0xf0] }
 0x79c   :  { %v12425_v5 = vor.u32 %v14234_v25, %v12424_v47  ;;  %v14099_v47 = vld [vmem:[#allocation30 + $0x6c] sm:$0xf]  ;;  %v11898_v25 = vld [vmem:[#allocation30 + $0x80] sm:$0xf0] }
 0x79d   :  { %8567 = vmatpush.bf16.msra.mxu3 %v12305_v57  ;;  %8593 = vmatpush.bf16.msrb.mxu1 %v12689_v56  ;;  %v13360_v57 = vld [vmem:[#allocation30 + $0xbd8] sm:$0xf]  ;;  %v14177_v56 = vld [vmem:[#allocation30 + $0x2dc] sm:$0xf] }
 0x79e   :  { %v13361_v41 = vor.u32 %v14468_v58, %v13360_v57  ;;  %v12213_v44 = vor.u32 %v14177_v56, %v12210_v4  ;;  %v12114_v57 = vld [vmem:[#allocation30 + $0x230] sm:$0xf0]  ;;  %v13024_v56 = vld [vmem:[#allocation30 + $0x938] sm:$0xf]  ;;  %v14384_v4 = vld [vmem:[#allocation30 + $0x94c] sm:$0xf0] }
 0x79f   :  { %8579 = vmatpush.bf16.msrb.mxu0 %v12521_v61  ;;  %8605 = vmatpush.bf16.msrb.mxu2 %v12905_v1  ;;  %v11997_v61 = vor.u32 %v14123_v51, %v11994_v52  ;;  %v12809_v1 = vor.u32 %v14330_v38, %v12808_v63  ;;  %v13264_v51 = vld [vmem:[#allocation30 + $0xb18] sm:$0xf]  ;;  %v14444_v52 = vld [vmem:[#allocation30 + $0xb2c] sm:$0xf0]  ;;  %v14153_v38 = vld [vmem:[#allocation30 + $0x21c] sm:$0xf] }
 0x7a0   :  { %v12117_v22 = vor.u32 %v14153_v38, %v12114_v57  ;;  %v12354_v38 = vld [vmem:[#allocation30 + $0x410] sm:$0xf0] }
 0x7a1   :  { %8568 = vmatpush.bf16.msra.mxu3 %v12281_v40  ;;  %8594 = vmatpush.bf16.msrb.mxu1 %v12665_v62  ;;  %v11970_v40 = vld [vmem:[#allocation30 + $0x110] sm:$0xf0]  ;;  %v14462_v62 = vld [vmem:[#allocation30 + $0xbbc] sm:$0xf0] }
 0x7a2   :  { %v11973_v10 = vor.u32 %v14117_v18, %v11970_v40  ;;  %v13337_v0 = vor.u32 %v14462_v62, %v13336_v2  ;;  %v13025_v18 = vor.u32 %v14384_v4, %v13024_v56  ;;  %v14147_v40 = vld [vmem:[#allocation30 + $0x1ec] sm:$0xf]  ;;  %v13000_v2 = vld [vmem:[#allocation30 + $0x908] sm:$0xf]  ;;  %v14309_v56 = vld [vmem:[#allocation30 + $0x6fc] sm:$0xf] }
 0x7a3   :  { %8580 = vmatpush.bf16.msrb.mxu0 %v12497_v54  ;;  %8606 = vmatpush.bf16.msrb.mxu2 %v12881_v11  ;;  %v12186_v54 = vld [vmem:[#allocation30 + $0x2c0] sm:$0xf0]  ;;  %v13096_v11 = vld [vmem:[#allocation30 + $0x9c8] sm:$0xf]  ;;  %v12738_v4 = vld [vmem:[#allocation30 + $0x710] sm:$0xf0] }
 0x7a4   :  { %v12189_v16 = vor.u32 %v14171_v6, %v12186_v54  ;;  %v13097_v21 = vor.u32 %v14402_v12, %v13096_v11  ;;  %v14087_v6 = vld [vmem:[#allocation30 + $0xc] sm:$0xf]  ;;  %v11850_v54 = vld [vmem:[#allocation30 + $0x20] sm:$0xf0]  ;;  %v14225_v11 = vld [vmem:[#allocation30 + $0x45c] sm:$0xf] }
 0x7a5   :  { %8569 = vmatpush.bf16.msra.mxu3 %v12257_v13  ;;  %8595 = vmatpush.bf16.msrb.mxu1 %v12641_v9  ;;  %v14111_v13 = vld [vmem:[#allocation30 + $0xcc] sm:$0xf]  ;;  %v14456_v9 = vld [vmem:[#allocation30 + $0xb8c] sm:$0xf0]  ;;  %v12402_v12 = vld [vmem:[#allocation30 + $0x470] sm:$0xf0] }
 0x7a6   :  { %v13313_v29 = vor.u32 %v14456_v9, %v13312_v3  ;;  %v12786_v3 = vld [vmem:[#allocation30 + $0x770] sm:$0xf0]  ;;  %v12405_v27 = vor.u32 %v14225_v11, %v12402_v12  ;;  %v14261_v11 = vld [vmem:[#allocation30 + $0x57c] sm:$0xf] }
 0x7a7   :  { %8581 = vmatpush.bf16.msrb.mxu0 %v12473_v26  ;;  %8607 = vmatpush.bf16.msrb.mxu2 %v12857_v30  ;;  %v11949_v26 = vor.u32 %v14111_v13, %v11946_v14  ;;  %v14105_v30 = vld [vmem:[#allocation30 + $0x9c] sm:$0xf]  ;;  %v14432_v14 = vld [vmem:[#allocation30 + $0xacc] sm:$0xf0]  ;;  %v12546_v12 = vld [vmem:[#allocation30 + $0x590] sm:$0xf0] }
 0x7a8   :  { %v11925_v36 = vor.u32 %v14105_v30, %v11922_v31  ;;  %v12378_v31 = vld [vmem:[#allocation30 + $0x440] sm:$0xf0] }
 0x7a9   :  { %8570 = vmatpush.bf16.msra.mxu3 %v12233_v37  ;;  %8596 = vmatpush.bf16.msrb.mxu1 %v12617_v8  ;;  %v15498_v60 = vpop.f32.mrf.mxu1  ;;  %v14450_v37 = vld [vmem:[#allocation30 + $0xb5c] sm:$0xf0]  ;;  %v12138_v8 = vld [vmem:[#allocation30 + $0x260] sm:$0xf0] }
 0x7aa   :  { %v13289_v46 = vor.u32 %v14450_v37, %v13288_v34  ;;  %v14426_v34 = vld [vmem:[#allocation30 + $0xa9c] sm:$0xf0] }
 0x7ab   :  { %8582 = vmatpush.bf16.msrb.mxu0 %v12449_v32  ;;  %8608 = vmatpush.bf16.msrb.mxu2 %v12833_v49  ;;  %v13048_v32 = vld [vmem:[#allocation30 + $0x968] sm:$0xf]  ;;  %v12141_v49 = vor.u32 %v14159_v20, %v12138_v8  ;;  %v14315_v8 = vld [vmem:[#allocation30 + $0x72c] sm:$0xf] }
 0x7ac   :  { %8571 = vmatmul.bf16.vlgmr.msra.gmra.mxu3 %v15461_v42  ;;  %8597 = vmatmul.bf16.vlgmr.msrb.gmra.mxu1 %v15471_v48 }
 0x7ad   :  { %8615 = vmatpush.bf16.msrb.mxu3 %v13169_v15  ;;  %8641 = vmatpush.bf16.msra.mxu1 %v12021_v45  ;;  %v14390_v45 = vld [vmem:[#allocation30 + $0x97c] sm:$0xf0] }
 0x7ae   :  { %v13049_v63 = vor.u32 %v14390_v45, %v13048_v32  ;;  %v12042_v32 = vld [vmem:[#allocation30 + $0x1a0] sm:$0xf0]  ;;  %v14273_v45 = vld [vmem:[#allocation30 + $0x5dc] sm:$0xf] }
 0x7af   :  { %8583 = vmatpush.bf16.msrb.mxu0 %v12425_v5  ;;  %8609 = vmatpush.bf16.msrb.mxu2 %v12809_v1  ;;  %v13265_v5 = vor.u32 %v14444_v52, %v13264_v51  ;;  %v13240_v1 = vld [vmem:[#allocation30 + $0xae8] sm:$0xf] }
 0x7b1   :  { %8616 = vmatpush.bf16.msrb.mxu3 %v13145_v59  ;;  %8642 = vmatpush.bf16.msra.mxu1 %v11997_v61  ;;  %v8340_v15 = vpop.f32.mrf.mxu1  ;;  %v11901_v59 = vor.u32 %v14099_v47, %v11898_v25  ;;  %v14093_v61 = vld [vmem:[#allocation30 + $0x3c] sm:$0xf]  ;;  %v12381_v47 = vor.u32 %v14219_v28, %v12378_v31  ;;  %v14255_v28 = vld [vmem:[#allocation30 + $0x54c] sm:$0xf] }
 0x7b2   :  { %8584 = vmatmul.bf16.vlgmr.msrb.gmra.mxu0 %v15466_v17  ;;  %8610 = vmatmul.bf16.vlgmr.msrb.gmra.mxu2 %v15475_v55  ;;  %v11877_v62 = vor.u32 %v14093_v61, %v11874_v19  ;;  %v12762_v15 = vld [vmem:[#allocation30 + $0x740] sm:$0xf0]  ;;  %v14369_v25 = vld [vmem:[#allocation30 + $0x8dc] sm:$0xf]  ;;  %v14267_v61 = vld [vmem:[#allocation30 + $0x5ac] sm:$0xf] }
 0x7b3   :  { %8628 = vmatpush.bf16.msra.mxu0 %v13361_v41  ;;  %8654 = vmatpush.bf16.msra.mxu2 %v12213_v44  ;;  %v14438_v41 = vld [vmem:[#allocation30 + $0xafc] sm:$0xf0]  ;;  %v12090_v44 = vld [vmem:[#allocation30 + $0x200] sm:$0xf0]  ;;  %v12765_v52 = vor.u32 %v14315_v8, %v12762_v15  ;;  %v14351_v31 = vld [vmem:[#allocation30 + $0x84c] sm:$0xf] }
 0x7b4   :  { %v12093_v13 = vor.u32 %v14147_v40, %v12090_v44  ;;  %v12570_v19 = vld [vmem:[#allocation30 + $0x5c0] sm:$0xf0]  ;;  %v14207_v40 = vld [vmem:[#allocation30 + $0x3cc] sm:$0xf] }
 0x7b5   :  { %8617 = vmatpush.bf16.msrb.mxu3 %v13121_v35  ;;  %8643 = vmatpush.bf16.msra.mxu1 %v11973_v10  ;;  %v15502_v58 = vpop.f32.mrf.mxu2  ;;  %v14378_v35 = vld [vmem:[#allocation30 + $0x91c] sm:$0xf0]  ;;  %v13241_v10 = vor.u32 %v14438_v41, %v13240_v1  ;;  %v14363_v1 = vld [vmem:[#allocation30 + $0x8ac] sm:$0xf]  ;;  %v12954_v41 = vld [vmem:[#allocation30 + $0x8c0] sm:$0xf0] }
 0x7b6   :  { %v13001_v9 = vor.u32 %v14378_v35, %v13000_v2  ;;  %v12330_v44 = vld [vmem:[#allocation30 + $0x3e0] sm:$0xf0]  ;;  %v12573_v35 = vor.u32 %v14267_v61, %v12570_v19  ;;  %v14243_v61 = vld [vmem:[#allocation30 + $0x4ec] sm:$0xf] }
 0x7b7   :  { %8629 = vmatpush.bf16.msra.mxu0 %v13337_v0  ;;  %8655 = vmatpush.bf16.msra.mxu2 %v12189_v16  ;;  %v13216_v0 = vld [vmem:[#allocation30 + $0xab8] sm:$0xf]  ;;  %v14321_v16 = vld [vmem:[#allocation30 + $0x75c] sm:$0xf]  ;;  %v12282_v8 = vld [vmem:[#allocation30 + $0x380] sm:$0xf0] }
 0x7b8   :  { %v12789_v30 = vor.u32 %v14321_v16, %v12786_v3  ;;  %v12474_v19 = vld [vmem:[#allocation30 + $0x500] sm:$0xf0] }
 0x7b9   :  { %8618 = vmatpush.bf16.msrb.mxu3 %v13097_v21  ;;  %8644 = vmatpush.bf16.msra.mxu1 %v11949_v26  ;;  %v14141_v21 = vld [vmem:[#allocation30 + $0x1bc] sm:$0xf]  ;;  %v11853_v26 = vor.u32 %v14087_v6, %v11850_v54  ;;  %v14303_v6 = vld [vmem:[#allocation30 + $0x6cc] sm:$0xf]  ;;  %v12714_v54 = vld [vmem:[#allocation30 + $0x6e0] sm:$0xf0] }
 0x7ba   :  { %v12069_v20 = vor.u32 %v14141_v21, %v12066_v23  ;;  %v12717_v3 = vor.u32 %v14303_v6, %v12714_v54  ;;  %v12306_v21 = vld [vmem:[#allocation30 + $0x3b0] sm:$0xf0]  ;;  %v12549_v23 = vor.u32 %v14261_v11, %v12546_v12  ;;  %v12618_v6 = vld [vmem:[#allocation30 + $0x620] sm:$0xf0]  ;;  %v12477_v54 = vor.u32 %v14243_v61, %v12474_v19  ;;  %v14237_v12 = vld [vmem:[#allocation30 + $0x4bc] sm:$0xf] }
 0x7bb   :  { %8630 = vmatpush.bf16.msra.mxu0 %v13313_v29  ;;  %8656 = vmatpush.bf16.msra.mxu2 %v12165_v33  ;;  %v13217_v29 = vor.u32 %v14432_v14, %v13216_v0  ;;  %v13192_v33 = vld [vmem:[#allocation30 + $0xa88] sm:$0xf]  ;;  %v12333_v0 = vor.u32 %v14207_v40, %v12330_v44  ;;  %v12930_v14 = vld [vmem:[#allocation30 + $0x890] sm:$0xf0]  ;;  %v14183_v40 = vld [vmem:[#allocation30 + $0x30c] sm:$0xf] }
 0x7bc   :  { %v13193_v51 = vor.u32 %v14426_v34, %v13192_v33  ;;  %v12906_v33 = vld [vmem:[#allocation30 + $0x860] sm:$0xf0]  ;;  %v13170_v11 = vld [vmem:[#allocation30 + $0xa70] sm:$0xf0]  ;;  %v11976_v61 = vld [vmem:[#allocation30 + $0x100] sm:$0xf] }
 0x7bd   :  { %8619 = vmatpush.bf16.msrb.mxu3 %v13073_v39  ;;  %8645 = vmatpush.bf16.msra.mxu1 %v11925_v36  ;;  %v8353_v24 = vpop.f32.mrf.mxu2  ;;  %v14135_v36 = vld [vmem:[#allocation30 + $0x18c] sm:$0xf]  ;;  %v14121_v19 = vld [vmem:[#allocation30 + $0x114] sm:$0xf0] }
 0x7be   :  { %v12045_v57 = vor.u32 %v14135_v36, %v12042_v32  ;;  %v14297_v24 = vld [vmem:[#allocation30 + $0x69c] sm:$0xf]  ;;  %v14291_v36 = vld [vmem:[#allocation30 + $0x66c] sm:$0xf]  ;;  %v12666_v32 = vld [vmem:[#allocation30 + $0x680] sm:$0xf0] }
 0x7bf   :  { %8631 = vmatpush.bf16.msra.mxu0 %v13289_v46  ;;  %8657 = vmatpush.bf16.msra.mxu2 %v12141_v49  ;;  %v15504_v37 = vpop.f32.mrf.mxu3  ;;  %v15506_v39 = vpop.f32.mrf.mxu0  ;;  %v12594_v46 = vld [vmem:[#allocation30 + $0x5f0] sm:$0xf0] }
 0x7c0   :  { %v12978_v49 = vld [vmem:[#allocation30 + $0x8f0] sm:$0xf0] }
 0x7c1   :  { %8620 = vmatpush.bf16.msrb.mxu3 %v13049_v63  ;;  %8646 = vmatpush.bf16.msra.mxu1 %v11901_v59  ;;  %v14213_v63 = vld [vmem:[#allocation30 + $0x3fc] sm:$0xf]  ;;  %v12597_v59 = vor.u32 %v14273_v45, %v12594_v46  ;;  %v12909_v45 = vor.u32 %v14351_v31, %v12906_v33  ;;  %v13146_v33 = vld [vmem:[#allocation30 + $0xa40] sm:$0xf0] }
 0x7c2   :  { %v14249_v46 = vld [vmem:[#allocation30 + $0x51c] sm:$0xf] }
 0x7c3   :  { %8632 = vmatpush.bf16.msra.mxu0 %v13265_v5  ;;  %8658 = vmatpush.bf16.msra.mxu2 %v12117_v22  ;;  %v12981_v5 = vor.u32 %v14369_v25, %v12978_v49  ;;  %v12357_v22 = vor.u32 %v14213_v63, %v12354_v38  ;;  %v14345_v49 = vld [vmem:[#allocation30 + $0x81c] sm:$0xf]  ;;  %v12669_v63 = vor.u32 %v14291_v36, %v12666_v32  ;;  %v14127_v36 = vld [vmem:[#allocation30 + $0x144] sm:$0xf0]  ;;  %v14327_v32 = vld [vmem:[#allocation30 + $0x78c] sm:$0xf] }
 0x7c4   :  { %v14189_v38 = vld [vmem:[#allocation30 + $0x33c] sm:$0xf] }
 0x7c5   :  { %8621 = vmatpush.bf16.msrb.mxu3 %v13025_v18  ;;  %8647 = vmatpush.bf16.msra.mxu1 %v11877_v62  ;;  %v12741_v18 = vor.u32 %v14309_v56, %v12738_v4  ;;  %v14285_v56 = vld [vmem:[#allocation30 + $0x63c] sm:$0xf]  ;;  %v12642_v4 = vld [vmem:[#allocation30 + $0x650] sm:$0xf0] }
 0x7c7   :  { %8633 = vmatpush.bf16.msra.mxu0 %v13241_v10  ;;  %8659 = vmatpush.bf16.msra.mxu2 %v12093_v13  ;;  %v8366_v2 = vpop.f32.mrf.mxu3  ;;  %v8379_v62 = vpop.f32.mrf.mxu0  ;;  %v12957_v10 = vor.u32 %v14363_v1, %v12954_v41  ;;  %v14357_v13 = vld [vmem:[#allocation30 + $0x87c] sm:$0xf]  ;;  %v14339_v41 = vld [vmem:[#allocation30 + $0x7ec] sm:$0xf] }
 0x7c8   :  { %v12645_v2 = vor.u32 %v14285_v56, %v12642_v4  ;;  %v12234_v62 = vld [vmem:[#allocation30 + $0x320] sm:$0xf0]  ;;  %v13122_v56 = vld [vmem:[#allocation30 + $0xa10] sm:$0xf0] }
 0x7c9   :  { %8622 = vmatpush.bf16.msrb.mxu3 %v13001_v9  ;;  %8648 = vmatpush.bf16.msra.mxu1 %v11853_v26  ;;  %v15512_v16 = vpop.f32.mrf.mxu1  ;;  %v14201_v9 = vld [vmem:[#allocation30 + $0x39c] sm:$0xf]  ;;  %v12690_v26 = vld [vmem:[#allocation30 + $0x6b0] sm:$0xf0] }
 0x7ca   :  { %v12693_v34 = vor.u32 %v14297_v24, %v12690_v26 }
 0x7cb   :  { %8634 = vmatpush.bf16.msra.mxu0 %v13217_v29  ;;  %8660 = vmatpush.bf16.msra.mxu2 %v12069_v20  ;;  %v12522_v29 = vld [vmem:[#allocation30 + $0x560] sm:$0xf0]  ;;  %v14195_v20 = vld [vmem:[#allocation30 + $0x36c] sm:$0xf] }
 0x7cc   :  { %8623 = vmatmul.bf16.vlgmr.msrb.gmra.mxu3 %v15482_v43  ;;  %8649 = vmatmul.bf16.vlgmr.msra.gmra.mxu1 %v15453_v53  ;;  %v12525_v15 = vor.u32 %v14255_v28, %v12522_v29  ;;  %v12285_v25 = vor.u32 %v14195_v20, %v12282_v8  ;;  %v14411_v29 = vld [vmem:[#allocation30 + $0xa2c] sm:$0xf]  ;;  %v12426_v20 = vld [vmem:[#allocation30 + $0x4a0] sm:$0xf0] }
 0x7cd   :  { %8667 = vmatpush.bf16.msra.mxu3 %v12405_v27  ;;  %8693 = vmatpush.bf16.msrb.mxu1 %v12789_v30  ;;  %v12933_v27 = vor.u32 %v14357_v13, %v12930_v14  ;;  %v12309_v30 = vor.u32 %v14201_v9, %v12306_v21  ;;  %v12450_v13 = vld [vmem:[#allocation30 + $0x4d0] sm:$0xf0]  ;;  %v12024_v14 = vld [vmem:[#allocation30 + $0x160] sm:$0xf]  ;;  %v12237_v9 = vor.u32 %v14183_v40, %v12234_v62  ;;  %v14333_v21 = vld [vmem:[#allocation30 + $0x7bc] sm:$0xf] }
 0x7ce   :  { %v12192_v62 = vld [vmem:[#allocation30 + $0x2b0] sm:$0xf] }
 0x7cf   :  { %8635 = vmatpush.bf16.msra.mxu0 %v13193_v51  ;;  %8661 = vmatpush.bf16.msra.mxu2 %v12045_v57  ;;  %v12882_v51 = vld [vmem:[#allocation30 + $0x830] sm:$0xf0] }
 0x7d0   :  { %v12258_v57 = vld [vmem:[#allocation30 + $0x350] sm:$0xf0] }
 0x7d1   :  { %8668 = vmatpush.bf16.msra.mxu3 %v12381_v47  ;;  %8694 = vmatpush.bf16.msrb.mxu1 %v12765_v52  ;;  %v12498_v47 = vld [vmem:[#allocation30 + $0x530] sm:$0xf0]  ;;  %v8392_v52 = vpop.f32.mrf.mxu1  ;;  %v12261_v1 = vor.u32 %v14189_v38, %v12258_v57 }
 0x7d2   :  { %8636 = vmatmul.bf16.vlgmr.msra.gmra.mxu0 %v15485_v7  ;;  %8662 = vmatmul.bf16.vlgmr.msra.gmra.mxu2 %v15456_v50  ;;  %v14181_v52 = vld [vmem:[#allocation30 + $0x2f4] sm:$0xf0] }
 0x7d3   :  { %8680 = vmatpush.bf16.msrb.mxu0 %v12597_v59  ;;  %8706 = vmatpush.bf16.msrb.mxu2 %v12981_v5  ;;  %v12501_v59 = vor.u32 %v14249_v46, %v12498_v47  ;;  %v12885_v5 = vor.u32 %v14345_v49, %v12882_v51  ;;  %v14465_v46 = vld [vmem:[#allocation30 + $0xbdc] sm:$0xf]  ;;  %v13362_v47 = vld [vmem:[#allocation30 + $0xbf0] sm:$0xf0]  ;;  %v13149_v49 = vor.u32 %v14411_v29, %v13146_v33  ;;  %v12216_v51 = vld [vmem:[#allocation30 + $0x2e0] sm:$0xf] }
 0x7d4   :  { %v13074_v29 = vld [vmem:[#allocation30 + $0x9b0] sm:$0xf0]  ;;  %v14109_v33 = vld [vmem:[#allocation30 + $0xb4] sm:$0xf0] }
 0x7d5   :  { %8669 = vmatpush.bf16.msra.mxu3 %v12357_v22  ;;  %8695 = vmatpush.bf16.msrb.mxu1 %v12741_v18  ;;  %v15514_v22 = vld [vmem:[#allocation31] sm:$0x3f]  ;;  %v15516_v44 = vpop.f32.mrf.mxu2 }
 0x7d6   :  { %v12858_v18 = vld [vmem:[#allocation30 + $0x800] sm:$0xf0]  ;;  %v6397_v24 = vperm.slane %v15514_v22, 0 }
 0x7d7   :  { %8681 = vmatpush.bf16.msrb.mxu0 %v12573_v35  ;;  %8707 = vmatpush.bf16.msrb.mxu2 %v12957_v10  ;;  %v14279_v35 = vld [vmem:[#allocation30 + $0x60c] sm:$0xf]  ;;  %v14417_v10 = vld [vmem:[#allocation30 + $0xa5c] sm:$0xf] }
 0x7d8   :  { %v13173_v28 = vor.u32 %v14417_v10, %v13170_v11  ;;  %v14399_v10 = vld [vmem:[#allocation30 + $0x9cc] sm:$0xf]  ;;  %v13098_v11 = vld [vmem:[#allocation30 + $0x9e0] sm:$0xf0] }
 0x7d9   :  { %8670 = vmatpush.bf16.msra.mxu3 %v12333_v0  ;;  %8696 = vmatpush.bf16.msrb.mxu1 %v12717_v3  ;;  %v12861_v0 = vor.u32 %v14339_v41, %v12858_v18  ;;  %v14133_v3 = vld [vmem:[#allocation30 + $0x174] sm:$0xf0]  ;;  %v15519_v26 = vpop.f32.mrf.mxu1  ;;  %v12217_v41 = vor.u32 %v14181_v52, %v12216_v51  ;;  %v14459_v18 = vld [vmem:[#allocation30 + $0xbac] sm:$0xf] }
 0x7da   :  { %v12025_v31 = vor.u32 %v14133_v3, %v12024_v14  ;;  %v14453_v14 = vld [vmem:[#allocation30 + $0xb7c] sm:$0xf]  ;;  %v13314_v3 = vld [vmem:[#allocation30 + $0xb90] sm:$0xf0] }
 0x7db   :  { %8682 = vmatpush.bf16.msrb.mxu0 %v12549_v23  ;;  %8708 = vmatpush.bf16.msrb.mxu2 %v12933_v27  ;;  %v12834_v23 = vld [vmem:[#allocation30 + $0x7d0] sm:$0xf0]  ;;  %v12621_v27 = vor.u32 %v14279_v35, %v12618_v6  ;;  %v14175_v35 = vld [vmem:[#allocation30 + $0x2c4] sm:$0xf0] }
 0x7dc   :  { %v12837_v8 = vor.u32 %v14333_v21, %v12834_v23  ;;  %v12168_v21 = vld [vmem:[#allocation30 + $0x280] sm:$0xf]  ;;  %v14169_v23 = vld [vmem:[#allocation30 + $0x294] sm:$0xf0] }
 0x7dd   :  { %8671 = vmatpush.bf16.msra.mxu3 %v12309_v30  ;;  %8697 = vmatpush.bf16.msrb.mxu1 %v12693_v34  ;;  %v12453_v30 = vor.u32 %v14237_v12, %v12450_v13  ;;  %v14231_v34 = vld [vmem:[#allocation30 + $0x48c] sm:$0xf]  ;;  %v11952_v12 = vld [vmem:[#allocation30 + $0xd0] sm:$0xf]  ;;  %v12193_v13 = vor.u32 %v14175_v35, %v12192_v62  ;;  %v14097_v62 = vld [vmem:[#allocation30 + $0x54] sm:$0xf0] }
 0x7de   :  { %v12429_v38 = vor.u32 %v14231_v34, %v12426_v20  ;;  %v12169_v20 = vor.u32 %v14169_v23, %v12168_v21  ;;  %v14091_v21 = vld [vmem:[#allocation30 + $0x24] sm:$0xf0] }
 0x7df   :  { %8683 = vmatpush.bf16.msrb.mxu0 %v12525_v15  ;;  %8709 = vmatpush.bf16.msrb.mxu2 %v12909_v45  ;;  %v12000_v15 = vld [vmem:[#allocation30 + $0x130] sm:$0xf]  ;;  %v12810_v45 = vld [vmem:[#allocation30 + $0x7a0] sm:$0xf0] }
 0x7e0   :  { %v12001_v57 = vor.u32 %v14127_v36, %v12000_v15  ;;  %v12813_v4 = vor.u32 %v14327_v32, %v12810_v45  ;;  %v13290_v15 = vld [vmem:[#allocation30 + $0xb60] sm:$0xf0]  ;;  %v12144_v32 = vld [vmem:[#allocation30 + $0x250] sm:$0xf]  ;;  %v14163_v45 = vld [vmem:[#allocation30 + $0x264] sm:$0xf0] }
 0x7e1   :  { %8672 = vmatpush.bf16.msra.mxu3 %v12285_v25  ;;  %8698 = vmatpush.bf16.msrb.mxu1 %v12669_v63  ;;  %v8405_v25 = vpop.f32.mrf.mxu2  ;;  %v8339_v63 = vadd.f32 %v15498_v60, %v6397_v24  ;;  %v13338_v60 = vld [vmem:[#allocation30 + $0xbc0] sm:$0xf0]  ;;  %v8444_v40 = vpop.f32.mrf.mxu1 }
 0x7e2   :  { %v14387_v25 = vld [vmem:[#allocation30 + $0x96c] sm:$0xf] }
 0x7e3   :  { %8684 = vmatpush.bf16.msrb.mxu0 %v12501_v59  ;;  %8710 = vmatpush.bf16.msrb.mxu2 %v12885_v5  ;;  %v14405_v59 = vld [vmem:[#allocation30 + $0x9fc] sm:$0xf]  ;;  %v13365_v5 = vor.u32 %v14465_v46, %v13362_v47 }
 0x7e5   :  { %8673 = vmatpush.bf16.msra.mxu3 %v12261_v1  ;;  %8699 = vmatpush.bf16.msrb.mxu1 %v12645_v2  ;;  %v8352_v1 = vadd.f32 %v15502_v58, %v8339_v63  ;;  %v13125_v2 = vor.u32 %v14405_v59, %v13122_v56  ;;  %v13341_v58 = vor.u32 %v14459_v18, %v13338_v60  ;;  %v11904_v63 = vld [vmem:[#allocation30 + $0x70] sm:$0xf]  ;;  %v14441_v56 = vld [vmem:[#allocation30 + $0xb1c] sm:$0xf]  ;;  %v13026_v60 = vld [vmem:[#allocation30 + $0x950] sm:$0xf0] }
 0x7e6   :  { %v12145_v59 = vor.u32 %v14163_v45, %v12144_v32  ;;  %v14381_v18 = vld [vmem:[#allocation30 + $0x93c] sm:$0xf]  ;;  %v14145_v32 = vld [vmem:[#allocation30 + $0x1d4] sm:$0xf0]  ;;  %v6398_v45 = vperm.slane %v15514_v22, 1 }
 0x7e7   :  { %8685 = vmatpush.bf16.msrb.mxu0 %v12477_v54  ;;  %8711 = vmatpush.bf16.msrb.mxu2 %v12861_v0  ;;  %v8365_v6 = vadd.f32 %v15504_v37, %v8352_v1  ;;  %v11977_v54 = vor.u32 %v14121_v19, %v11976_v61  ;;  %v14115_v0 = vld [vmem:[#allocation30 + $0xe4] sm:$0xf0]  ;;  %v13101_v37 = vor.u32 %v14399_v10, %v13098_v11  ;;  %v12120_v19 = vld [vmem:[#allocation30 + $0x220] sm:$0xf]  ;;  %v13242_v10 = vld [vmem:[#allocation30 + $0xb00] sm:$0xf0] }
 0x7e9   :  { %8674 = vmatpush.bf16.msra.mxu3 %v12237_v9  ;;  %8700 = vmatpush.bf16.msrb.mxu1 %v12621_v27  ;;  %v15527_v9 = vpop.f32.mrf.mxu2  ;;  %v8378_v24 = vadd.f32 %v15506_v39, %v8365_v6  ;;  %v11953_v27 = vor.u32 %v14115_v0, %v11952_v12  ;;  %v15532_v36 = vpop.f32.mrf.mxu1  ;;  %v12096_v12 = vld [vmem:[#allocation30 + $0x1f0] sm:$0xf]  ;;  %v14151_v0 = vld [vmem:[#allocation30 + $0x204] sm:$0xf0] }
 0x7eb   :  { %8686 = vmatpush.bf16.msrb.mxu0 %v12453_v30  ;;  %8712 = vmatpush.bf16.msrb.mxu2 %v12837_v8  ;;  %v13317_v30 = vor.u32 %v14453_v14, %v13314_v3  ;;  %v8391_v34 = vadd.f32 %v15512_v16, %v8378_v24  ;;  %v14447_v8 = vld [vmem:[#allocation30 + $0xb4c] sm:$0xf]  ;;  %v13002_v3 = vld [vmem:[#allocation30 + $0x920] sm:$0xf0] }
 0x7ec   :  { %8675 = vmatmul.bf16.vlgmr.msra.gmra.mxu3 %v15461_v42  ;;  %8701 = vmatmul.bf16.vlgmr.msrb.gmra.mxu1 %v15471_v48  ;;  %v13293_v16 = vor.u32 %v14447_v8, %v13290_v15 }
 0x7ed   :  { %8719 = vmatpush.bf16.msrb.mxu3 %v13173_v28  ;;  %8745 = vmatpush.bf16.msra.mxu1 %v12025_v31  ;;  %v14393_v28 = vld [vmem:[#allocation30 + $0x99c] sm:$0xf]  ;;  %v11928_v31 = vld [vmem:[#allocation30 + $0xa0] sm:$0xf]  ;;  %v8404_v46 = vadd.f32 %v15516_v44, %v8391_v34  ;;  %v14157_v44 = vld [vmem:[#allocation30 + $0x234] sm:$0xf0] }
 0x7ee   :  { %v13077_v39 = vor.u32 %v14393_v28, %v13074_v29  ;;  %v11929_v47 = vor.u32 %v14109_v33, %v11928_v31  ;;  %v12121_v6 = vor.u32 %v14157_v44, %v12120_v19  ;;  %v12408_v28 = vld [vmem:[#allocation30 + $0x460] sm:$0xf]  ;;  %v14229_v29 = vld [vmem:[#allocation30 + $0x474] sm:$0xf0]  ;;  %v12097_v31 = vor.u32 %v14151_v0, %v12096_v12  ;;  %v13218_v33 = vld [vmem:[#allocation30 + $0xad0] sm:$0xf0] }
 0x7ef   :  { %8687 = vmatpush.bf16.msrb.mxu0 %v12429_v38  ;;  %8713 = vmatpush.bf16.msrb.mxu2 %v12813_v4  ;;  %v8416_v51 = vpop.f32.mrf.mxu3  ;;  %v8429_v52 = vpop.f32.mrf.mxu0  ;;  %v14103_v38 = vld [vmem:[#allocation30 + $0x84] sm:$0xf0]  ;;  %v13266_v4 = vld [vmem:[#allocation30 + $0xb30] sm:$0xf0]  ;;  %v12792_v34 = vld [vmem:[#allocation30 + $0x760] sm:$0xf]  ;;  %v8443_v19 = vadd.f32 %v15519_v26, %v6398_v45 }
 0x7f0   :  { %v13269_v40 = vor.u32 %v14441_v56, %v13266_v4  ;;  %v12048_v56 = vld [vmem:[#allocation30 + $0x190] sm:$0xf]  ;;  %v14139_v4 = vld [vmem:[#allocation30 + $0x1a4] sm:$0xf0] }
 0x7f1   :  { %8720 = vmatpush.bf16.msrb.mxu3 %v13149_v49  ;;  %8746 = vmatpush.bf16.msra.mxu1 %v12001_v57  ;;  %v13050_v49 = vld [vmem:[#allocation30 + $0x980] sm:$0xf0]  ;;  %v8417_v57 = vadd.f32 %v8416_v51, %v8404_v46  ;;  %v8496_v11 = vpop.f32.mrf.mxu1  ;;  %v12576_v0 = vld [vmem:[#allocation30 + $0x5b0] sm:$0xf] }
 0x7f2   :  { %8688 = vmatmul.bf16.vlgmr.msrb.gmra.mxu0 %v15466_v17  ;;  %8714 = vmatmul.bf16.vlgmr.msrb.gmra.mxu2 %v15475_v55  ;;  %v13053_v61 = vor.u32 %v14387_v25, %v13050_v49  ;;  %v12384_v25 = vld [vmem:[#allocation30 + $0x430] sm:$0xf]  ;;  %v14313_v11 = vld [vmem:[#allocation30 + $0x714] sm:$0xf0] }
 0x7f3   :  { %8732 = vmatpush.bf16.msra.mxu0 %v13365_v5  ;;  %8758 = vmatpush.bf16.msra.mxu2 %v12217_v41  ;;  %v8457_v5 = vpop.f32.mrf.mxu2  ;;  %v8430_v1 = vadd.f32 %v8429_v52, %v8417_v57  ;;  %v11905_v41 = vor.u32 %v14103_v38, %v11904_v63  ;;  %v14223_v52 = vld [vmem:[#allocation30 + $0x444] sm:$0xf0]  ;;  %v13194_v63 = vld [vmem:[#allocation30 + $0xaa0] sm:$0xf0]  ;;  %v12768_v57 = vld [vmem:[#allocation30 + $0x730] sm:$0xf] }
 0x7f4   :  { %v12600_v5 = vld [vmem:[#allocation30 + $0x5e0] sm:$0xf]  ;;  %v12385_v44 = vor.u32 %v14223_v52, %v12384_v25  ;;  %v14205_v25 = vld [vmem:[#allocation30 + $0x3b4] sm:$0xf0] }
 0x7f5   :  { %8721 = vmatpush.bf16.msrb.mxu3 %v13125_v2  ;;  %8747 = vmatpush.bf16.msra.mxu1 %v11977_v54  ;;  %v11880_v2 = vld [vmem:[#allocation30 + $0x40] sm:$0xf]  ;;  %v8953_v35 = vmax.f32 %v8430_v1, 0.0  ;;  %v14435_v54 = vld [vmem:[#allocation30 + $0xaec] sm:$0xf] }
 0x7f6   :  { %v11881_v14 = vor.u32 %v14097_v62, %v11880_v2  ;;  %v12984_v1 = vld [vmem:[#allocation30 + $0x8e0] sm:$0xf]  ;;  %v14301_v52 = vld [vmem:[#allocation30 + $0x6b4] sm:$0xf0] }
 0x7f7   :  { %8733 = vmatpush.bf16.msra.mxu0 %v13341_v58  ;;  %8759 = vmatpush.bf16.msra.mxu2 %v12193_v13  ;;  %v13029_v58 = vor.u32 %v14381_v18, %v13026_v60  ;;  %v14375_v13 = vld [vmem:[#allocation30 + $0x90c] sm:$0xf]  ;;  %8959 = vst [vmem:[%s15656_s3] sm:$0xff] %v8953_v35  ;;  %v8418_v23 = vpop.f32.mrf.mxu3  ;;  %v8431_v24 = vpop.f32.mrf.mxu0  ;;  %v12360_v62 = vld [vmem:[#allocation30 + $0x400] sm:$0xf]  ;;  %v14217_v35 = vld [vmem:[#allocation30 + $0x414] sm:$0xf0] }
 0x7f8   :  { %v13005_v15 = vor.u32 %v14375_v13, %v13002_v3  ;;  %v14271_v13 = vld [vmem:[#allocation30 + $0x5c4] sm:$0xf0]  ;;  %v12361_v3 = vor.u32 %v14217_v35, %v12360_v62  ;;  %v12336_v23 = vld [vmem:[#allocation30 + $0x3d0] sm:$0xf]  ;;  %v12888_v35 = vld [vmem:[#allocation30 + $0x820] sm:$0xf] }
 0x7f9   :  { %8722 = vmatpush.bf16.msrb.mxu3 %v13101_v37  ;;  %8748 = vmatpush.bf16.msra.mxu1 %v11953_v27  ;;  %v11856_v37 = vld [vmem:[#allocation30 + $0x10] sm:$0xf]  ;;  %v13245_v27 = vor.u32 %v14435_v54, %v13242_v10  ;;  %v12049_v54 = vor.u32 %v14139_v4, %v12048_v56  ;;  %v12744_v10 = vld [vmem:[#allocation30 + $0x700] sm:$0xf]  ;;  %v14211_v24 = vld [vmem:[#allocation30 + $0x3e4] sm:$0xf0] }
 0x7fa   :  { %v11857_v46 = vor.u32 %v14091_v21, %v11856_v37  ;;  %v12960_v37 = vld [vmem:[#allocation30 + $0x8b0] sm:$0xf]  ;;  %v14367_v21 = vld [vmem:[#allocation30 + $0x8c4] sm:$0xf0] }
 0x7fb   :  { %8734 = vmatpush.bf16.msra.mxu0 %v13317_v30  ;;  %8760 = vmatpush.bf16.msra.mxu2 %v12169_v20  ;;  %v14429_v30 = vld [vmem:[#allocation30 + $0xabc] sm:$0xf]  ;;  %v14325_v20 = vld [vmem:[#allocation30 + $0x774] sm:$0xf0]  ;;  %v15538_v8 = vpop.f32.mrf.mxu2  ;;  %v12912_v4 = vld [vmem:[#allocation30 + $0x850] sm:$0xf] }
 0x7fc   :  { %v13221_v49 = vor.u32 %v14429_v30, %v13218_v33  ;;  %v12793_v51 = vor.u32 %v14325_v20, %v12792_v34  ;;  %v12961_v30 = vor.u32 %v14367_v21, %v12960_v37  ;;  %v14265_v33 = vld [vmem:[#allocation30 + $0x594] sm:$0xf0]  ;;  %v12337_v20 = vor.u32 %v14211_v24, %v12336_v23  ;;  %v12480_v37 = vld [vmem:[#allocation30 + $0x4f0] sm:$0xf]  ;;  %v14247_v21 = vld [vmem:[#allocation30 + $0x504] sm:$0xf0] }
 0x7fd   :  { %8723 = vmatpush.bf16.msrb.mxu3 %v13077_v39  ;;  %8749 = vmatpush.bf16.msra.mxu1 %v11929_v47  ;;  %v12072_v39 = vld [vmem:[#allocation30 + $0x1c0] sm:$0xf]  ;;  %v12409_v47 = vor.u32 %v14229_v29, %v12408_v28  ;;  %v12720_v28 = vld [vmem:[#allocation30 + $0x6d0] sm:$0xf]  ;;  %v14307_v29 = vld [vmem:[#allocation30 + $0x6e4] sm:$0xf0] }
 0x7fe   :  { %v12073_v38 = vor.u32 %v14145_v32, %v12072_v39  ;;  %v14361_v39 = vld [vmem:[#allocation30 + $0x894] sm:$0xf0] }
 0x7ff   :  { %8735 = vmatpush.bf16.msra.mxu0 %v13293_v16  ;;  %8761 = vmatpush.bf16.msra.mxu2 %v12145_v59  ;;  %v14423_v16 = vld [vmem:[#allocation30 + $0xa8c] sm:$0xf]  ;;  %v14319_v59 = vld [vmem:[#allocation30 + $0x744] sm:$0xf0]  ;;  %v8468_v18 = vpop.f32.mrf.mxu3  ;;  %v8481_v60 = vpop.f32.mrf.mxu0 }
 0x800   :  { %v12769_v2 = vor.u32 %v14319_v59, %v12768_v57 }
 0x801   :  { %8724 = vmatpush.bf16.msrb.mxu3 %v13053_v61  ;;  %8750 = vmatpush.bf16.msra.mxu1 %v11905_v41  ;;  %v14277_v61 = vld [vmem:[#allocation30 + $0x5f4] sm:$0xf0] }
 0x802   :  { %v14373_v41 = vld [vmem:[#allocation30 + $0x8f4] sm:$0xf0]  ;;  %v12601_v26 = vor.u32 %v14277_v61, %v12600_v5  ;;  %v14355_v5 = vld [vmem:[#allocation30 + $0x864] sm:$0xf0] }
 0x803   :  { %8736 = vmatpush.bf16.msra.mxu0 %v13269_v40  ;;  %8762 = vmatpush.bf16.msra.mxu2 %v12121_v6  ;;  %v13197_v40 = vor.u32 %v14423_v16, %v13194_v63  ;;  %v8456_v6 = vadd.f32 %v15527_v9, %v8443_v19  ;;  %v12985_v12 = vor.u32 %v14373_v41, %v12984_v1  ;;  %v12528_v63 = vld [vmem:[#allocation30 + $0x550] sm:$0xf] }
 0x804   :  { %v12745_v9 = vor.u32 %v14313_v11, %v12744_v10  ;;  %v12288_v19 = vld [vmem:[#allocation30 + $0x370] sm:$0xf]  ;;  %v12264_v11 = vld [vmem:[#allocation30 + $0x340] sm:$0xf] }
 0x805   :  { %8725 = vmatpush.bf16.msrb.mxu3 %v13029_v58  ;;  %8751 = vmatpush.bf16.msra.mxu1 %v11881_v14  ;;  %v8509_v58 = vpop.f32.mrf.mxu2  ;;  %v8469_v14 = vadd.f32 %v8468_v18, %v8456_v6  ;;  %v12672_v41 = vld [vmem:[#allocation30 + $0x670] sm:$0xf]  ;;  %v14295_v18 = vld [vmem:[#allocation30 + $0x684] sm:$0xf0]  ;;  %v14349_v6 = vld [vmem:[#allocation30 + $0x834] sm:$0xf0] }
 0x806   :  { %v12673_v10 = vor.u32 %v14295_v18, %v12672_v41  ;;  %v14193_v58 = vld [vmem:[#allocation30 + $0x354] sm:$0xf0]  ;;  %v14124_v18 = vld [vmem:[#allocation30 + $0x134] sm:$0xf] }
 0x807   :  { %8737 = vmatpush.bf16.msra.mxu0 %v13245_v27  ;;  %8763 = vmatpush.bf16.msra.mxu2 %v12097_v31  ;;  %v12577_v27 = vor.u32 %v14271_v13, %v12576_v0  ;;  %v12552_v31 = vld [vmem:[#allocation30 + $0x580] sm:$0xf]  ;;  %v8482_v34 = vadd.f32 %v8481_v60, %v8469_v14  ;;  %v8470_v32 = vpop.f32.mrf.mxu3  ;;  %v8483_v45 = vpop.f32.mrf.mxu0  ;;  %v12913_v60 = vor.u32 %v14355_v5, %v12912_v4  ;;  %v14289_v14 = vld [vmem:[#allocation30 + $0x654] sm:$0xf0]  ;;  %v13152_v4 = vld [vmem:[#allocation30 + $0xa30] sm:$0xf] }
 0x808   :  { %v12648_v13 = vld [vmem:[#allocation30 + $0x640] sm:$0xf]  ;;  %v12265_v24 = vor.u32 %v14193_v58, %v12264_v11  ;;  %v14409_v58 = vld [vmem:[#allocation30 + $0xa14] sm:$0xf0] }
 0x809   :  { %8726 = vmatpush.bf16.msrb.mxu3 %v13005_v15  ;;  %8752 = vmatpush.bf16.msra.mxu1 %v11857_v46  ;;  %v12936_v15 = vld [vmem:[#allocation30 + $0x880] sm:$0xf]  ;;  %v12721_v46 = vor.u32 %v14307_v29, %v12720_v28  ;;  %v8495_v57 = vadd.f32 %v15532_v36, %v8482_v34  ;;  %v15548_v59 = vpop.f32.mrf.mxu1  ;;  %v12240_v28 = vld [vmem:[#allocation30 + $0x310] sm:$0xf]  ;;  %v14187_v29 = vld [vmem:[#allocation30 + $0x324] sm:$0xf0] }
 0x80a   :  { %v12937_v16 = vor.u32 %v14361_v39, %v12936_v15  ;;  %v13176_v34 = vld [vmem:[#allocation30 + $0xa60] sm:$0xf]  ;;  %v12481_v15 = vor.u32 %v14247_v21, %v12480_v37  ;;  %v14421_v39 = vld [vmem:[#allocation30 + $0xa74] sm:$0xf0]  ;;  %v13344_v21 = vld [vmem:[#allocation30 + $0xbb0] sm:$0xf] }
 0x80b   :  { %8738 = vmatpush.bf16.msra.mxu0 %v13221_v49  ;;  %8764 = vmatpush.bf16.msra.mxu2 %v12073_v38  ;;  %v12553_v49 = vor.u32 %v14265_v33, %v12552_v31  ;;  %v14259_v38 = vld [vmem:[#allocation30 + $0x564] sm:$0xf0]  ;;  %v8508_v36 = vadd.f32 %v15538_v8, %v8495_v57  ;;  %v12624_v31 = vld [vmem:[#allocation30 + $0x610] sm:$0xf]  ;;  %v12456_v32 = vld [vmem:[#allocation30 + $0x4c0] sm:$0xf] }
 0x80c   :  { %8727 = vmatmul.bf16.vlgmr.msrb.gmra.mxu3 %v15482_v43  ;;  %8753 = vmatmul.bf16.vlgmr.msra.gmra.mxu1 %v15453_v53  ;;  %v12529_v1 = vor.u32 %v14259_v38, %v12528_v63  ;;  %v14283_v33 = vld [vmem:[#allocation30 + $0x624] sm:$0xf0]  ;;  %v13128_v11 = vld [vmem:[#allocation30 + $0xa00] sm:$0xf] }
 0x80d   :  { %8771 = vmatpush.bf16.msra.mxu3 %v12409_v47  ;;  %8797 = vmatpush.bf16.msrb.mxu1 %v12793_v51  ;;  %v12312_v47 = vld [vmem:[#allocation30 + $0x3a0] sm:$0xf]  ;;  %v12625_v57 = vor.u32 %v14283_v33, %v12624_v31  ;;  %v14112_v31 = vld [vmem:[#allocation30 + $0xd4] sm:$0xf]  ;;  %v11954_v33 = vld [vmem:[#allocation30 + $0xe8] sm:$0xf0] }
 0x80e   :  { %v12696_v51 = vld [vmem:[#allocation30 + $0x6a0] sm:$0xf]  ;;  %v12313_v56 = vor.u32 %v14205_v25, %v12312_v47  ;;  %v14130_v47 = vld [vmem:[#allocation30 + $0x164] sm:$0xf]  ;;  %v12026_v25 = vld [vmem:[#allocation30 + $0x178] sm:$0xf0] }
 0x80f   :  { %8739 = vmatpush.bf16.msra.mxu0 %v13197_v40  ;;  %8765 = vmatpush.bf16.msra.mxu2 %v12049_v54  ;;  %v12697_v61 = vor.u32 %v14301_v52, %v12696_v51  ;;  %v12504_v40 = vld [vmem:[#allocation30 + $0x520] sm:$0xf]  ;;  %v8520_v54 = vpop.f32.mrf.mxu3  ;;  %v12241_v51 = vor.u32 %v14187_v29, %v12240_v28  ;;  %v13104_v28 = vld [vmem:[#allocation30 + $0x9d0] sm:$0xf]  ;;  %v14403_v29 = vld [vmem:[#allocation30 + $0x9e4] sm:$0xf0] }
 0x810   :  { %v12840_v52 = vld [vmem:[#allocation30 + $0x7c0] sm:$0xf] }
 0x811   :  { %8772 = vmatpush.bf16.msra.mxu3 %v12385_v44  ;;  %8798 = vmatpush.bf16.msrb.mxu1 %v12769_v2  ;;  %v14199_v44 = vld [vmem:[#allocation30 + $0x384] sm:$0xf0]  ;;  %v14253_v2 = vld [vmem:[#allocation30 + $0x534] sm:$0xf0]  ;;  %v8548_v23 = vpop.f32.mrf.mxu1 }
 0x812   :  { %8740 = vmatmul.bf16.vlgmr.msra.gmra.mxu0 %v15485_v7  ;;  %8766 = vmatmul.bf16.vlgmr.msra.gmra.mxu2 %v15456_v50  ;;  %v12289_v62 = vor.u32 %v14199_v44, %v12288_v19  ;;  %v12505_v0 = vor.u32 %v14253_v2, %v12504_v40  ;;  %v14415_v19 = vld [vmem:[#allocation30 + $0xa44] sm:$0xf0]  ;;  %v12432_v44 = vld [vmem:[#allocation30 + $0x490] sm:$0xf]  ;;  %v14172_v23 = vld [vmem:[#allocation30 + $0x2b4] sm:$0xf] }
 0x813   :  { %8784 = vmatpush.bf16.msrb.mxu0 %v12601_v26  ;;  %8810 = vmatpush.bf16.msrb.mxu2 %v12985_v12  ;;  %v8533_v26 = vpop.f32.mrf.mxu0  ;;  %v8521_v12 = vadd.f32 %v8520_v54, %v8508_v36  ;;  %v12816_v40 = vld [vmem:[#allocation30 + $0x790] sm:$0xf]  ;;  %v14331_v2 = vld [vmem:[#allocation30 + $0x7a4] sm:$0xf0]  ;;  %v13368_v36 = vld [vmem:[#allocation30 + $0xbe0] sm:$0xf] }
 0x814   :  { %v12218_v54 = vld [vmem:[#allocation30 + $0x2f8] sm:$0xf0] }
 0x815   :  { %8773 = vmatpush.bf16.msra.mxu3 %v12361_v3  ;;  %8799 = vmatpush.bf16.msrb.mxu1 %v12745_v9  ;;  %v12889_v3 = vor.u32 %v14349_v6, %v12888_v35  ;;  %v12864_v9 = vld [vmem:[#allocation30 + $0x7f0] sm:$0xf]  ;;  %v8534_v8 = vadd.f32 %v8533_v26, %v8521_v12  ;;  %v13153_v35 = vor.u32 %v14415_v19, %v13152_v4  ;;  %v14178_v6 = vld [vmem:[#allocation30 + $0x2e4] sm:$0xf] }
 0x816   :  { %v12817_v12 = vor.u32 %v14331_v2, %v12816_v40  ;;  %v12221_v37 = vor.u32 %v14178_v6, %v12218_v54  ;;  %v13272_v2 = vld [vmem:[#allocation30 + $0xb20] sm:$0xf]  ;;  %v12122_v6 = vld [vmem:[#allocation30 + $0x238] sm:$0xf0] }
 0x817   :  { %8785 = vmatpush.bf16.msrb.mxu0 %v12577_v27  ;;  %8811 = vmatpush.bf16.msrb.mxu2 %v12961_v30  ;;  %v14343_v27 = vld [vmem:[#allocation30 + $0x804] sm:$0xf0]  ;;  %v12649_v30 = vor.u32 %v14289_v14, %v12648_v13  ;;  %v8522_v63 = vpop.f32.mrf.mxu3  ;;  %v14118_v13 = vld [vmem:[#allocation30 + $0x104] sm:$0xf]  ;;  %v11978_v14 = vld [vmem:[#allocation30 + $0x118] sm:$0xf0] }
 0x818   :  { %v12865_v45 = vor.u32 %v14343_v27, %v12864_v9  ;;  %v14463_v9 = vld [vmem:[#allocation30 + $0xbc4] sm:$0xf0]  ;;  %v11981_v27 = vor.u32 %v14118_v13, %v11978_v14  ;;  %v11882_v13 = vld [vmem:[#allocation30 + $0x58] sm:$0xf0] }
 0x819   :  { %8774 = vmatpush.bf16.msra.mxu3 %v12337_v20  ;;  %8800 = vmatpush.bf16.msrb.mxu1 %v12721_v46  ;;  %v8954_v20 = vmax.f32 %v8534_v8, 0.0  ;;  %v14241_v46 = vld [vmem:[#allocation30 + $0x4d4] sm:$0xf0]  ;;  %v13129_v8 = vor.u32 %v14409_v58, %v13128_v11  ;;  %v13032_v11 = vld [vmem:[#allocation30 + $0x940] sm:$0xf] }
 0x81a   :  { %v12457_v5 = vor.u32 %v14241_v46, %v12456_v32  ;;  %v14166_v32 = vld [vmem:[#allocation30 + $0x284] sm:$0xf]  ;;  %v11957_v46 = vor.u32 %v14112_v31, %v11954_v33  ;;  %v14385_v58 = vld [vmem:[#allocation30 + $0x954] sm:$0xf0] }
 0x81b   :  { %8786 = vmatpush.bf16.msrb.mxu0 %v12553_v49  ;;  %8812 = vmatpush.bf16.msrb.mxu2 %v12937_v16  ;;  %8960 = vst [vmem:[%s15656_s3 + $0x8] sm:$0xff] %v8954_v20  ;;  %v15554_v49 = vpop.f32.mrf.mxu2  ;;  %v14337_v16 = vld [vmem:[#allocation30 + $0x7d4] sm:$0xf0]  ;;  %v8535_v38 = vpop.f32.mrf.mxu0  ;;  %v13320_v20 = vld [vmem:[#allocation30 + $0xb80] sm:$0xf] }
 0x81c   :  { %v12841_v41 = vor.u32 %v14337_v16, %v12840_v52  ;;  %v14106_v52 = vld [vmem:[#allocation30 + $0xa4] sm:$0xf]  ;;  %v11930_v16 = vld [vmem:[#allocation30 + $0xb8] sm:$0xf0]  ;;  %v13296_v38 = vld [vmem:[#allocation30 + $0xb50] sm:$0xf] }
 0x81d   :  { %8775 = vmatpush.bf16.msra.mxu3 %v12313_v56  ;;  %8801 = vmatpush.bf16.msrb.mxu1 %v12697_v61  ;;  %v13177_v56 = vor.u32 %v14421_v39, %v13176_v34  ;;  %v12029_v61 = vor.u32 %v14130_v47, %v12026_v25  ;;  %v13105_v39 = vor.u32 %v14403_v29, %v13104_v28  ;;  %v13080_v47 = vld [vmem:[#allocation30 + $0x9a0] sm:$0xf]  ;;  %v14397_v25 = vld [vmem:[#allocation30 + $0x9b4] sm:$0xf0]  ;;  %v14379_v28 = vld [vmem:[#allocation30 + $0x924] sm:$0xf0] }
 0x81e   :  { %v13081_v4 = vor.u32 %v14397_v25, %v13080_v47  ;;  %v11933_v19 = vor.u32 %v14106_v52, %v11930_v16  ;;  %v14088_v29 = vld [vmem:[#allocation30 + $0x14] sm:$0xf]  ;;  %v14226_v33 = vld [vmem:[#allocation30 + $0x464] sm:$0xf]  ;;  %v6399_v52 = vperm.slane %v15514_v22, 2 }
 0x81f   :  { %8787 = vmatpush.bf16.msrb.mxu0 %v12529_v1  ;;  %8813 = vmatpush.bf16.msrb.mxu2 %v12913_v60  ;;  %v14235_v1 = vld [vmem:[#allocation30 + $0x4a4] sm:$0xf0]  ;;  %v12002_v60 = vld [vmem:[#allocation30 + $0x148] sm:$0xf0]  ;;  %v14142_v25 = vld [vmem:[#allocation30 + $0x1c4] sm:$0xf] }
 0x820   :  { %v12433_v26 = vor.u32 %v14235_v1, %v12432_v44  ;;  %v13056_v44 = vld [vmem:[#allocation30 + $0x970] sm:$0xf]  ;;  %v14391_v1 = vld [vmem:[#allocation30 + $0x984] sm:$0xf0]  ;;  %v14274_v22 = vld [vmem:[#allocation30 + $0x5e4] sm:$0xf] }
 0x821   :  { %8776 = vmatpush.bf16.msra.mxu3 %v12289_v62  ;;  %8802 = vmatpush.bf16.msrb.mxu1 %v12673_v10  ;;  %v14469_v62 = vld [vmem:[#allocation30 + $0xbf4] sm:$0xf0]  ;;  %v12005_v10 = vor.u32 %v14124_v18, %v12002_v60  ;;  %v14100_v18 = vld [vmem:[#allocation30 + $0x74] sm:$0xf]  ;;  %v11906_v60 = vld [vmem:[#allocation30 + $0x88] sm:$0xf0] }
 0x823   :  { %8788 = vmatpush.bf16.msrb.mxu0 %v12505_v0  ;;  %8814 = vmatpush.bf16.msrb.mxu2 %v12889_v3  ;;  %v13369_v0 = vor.u32 %v14469_v62, %v13368_v36  ;;  %v8561_v3 = vpop.f32.mrf.mxu2  ;;  %v14445_v36 = vld [vmem:[#allocation30 + $0xb34] sm:$0xf0]  ;;  %v13057_v62 = vor.u32 %v14391_v1, %v13056_v44  ;;  %v13200_v44 = vld [vmem:[#allocation30 + $0xa90] sm:$0xf]  ;;  %v14427_v1 = vld [vmem:[#allocation30 + $0xaa4] sm:$0xf0] }
 0x824   :  { %v13248_v3 = vld [vmem:[#allocation30 + $0xaf0] sm:$0xf] }
 0x825   :  { %8777 = vmatpush.bf16.msra.mxu3 %v12265_v24  ;;  %8803 = vmatpush.bf16.msrb.mxu1 %v12649_v30  ;;  %v12194_v24 = vld [vmem:[#allocation30 + $0x2c8] sm:$0xf0]  ;;  %v13345_v30 = vor.u32 %v14463_v9, %v13344_v21  ;;  %v13033_v9 = vor.u32 %v14385_v58, %v13032_v11  ;;  %v13201_v11 = vor.u32 %v14427_v1, %v13200_v44  ;;  %v14352_v44 = vld [vmem:[#allocation30 + $0x854] sm:$0xf] }
 0x826   :  { %v12197_v34 = vor.u32 %v14172_v23, %v12194_v24  ;;  %v12098_v23 = vld [vmem:[#allocation30 + $0x208] sm:$0xf0]  ;;  %v13008_v24 = vld [vmem:[#allocation30 + $0x910] sm:$0xf] }
 0x827   :  { %8789 = vmatpush.bf16.msrb.mxu0 %v12481_v15  ;;  %8815 = vmatpush.bf16.msrb.mxu2 %v12865_v45  ;;  %v14457_v15 = vld [vmem:[#allocation30 + $0xb94] sm:$0xf0]  ;;  %v12170_v45 = vld [vmem:[#allocation30 + $0x298] sm:$0xf0]  ;;  %v13009_v47 = vor.u32 %v14379_v28, %v13008_v24  ;;  %v14364_v28 = vld [vmem:[#allocation30 + $0x8b4] sm:$0xf] }
 0x828   :  { %v12173_v63 = vor.u32 %v14166_v32, %v12170_v45  ;;  %v14322_v32 = vld [vmem:[#allocation30 + $0x764] sm:$0xf]  ;;  %v12794_v45 = vld [vmem:[#allocation30 + $0x778] sm:$0xf0] }
 0x829   :  { %8778 = vmatpush.bf16.msra.mxu3 %v12241_v51  ;;  %8804 = vmatpush.bf16.msrb.mxu1 %v12625_v57  ;;  %v13321_v51 = vor.u32 %v14457_v15, %v13320_v20  ;;  %v14451_v57 = vld [vmem:[#allocation30 + $0xb64] sm:$0xf0]  ;;  %v13224_v20 = vld [vmem:[#allocation30 + $0xac0] sm:$0xf] }
 0x82b   :  { %8790 = vmatpush.bf16.msrb.mxu0 %v12457_v5  ;;  %8816 = vmatpush.bf16.msrb.mxu2 %v12841_v41  ;;  %v14160_v5 = vld [vmem:[#allocation30 + $0x254] sm:$0xf]  ;;  %v13297_v41 = vor.u32 %v14451_v57, %v13296_v38 }
 0x82c   :  { %8779 = vmatmul.bf16.vlgmr.msra.gmra.mxu3 %v15461_v42  ;;  %8805 = vmatmul.bf16.vlgmr.msrb.gmra.mxu1 %v15471_v48 }
 0x82d   :  { %8823 = vmatpush.bf16.msrb.mxu3 %v13177_v56  ;;  %8849 = vmatpush.bf16.msra.mxu1 %v12029_v61  ;;  %v15560_v56 = vpop.f32.mrf.mxu1  ;;  %v12146_v61 = vld [vmem:[#allocation30 + $0x268] sm:$0xf0] }
 0x82e   :  { %v12149_v40 = vor.u32 %v14160_v5, %v12146_v61  ;;  %v12797_v61 = vor.u32 %v14322_v32, %v12794_v45  ;;  %v14358_v45 = vld [vmem:[#allocation30 + $0x884] sm:$0xf] }
 0x82f   :  { %8791 = vmatpush.bf16.msrb.mxu0 %v12433_v26  ;;  %8817 = vmatpush.bf16.msrb.mxu2 %v12817_v12  ;;  %v15562_v54 = vpop.f32.mrf.mxu3  ;;  %v15564_v26 = vpop.f32.mrf.mxu0  ;;  %v13273_v12 = vor.u32 %v14445_v36, %v13272_v2  ;;  %v12050_v2 = vld [vmem:[#allocation30 + $0x1a8] sm:$0xf0]  ;;  %v12602_v36 = vld [vmem:[#allocation30 + $0x5f8] sm:$0xf0] }
 0x831   :  { %8824 = vmatpush.bf16.msrb.mxu3 %v13153_v35  ;;  %8850 = vmatpush.bf16.msra.mxu1 %v12005_v10  ;;  %v14154_v35 = vld [vmem:[#allocation30 + $0x224] sm:$0xf]  ;;  %v11909_v10 = vor.u32 %v14100_v18, %v11906_v60  ;;  %v14316_v18 = vld [vmem:[#allocation30 + $0x734] sm:$0xf]  ;;  %v12770_v60 = vld [vmem:[#allocation30 + $0x748] sm:$0xf0] }
 0x832   :  { %8792 = vmatmul.bf16.vlgmr.msrb.gmra.mxu0 %v15466_v17  ;;  %8818 = vmatmul.bf16.vlgmr.msrb.gmra.mxu2 %v15475_v55  ;;  %v12125_v14 = vor.u32 %v14154_v35, %v12122_v6  ;;  %v14370_v6 = vld [vmem:[#allocation30 + $0x8e4] sm:$0xf]  ;;  %v12773_v58 = vor.u32 %v14316_v18, %v12770_v60  ;;  %v12290_v18 = vld [vmem:[#allocation30 + $0x388] sm:$0xf0] }
 0x833   :  { %8836 = vmatpush.bf16.msra.mxu0 %v13369_v0  ;;  %8862 = vmatpush.bf16.msra.mxu2 %v12221_v37  ;;  %v14094_v0 = vld [vmem:[#allocation30 + $0x44] sm:$0xf]  ;;  %v14439_v37 = vld [vmem:[#allocation30 + $0xb04] sm:$0xf0] }
 0x834   :  { %v13249_v31 = vor.u32 %v14439_v37, %v13248_v3  ;;  %v12605_v3 = vor.u32 %v14274_v22, %v12602_v36  ;;  %v14310_v37 = vld [vmem:[#allocation30 + $0x704] sm:$0xf] }
 0x835   :  { %8825 = vmatpush.bf16.msrb.mxu3 %v13129_v8  ;;  %8851 = vmatpush.bf16.msra.mxu1 %v11981_v27  ;;  %v8600_v21 = vpop.f32.mrf.mxu1  ;;  %v14148_v8 = vld [vmem:[#allocation30 + $0x1f4] sm:$0xf]  ;;  %v11885_v27 = vor.u32 %v14094_v0, %v11882_v13  ;;  %v12362_v0 = vld [vmem:[#allocation30 + $0x418] sm:$0xf0]  ;;  %v14250_v36 = vld [vmem:[#allocation30 + $0x524] sm:$0xf] }
 0x836   :  { %v12101_v15 = vor.u32 %v14148_v8, %v12098_v23  ;;  %v14268_v8 = vld [vmem:[#allocation30 + $0x5b4] sm:$0xf]  ;;  %v12578_v23 = vld [vmem:[#allocation30 + $0x5c8] sm:$0xf0] }
 0x837   :  { %8837 = vmatpush.bf16.msra.mxu0 %v13345_v30  ;;  %8863 = vmatpush.bf16.msra.mxu2 %v12197_v34  ;;  %v11858_v30 = vld [vmem:[#allocation30 + $0x28] sm:$0xf0]  ;;  %v12410_v34 = vld [vmem:[#allocation30 + $0x478] sm:$0xf0]  ;;  %v8574_v16 = vpop.f32.mrf.mxu3 }
 0x838   :  { %v11861_v38 = vor.u32 %v14088_v29, %v11858_v30  ;;  %v12413_v57 = vor.u32 %v14226_v33, %v12410_v34  ;;  %v12962_v29 = vld [vmem:[#allocation30 + $0x8c8] sm:$0xf0]  ;;  %v14208_v30 = vld [vmem:[#allocation30 + $0x3d4] sm:$0xf]  ;;  %v12581_v33 = vor.u32 %v14268_v8, %v12578_v23 }
 0x839   :  { %8826 = vmatpush.bf16.msrb.mxu3 %v13105_v39  ;;  %8852 = vmatpush.bf16.msra.mxu1 %v11957_v46  ;;  %v14433_v39 = vld [vmem:[#allocation30 + $0xad4] sm:$0xf0]  ;;  %v15566_v46 = vpop.f32.mrf.mxu2  ;;  %v14304_v34 = vld [vmem:[#allocation30 + $0x6d4] sm:$0xf]  ;;  %v12482_v8 = vld [vmem:[#allocation30 + $0x508] sm:$0xf0] }
 0x83a   :  { %v13225_v5 = vor.u32 %v14433_v39, %v13224_v20  ;;  %v12722_v20 = vld [vmem:[#allocation30 + $0x6e8] sm:$0xf0]  ;;  %v12554_v39 = vld [vmem:[#allocation30 + $0x598] sm:$0xf0] }
 0x83b   :  { %8838 = vmatpush.bf16.msra.mxu0 %v13321_v51  ;;  %8864 = vmatpush.bf16.msra.mxu2 %v12173_v63  ;;  %v12074_v51 = vld [vmem:[#allocation30 + $0x1d8] sm:$0xf0]  ;;  %v8587_v63 = vpop.f32.mrf.mxu0 }
 0x83c   :  { %v14298_v63 = vld [vmem:[#allocation30 + $0x6a4] sm:$0xf] }
 0x83d   :  { %8827 = vmatpush.bf16.msrb.mxu3 %v13081_v4  ;;  %8853 = vmatpush.bf16.msra.mxu1 %v11933_v19  ;;  %v14220_v4 = vld [vmem:[#allocation30 + $0x434] sm:$0xf]  ;;  %v12386_v19 = vld [vmem:[#allocation30 + $0x448] sm:$0xf0] }
 0x83e   :  { %v12389_v35 = vor.u32 %v14220_v4, %v12386_v19  ;;  %v14256_v4 = vld [vmem:[#allocation30 + $0x554] sm:$0xf] }
 0x83f   :  { %8839 = vmatpush.bf16.msra.mxu0 %v13297_v41  ;;  %8865 = vmatpush.bf16.msra.mxu2 %v12149_v40  ;;  %v12077_v41 = vor.u32 %v14142_v25, %v12074_v51  ;;  %v14136_v40 = vld [vmem:[#allocation30 + $0x194] sm:$0xf]  ;;  %v12725_v25 = vor.u32 %v14304_v34, %v12722_v20  ;;  %v14202_v51 = vld [vmem:[#allocation30 + $0x3a4] sm:$0xf] }
 0x841   :  { %8828 = vmatpush.bf16.msrb.mxu3 %v13057_v62  ;;  %8854 = vmatpush.bf16.msra.mxu1 %v11909_v10  ;;  %v8547_v62 = vadd.f32 %v15548_v59, %v6399_v52  ;;  %v12986_v10 = vld [vmem:[#allocation30 + $0x8f8] sm:$0xf0]  ;;  %v8613_v21 = vpop.f32.mrf.mxu2 }
 0x842   :  { %v12746_v59 = vld [vmem:[#allocation30 + $0x718] sm:$0xf0] }
 0x843   :  { %8840 = vmatpush.bf16.msra.mxu0 %v13273_v12  ;;  %8866 = vmatpush.bf16.msra.mxu2 %v12125_v14  ;;  %v14214_v12 = vld [vmem:[#allocation30 + $0x404] sm:$0xf]  ;;  %v8560_v13 = vadd.f32 %v15554_v49, %v8547_v62  ;;  %v12053_v14 = vor.u32 %v14136_v40, %v12050_v2  ;;  %v12749_v49 = vor.u32 %v14310_v37, %v12746_v59  ;;  %v12314_v52 = vld [vmem:[#allocation30 + $0x3b8] sm:$0xf0]  ;;  %v14292_v40 = vld [vmem:[#allocation30 + $0x674] sm:$0xf] }
 0x844   :  { %v12317_v19 = vor.u32 %v14202_v51, %v12314_v52  ;;  %v12674_v2 = vld [vmem:[#allocation30 + $0x688] sm:$0xf0]  ;;  %v12506_v62 = vld [vmem:[#allocation30 + $0x538] sm:$0xf0]  ;;  %v14286_v37 = vld [vmem:[#allocation30 + $0x644] sm:$0xf] }
 0x845   :  { %8829 = vmatpush.bf16.msrb.mxu3 %v13033_v9  ;;  %8855 = vmatpush.bf16.msra.mxu1 %v11885_v27  ;;  %v12989_v9 = vor.u32 %v14370_v6, %v12986_v10  ;;  %v8573_v24 = vadd.f32 %v15562_v54, %v8560_v13  ;;  %v12365_v27 = vor.u32 %v14214_v12, %v12362_v0  ;;  %v14346_v6 = vld [vmem:[#allocation30 + $0x824] sm:$0xf]  ;;  %v12890_v10 = vld [vmem:[#allocation30 + $0x838] sm:$0xf0] }
 0x846   :  { %v12677_v12 = vor.u32 %v14292_v40, %v12674_v2  ;;  %v14190_v0 = vld [vmem:[#allocation30 + $0x344] sm:$0xf]  ;;  %v12266_v13 = vld [vmem:[#allocation30 + $0x358] sm:$0xf0]  ;;  %v12893_v21 = vor.u32 %v14346_v6, %v12890_v10  ;;  %v13346_v6 = vld [vmem:[#allocation30 + $0xbc8] sm:$0xf0] }
 0x847   :  { %8841 = vmatpush.bf16.msra.mxu0 %v13249_v31  ;;  %8867 = vmatpush.bf16.msra.mxu2 %v12101_v15  ;;  %v12338_v31 = vld [vmem:[#allocation30 + $0x3e8] sm:$0xf0]  ;;  %v14262_v15 = vld [vmem:[#allocation30 + $0x584] sm:$0xf]  ;;  %v8586_v54 = vadd.f32 %v15564_v26, %v8573_v24  ;;  %v12650_v59 = vld [vmem:[#allocation30 + $0x658] sm:$0xf0]  ;;  %v12269_v24 = vor.u32 %v14190_v0, %v12266_v13 }
 0x848   :  { %v12341_v32 = vor.u32 %v14208_v30, %v12338_v31  ;;  %v12557_v16 = vor.u32 %v14262_v15, %v12554_v39  ;;  %v12530_v26 = vld [vmem:[#allocation30 + $0x568] sm:$0xf0]  ;;  %v14280_v31 = vld [vmem:[#allocation30 + $0x614] sm:$0xf]  ;;  %v13178_v15 = vld [vmem:[#allocation30 + $0xa78] sm:$0xf0] }
 0x849   :  { %8830 = vmatpush.bf16.msrb.mxu3 %v13009_v47  ;;  %8856 = vmatpush.bf16.msra.mxu1 %v11861_v38  ;;  %v12938_v47 = vld [vmem:[#allocation30 + $0x898] sm:$0xf0]  ;;  %v12533_v60 = vor.u32 %v14256_v4, %v12530_v26  ;;  %v12242_v30 = vld [vmem:[#allocation30 + $0x328] sm:$0xf0]  ;;  %v14412_v4 = vld [vmem:[#allocation30 + $0xa34] sm:$0xf] }
 0x84a   :  { %v12698_v38 = vld [vmem:[#allocation30 + $0x6b8] sm:$0xf0]  ;;  %v13154_v26 = vld [vmem:[#allocation30 + $0xa48] sm:$0xf0]  ;;  %v14406_v2 = vld [vmem:[#allocation30 + $0xa04] sm:$0xf] }
 0x84b   :  { %8842 = vmatpush.bf16.msra.mxu0 %v13225_v5  ;;  %8868 = vmatpush.bf16.msra.mxu2 %v12077_v41  ;;  %v8599_v5 = vadd.f32 %v15560_v56, %v8586_v54  ;;  %v12701_v1 = vor.u32 %v14298_v63, %v12698_v38  ;;  %v14196_v41 = vld [vmem:[#allocation30 + $0x374] sm:$0xf]  ;;  %v14238_v54 = vld [vmem:[#allocation30 + $0x4c4] sm:$0xf]  ;;  %v12842_v51 = vld [vmem:[#allocation30 + $0x7d8] sm:$0xf0] }
 0x84c   :  { %8831 = vmatmul.bf16.vlgmr.msrb.gmra.mxu3 %v15482_v43  ;;  %8857 = vmatmul.bf16.vlgmr.msra.gmra.mxu1 %v15453_v53  ;;  %v12965_v53 = vor.u32 %v14364_v28, %v12962_v29  ;;  %v12866_v28 = vld [vmem:[#allocation30 + $0x808] sm:$0xf0]  ;;  %v14184_v29 = vld [vmem:[#allocation30 + $0x314] sm:$0xf]  ;;  %v14454_v0 = vld [vmem:[#allocation30 + $0xb84] sm:$0xf] }
 0x84d   :  { %8875 = vmatpush.bf16.msra.mxu3 %v12413_v57  ;;  %8901 = vmatpush.bf16.msrb.mxu1 %v12797_v61  ;;  %v12941_v57 = vor.u32 %v14358_v45, %v12938_v47  ;;  %v15578_v61 = vpop.f32.mrf.mxu1  ;;  %v8612_v56 = vadd.f32 %v15566_v46, %v8599_v5  ;;  %v12245_v47 = vor.u32 %v14184_v29, %v12242_v30  ;;  %v13322_v13 = vld [vmem:[#allocation30 + $0xb98] sm:$0xf0] }
 0x84f   :  { %8843 = vmatpush.bf16.msra.mxu0 %v13201_v11  ;;  %8869 = vmatpush.bf16.msra.mxu2 %v12053_v14  ;;  %v8624_v11 = vpop.f32.mrf.mxu3 }
 0x850   :  { %v8625_v14 = vadd.f32 %v8624_v11, %v8612_v56  ;;  %v14400_v11 = vld [vmem:[#allocation30 + $0x9d4] sm:$0xf] }
 0x851   :  { %8876 = vmatpush.bf16.msra.mxu3 %v12389_v35  ;;  %8902 = vmatpush.bf16.msrb.mxu1 %v12773_v58  ;;  %v12293_v35 = vor.u32 %v14196_v41, %v12290_v18  ;;  %v8637_v58 = vpop.f32.mrf.mxu0  ;;  %v14466_v41 = vld [vmem:[#allocation30 + $0xbe4] sm:$0xf]  ;;  %v13370_v18 = vld [vmem:[#allocation30 + $0xbf8] sm:$0xf0] }
 0x852   :  { %8844 = vmatmul.bf16.vlgmr.msra.gmra.mxu0 %v15485_v7  ;;  %8870 = vmatmul.bf16.vlgmr.msra.gmra.mxu2 %v15456_v50  ;;  %v12914_v50 = vld [vmem:[#allocation30 + $0x868] sm:$0xf0]  ;;  %v8638_v46 = vadd.f32 %v8637_v58, %v8625_v14  ;;  %v14394_v14 = vld [vmem:[#allocation30 + $0x9a4] sm:$0xf] }
 0x853   :  { %8888 = vmatpush.bf16.msrb.mxu0 %v12605_v3  ;;  %8914 = vmatpush.bf16.msrb.mxu2 %v12989_v9  ;;  %v12917_v22 = vor.u32 %v14352_v44, %v12914_v50  ;;  %v12509_v3 = vor.u32 %v14250_v36, %v12506_v62  ;;  %v14244_v9 = vld [vmem:[#allocation30 + $0x4f4] sm:$0xf]  ;;  %v12434_v44 = vld [vmem:[#allocation30 + $0x4a8] sm:$0xf0]  ;;  %v13373_v62 = vor.u32 %v14466_v41, %v13370_v18 }
 0x854   :  { %v8955_v34 = vmax.f32 %v8638_v46, 0.0  ;;  %v12485_v20 = vor.u32 %v14244_v9, %v12482_v8  ;;  %v14328_v50 = vld [vmem:[#allocation30 + $0x794] sm:$0xf]  ;;  %v13106_v58 = vld [vmem:[#allocation30 + $0x9e8] sm:$0xf0] }
 0x855   :  { %8877 = vmatpush.bf16.msra.mxu3 %v12365_v27  ;;  %8903 = vmatpush.bf16.msrb.mxu1 %v12749_v49  ;;  %v8652_v23 = vpop.f32.mrf.mxu1  ;;  %v14340_v27 = vld [vmem:[#allocation30 + $0x7f4] sm:$0xf]  ;;  %v12653_v49 = vor.u32 %v14286_v37, %v12650_v59  ;;  %v15584_v45 = vpop.f32.mrf.mxu2  ;;  %v13298_v59 = vld [vmem:[#allocation30 + $0xb68] sm:$0xf0] }
 0x856   :  { %v12869_v39 = vor.u32 %v14340_v27, %v12866_v28  ;;  %8961 = vst [vmem:[%s15656_s3 + $0x10] sm:$0xff] %v8955_v34  ;;  %v14448_v37 = vld [vmem:[#allocation30 + $0xb54] sm:$0xf]  ;;  %v13058_v46 = vld [vmem:[#allocation30 + $0x988] sm:$0xf0] }
 0x857   :  { %8889 = vmatpush.bf16.msrb.mxu0 %v12581_v33  ;;  %8915 = vmatpush.bf16.msrb.mxu2 %v12965_v53  ;;  %v12626_v33 = vld [vmem:[#allocation30 + $0x628] sm:$0xf0]  ;;  %v14418_v53 = vld [vmem:[#allocation30 + $0xa64] sm:$0xf]  ;;  %v8626_v52 = vpop.f32.mrf.mxu3  ;;  %v14388_v8 = vld [vmem:[#allocation30 + $0x974] sm:$0xf]  ;;  %v13301_v23 = vor.u32 %v14448_v37, %v13298_v59 }
 0x858   :  { %v12629_v63 = vor.u32 %v14280_v31, %v12626_v33  ;;  %v13181_v38 = vor.u32 %v14418_v53, %v13178_v15  ;;  %v13274_v27 = vld [vmem:[#allocation30 + $0xb38] sm:$0xf0]  ;;  %v14436_v31 = vld [vmem:[#allocation30 + $0xaf4] sm:$0xf]  ;;  %v13250_v33 = vld [vmem:[#allocation30 + $0xb08] sm:$0xf0] }
 0x859   :  { %8878 = vmatpush.bf16.msra.mxu3 %v12341_v32  ;;  %8904 = vmatpush.bf16.msrb.mxu1 %v12725_v25  ;;  %v12458_v32 = vld [vmem:[#allocation30 + $0x4d8] sm:$0xf0]  ;;  %v14334_v25 = vld [vmem:[#allocation30 + $0x7c4] sm:$0xf]  ;;  %v14376_v53 = vld [vmem:[#allocation30 + $0x914] sm:$0xf] }
 0x85a   :  { %v12845_v5 = vor.u32 %v14334_v25, %v12842_v51  ;;  %v13010_v15 = vld [vmem:[#allocation30 + $0x928] sm:$0xf0]  ;;  %v15590_v51 = vld [vmem:[#allocation31] sm:$0x3f] }
 0x85b   :  { %8890 = vmatpush.bf16.msrb.mxu0 %v12557_v16  ;;  %8916 = vmatpush.bf16.msrb.mxu2 %v12941_v57  ;;  %v8639_v16 = vpop.f32.mrf.mxu0  ;;  %v12461_v57 = vor.u32 %v14238_v54, %v12458_v32  ;;  %v14430_v54 = vld [vmem:[#allocation30 + $0xac4] sm:$0xf]  ;;  %v13226_v32 = vld [vmem:[#allocation30 + $0xad8] sm:$0xf0]  ;;  %v13013_v25 = vor.u32 %v14376_v53, %v13010_v15  ;;  %v6400_v52 = vperm.slane %v15590_v51, 3  ;;  %v6402_v53 = vperm.slane %v15590_v51, 5 }
 0x85d   :  { %8879 = vmatpush.bf16.msra.mxu3 %v12317_v19  ;;  %8905 = vmatpush.bf16.msrb.mxu1 %v12701_v1  ;;  %v14232_v19 = vld [vmem:[#allocation30 + $0x494] sm:$0xf]  ;;  %v12818_v1 = vld [vmem:[#allocation30 + $0x7a8] sm:$0xf0]  ;;  %v8665_v56 = vpop.f32.mrf.mxu2 }
 0x85e   :  { %v12437_v40 = vor.u32 %v14232_v19, %v12434_v44  ;;  %v12821_v36 = vor.u32 %v14328_v50, %v12818_v1 }
 0x85f   :  { %8891 = vmatpush.bf16.msrb.mxu0 %v12533_v60  ;;  %8917 = vmatpush.bf16.msrb.mxu2 %v12917_v22  ;;  %v13157_v60 = vor.u32 %v14412_v4, %v13154_v26  ;;  %v13130_v22 = vld [vmem:[#allocation30 + $0xa18] sm:$0xf0]  ;;  %v13202_v4 = vld [vmem:[#allocation30 + $0xaa8] sm:$0xf0]  ;;  %v8651_v26 = vadd.f32 %v15578_v61, %v6400_v52 }
 0x860   :  { %v13133_v10 = vor.u32 %v14406_v2, %v13130_v22 }
 0x861   :  { %8880 = vmatpush.bf16.msra.mxu3 %v12293_v35  ;;  %8906 = vmatpush.bf16.msrb.mxu1 %v12677_v12  ;;  %v14460_v35 = vld [vmem:[#allocation30 + $0xbb4] sm:$0xf]  ;;  %v8664_v19 = vadd.f32 %v15584_v45, %v8651_v26 }
 0x862   :  { %v13349_v12 = vor.u32 %v14460_v35, %v13346_v6 }
 0x863   :  { %8892 = vmatpush.bf16.msrb.mxu0 %v12509_v3  ;;  %8918 = vmatpush.bf16.msrb.mxu2 %v12893_v21  ;;  %v13325_v3 = vor.u32 %v14454_v0, %v13322_v13 }
 0x865   :  { %8881 = vmatpush.bf16.msra.mxu3 %v12269_v24  ;;  %8907 = vmatpush.bf16.msrb.mxu1 %v12653_v49  ;;  %v14442_v24 = vld [vmem:[#allocation30 + $0xb24] sm:$0xf]  ;;  %v13034_v49 = vld [vmem:[#allocation30 + $0x958] sm:$0xf0] }
 0x866   :  { %v13277_v30 = vor.u32 %v14442_v24, %v13274_v27 }
 0x867   :  { %8893 = vmatpush.bf16.msrb.mxu0 %v12485_v20  ;;  %8919 = vmatpush.bf16.msrb.mxu2 %v12869_v39  ;;  %v13253_v39 = vor.u32 %v14436_v31, %v13250_v33 }
 0x869   :  { %8882 = vmatpush.bf16.msra.mxu3 %v12245_v47  ;;  %8908 = vmatpush.bf16.msrb.mxu1 %v12629_v63  ;;  %v8702_v21 = vpop.f32.mrf.mxu1 }
 0x86b   :  { %8894 = vmatpush.bf16.msrb.mxu0 %v12461_v57  ;;  %8920 = vmatpush.bf16.msrb.mxu2 %v12845_v5  ;;  %v14424_v57 = vld [vmem:[#allocation30 + $0xa94] sm:$0xf] }
 0x86c   :  { %8883 = vmatmul.bf16.vlgmr.msra.gmra.mxu3 %v15461_v42  ;;  %8909 = vmatmul.bf16.vlgmr.msrb.gmra.mxu1 %v15471_v48  ;;  %v13109_v42 = vor.u32 %v14400_v11, %v13106_v58  ;;  %v13082_v48 = vld [vmem:[#allocation30 + $0x9b8] sm:$0xf0]  ;;  %v13205_v5 = vor.u32 %v14424_v57, %v13202_v4 }
 0x86d   :  { %8927 = vmatpush.bf16.msrb.mxu3 %v13181_v38  ;;  %v13085_v9 = vor.u32 %v14394_v14, %v13082_v48  ;;  %v13229_v38 = vor.u32 %v14430_v54, %v13226_v32 }
 0x86f   :  { %8895 = vmatpush.bf16.msrb.mxu0 %v12437_v40  ;;  %8921 = vmatpush.bf16.msrb.mxu2 %v12821_v36  ;;  %v8676_v28 = vpop.f32.mrf.mxu3  ;;  %v8689_v29 = vpop.f32.mrf.mxu0 }
 0x870   :  { %v8677_v50 = vadd.f32 %v8676_v28, %v8664_v19 }
 0x871   :  { %8928 = vmatpush.bf16.msrb.mxu3 %v13157_v60  ;;  %v8704_v34 = vpop.f32.mrf.mxu1 }
 0x872   :  { %8896 = vmatmul.bf16.vlgmr.msrb.gmra.mxu0 %v15466_v17  ;;  %8922 = vmatmul.bf16.vlgmr.msrb.gmra.mxu2 %v15475_v55  ;;  %v13061_v17 = vor.u32 %v14388_v8, %v13058_v46  ;;  %v14382_v55 = vld [vmem:[#allocation30 + $0x944] sm:$0xf]  ;;  %v8690_v1 = vadd.f32 %v8689_v29, %v8677_v50 }
 0x873   :  { %8940 = vmatpush.bf16.msra.mxu0 %v13373_v62  ;;  %v13037_v20 = vor.u32 %v14382_v55, %v13034_v49 }
 0x874   :  { %v8703_v41 = vadd.f32 %v8702_v21, %v8690_v1 }
 0x875   :  { %8929 = vmatpush.bf16.msrb.mxu3 %v13133_v10  ;;  %v8715_v47 = vpop.f32.mrf.mxu2 }
 0x876   :  { %v8716_v60 = vadd.f32 %v8715_v47, %v8703_v41 }
 0x877   :  { %8941 = vmatpush.bf16.msra.mxu0 %v13349_v12  ;;  %v8678_v16 = vpop.f32.mrf.mxu3  ;;  %v8691_v63 = vpop.f32.mrf.mxu0  ;;  %v6401_v12 = vperm.slane %v15590_v51, 4 }
 0x879   :  { %8930 = vmatpush.bf16.msrb.mxu3 %v13109_v42 }
 0x87b   :  { %8942 = vmatpush.bf16.msra.mxu0 %v13325_v3 }
 0x87d   :  { %8931 = vmatpush.bf16.msrb.mxu3 %v13085_v9  ;;  %v8717_v44 = vpop.f32.mrf.mxu2 }
 0x87f   :  { %8943 = vmatpush.bf16.msra.mxu0 %v13301_v23 }
 0x881   :  { %8932 = vmatpush.bf16.msrb.mxu3 %v13061_v17 }
 0x883   :  { %8944 = vmatpush.bf16.msra.mxu0 %v13277_v30 }
 0x885   :  { %8933 = vmatpush.bf16.msrb.mxu3 %v13037_v20 }
 0x887   :  { %8945 = vmatpush.bf16.msra.mxu0 %v13253_v39 }
 0x889   :  { %8934 = vmatpush.bf16.msrb.mxu3 %v13013_v25  ;;  %v8754_v18 = vpop.f32.mrf.mxu1 }
 0x88a   :  { %v8755_v42 = vadd.f32 %v8754_v18, %v6401_v12 }
 0x88b   :  { %8946 = vmatpush.bf16.msra.mxu0 %v13229_v38 }
 0x88c   :  { %8935 = vmatmul.bf16.vlgmr.msrb.gmra.mxu3 %v15482_v43 }
 0x88f   :  { %8947 = vmatpush.bf16.msra.mxu0 %v13205_v5  ;;  %v8728_v40 = vpop.f32.mrf.mxu3  ;;  %v8741_v2 = vpop.f32.mrf.mxu0 }
 0x890   :  { %v8729_v22 = vadd.f32 %v8728_v40, %v8716_v60 }
 0x891   :  { %v8756_v61 = vpop.f32.mrf.mxu1 }
 0x892   :  { %8948 = vmatmul.bf16.vlgmr.msra.gmra.mxu0 %v15485_v7  ;;  %v8742_v36 = vadd.f32 %v8741_v2, %v8729_v22 }
 0x894   :  { %v8956_v62 = vmax.f32 %v8742_v36, 0.0 }
 0x895   :  { %v8767_v43 = vpop.f32.mrf.mxu2 }
 0x896   :  { %8962 = vst [vmem:[%s15656_s3 + $0x18] sm:$0xff] %v8956_v62  ;;  %v8768_v14 = vadd.f32 %v8767_v43, %v8755_v42 }
 0x897   :  { %v8730_v45 = vpop.f32.mrf.mxu3  ;;  %v8743_v56 = vpop.f32.mrf.mxu0 }
 0x89d   :  { %v8769_v35 = vpop.f32.mrf.mxu2 }
 0x8a9   :  { %v8806_v6 = vpop.f32.mrf.mxu1 }
 0x8af   :  { %v8780_v10 = vpop.f32.mrf.mxu3  ;;  %v8793_v7 = vpop.f32.mrf.mxu0 }
 0x8b0   :  { %v8781_v3 = vadd.f32 %v8780_v10, %v8768_v14 }
 0x8b1   :  { %v8808_v11 = vpop.f32.mrf.mxu1 }
 0x8b2   :  { %v8794_v37 = vadd.f32 %v8793_v7, %v8781_v3 }
 0x8b4   :  { %v8807_v59 = vadd.f32 %v8806_v6, %v8794_v37 }
 0x8b5   :  { %v8819_v58 = vpop.f32.mrf.mxu2 }
 0x8b6   :  { %v8820_v9 = vadd.f32 %v8819_v58, %v8807_v59 }
 0x8b7   :  { %v8782_v0 = vpop.f32.mrf.mxu3  ;;  %v8795_v13 = vpop.f32.mrf.mxu0 }
 0x8bd   :  { %v8821_v48 = vpop.f32.mrf.mxu2 }
 0x8c9   :  { %v8858_v21 = vpop.f32.mrf.mxu1 }
 0x8ca   :  { %v8859_v54 = vadd.f32 %v8858_v21, %v6402_v53 }
 0x8cf   :  { %v8832_v8 = vpop.f32.mrf.mxu3  ;;  %v8845_v46 = vpop.f32.mrf.mxu0 }
 0x8d0   :  { %v8833_v23 = vadd.f32 %v8832_v8, %v8820_v9 }
 0x8d1   :  { %v8860_v27 = vpop.f32.mrf.mxu1 }
 0x8d2   :  { %v8846_v24 = vadd.f32 %v8845_v46, %v8833_v23 }
 0x8d4   :  { %v8957_v17 = vmax.f32 %v8846_v24, 0.0 }
 0x8d5   :  { %v8871_v28 = vpop.f32.mrf.mxu2 }
 0x8d6   :  { %8963 = vst [vmem:[%s15656_s3 + $0x20] sm:$0xff] %v8957_v17  ;;  %v8872_v32 = vadd.f32 %v8871_v28, %v8859_v54 }
 0x8d7   :  { %v8834_v29 = vpop.f32.mrf.mxu3  ;;  %v8847_v55 = vpop.f32.mrf.mxu0 }
 0x8dd   :  { %v8873_v49 = vpop.f32.mrf.mxu2 }
 0x8e9   :  { %v8910_v30 = vpop.f32.mrf.mxu1 }
 0x8ef   :  { %v8884_v31 = vpop.f32.mrf.mxu3  ;;  %v8897_v33 = vpop.f32.mrf.mxu0 }
 0x8f0   :  { %v8885_v25 = vadd.f32 %v8884_v31, %v8872_v32 }
 0x8f1   :  { %v8912_v34 = vpop.f32.mrf.mxu1 }
 0x8f2   :  { %v8898_v52 = vadd.f32 %v8897_v33, %v8885_v25 }
 0x8f4   :  { %v8911_v16 = vadd.f32 %v8910_v30, %v8898_v52 }
 0x8f5   :  { %v8923_v20 = vpop.f32.mrf.mxu2 }
 0x8f6   :  { %v8924_v63 = vadd.f32 %v8923_v20, %v8911_v16 }
 0x8f7   :  { %v8886_v15 = vpop.f32.mrf.mxu3  ;;  %v8899_v39 = vpop.f32.mrf.mxu0 }
 0x8fd   :  { %v8925_v47 = vpop.f32.mrf.mxu2 }
 0x90f   :  { %v8936_v38 = vpop.f32.mrf.mxu3  ;;  %v8949_v57 = vpop.f32.mrf.mxu0 }
 0x910   :  { %v8937_v4 = vadd.f32 %v8936_v38, %v8924_v63 }
 0x912   :  { %v8950_v26 = vadd.f32 %v8949_v57, %v8937_v4 }
 0x914   :  { %v8958_v5 = vmax.f32 %v8950_v26, 0.0 }
 0x916   :  { %8964 = vst [vmem:[%s15656_s3 + $0x28] sm:$0xff] %v8958_v5 }
 0x917   :  { %v8938_v19 = vpop.f32.mrf.mxu3  ;;  %v8951_v51 = vpop.f32.mrf.mxu0 }
 0x918   :  { %8979 = vsyncpa [#allocation3], 1 }
 0x919   :  { %8980 = vsyncpa [#allocation5], 1 }
 0x91a   :  { %8981 = vsyncpa [#allocation8], 1 }
 0x91b   :  { %8982 = vsyncpa [#allocation11], 1 }
 0x91c   :  { %8983 = vsyncpa [#allocation14], 1 }
 0x91d   :  { %8984 = vsyncpa [#allocation17], 1 }
 0x91e   :  { %8985 = vsyncpa [#allocation20], 1 }
 0x91f   :  { %8986 = vsyncpa [#allocation23], 1 }
 0x920   :  { %8987 = vsyncpa [#allocation26], 1 }
 0x921   :  { %8988 = vsyncpa [#allocation29], 1 }
 0x922   :  { %8989 = vsyncpa [#allocation32], 1 }

</bundles_post_ra>
